<compile_context>
chip_gen: v7x
topology: tpu7x:2x2x1
jax: 0.10.0
libtpu: 0.0.40
codegen_flags: <defaults>
</compile_context>

<pallas_src>
import functools

import jax
import jax.numpy as jnp
from jax import lax
from jax.experimental import pallas as pl
from jax.experimental.pallas import tpu as pltpu

_BN_EPS = 1e-5


# ---------------------------------------------------------------------------
# Kernel 1: fc  =  Linear(nz, 2F, bias=False) -> BatchNorm1d (folded) -> GLU
# BN scale is folded into the weight columns in the wrapper.
# ---------------------------------------------------------------------------
def _fc_bn_glu_kernel(x_ref, w_ref, b_ref, o_ref):
    # x_ref: (N, nz)   w_ref: (nz, 2F) (scale-folded)   b_ref: (1, 2F)
    # o_ref: (N, F)
    h = jnp.dot(x_ref[...], w_ref[...], preferred_element_type=jnp.float32)
    h = h + b_ref[...]                                    # folded BN1d shift
    F = o_ref.shape[1]
    o_ref[...] = (h[:, :F] * jax.nn.sigmoid(h[:, F:])).astype(o_ref.dtype)  # GLU


def fc_bn_glu(x, w_scaled, shift):
    """x:(N,nz) @ w_scaled:(nz,2F) (+shift), GLU -> (N, F)."""
    N, nz = x.shape
    F2 = w_scaled.shape[1]
    F = F2 // 2
    return pl.pallas_call(
        _fc_bn_glu_kernel,
        out_shape=jax.ShapeDtypeStruct((N, F), jnp.float32),
        grid_spec=pltpu.PrefetchScalarGridSpec(
            num_scalar_prefetch=0,
            grid=(1,),
            in_specs=[
                pl.BlockSpec((N, nz), lambda i: (0, 0)),
                pl.BlockSpec((nz, F2), lambda i: (0, 0)),
                pl.BlockSpec((1, F2), lambda i: (0, 0)),
            ],
            out_specs=pl.BlockSpec((N, F), lambda i: (0, 0)),
        ),
        compiler_params=pltpu.CompilerParams(
            dimension_semantics=("arbitrary",)),
    )(x, w_scaled, shift.reshape(1, F2))


# ---------------------------------------------------------------------------
# Kernel 2: fused upBlock body = conv3x3 (on the upsampled image, big-K dot)
#           -> BN shift -> GLU.  Channel-major, lane-dense.
# ---------------------------------------------------------------------------
def _upblock_kernel(x_ref, w_ref, b_ref, o_ref, xl_ref, xr_ref, slab_ref, *, Wup):
    # One batch element per grid step.
    #   x_ref:   (1, Cin_p, P)    flat upsampled image, zero halo both ends, bf16
    #   w_ref:   (C2, 9*Cin_p)    conv taps (tap-major along K), BN scale folded
    #   b_ref:   (C2, 1)          folded BatchNorm2d shift (f32)
    #   o_ref:   (1, C2//2, S)    GLU output, S = Hup*Wup on lanes (f32)
    #   xl_ref/xr_ref: (Cin_p, P) pre-masked copies for dx = -1 / +1 taps
    #   slab_ref:(9*Cin_p, T)     big-K tap slab for one spatial tile
    Cin_p = x_ref.shape[1]
    P = x_ref.shape[2]
    C2 = w_ref.shape[0]
    Ch = C2 // 2
    S = o_ref.shape[2]
    T = slab_ref.shape[1]
    halo = Wup + 1
    n_tiles = S // T

    # Source column of every padded-flat position (halo = Wup+1, so the column
    # of padded index i is (i-1) mod Wup; halo entries are zero anyway).
    xv = x_ref[0]                                                  # (Cin_p, P)
    col = (lax.broadcasted_iota(jnp.int32, (1, P), 1) + (Wup - 1)) % Wup
    zeros = jnp.zeros_like(xv)
    # dx=-1 taps never validly read source column Wup-1 -> zero it once.
    xl_ref[...] = jnp.where(col != (Wup - 1), xv, zeros)
    # dx=+1 taps never validly read source column 0 -> zero it once.
    xr_ref[...] = jnp.where(col != 0, xv, zeros)

    for t in range(n_tiles):                       # static spatial tile loop
        base = halo + t * T
        for k in range(9):                         # assemble (9*Cin_p, T) slab
            dy, dx = k // 3 - 1, k % 3 - 1
            start = base + dy * Wup + dx           # static lane offset
            if dx == -1:
                tap = xl_ref[:, start:start + T]
            elif dx == 1:
                tap = xr_ref[:, start:start + T]
            else:
                tap = x_ref[0, :, start:start + T]
            slab_ref[k * Cin_p:(k + 1) * Cin_p, :] = tap

        # One big-K MXU dot (K = 9*Cin_p), f32 accumulation.
        acc = jnp.dot(w_ref[...], slab_ref[...],
                      preferred_element_type=jnp.float32)
        acc = acc + b_ref[...]                                      # BN shift
        o_ref[0, :, t * T:(t + 1) * T] = (
            acc[:Ch] * jax.nn.sigmoid(acc[Ch:])).astype(o_ref.dtype)  # GLU


def _pick_tile(S, target=1024):
    if S <= target:
        return S
    t = target
    while S % t:
        t //= 2
    return t


def upblock(x_nchw, conv_w_oihw, bn_scale, bn_shift, *,
            compute_dtype=jnp.bfloat16):
    """Upsample(x2, nearest) -> conv3x3 -> folded BN -> GLU.  NCHW in/out."""
    N, Cin, H, W = x_nchw.shape
    C2 = conv_w_oihw.shape[0]
    Ch = C2 // 2
    Hup, Wup = 2 * H, 2 * W
    S = Hup * Wup
    halo = Wup + 1
    P = S + 2 * halo

    # Pad channels so slab stores stay tile-aligned (16 rows for bf16, 8 f32).
    sub = 16 if compute_dtype == jnp.bfloat16 else 8
    Cin_p = ((Cin + sub - 1) // sub) * sub

    # Nearest x2 upsample + flatten + channel pad + flat halo pad + cast.
    # Stays channel-major; fuses into one XLA pass under jit.
    xu = jnp.broadcast_to(x_nchw[:, :, :, None, :, None],
                          (N, Cin, H, 2, W, 2)).reshape(N, Cin, S)
    x_in = jnp.pad(xu, ((0, 0), (0, Cin_p - Cin),
                        (halo, halo))).astype(compute_dtype)

    # Conv weight (C2, Cin, 3, 3) -> (C2, 9*Cin_p), BN scale folded, bf16.
    w_taps = jnp.transpose(conv_w_oihw, (2, 3, 0, 1)).reshape(9, C2, Cin)
    w_taps = w_taps * bn_scale[None, :, None]
    w_taps = jnp.pad(w_taps, ((0, 0), (0, 0), (0, Cin_p - Cin)))
    w_mat = jnp.transpose(w_taps, (1, 0, 2)).reshape(C2, 9 * Cin_p)
    w_mat = w_mat.astype(compute_dtype)

    T = _pick_tile(S)
    kern = functools.partial(_upblock_kernel, Wup=Wup)
    itemsize = jnp.dtype(compute_dtype).itemsize
    cost = pl.CostEstimate(
        flops=2 * 9 * Cin_p * C2 * S * N + 4 * C2 * S * N,
        transcendentals=N * Ch * S,
        bytes_accessed=(N * Cin_p * P * itemsize + C2 * 9 * Cin_p * itemsize
                        + N * Ch * S * 4),
    )
    out_flat = pl.pallas_call(
        kern,
        out_shape=jax.ShapeDtypeStruct((N, Ch, S), jnp.float32),
        grid_spec=pltpu.PrefetchScalarGridSpec(
            num_scalar_prefetch=0,
            grid=(N,),
            in_specs=[
                pl.BlockSpec((1, Cin_p, P), lambda n: (n, 0, 0)),
                pl.BlockSpec((C2, 9 * Cin_p), lambda n: (0, 0)),
                pl.BlockSpec((C2, 1), lambda n: (0, 0)),
            ],
            out_specs=pl.BlockSpec((1, Ch, S), lambda n: (n, 0, 0)),
            scratch_shapes=[
                pltpu.VMEM((Cin_p, P), compute_dtype),       # xl (dx=-1 taps)
                pltpu.VMEM((Cin_p, P), compute_dtype),       # xr (dx=+1 taps)
                pltpu.VMEM((9 * Cin_p, T), compute_dtype),   # big-K tap slab
            ],
        ),
        compiler_params=pltpu.CompilerParams(
            dimension_semantics=("parallel",)),
        cost_estimate=cost,
    )(x_in, w_mat, bn_shift.reshape(C2, 1).astype(jnp.float32))

    return out_flat.reshape(N, Ch, Hup, Wup)   # metadata-only reshape to NCHW


# ---------------------------------------------------------------------------
# Full INIT_STAGE_G forward
# ---------------------------------------------------------------------------
def init_stage_g(z_code, c_code, params, ngf, conv_dtype=jnp.bfloat16):
    x = jnp.concatenate([c_code, z_code], axis=1)             # (N, nz)

    # fc: Linear -> BN1d -> GLU (scale folded into the weight columns).
    s = params["fc_gamma"] * lax.rsqrt(params["fc_var"] + _BN_EPS)
    b = params["fc_beta"] - params["fc_mean"] * s
    h = fc_bn_glu(x, params["fc_w"].T * s[None, :], b)        # (N, ngf*16)
    out = h.reshape(-1, ngf, 4, 4)

    for i in (1, 2, 3, 4):                                    # four upBlocks
        s = params[f"up{i}_gamma"] * lax.rsqrt(params[f"up{i}_var"] + _BN_EPS)
        b = params[f"up{i}_beta"] - params[f"up{i}_mean"] * s
        out = upblock(out, params[f"up{i}_w"], s, b, compute_dtype=conv_dtype)
    return out                                                # (N, ngf//16, 64, 64)


# ---------------------------------------------------------------------------
# Parameters, pure-JAX reference, and test
# ---------------------------------------------------------------------------
def _make_params(key, ngf, nz):
    ks = iter(jax.random.split(key, 32))
    params = {
        "fc_w": 0.1 * jax.random.normal(next(ks), (ngf * 32, nz), jnp.float32),
        "fc_gamma": 1.0 + 0.1 * jax.random.normal(next(ks), (ngf * 32,), jnp.float32),
        "fc_beta": 0.1 * jax.random.normal(next(ks), (ngf * 32,), jnp.float32),
        "fc_mean": 0.1 * jax.random.normal(next(ks), (ngf * 32,), jnp.float32),
        "fc_var": 0.5 + jax.random.uniform(next(ks), (ngf * 32,), jnp.float32),
    }
    cin = ngf
    for i in (1, 2, 3, 4):
        c2 = cin  # upBlock(cin, cin//2): conv3x3(cin, (cin//2)*2) = conv3x3(cin, cin)
        params[f"up{i}_w"] = 0.1 * jax.random.normal(next(ks), (c2, cin, 3, 3), jnp.float32)
        params[f"up{i}_gamma"] = 1.0 + 0.1 * jax.random.normal(next(ks), (c2,), jnp.float32)
        params[f"up{i}_beta"] = 0.1 * jax.random.normal(next(ks), (c2,), jnp.float32)
        params[f"up{i}_mean"] = 0.1 * jax.random.normal(next(ks), (c2,), jnp.float32)
        params[f"up{i}_var"] = 0.5 + jax.random.uniform(next(ks), (c2,), jnp.float32)
        cin = cin // 2
    return params


def _reference(z_code, c_code, params, ngf, conv_dtype=jnp.float32):
    """Pure-JAX reference.  conv_dtype controls the precision of the conv
    matmul inputs (BN scale folded into the weights before the cast, matching
    the kernel's precision policy); everything else is f32.  With
    conv_dtype=f32 this is the straight translation of the PyTorch module."""
    x = jnp.concatenate([c_code, z_code], axis=1)
    h = x @ params["fc_w"].T
    s = params["fc_gamma"] / jnp.sqrt(params["fc_var"] + _BN_EPS)
    h = (h - params["fc_mean"]) * s + params["fc_beta"]
    F = h.shape[1] // 2
    h = h[:, :F] * jax.nn.sigmoid(h[:, F:])
    out = h.reshape(-1, ngf, 4, 4)
    for i in (1, 2, 3, 4):
        s = params[f"up{i}_gamma"] / jnp.sqrt(params[f"up{i}_var"] + _BN_EPS)
        b = params[f"up{i}_beta"] - params[f"up{i}_mean"] * s
        w_eff = (params[f"up{i}_w"] * s[:, None, None, None]).astype(conv_dtype)
        up = jnp.repeat(jnp.repeat(out, 2, axis=2), 2, axis=3).astype(conv_dtype)
        y = lax.conv_general_dilated(
            up, w_eff, window_strides=(1, 1), padding=((1, 1), (1, 1)),
            dimension_numbers=("NCHW", "OIHW", "NCHW"),
            preferred_element_type=jnp.float32)
        y = y + b[None, :, None, None]
        Ch = y.shape[1] // 2
        out = y[:, :Ch] * jax.nn.sigmoid(y[:, Ch:])
    return out


if __name__ == "__main__":
    key = jax.random.PRNGKey(0)
    k_params, k_z, k_c = jax.random.split(key, 3)

    N = 2
    ngf = 32            # small; divisible by 16
    z_dim, ncf = 16, 16
    nz = z_dim + ncf

    params = _make_params(k_params, ngf, nz)
    z_code = jax.random.normal(k_z, (N, z_dim), jnp.float32)
    c_code = jax.random.normal(k_c, (N, ncf), jnp.float32)

    fwd = jax.jit(init_stage_g, static_argnames=("ngf", "conv_dtype"))
    out = jax.block_until_ready(fwd(z_code, c_code, params, ngf=ngf))
    assert out.shape == (N, ngf // 16, 64, 64)

    # 1) Strict check vs a precision-matched reference (bf16 conv inputs, f32
    #    accumulation/epilogue): validates halo, masks, slab, tiling, BN, GLU.
    ref_bf = jax.block_until_ready(
        _reference(z_code, c_code, params, ngf, conv_dtype=jnp.bfloat16))
    err_bf = float(jnp.max(jnp.abs(out - ref_bf)))
    assert jnp.allclose(out, ref_bf, atol=2e-3, rtol=2e-3), err_bf

    # 2) Loose check vs the full-f32 module reference: bounds the bf16 error.
    ref_f32 = jax.block_until_ready(
        _reference(z_code, c_code, params, ngf, conv_dtype=jnp.float32))
    err_f32 = float(jnp.max(jnp.abs(out - ref_f32)))
    assert jnp.allclose(out, ref_f32, atol=5e-2, rtol=5e-2), err_f32

    print("KERNEL_OK")
</pallas_src>

<mosaic_0001>
module attributes {stable_mosaic.version = 11 : i64} {
  func.func @_fc_bn_glu_kernel(%arg0: i32, %arg1: memref<2x32xf32, #tpu.memory_space<vmem>>, %arg2: memref<32x1024xf32, #tpu.memory_space<vmem>>, %arg3: memref<1x1024xf32, #tpu.memory_space<vmem>>, %arg4: memref<2x512xf32, #tpu.memory_space<vmem>>) attributes {dimension_semantics = [#tpu.dimension_semantics<arbitrary>], iteration_bounds = array<i64: 1>, scalar_prefetch = 0 : i64, scratch_operands = 0 : i64, tpu.core_type = #tpu.core_type<tc>, window_params = [{pipeline_mode = #tpu.pipeline_mode<synchronous>, transform_indices = @transform_0, window_bounds = array<i64: 2, 32>}, {pipeline_mode = #tpu.pipeline_mode<synchronous>, transform_indices = @transform_1, window_bounds = array<i64: 32, 1024>}, {pipeline_mode = #tpu.pipeline_mode<synchronous>, transform_indices = @transform_2, window_bounds = array<i64: 1, 1024>}, {pipeline_mode = #tpu.pipeline_mode<synchronous>, transform_indices = @transform_3, window_bounds = array<i64: 2, 512>}]} {
    %c0 = arith.constant 0 : index
    %c0_0 = arith.constant 0 : index
    %0 = vector.load %arg1[%c0, %c0_0] : memref<2x32xf32, #tpu.memory_space<vmem>>, vector<2x32xf32>
    %c0_1 = arith.constant 0 : index
    %c0_2 = arith.constant 0 : index
    %1 = vector.load %arg2[%c0_1, %c0_2] : memref<32x1024xf32, #tpu.memory_space<vmem>>, vector<32x1024xf32>
    %cst = arith.constant dense<0.000000e+00> : vector<2x1024xf32>
    %2 = tpu.matmul %0, %1, %cst {dimension_numbers = #tpu.dot_dimension_numbers<[1], [0], [0], [1], [0, 0, 1, 1], [], []>} : vector<2x32xf32>, vector<32x1024xf32>, vector<2x1024xf32> -> vector<2x1024xf32>
    %c0_3 = arith.constant 0 : index
    %c0_4 = arith.constant 0 : index
    %3 = vector.load %arg3[%c0_3, %c0_4] : memref<1x1024xf32, #tpu.memory_space<vmem>>, vector<1x1024xf32>
    %4 = vector.broadcast %3 : vector<1x1024xf32> to vector<2x1024xf32>
    %5 = arith.addf %2, %4 : vector<2x1024xf32>
    %6 = vector.extract_strided_slice %5 {offsets = [0, 0], sizes = [2, 512], strides = [1, 1]} : vector<2x1024xf32> to vector<2x512xf32>
    %7 = vector.extract_strided_slice %5 {offsets = [0, 512], sizes = [2, 512], strides = [1, 1]} : vector<2x1024xf32> to vector<2x512xf32>
    %8 = arith.negf %7 : vector<2x512xf32>
    %9 = math.exp %8 : vector<2x512xf32>
    %cst_5 = arith.constant 1.000000e+00 : f32
    %10 = vector.broadcast %cst_5 : f32 to vector<2x512xf32>
    %11 = arith.addf %10, %9 : vector<2x512xf32>
    %12 = arith.divf %10, %11 : vector<2x512xf32>
    %13 = arith.mulf %6, %12 : vector<2x512xf32>
    %c0_6 = arith.constant 0 : index
    %c0_7 = arith.constant 0 : index
    %14 = vector.load %arg4[%c0_6, %c0_7] : memref<2x512xf32, #tpu.memory_space<vmem>>, vector<2x512xf32>
    tpu.vector_store %arg4[%c0_6, %c0_7], %13 {strides = array<i32>} : memref<2x512xf32, #tpu.memory_space<vmem>>, vector<2x512xf32>,
    return
  }
  func.func @transform_0(%arg0: i32) -> (i32, i32) {
    %c0_i32 = arith.constant 0 : i32
    %c0_i32_0 = arith.constant 0 : i32
    %c0_i32_1 = arith.constant 0 : i32
    return %c0_i32, %c0_i32_0 : i32, i32
  }
  func.func @transform_1(%arg0: i32) -> (i32, i32) {
    %c0_i32 = arith.constant 0 : i32
    %c0_i32_0 = arith.constant 0 : i32
    %c0_i32_1 = arith.constant 0 : i32
    return %c0_i32, %c0_i32_0 : i32, i32
  }
  func.func @transform_2(%arg0: i32) -> (i32, i32) {
    %c0_i32 = arith.constant 0 : i32
    %c0_i32_0 = arith.constant 0 : i32
    %c0_i32_1 = arith.constant 0 : i32
    return %c0_i32, %c0_i32_0 : i32, i32
  }
  func.func @transform_3(%arg0: i32) -> (i32, i32) {
    %c0_i32 = arith.constant 0 : i32
    %c0_i32_0 = arith.constant 0 : i32
    %c0_i32_1 = arith.constant 0 : i32
    return %c0_i32, %c0_i32_0 : i32, i32
  }
}

module attributes {stable_mosaic.version = 11 : i64} {
  func.func @_upblock_kernel(%arg0: i32, %arg1: memref<1x32x82xbf16, #tpu.memory_space<vmem>>, %arg2: memref<32x288xbf16, #tpu.memory_space<vmem>>, %arg3: memref<32x1xf32, #tpu.memory_space<vmem>>, %arg4: memref<1x16x64xf32, #tpu.memory_space<vmem>>, %arg5: memref<32x82xbf16, #tpu.memory_space<vmem>>, %arg6: memref<32x82xbf16, #tpu.memory_space<vmem>>, %arg7: memref<288x64xbf16, #tpu.memory_space<vmem>>) attributes {dimension_semantics = [#tpu.dimension_semantics<parallel>], iteration_bounds = array<i64: 2>, scalar_prefetch = 0 : i64, scratch_operands = 3 : i64, tpu.core_type = #tpu.core_type<tc>, window_params = [{transform_indices = @transform_0, window_bounds = array<i64: 1, 32, 82>}, {pipeline_mode = #tpu.pipeline_mode<synchronous>, transform_indices = @transform_1, window_bounds = array<i64: 32, 288>}, {pipeline_mode = #tpu.pipeline_mode<synchronous>, transform_indices = @transform_2, window_bounds = array<i64: 32, 1>}, {transform_indices = @transform_3, window_bounds = array<i64: 1, 16, 64>}]} {
    %c0 = arith.constant 0 : index
    %c0_0 = arith.constant 0 : index
    %c0_1 = arith.constant 0 : index
    %0 = vector.load %arg1[%c0, %c0_0, %c0_1] : memref<1x32x82xbf16, #tpu.memory_space<vmem>>, vector<1x32x82xbf16>
    %1 = vector.shape_cast %0 : vector<1x32x82xbf16> to vector<32x82xbf16>
    %2 = tpu.iota {dimensions = array<i32: 1>} : vector<1x82xi32>
    %c7_i32 = arith.constant 7 : i32
    %3 = vector.broadcast %c7_i32 : i32 to vector<1x82xi32>
    %4 = arith.addi %2, %3 : vector<1x82xi32>
    %c8_i32 = arith.constant 8 : i32
    %c0_i32 = arith.constant 0 : i32
    %5 = arith.cmpi eq, %c8_i32, %c0_i32 : i32
    %c1_i32 = arith.constant 1 : i32
    %6 = arith.select %5, %c1_i32, %c8_i32 : i32
    %7 = vector.broadcast %6 : i32 to vector<1x82xi32>
    %8 = arith.remsi %4, %7 : vector<1x82xi32>
    %c0_i32_2 = arith.constant 0 : i32
    %9 = vector.broadcast %c0_i32_2 : i32 to vector<1x82xi32>
    %10 = arith.cmpi ne, %8, %9 : vector<1x82xi32>
    %c0_i32_3 = arith.constant 0 : i32
    %11 = vector.broadcast %c0_i32_3 : i32 to vector<1x82xi32>
    %12 = arith.cmpi slt, %8, %11 : vector<1x82xi32>
    %c0_i32_4 = arith.constant 0 : i32
    %13 = arith.cmpi slt, %6, %c0_i32_4 : i32
    %14 = vector.broadcast %13 : i1 to vector<1x82xi1>
    %15 = vector.broadcast %14 : vector<1x82xi1> to vector<1x82xi1>
    %16 = arith.xori %12, %15 : vector<1x82xi1>
    %17 = arith.andi %16, %10 : vector<1x82xi1>
    %18 = vector.broadcast %6 : i32 to vector<1x82xi32>
    %19 = arith.addi %8, %18 : vector<1x82xi32>
    %20 = arith.select %17, %19, %8 : vector<1x82xi1>, vector<1x82xi32>
    %cst = arith.constant 0.000000e+00 : bf16
    %21 = vector.broadcast %cst : bf16 to vector<32x82xbf16>
    %c7_i32_5 = arith.constant 7 : i32
    %22 = vector.broadcast %c7_i32_5 : i32 to vector<1x82xi32>
    %23 = arith.cmpi ne, %20, %22 : vector<1x82xi32>
    %24 = vector.shape_cast %23 : vector<1x82xi1> to vector<1x82xi1>
    %25 = vector.broadcast %24 : vector<1x82xi1> to vector<32x82xi1>
    %26 = arith.select %25, %1, %21 : vector<32x82xi1>, vector<32x82xbf16>
    %c0_6 = arith.constant 0 : index
    %c0_7 = arith.constant 0 : index
    %27 = vector.load %arg5[%c0_6, %c0_7] : memref<32x82xbf16, #tpu.memory_space<vmem>>, vector<32x82xbf16>
    tpu.vector_store %arg5[%c0_6, %c0_7], %26 {strides = array<i32>} : memref<32x82xbf16, #tpu.memory_space<vmem>>, vector<32x82xbf16>,
    %c0_i32_8 = arith.constant 0 : i32
    %28 = vector.broadcast %c0_i32_8 : i32 to vector<1x82xi32>
    %29 = arith.cmpi ne, %20, %28 : vector<1x82xi32>
    %30 = vector.shape_cast %29 : vector<1x82xi1> to vector<1x82xi1>
    %31 = vector.broadcast %30 : vector<1x82xi1> to vector<32x82xi1>
    %32 = arith.select %31, %1, %21 : vector<32x82xi1>, vector<32x82xbf16>
    %c0_9 = arith.constant 0 : index
    %c0_10 = arith.constant 0 : index
    %33 = vector.load %arg6[%c0_9, %c0_10] : memref<32x82xbf16, #tpu.memory_space<vmem>>, vector<32x82xbf16>
    tpu.vector_store %arg6[%c0_9, %c0_10], %32 {strides = array<i32>} : memref<32x82xbf16, #tpu.memory_space<vmem>>, vector<32x82xbf16>,
    %c0_11 = arith.constant 0 : index
    %c0_12 = arith.constant 0 : index
    %34 = vector.load %arg5[%c0_11, %c0_12] : memref<32x82xbf16, #tpu.memory_space<vmem>>, vector<32x64xbf16>
    %c0_13 = arith.constant 0 : index
    %c0_14 = arith.constant 0 : index
    %35 = vector.load %arg7[%c0_13, %c0_14] : memref<288x64xbf16, #tpu.memory_space<vmem>>, vector<32x64xbf16>
    tpu.vector_store %arg7[%c0_13, %c0_14], %34 {strides = array<i32>} : memref<288x64xbf16, #tpu.memory_space<vmem>>, vector<32x64xbf16>,
    %c0_15 = arith.constant 0 : index
    %c0_16 = arith.constant 0 : index
    %c1 = arith.constant 1 : index
    %36 = vector.load %arg1[%c0_15, %c0_16, %c1] : memref<1x32x82xbf16, #tpu.memory_space<vmem>>, vector<1x32x64xbf16>
    %37 = vector.shape_cast %36 : vector<1x32x64xbf16> to vector<32x64xbf16>
    %c32 = arith.constant 32 : index
    %c0_17 = arith.constant 0 : index
    %38 = vector.load %arg7[%c32, %c0_17] : memref<288x64xbf16, #tpu.memory_space<vmem>>, vector<32x64xbf16>
    tpu.vector_store %arg7[%c32, %c0_17], %37 {strides = array<i32>} : memref<288x64xbf16, #tpu.memory_space<vmem>>, vector<32x64xbf16>,
    %c0_18 = arith.constant 0 : index
    %c2 = arith.constant 2 : index
    %39 = vector.load %arg6[%c0_18, %c2] : memref<32x82xbf16, #tpu.memory_space<vmem>>, vector<32x64xbf16>
    %c64 = arith.constant 64 : index
    %c0_19 = arith.constant 0 : index
    %40 = vector.load %arg7[%c64, %c0_19] : memref<288x64xbf16, #tpu.memory_space<vmem>>, vector<32x64xbf16>
    tpu.vector_store %arg7[%c64, %c0_19], %39 {strides = array<i32>} : memref<288x64xbf16, #tpu.memory_space<vmem>>, vector<32x64xbf16>,
    %c0_20 = arith.constant 0 : index
    %c8 = arith.constant 8 : index
    %41 = vector.load %arg5[%c0_20, %c8] : memref<32x82xbf16, #tpu.memory_space<vmem>>, vector<32x64xbf16>
    %c96 = arith.constant 96 : index
    %c0_21 = arith.constant 0 : index
    %42 = vector.load %arg7[%c96, %c0_21] : memref<288x64xbf16, #tpu.memory_space<vmem>>, vector<32x64xbf16>
    tpu.vector_store %arg7[%c96, %c0_21], %41 {strides = array<i32>} : memref<288x64xbf16, #tpu.memory_space<vmem>>, vector<32x64xbf16>,
    %c0_22 = arith.constant 0 : index
    %c0_23 = arith.constant 0 : index
    %c9 = arith.constant 9 : index
    %43 = vector.load %arg1[%c0_22, %c0_23, %c9] : memref<1x32x82xbf16, #tpu.memory_space<vmem>>, vector<1x32x64xbf16>
    %44 = vector.shape_cast %43 : vector<1x32x64xbf16> to vector<32x64xbf16>
    %c128 = arith.constant 128 : index
    %c0_24 = arith.constant 0 : index
    %45 = vector.load %arg7[%c128, %c0_24] : memref<288x64xbf16, #tpu.memory_space<vmem>>, vector<32x64xbf16>
    tpu.vector_store %arg7[%c128, %c0_24], %44 {strides = array<i32>} : memref<288x64xbf16, #tpu.memory_space<vmem>>, vector<32x64xbf16>,
    %c0_25 = arith.constant 0 : index
    %c10 = arith.constant 10 : index
    %46 = vector.load %arg6[%c0_25, %c10] : memref<32x82xbf16, #tpu.memory_space<vmem>>, vector<32x64xbf16>
    %c160 = arith.constant 160 : index
    %c0_26 = arith.constant 0 : index
    %47 = vector.load %arg7[%c160, %c0_26] : memref<288x64xbf16, #tpu.memory_space<vmem>>, vector<32x64xbf16>
    tpu.vector_store %arg7[%c160, %c0_26], %46 {strides = array<i32>} : memref<288x64xbf16, #tpu.memory_space<vmem>>, vector<32x64xbf16>,
    %c0_27 = arith.constant 0 : index
    %c16 = arith.constant 16 : index
    %48 = vector.load %arg5[%c0_27, %c16] : memref<32x82xbf16, #tpu.memory_space<vmem>>, vector<32x64xbf16>
    %c192 = arith.constant 192 : index
    %c0_28 = arith.constant 0 : index
    %49 = vector.load %arg7[%c192, %c0_28] : memref<288x64xbf16, #tpu.memory_space<vmem>>, vector<32x64xbf16>
    tpu.vector_store %arg7[%c192, %c0_28], %48 {strides = array<i32>} : memref<288x64xbf16, #tpu.memory_space<vmem>>, vector<32x64xbf16>,
    %c0_29 = arith.constant 0 : index
    %c0_30 = arith.constant 0 : index
    %c17 = arith.constant 17 : index
    %50 = vector.load %arg1[%c0_29, %c0_30, %c17] : memref<1x32x82xbf16, #tpu.memory_space<vmem>>, vector<1x32x64xbf16>
    %51 = vector.shape_cast %50 : vector<1x32x64xbf16> to vector<32x64xbf16>
    %c224 = arith.constant 224 : index
    %c0_31 = arith.constant 0 : index
    %52 = vector.load %arg7[%c224, %c0_31] : memref<288x64xbf16, #tpu.memory_space<vmem>>, vector<32x64xbf16>
    tpu.vector_store %arg7[%c224, %c0_31], %51 {strides = array<i32>} : memref<288x64xbf16, #tpu.memory_space<vmem>>, vector<32x64xbf16>,
    %c0_32 = arith.constant 0 : index
    %c18 = arith.constant 18 : index
    %53 = vector.load %arg6[%c0_32, %c18] : memref<32x82xbf16, #tpu.memory_space<vmem>>, vector<32x64xbf16>
    %c256 = arith.constant 256 : index
    %c0_33 = arith.constant 0 : index
    %54 = vector.load %arg7[%c256, %c0_33] : memref<288x64xbf16, #tpu.memory_space<vmem>>, vector<32x64xbf16>
    tpu.vector_store %arg7[%c256, %c0_33], %53 {strides = array<i32>} : memref<288x64xbf16, #tpu.memory_space<vmem>>, vector<32x64xbf16>,
    %c0_34 = arith.constant 0 : index
    %c0_35 = arith.constant 0 : index
    %55 = vector.load %arg2[%c0_34, %c0_35] : memref<32x288xbf16, #tpu.memory_space<vmem>>, vector<32x288xbf16>
    %c0_36 = arith.constant 0 : index
    %c0_37 = arith.constant 0 : index
    %56 = vector.load %arg7[%c0_36, %c0_37] : memref<288x64xbf16, #tpu.memory_space<vmem>>, vector<288x64xbf16>
    %cst_38 = arith.constant dense<0.000000e+00> : vector<32x64xf32>
    %57 = tpu.matmul %55, %56, %cst_38 {dimension_numbers = #tpu.dot_dimension_numbers<[1], [0], [0], [1], [0, 0, 1, 1], [], []>} : vector<32x288xbf16>, vector<288x64xbf16>, vector<32x64xf32> -> vector<32x64xf32>
    %c0_39 = arith.constant 0 : index
    %c0_40 = arith.constant 0 : index
    %58 = vector.load %arg3[%c0_39, %c0_40] : memref<32x1xf32, #tpu.memory_space<vmem>>, vector<32x1xf32>
    %59 = vector.broadcast %58 : vector<32x1xf32> to vector<32x64xf32>
    %60 = arith.addf %57, %59 : vector<32x64xf32>
    %61 = vector.extract_strided_slice %60 {offsets = [0, 0], sizes = [16, 64], strides = [1, 1]} : vector<32x64xf32> to vector<16x64xf32>
    %62 = vector.extract_strided_slice %60 {offsets = [16, 0], sizes = [16, 64], strides = [1, 1]} : vector<32x64xf32> to vector<16x64xf32>
    %63 = arith.negf %62 : vector<16x64xf32>
    %64 = math.exp %63 : vector<16x64xf32>
    %cst_41 = arith.constant 1.000000e+00 : f32
    %65 = vector.broadcast %cst_41 : f32 to vector<16x64xf32>
    %66 = arith.addf %65, %64 : vector<16x64xf32>
    %67 = arith.divf %65, %66 : vector<16x64xf32>
    %68 = arith.mulf %61, %67 : vector<16x64xf32>
    %c0_42 = arith.constant 0 : index
    %c0_43 = arith.constant 0 : index
    %c0_44 = arith.constant 0 : index
    %69 = vector.load %arg4[%c0_42, %c0_43, %c0_44] : memref<1x16x64xf32, #tpu.memory_space<vmem>>, vector<1x16x64xf32>
    %70 = vector.shape_cast %69 : vector<1x16x64xf32> to vector<16x64xf32>
    %71 = vector.shape_cast %68 : vector<16x64xf32> to vector<1x16x64xf32>
    tpu.vector_store %arg4[%c0_42, %c0_43, %c0_44], %71 {strides = array<i32>} : memref<1x16x64xf32, #tpu.memory_space<vmem>>, vector<1x16x64xf32>,
    return
  }
  func.func @transform_0(%arg0: i32) -> (i32, i32, i32) {
    %c0_i32 = arith.constant 0 : i32
    %c0_i32_0 = arith.constant 0 : i32
    %c0_i32_1 = arith.constant 0 : i32
    return %arg0, %c0_i32, %c0_i32_0 : i32, i32, i32
  }
  func.func @transform_1(%arg0: i32) -> (i32, i32) {
    %c0_i32 = arith.constant 0 : i32
    %c0_i32_0 = arith.constant 0 : i32
    %c0_i32_1 = arith.constant 0 : i32
    return %c0_i32, %c0_i32_0 : i32, i32
  }
  func.func @transform_2(%arg0: i32) -> (i32, i32) {
    %c0_i32 = arith.constant 0 : i32
    %c0_i32_0 = arith.constant 0 : i32
    %c0_i32_1 = arith.constant 0 : i32
    return %c0_i32, %c0_i32_0 : i32, i32
  }
  func.func @transform_3(%arg0: i32) -> (i32, i32, i32) {
    %c0_i32 = arith.constant 0 : i32
    %c0_i32_0 = arith.constant 0 : i32
    %c0_i32_1 = arith.constant 0 : i32
    return %arg0, %c0_i32, %c0_i32_0 : i32, i32, i32
  }
}

module attributes {stable_mosaic.version = 11 : i64} {
  func.func @_upblock_kernel(%arg0: i32, %arg1: memref<1x16x290xbf16, #tpu.memory_space<vmem>>, %arg2: memref<16x144xbf16, #tpu.memory_space<vmem>>, %arg3: memref<16x1xf32, #tpu.memory_space<vmem>>, %arg4: memref<1x8x256xf32, #tpu.memory_space<vmem>>, %arg5: memref<16x290xbf16, #tpu.memory_space<vmem>>, %arg6: memref<16x290xbf16, #tpu.memory_space<vmem>>, %arg7: memref<144x256xbf16, #tpu.memory_space<vmem>>) attributes {dimension_semantics = [#tpu.dimension_semantics<parallel>], iteration_bounds = array<i64: 2>, scalar_prefetch = 0 : i64, scratch_operands = 3 : i64, tpu.core_type = #tpu.core_type<tc>, window_params = [{transform_indices = @transform_0, window_bounds = array<i64: 1, 16, 290>}, {pipeline_mode = #tpu.pipeline_mode<synchronous>, transform_indices = @transform_1, window_bounds = array<i64: 16, 144>}, {pipeline_mode = #tpu.pipeline_mode<synchronous>, transform_indices = @transform_2, window_bounds = array<i64: 16, 1>}, {transform_indices = @transform_3, window_bounds = array<i64: 1, 8, 256>}]} {
    %c0 = arith.constant 0 : index
    %c0_0 = arith.constant 0 : index
    %c0_1 = arith.constant 0 : index
    %0 = vector.load %arg1[%c0, %c0_0, %c0_1] : memref<1x16x290xbf16, #tpu.memory_space<vmem>>, vector<1x16x290xbf16>
    %1 = vector.shape_cast %0 : vector<1x16x290xbf16> to vector<16x290xbf16>
    %2 = tpu.iota {dimensions = array<i32: 1>} : vector<1x290xi32>
    %c15_i32 = arith.constant 15 : i32
    %3 = vector.broadcast %c15_i32 : i32 to vector<1x290xi32>
    %4 = arith.addi %2, %3 : vector<1x290xi32>
    %c16_i32 = arith.constant 16 : i32
    %c0_i32 = arith.constant 0 : i32
    %5 = arith.cmpi eq, %c16_i32, %c0_i32 : i32
    %c1_i32 = arith.constant 1 : i32
    %6 = arith.select %5, %c1_i32, %c16_i32 : i32
    %7 = vector.broadcast %6 : i32 to vector<1x290xi32>
    %8 = arith.remsi %4, %7 : vector<1x290xi32>
    %c0_i32_2 = arith.constant 0 : i32
    %9 = vector.broadcast %c0_i32_2 : i32 to vector<1x290xi32>
    %10 = arith.cmpi ne, %8, %9 : vector<1x290xi32>
    %c0_i32_3 = arith.constant 0 : i32
    %11 = vector.broadcast %c0_i32_3 : i32 to vector<1x290xi32>
    %12 = arith.cmpi slt, %8, %11 : vector<1x290xi32>
    %c0_i32_4 = arith.constant 0 : i32
    %13 = arith.cmpi slt, %6, %c0_i32_4 : i32
    %14 = vector.broadcast %13 : i1 to vector<1x290xi1>
    %15 = vector.broadcast %14 : vector<1x290xi1> to vector<1x290xi1>
    %16 = arith.xori %12, %15 : vector<1x290xi1>
    %17 = arith.andi %16, %10 : vector<1x290xi1>
    %18 = vector.broadcast %6 : i32 to vector<1x290xi32>
    %19 = arith.addi %8, %18 : vector<1x290xi32>
    %20 = arith.select %17, %19, %8 : vector<1x290xi1>, vector<1x290xi32>
    %cst = arith.constant 0.000000e+00 : bf16
    %21 = vector.broadcast %cst : bf16 to vector<16x290xbf16>
    %c15_i32_5 = arith.constant 15 : i32
    %22 = vector.broadcast %c15_i32_5 : i32 to vector<1x290xi32>
    %23 = arith.cmpi ne, %20, %22 : vector<1x290xi32>
    %24 = vector.shape_cast %23 : vector<1x290xi1> to vector<1x290xi1>
    %25 = vector.broadcast %24 : vector<1x290xi1> to vector<16x290xi1>
    %26 = arith.select %25, %1, %21 : vector<16x290xi1>, vector<16x290xbf16>
    %c0_6 = arith.constant 0 : index
    %c0_7 = arith.constant 0 : index
    %27 = vector.load %arg5[%c0_6, %c0_7] : memref<16x290xbf16, #tpu.memory_space<vmem>>, vector<16x290xbf16>
    tpu.vector_store %arg5[%c0_6, %c0_7], %26 {strides = array<i32>} : memref<16x290xbf16, #tpu.memory_space<vmem>>, vector<16x290xbf16>,
    %c0_i32_8 = arith.constant 0 : i32
    %28 = vector.broadcast %c0_i32_8 : i32 to vector<1x290xi32>
    %29 = arith.cmpi ne, %20, %28 : vector<1x290xi32>
    %30 = vector.shape_cast %29 : vector<1x290xi1> to vector<1x290xi1>
    %31 = vector.broadcast %30 : vector<1x290xi1> to vector<16x290xi1>
    %32 = arith.select %31, %1, %21 : vector<16x290xi1>, vector<16x290xbf16>
    %c0_9 = arith.constant 0 : index
    %c0_10 = arith.constant 0 : index
    %33 = vector.load %arg6[%c0_9, %c0_10] : memref<16x290xbf16, #tpu.memory_space<vmem>>, vector<16x290xbf16>
    tpu.vector_store %arg6[%c0_9, %c0_10], %32 {strides = array<i32>} : memref<16x290xbf16, #tpu.memory_space<vmem>>, vector<16x290xbf16>,
    %c0_11 = arith.constant 0 : index
    %c0_12 = arith.constant 0 : index
    %34 = vector.load %arg5[%c0_11, %c0_12] : memref<16x290xbf16, #tpu.memory_space<vmem>>, vector<16x256xbf16>
    %c0_13 = arith.constant 0 : index
    %c0_14 = arith.constant 0 : index
    %35 = vector.load %arg7[%c0_13, %c0_14] : memref<144x256xbf16, #tpu.memory_space<vmem>>, vector<16x256xbf16>
    tpu.vector_store %arg7[%c0_13, %c0_14], %34 {strides = array<i32>} : memref<144x256xbf16, #tpu.memory_space<vmem>>, vector<16x256xbf16>,
    %c0_15 = arith.constant 0 : index
    %c0_16 = arith.constant 0 : index
    %c1 = arith.constant 1 : index
    %36 = vector.load %arg1[%c0_15, %c0_16, %c1] : memref<1x16x290xbf16, #tpu.memory_space<vmem>>, vector<1x16x256xbf16>
    %37 = vector.shape_cast %36 : vector<1x16x256xbf16> to vector<16x256xbf16>
    %c16 = arith.constant 16 : index
    %c0_17 = arith.constant 0 : index
    %38 = vector.load %arg7[%c16, %c0_17] : memref<144x256xbf16, #tpu.memory_space<vmem>>, vector<16x256xbf16>
    tpu.vector_store %arg7[%c16, %c0_17], %37 {strides = array<i32>} : memref<144x256xbf16, #tpu.memory_space<vmem>>, vector<16x256xbf16>,
    %c0_18 = arith.constant 0 : index
    %c2 = arith.constant 2 : index
    %39 = vector.load %arg6[%c0_18, %c2] : memref<16x290xbf16, #tpu.memory_space<vmem>>, vector<16x256xbf16>
    %c32 = arith.constant 32 : index
    %c0_19 = arith.constant 0 : index
    %40 = vector.load %arg7[%c32, %c0_19] : memref<144x256xbf16, #tpu.memory_space<vmem>>, vector<16x256xbf16>
    tpu.vector_store %arg7[%c32, %c0_19], %39 {strides = array<i32>} : memref<144x256xbf16, #tpu.memory_space<vmem>>, vector<16x256xbf16>,
    %c0_20 = arith.constant 0 : index
    %c16_21 = arith.constant 16 : index
    %41 = vector.load %arg5[%c0_20, %c16_21] : memref<16x290xbf16, #tpu.memory_space<vmem>>, vector<16x256xbf16>
    %c48 = arith.constant 48 : index
    %c0_22 = arith.constant 0 : index
    %42 = vector.load %arg7[%c48, %c0_22] : memref<144x256xbf16, #tpu.memory_space<vmem>>, vector<16x256xbf16>
    tpu.vector_store %arg7[%c48, %c0_22], %41 {strides = array<i32>} : memref<144x256xbf16, #tpu.memory_space<vmem>>, vector<16x256xbf16>,
    %c0_23 = arith.constant 0 : index
    %c0_24 = arith.constant 0 : index
    %c17 = arith.constant 17 : index
    %43 = vector.load %arg1[%c0_23, %c0_24, %c17] : memref<1x16x290xbf16, #tpu.memory_space<vmem>>, vector<1x16x256xbf16>
    %44 = vector.shape_cast %43 : vector<1x16x256xbf16> to vector<16x256xbf16>
    %c64 = arith.constant 64 : index
    %c0_25 = arith.constant 0 : index
    %45 = vector.load %arg7[%c64, %c0_25] : memref<144x256xbf16, #tpu.memory_space<vmem>>, vector<16x256xbf16>
    tpu.vector_store %arg7[%c64, %c0_25], %44 {strides = array<i32>} : memref<144x256xbf16, #tpu.memory_space<vmem>>, vector<16x256xbf16>,
    %c0_26 = arith.constant 0 : index
    %c18 = arith.constant 18 : index
    %46 = vector.load %arg6[%c0_26, %c18] : memref<16x290xbf16, #tpu.memory_space<vmem>>, vector<16x256xbf16>
    %c80 = arith.constant 80 : index
    %c0_27 = arith.constant 0 : index
    %47 = vector.load %arg7[%c80, %c0_27] : memref<144x256xbf16, #tpu.memory_space<vmem>>, vector<16x256xbf16>
    tpu.vector_store %arg7[%c80, %c0_27], %46 {strides = array<i32>} : memref<144x256xbf16, #tpu.memory_space<vmem>>, vector<16x256xbf16>,
    %c0_28 = arith.constant 0 : index
    %c32_29 = arith.constant 32 : index
    %48 = vector.load %arg5[%c0_28, %c32_29] : memref<16x290xbf16, #tpu.memory_space<vmem>>, vector<16x256xbf16>
    %c96 = arith.constant 96 : index
    %c0_30 = arith.constant 0 : index
    %49 = vector.load %arg7[%c96, %c0_30] : memref<144x256xbf16, #tpu.memory_space<vmem>>, vector<16x256xbf16>
    tpu.vector_store %arg7[%c96, %c0_30], %48 {strides = array<i32>} : memref<144x256xbf16, #tpu.memory_space<vmem>>, vector<16x256xbf16>,
    %c0_31 = arith.constant 0 : index
    %c0_32 = arith.constant 0 : index
    %c33 = arith.constant 33 : index
    %50 = vector.load %arg1[%c0_31, %c0_32, %c33] : memref<1x16x290xbf16, #tpu.memory_space<vmem>>, vector<1x16x256xbf16>
    %51 = vector.shape_cast %50 : vector<1x16x256xbf16> to vector<16x256xbf16>
    %c112 = arith.constant 112 : index
    %c0_33 = arith.constant 0 : index
    %52 = vector.load %arg7[%c112, %c0_33] : memref<144x256xbf16, #tpu.memory_space<vmem>>, vector<16x256xbf16>
    tpu.vector_store %arg7[%c112, %c0_33], %51 {strides = array<i32>} : memref<144x256xbf16, #tpu.memory_space<vmem>>, vector<16x256xbf16>,
    %c0_34 = arith.constant 0 : index
    %c34 = arith.constant 34 : index
    %53 = vector.load %arg6[%c0_34, %c34] : memref<16x290xbf16, #tpu.memory_space<vmem>>, vector<16x256xbf16>
    %c128 = arith.constant 128 : index
    %c0_35 = arith.constant 0 : index
    %54 = vector.load %arg7[%c128, %c0_35] : memref<144x256xbf16, #tpu.memory_space<vmem>>, vector<16x256xbf16>
    tpu.vector_store %arg7[%c128, %c0_35], %53 {strides = array<i32>} : memref<144x256xbf16, #tpu.memory_space<vmem>>, vector<16x256xbf16>,
    %c0_36 = arith.constant 0 : index
    %c0_37 = arith.constant 0 : index
    %55 = vector.load %arg2[%c0_36, %c0_37] : memref<16x144xbf16, #tpu.memory_space<vmem>>, vector<16x144xbf16>
    %c0_38 = arith.constant 0 : index
    %c0_39 = arith.constant 0 : index
    %56 = vector.load %arg7[%c0_38, %c0_39] : memref<144x256xbf16, #tpu.memory_space<vmem>>, vector<144x256xbf16>
    %cst_40 = arith.constant dense<0.000000e+00> : vector<16x256xf32>
    %57 = tpu.matmul %55, %56, %cst_40 {dimension_numbers = #tpu.dot_dimension_numbers<[1], [0], [0], [1], [0, 0, 1, 1], [], []>} : vector<16x144xbf16>, vector<144x256xbf16>, vector<16x256xf32> -> vector<16x256xf32>
    %c0_41 = arith.constant 0 : index
    %c0_42 = arith.constant 0 : index
    %58 = vector.load %arg3[%c0_41, %c0_42] : memref<16x1xf32, #tpu.memory_space<vmem>>, vector<16x1xf32>
    %59 = vector.broadcast %58 : vector<16x1xf32> to vector<16x256xf32>
    %60 = arith.addf %57, %59 : vector<16x256xf32>
    %61 = vector.extract_strided_slice %60 {offsets = [0, 0], sizes = [8, 256], strides = [1, 1]} : vector<16x256xf32> to vector<8x256xf32>
    %62 = vector.extract_strided_slice %60 {offsets = [8, 0], sizes = [8, 256], strides = [1, 1]} : vector<16x256xf32> to vector<8x256xf32>
    %63 = arith.negf %62 : vector<8x256xf32>
    %64 = math.exp %63 : vector<8x256xf32>
    %cst_43 = arith.constant 1.000000e+00 : f32
    %65 = vector.broadcast %cst_43 : f32 to vector<8x256xf32>
    %66 = arith.addf %65, %64 : vector<8x256xf32>
    %67 = arith.divf %65, %66 : vector<8x256xf32>
    %68 = arith.mulf %61, %67 : vector<8x256xf32>
    %c0_44 = arith.constant 0 : index
    %c0_45 = arith.constant 0 : index
    %c0_46 = arith.constant 0 : index
    %69 = vector.load %arg4[%c0_44, %c0_45, %c0_46] : memref<1x8x256xf32, #tpu.memory_space<vmem>>, vector<1x8x256xf32>
    %70 = vector.shape_cast %69 : vector<1x8x256xf32> to vector<8x256xf32>
    %71 = vector.shape_cast %68 : vector<8x256xf32> to vector<1x8x256xf32>
    tpu.vector_store %arg4[%c0_44, %c0_45, %c0_46], %71 {strides = array<i32>} : memref<1x8x256xf32, #tpu.memory_space<vmem>>, vector<1x8x256xf32>,
    return
  }
  func.func @transform_0(%arg0: i32) -> (i32, i32, i32) {
    %c0_i32 = arith.constant 0 : i32
    %c0_i32_0 = arith.constant 0 : i32
    %c0_i32_1 = arith.constant 0 : i32
    return %arg0, %c0_i32, %c0_i32_0 : i32, i32, i32
  }
  func.func @transform_1(%arg0: i32) -> (i32, i32) {
    %c0_i32 = arith.constant 0 : i32
    %c0_i32_0 = arith.constant 0 : i32
    %c0_i32_1 = arith.constant 0 : i32
    return %c0_i32, %c0_i32_0 : i32, i32
  }
  func.func @transform_2(%arg0: i32) -> (i32, i32) {
    %c0_i32 = arith.constant 0 : i32
    %c0_i32_0 = arith.constant 0 : i32
    %c0_i32_1 = arith.constant 0 : i32
    return %c0_i32, %c0_i32_0 : i32, i32
  }
  func.func @transform_3(%arg0: i32) -> (i32, i32, i32) {
    %c0_i32 = arith.constant 0 : i32
    %c0_i32_0 = arith.constant 0 : i32
    %c0_i32_1 = arith.constant 0 : i32
    return %arg0, %c0_i32, %c0_i32_0 : i32, i32, i32
  }
}

module attributes {stable_mosaic.version = 11 : i64} {
  func.func @_upblock_kernel(%arg0: i32, %arg1: memref<1x16x1090xbf16, #tpu.memory_space<vmem>>, %arg2: memref<8x144xbf16, #tpu.memory_space<vmem>>, %arg3: memref<8x1xf32, #tpu.memory_space<vmem>>, %arg4: memref<1x4x1024xf32, #tpu.memory_space<vmem>>, %arg5: memref<16x1090xbf16, #tpu.memory_space<vmem>>, %arg6: memref<16x1090xbf16, #tpu.memory_space<vmem>>, %arg7: memref<144x1024xbf16, #tpu.memory_space<vmem>>) attributes {dimension_semantics = [#tpu.dimension_semantics<parallel>], iteration_bounds = array<i64: 2>, scalar_prefetch = 0 : i64, scratch_operands = 3 : i64, tpu.core_type = #tpu.core_type<tc>, window_params = [{transform_indices = @transform_0, window_bounds = array<i64: 1, 16, 1090>}, {pipeline_mode = #tpu.pipeline_mode<synchronous>, transform_indices = @transform_1, window_bounds = array<i64: 8, 144>}, {pipeline_mode = #tpu.pipeline_mode<synchronous>, transform_indices = @transform_2, window_bounds = array<i64: 8, 1>}, {transform_indices = @transform_3, window_bounds = array<i64: 1, 4, 1024>}]} {
    %c0 = arith.constant 0 : index
    %c0_0 = arith.constant 0 : index
    %c0_1 = arith.constant 0 : index
    %0 = vector.load %arg1[%c0, %c0_0, %c0_1] : memref<1x16x1090xbf16, #tpu.memory_space<vmem>>, vector<1x16x1090xbf16>
    %1 = vector.shape_cast %0 : vector<1x16x1090xbf16> to vector<16x1090xbf16>
    %2 = tpu.iota {dimensions = array<i32: 1>} : vector<1x1090xi32>
    %c31_i32 = arith.constant 31 : i32
    %3 = vector.broadcast %c31_i32 : i32 to vector<1x1090xi32>
    %4 = arith.addi %2, %3 : vector<1x1090xi32>
    %c32_i32 = arith.constant 32 : i32
    %c0_i32 = arith.constant 0 : i32
    %5 = arith.cmpi eq, %c32_i32, %c0_i32 : i32
    %c1_i32 = arith.constant 1 : i32
    %6 = arith.select %5, %c1_i32, %c32_i32 : i32
    %7 = vector.broadcast %6 : i32 to vector<1x1090xi32>
    %8 = arith.remsi %4, %7 : vector<1x1090xi32>
    %c0_i32_2 = arith.constant 0 : i32
    %9 = vector.broadcast %c0_i32_2 : i32 to vector<1x1090xi32>
    %10 = arith.cmpi ne, %8, %9 : vector<1x1090xi32>
    %c0_i32_3 = arith.constant 0 : i32
    %11 = vector.broadcast %c0_i32_3 : i32 to vector<1x1090xi32>
    %12 = arith.cmpi slt, %8, %11 : vector<1x1090xi32>
    %c0_i32_4 = arith.constant 0 : i32
    %13 = arith.cmpi slt, %6, %c0_i32_4 : i32
    %14 = vector.broadcast %13 : i1 to vector<1x1090xi1>
    %15 = vector.broadcast %14 : vector<1x1090xi1> to vector<1x1090xi1>
    %16 = arith.xori %12, %15 : vector<1x1090xi1>
    %17 = arith.andi %16, %10 : vector<1x1090xi1>
    %18 = vector.broadcast %6 : i32 to vector<1x1090xi32>
    %19 = arith.addi %8, %18 : vector<1x1090xi32>
    %20 = arith.select %17, %19, %8 : vector<1x1090xi1>, vector<1x1090xi32>
    %cst = arith.constant 0.000000e+00 : bf16
    %21 = vector.broadcast %cst : bf16 to vector<16x1090xbf16>
    %c31_i32_5 = arith.constant 31 : i32
    %22 = vector.broadcast %c31_i32_5 : i32 to vector<1x1090xi32>
    %23 = arith.cmpi ne, %20, %22 : vector<1x1090xi32>
    %24 = vector.shape_cast %23 : vector<1x1090xi1> to vector<1x1090xi1>
    %25 = vector.broadcast %24 : vector<1x1090xi1> to vector<16x1090xi1>
    %26 = arith.select %25, %1, %21 : vector<16x1090xi1>, vector<16x1090xbf16>
    %c0_6 = arith.constant 0 : index
    %c0_7 = arith.constant 0 : index
    %27 = vector.load %arg5[%c0_6, %c0_7] : memref<16x1090xbf16, #tpu.memory_space<vmem>>, vector<16x1090xbf16>
    tpu.vector_store %arg5[%c0_6, %c0_7], %26 {strides = array<i32>} : memref<16x1090xbf16, #tpu.memory_space<vmem>>, vector<16x1090xbf16>,
    %c0_i32_8 = arith.constant 0 : i32
    %28 = vector.broadcast %c0_i32_8 : i32 to vector<1x1090xi32>
    %29 = arith.cmpi ne, %20, %28 : vector<1x1090xi32>
    %30 = vector.shape_cast %29 : vector<1x1090xi1> to vector<1x1090xi1>
    %31 = vector.broadcast %30 : vector<1x1090xi1> to vector<16x1090xi1>
    %32 = arith.select %31, %1, %21 : vector<16x1090xi1>, vector<16x1090xbf16>
    %c0_9 = arith.constant 0 : index
    %c0_10 = arith.constant 0 : index
    %33 = vector.load %arg6[%c0_9, %c0_10] : memref<16x1090xbf16, #tpu.memory_space<vmem>>, vector<16x1090xbf16>
    tpu.vector_store %arg6[%c0_9, %c0_10], %32 {strides = array<i32>} : memref<16x1090xbf16, #tpu.memory_space<vmem>>, vector<16x1090xbf16>,
    %c0_11 = arith.constant 0 : index
    %c0_12 = arith.constant 0 : index
    %34 = vector.load %arg5[%c0_11, %c0_12] : memref<16x1090xbf16, #tpu.memory_space<vmem>>, vector<16x1024xbf16>
    %c0_13 = arith.constant 0 : index
    %c0_14 = arith.constant 0 : index
    %35 = vector.load %arg7[%c0_13, %c0_14] : memref<144x1024xbf16, #tpu.memory_space<vmem>>, vector<16x1024xbf16>
    tpu.vector_store %arg7[%c0_13, %c0_14], %34 {strides = array<i32>} : memref<144x1024xbf16, #tpu.memory_space<vmem>>, vector<16x1024xbf16>,
    %c0_15 = arith.constant 0 : index
    %c0_16 = arith.constant 0 : index
    %c1 = arith.constant 1 : index
    %36 = vector.load %arg1[%c0_15, %c0_16, %c1] : memref<1x16x1090xbf16, #tpu.memory_space<vmem>>, vector<1x16x1024xbf16>
    %37 = vector.shape_cast %36 : vector<1x16x1024xbf16> to vector<16x1024xbf16>
    %c16 = arith.constant 16 : index
    %c0_17 = arith.constant 0 : index
    %38 = vector.load %arg7[%c16, %c0_17] : memref<144x1024xbf16, #tpu.memory_space<vmem>>, vector<16x1024xbf16>
    tpu.vector_store %arg7[%c16, %c0_17], %37 {strides = array<i32>} : memref<144x1024xbf16, #tpu.memory_space<vmem>>, vector<16x1024xbf16>,
    %c0_18 = arith.constant 0 : index
    %c2 = arith.constant 2 : index
    %39 = vector.load %arg6[%c0_18, %c2] : memref<16x1090xbf16, #tpu.memory_space<vmem>>, vector<16x1024xbf16>
    %c32 = arith.constant 32 : index
    %c0_19 = arith.constant 0 : index
    %40 = vector.load %arg7[%c32, %c0_19] : memref<144x1024xbf16, #tpu.memory_space<vmem>>, vector<16x1024xbf16>
    tpu.vector_store %arg7[%c32, %c0_19], %39 {strides = array<i32>} : memref<144x1024xbf16, #tpu.memory_space<vmem>>, vector<16x1024xbf16>,
    %c0_20 = arith.constant 0 : index
    %c32_21 = arith.constant 32 : index
    %41 = vector.load %arg5[%c0_20, %c32_21] : memref<16x1090xbf16, #tpu.memory_space<vmem>>, vector<16x1024xbf16>
    %c48 = arith.constant 48 : index
    %c0_22 = arith.constant 0 : index
    %42 = vector.load %arg7[%c48, %c0_22] : memref<144x1024xbf16, #tpu.memory_space<vmem>>, vector<16x1024xbf16>
    tpu.vector_store %arg7[%c48, %c0_22], %41 {strides = array<i32>} : memref<144x1024xbf16, #tpu.memory_space<vmem>>, vector<16x1024xbf16>,
    %c0_23 = arith.constant 0 : index
    %c0_24 = arith.constant 0 : index
    %c33 = arith.constant 33 : index
    %43 = vector.load %arg1[%c0_23, %c0_24, %c33] : memref<1x16x1090xbf16, #tpu.memory_space<vmem>>, vector<1x16x1024xbf16>
    %44 = vector.shape_cast %43 : vector<1x16x1024xbf16> to vector<16x1024xbf16>
    %c64 = arith.constant 64 : index
    %c0_25 = arith.constant 0 : index
    %45 = vector.load %arg7[%c64, %c0_25] : memref<144x1024xbf16, #tpu.memory_space<vmem>>, vector<16x1024xbf16>
    tpu.vector_store %arg7[%c64, %c0_25], %44 {strides = array<i32>} : memref<144x1024xbf16, #tpu.memory_space<vmem>>, vector<16x1024xbf16>,
    %c0_26 = arith.constant 0 : index
    %c34 = arith.constant 34 : index
    %46 = vector.load %arg6[%c0_26, %c34] : memref<16x1090xbf16, #tpu.memory_space<vmem>>, vector<16x1024xbf16>
    %c80 = arith.constant 80 : index
    %c0_27 = arith.constant 0 : index
    %47 = vector.load %arg7[%c80, %c0_27] : memref<144x1024xbf16, #tpu.memory_space<vmem>>, vector<16x1024xbf16>
    tpu.vector_store %arg7[%c80, %c0_27], %46 {strides = array<i32>} : memref<144x1024xbf16, #tpu.memory_space<vmem>>, vector<16x1024xbf16>,
    %c0_28 = arith.constant 0 : index
    %c64_29 = arith.constant 64 : index
    %48 = vector.load %arg5[%c0_28, %c64_29] : memref<16x1090xbf16, #tpu.memory_space<vmem>>, vector<16x1024xbf16>
    %c96 = arith.constant 96 : index
    %c0_30 = arith.constant 0 : index
    %49 = vector.load %arg7[%c96, %c0_30] : memref<144x1024xbf16, #tpu.memory_space<vmem>>, vector<16x1024xbf16>
    tpu.vector_store %arg7[%c96, %c0_30], %48 {strides = array<i32>} : memref<144x1024xbf16, #tpu.memory_space<vmem>>, vector<16x1024xbf16>,
    %c0_31 = arith.constant 0 : index
    %c0_32 = arith.constant 0 : index
    %c65 = arith.constant 65 : index
    %50 = vector.load %arg1[%c0_31, %c0_32, %c65] : memref<1x16x1090xbf16, #tpu.memory_space<vmem>>, vector<1x16x1024xbf16>
    %51 = vector.shape_cast %50 : vector<1x16x1024xbf16> to vector<16x1024xbf16>
    %c112 = arith.constant 112 : index
    %c0_33 = arith.constant 0 : index
    %52 = vector.load %arg7[%c112, %c0_33] : memref<144x1024xbf16, #tpu.memory_space<vmem>>, vector<16x1024xbf16>
    tpu.vector_store %arg7[%c112, %c0_33], %51 {strides = array<i32>} : memref<144x1024xbf16, #tpu.memory_space<vmem>>, vector<16x1024xbf16>,
    %c0_34 = arith.constant 0 : index
    %c66 = arith.constant 66 : index
    %53 = vector.load %arg6[%c0_34, %c66] : memref<16x1090xbf16, #tpu.memory_space<vmem>>, vector<16x1024xbf16>
    %c128 = arith.constant 128 : index
    %c0_35 = arith.constant 0 : index
    %54 = vector.load %arg7[%c128, %c0_35] : memref<144x1024xbf16, #tpu.memory_space<vmem>>, vector<16x1024xbf16>
    tpu.vector_store %arg7[%c128, %c0_35], %53 {strides = array<i32>} : memref<144x1024xbf16, #tpu.memory_space<vmem>>, vector<16x1024xbf16>,
    %c0_36 = arith.constant 0 : index
    %c0_37 = arith.constant 0 : index
    %55 = vector.load %arg2[%c0_36, %c0_37] : memref<8x144xbf16, #tpu.memory_space<vmem>>, vector<8x144xbf16>
    %c0_38 = arith.constant 0 : index
    %c0_39 = arith.constant 0 : index
    %56 = vector.load %arg7[%c0_38, %c0_39] : memref<144x1024xbf16, #tpu.memory_space<vmem>>, vector<144x1024xbf16>
    %cst_40 = arith.constant dense<0.000000e+00> : vector<8x1024xf32>
    %57 = tpu.matmul %55, %56, %cst_40 {dimension_numbers = #tpu.dot_dimension_numbers<[1], [0], [0], [1], [0, 0, 1, 1], [], []>} : vector<8x144xbf16>, vector<144x1024xbf16>, vector<8x1024xf32> -> vector<8x1024xf32>
    %c0_41 = arith.constant 0 : index
    %c0_42 = arith.constant 0 : index
    %58 = vector.load %arg3[%c0_41, %c0_42] : memref<8x1xf32, #tpu.memory_space<vmem>>, vector<8x1xf32>
    %59 = vector.broadcast %58 : vector<8x1xf32> to vector<8x1024xf32>
    %60 = arith.addf %57, %59 : vector<8x1024xf32>
    %61 = vector.extract_strided_slice %60 {offsets = [0, 0], sizes = [4, 1024], strides = [1, 1]} : vector<8x1024xf32> to vector<4x1024xf32>
    %62 = vector.extract_strided_slice %60 {offsets = [4, 0], sizes = [4, 1024], strides = [1, 1]} : vector<8x1024xf32> to vector<4x1024xf32>
    %63 = arith.negf %62 : vector<4x1024xf32>
    %64 = math.exp %63 : vector<4x1024xf32>
    %cst_43 = arith.constant 1.000000e+00 : f32
    %65 = vector.broadcast %cst_43 : f32 to vector<4x1024xf32>
    %66 = arith.addf %65, %64 : vector<4x1024xf32>
    %67 = arith.divf %65, %66 : vector<4x1024xf32>
    %68 = arith.mulf %61, %67 : vector<4x1024xf32>
    %c0_44 = arith.constant 0 : index
    %c0_45 = arith.constant 0 : index
    %c0_46 = arith.constant 0 : index
    %69 = vector.load %arg4[%c0_44, %c0_45, %c0_46] : memref<1x4x1024xf32, #tpu.memory_space<vmem>>, vector<1x4x1024xf32>
    %70 = vector.shape_cast %69 : vector<1x4x1024xf32> to vector<4x1024xf32>
    %71 = vector.shape_cast %68 : vector<4x1024xf32> to vector<1x4x1024xf32>
    tpu.vector_store %arg4[%c0_44, %c0_45, %c0_46], %71 {strides = array<i32>} : memref<1x4x1024xf32, #tpu.memory_space<vmem>>, vector<1x4x1024xf32>,
    return
  }
  func.func @transform_0(%arg0: i32) -> (i32, i32, i32) {
    %c0_i32 = arith.constant 0 : i32
    %c0_i32_0 = arith.constant 0 : i32
    %c0_i32_1 = arith.constant 0 : i32
    return %arg0, %c0_i32, %c0_i32_0 : i32, i32, i32
  }
  func.func @transform_1(%arg0: i32) -> (i32, i32) {
    %c0_i32 = arith.constant 0 : i32
    %c0_i32_0 = arith.constant 0 : i32
    %c0_i32_1 = arith.constant 0 : i32
    return %c0_i32, %c0_i32_0 : i32, i32
  }
  func.func @transform_2(%arg0: i32) -> (i32, i32) {
    %c0_i32 = arith.constant 0 : i32
    %c0_i32_0 = arith.constant 0 : i32
    %c0_i32_1 = arith.constant 0 : i32
    return %c0_i32, %c0_i32_0 : i32, i32
  }
  func.func @transform_3(%arg0: i32) -> (i32, i32, i32) {
    %c0_i32 = arith.constant 0 : i32
    %c0_i32_0 = arith.constant 0 : i32
    %c0_i32_1 = arith.constant 0 : i32
    return %arg0, %c0_i32, %c0_i32_0 : i32, i32, i32
  }
}

module attributes {stable_mosaic.version = 11 : i64} {
  func.func @_upblock_kernel(%arg0: i32, %arg1: memref<1x16x4226xbf16, #tpu.memory_space<vmem>>, %arg2: memref<4x144xbf16, #tpu.memory_space<vmem>>, %arg3: memref<4x1xf32, #tpu.memory_space<vmem>>, %arg4: memref<1x2x4096xf32, #tpu.memory_space<vmem>>, %arg5: memref<16x4226xbf16, #tpu.memory_space<vmem>>, %arg6: memref<16x4226xbf16, #tpu.memory_space<vmem>>, %arg7: memref<144x1024xbf16, #tpu.memory_space<vmem>>) attributes {dimension_semantics = [#tpu.dimension_semantics<parallel>], iteration_bounds = array<i64: 2>, scalar_prefetch = 0 : i64, scratch_operands = 3 : i64, tpu.core_type = #tpu.core_type<tc>, window_params = [{transform_indices = @transform_0, window_bounds = array<i64: 1, 16, 4226>}, {pipeline_mode = #tpu.pipeline_mode<synchronous>, transform_indices = @transform_1, window_bounds = array<i64: 4, 144>}, {pipeline_mode = #tpu.pipeline_mode<synchronous>, transform_indices = @transform_2, window_bounds = array<i64: 4, 1>}, {transform_indices = @transform_3, window_bounds = array<i64: 1, 2, 4096>}]} {
    %c0 = arith.constant 0 : index
    %c0_0 = arith.constant 0 : index
    %c0_1 = arith.constant 0 : index
    %0 = vector.load %arg1[%c0, %c0_0, %c0_1] : memref<1x16x4226xbf16, #tpu.memory_space<vmem>>, vector<1x16x4226xbf16>
    %1 = vector.shape_cast %0 : vector<1x16x4226xbf16> to vector<16x4226xbf16>
    %2 = tpu.iota {dimensions = array<i32: 1>} : vector<1x4226xi32>
    %c63_i32 = arith.constant 63 : i32
    %3 = vector.broadcast %c63_i32 : i32 to vector<1x4226xi32>
    %4 = arith.addi %2, %3 : vector<1x4226xi32>
    %c64_i32 = arith.constant 64 : i32
    %c0_i32 = arith.constant 0 : i32
    %5 = arith.cmpi eq, %c64_i32, %c0_i32 : i32
    %c1_i32 = arith.constant 1 : i32
    %6 = arith.select %5, %c1_i32, %c64_i32 : i32
    %7 = vector.broadcast %6 : i32 to vector<1x4226xi32>
    %8 = arith.remsi %4, %7 : vector<1x4226xi32>
    %c0_i32_2 = arith.constant 0 : i32
    %9 = vector.broadcast %c0_i32_2 : i32 to vector<1x4226xi32>
    %10 = arith.cmpi ne, %8, %9 : vector<1x4226xi32>
    %c0_i32_3 = arith.constant 0 : i32
    %11 = vector.broadcast %c0_i32_3 : i32 to vector<1x4226xi32>
    %12 = arith.cmpi slt, %8, %11 : vector<1x4226xi32>
    %c0_i32_4 = arith.constant 0 : i32
    %13 = arith.cmpi slt, %6, %c0_i32_4 : i32
    %14 = vector.broadcast %13 : i1 to vector<1x4226xi1>
    %15 = vector.broadcast %14 : vector<1x4226xi1> to vector<1x4226xi1>
    %16 = arith.xori %12, %15 : vector<1x4226xi1>
    %17 = arith.andi %16, %10 : vector<1x4226xi1>
    %18 = vector.broadcast %6 : i32 to vector<1x4226xi32>
    %19 = arith.addi %8, %18 : vector<1x4226xi32>
    %20 = arith.select %17, %19, %8 : vector<1x4226xi1>, vector<1x4226xi32>
    %cst = arith.constant 0.000000e+00 : bf16
    %21 = vector.broadcast %cst : bf16 to vector<16x4226xbf16>
    %c63_i32_5 = arith.constant 63 : i32
    %22 = vector.broadcast %c63_i32_5 : i32 to vector<1x4226xi32>
    %23 = arith.cmpi ne, %20, %22 : vector<1x4226xi32>
    %24 = vector.shape_cast %23 : vector<1x4226xi1> to vector<1x4226xi1>
    %25 = vector.broadcast %24 : vector<1x4226xi1> to vector<16x4226xi1>
    %26 = arith.select %25, %1, %21 : vector<16x4226xi1>, vector<16x4226xbf16>
    %c0_6 = arith.constant 0 : index
    %c0_7 = arith.constant 0 : index
    %27 = vector.load %arg5[%c0_6, %c0_7] : memref<16x4226xbf16, #tpu.memory_space<vmem>>, vector<16x4226xbf16>
    tpu.vector_store %arg5[%c0_6, %c0_7], %26 {strides = array<i32>} : memref<16x4226xbf16, #tpu.memory_space<vmem>>, vector<16x4226xbf16>,
    %c0_i32_8 = arith.constant 0 : i32
    %28 = vector.broadcast %c0_i32_8 : i32 to vector<1x4226xi32>
    %29 = arith.cmpi ne, %20, %28 : vector<1x4226xi32>
    %30 = vector.shape_cast %29 : vector<1x4226xi1> to vector<1x4226xi1>
    %31 = vector.broadcast %30 : vector<1x4226xi1> to vector<16x4226xi1>
    %32 = arith.select %31, %1, %21 : vector<16x4226xi1>, vector<16x4226xbf16>
    %c0_9 = arith.constant 0 : index
    %c0_10 = arith.constant 0 : index
    %33 = vector.load %arg6[%c0_9, %c0_10] : memref<16x4226xbf16, #tpu.memory_space<vmem>>, vector<16x4226xbf16>
    tpu.vector_store %arg6[%c0_9, %c0_10], %32 {strides = array<i32>} : memref<16x4226xbf16, #tpu.memory_space<vmem>>, vector<16x4226xbf16>,
    %c0_11 = arith.constant 0 : index
    %c0_12 = arith.constant 0 : index
    %34 = vector.load %arg5[%c0_11, %c0_12] : memref<16x4226xbf16, #tpu.memory_space<vmem>>, vector<16x1024xbf16>
    %c0_13 = arith.constant 0 : index
    %c0_14 = arith.constant 0 : index
    %35 = vector.load %arg7[%c0_13, %c0_14] : memref<144x1024xbf16, #tpu.memory_space<vmem>>, vector<16x1024xbf16>
    tpu.vector_store %arg7[%c0_13, %c0_14], %34 {strides = array<i32>} : memref<144x1024xbf16, #tpu.memory_space<vmem>>, vector<16x1024xbf16>,
    %c0_15 = arith.constant 0 : index
    %c0_16 = arith.constant 0 : index
    %c1 = arith.constant 1 : index
    %36 = vector.load %arg1[%c0_15, %c0_16, %c1] : memref<1x16x4226xbf16, #tpu.memory_space<vmem>>, vector<1x16x1024xbf16>
    %37 = vector.shape_cast %36 : vector<1x16x1024xbf16> to vector<16x1024xbf16>
    %c16 = arith.constant 16 : index
    %c0_17 = arith.constant 0 : index
    %38 = vector.load %arg7[%c16, %c0_17] : memref<144x1024xbf16, #tpu.memory_space<vmem>>, vector<16x1024xbf16>
    tpu.vector_store %arg7[%c16, %c0_17], %37 {strides = array<i32>} : memref<144x1024xbf16, #tpu.memory_space<vmem>>, vector<16x1024xbf16>,
    %c0_18 = arith.constant 0 : index
    %c2 = arith.constant 2 : index
    %39 = vector.load %arg6[%c0_18, %c2] : memref<16x4226xbf16, #tpu.memory_space<vmem>>, vector<16x1024xbf16>
    %c32 = arith.constant 32 : index
    %c0_19 = arith.constant 0 : index
    %40 = vector.load %arg7[%c32, %c0_19] : memref<144x1024xbf16, #tpu.memory_space<vmem>>, vector<16x1024xbf16>
    tpu.vector_store %arg7[%c32, %c0_19], %39 {strides = array<i32>} : memref<144x1024xbf16, #tpu.memory_space<vmem>>, vector<16x1024xbf16>,
    %c0_20 = arith.constant 0 : index
    %c64 = arith.constant 64 : index
    %41 = vector.load %arg5[%c0_20, %c64] : memref<16x4226xbf16, #tpu.memory_space<vmem>>, vector<16x1024xbf16>
    %c48 = arith.constant 48 : index
    %c0_21 = arith.constant 0 : index
    %42 = vector.load %arg7[%c48, %c0_21] : memref<144x1024xbf16, #tpu.memory_space<vmem>>, vector<16x1024xbf16>
    tpu.vector_store %arg7[%c48, %c0_21], %41 {strides = array<i32>} : memref<144x1024xbf16, #tpu.memory_space<vmem>>, vector<16x1024xbf16>,
    %c0_22 = arith.constant 0 : index
    %c0_23 = arith.constant 0 : index
    %c65 = arith.constant 65 : index
    %43 = vector.load %arg1[%c0_22, %c0_23, %c65] : memref<1x16x4226xbf16, #tpu.memory_space<vmem>>, vector<1x16x1024xbf16>
    %44 = vector.shape_cast %43 : vector<1x16x1024xbf16> to vector<16x1024xbf16>
    %c64_24 = arith.constant 64 : index
    %c0_25 = arith.constant 0 : index
    %45 = vector.load %arg7[%c64_24, %c0_25] : memref<144x1024xbf16, #tpu.memory_space<vmem>>, vector<16x1024xbf16>
    tpu.vector_store %arg7[%c64_24, %c0_25], %44 {strides = array<i32>} : memref<144x1024xbf16, #tpu.memory_space<vmem>>, vector<16x1024xbf16>,
    %c0_26 = arith.constant 0 : index
    %c66 = arith.constant 66 : index
    %46 = vector.load %arg6[%c0_26, %c66] : memref<16x4226xbf16, #tpu.memory_space<vmem>>, vector<16x1024xbf16>
    %c80 = arith.constant 80 : index
    %c0_27 = arith.constant 0 : index
    %47 = vector.load %arg7[%c80, %c0_27] : memref<144x1024xbf16, #tpu.memory_space<vmem>>, vector<16x1024xbf16>
    tpu.vector_store %arg7[%c80, %c0_27], %46 {strides = array<i32>} : memref<144x1024xbf16, #tpu.memory_space<vmem>>, vector<16x1024xbf16>,
    %c0_28 = arith.constant 0 : index
    %c128 = arith.constant 128 : index
    %48 = vector.load %arg5[%c0_28, %c128] : memref<16x4226xbf16, #tpu.memory_space<vmem>>, vector<16x1024xbf16>
    %c96 = arith.constant 96 : index
    %c0_29 = arith.constant 0 : index
    %49 = vector.load %arg7[%c96, %c0_29] : memref<144x1024xbf16, #tpu.memory_space<vmem>>, vector<16x1024xbf16>
    tpu.vector_store %arg7[%c96, %c0_29], %48 {strides = array<i32>} : memref<144x1024xbf16, #tpu.memory_space<vmem>>, vector<16x1024xbf16>,
    %c0_30 = arith.constant 0 : index
    %c0_31 = arith.constant 0 : index
    %c129 = arith.constant 129 : index
    %50 = vector.load %arg1[%c0_30, %c0_31, %c129] : memref<1x16x4226xbf16, #tpu.memory_space<vmem>>, vector<1x16x1024xbf16>
    %51 = vector.shape_cast %50 : vector<1x16x1024xbf16> to vector<16x1024xbf16>
    %c112 = arith.constant 112 : index
    %c0_32 = arith.constant 0 : index
    %52 = vector.load %arg7[%c112, %c0_32] : memref<144x1024xbf16, #tpu.memory_space<vmem>>, vector<16x1024xbf16>
    tpu.vector_store %arg7[%c112, %c0_32], %51 {strides = array<i32>} : memref<144x1024xbf16, #tpu.memory_space<vmem>>, vector<16x1024xbf16>,
    %c0_33 = arith.constant 0 : index
    %c130 = arith.constant 130 : index
    %53 = vector.load %arg6[%c0_33, %c130] : memref<16x4226xbf16, #tpu.memory_space<vmem>>, vector<16x1024xbf16>
    %c128_34 = arith.constant 128 : index
    %c0_35 = arith.constant 0 : index
    %54 = vector.load %arg7[%c128_34, %c0_35] : memref<144x1024xbf16, #tpu.memory_space<vmem>>, vector<16x1024xbf16>
    tpu.vector_store %arg7[%c128_34, %c0_35], %53 {strides = array<i32>} : memref<144x1024xbf16, #tpu.memory_space<vmem>>, vector<16x1024xbf16>,
    %c0_36 = arith.constant 0 : index
    %c0_37 = arith.constant 0 : index
    %55 = vector.load %arg2[%c0_36, %c0_37] : memref<4x144xbf16, #tpu.memory_space<vmem>>, vector<4x144xbf16>
    %c0_38 = arith.constant 0 : index
    %c0_39 = arith.constant 0 : index
    %56 = vector.load %arg7[%c0_38, %c0_39] : memref<144x1024xbf16, #tpu.memory_space<vmem>>, vector<144x1024xbf16>
    %cst_40 = arith.constant dense<0.000000e+00> : vector<4x1024xf32>
    %57 = tpu.matmul %55, %56, %cst_40 {dimension_numbers = #tpu.dot_dimension_numbers<[1], [0], [0], [1], [0, 0, 1, 1], [], []>} : vector<4x144xbf16>, vector<144x1024xbf16>, vector<4x1024xf32> -> vector<4x1024xf32>
    %c0_41 = arith.constant 0 : index
    %c0_42 = arith.constant 0 : index
    %58 = vector.load %arg3[%c0_41, %c0_42] : memref<4x1xf32, #tpu.memory_space<vmem>>, vector<4x1xf32>
    %59 = vector.broadcast %58 : vector<4x1xf32> to vector<4x1024xf32>
    %60 = arith.addf %57, %59 : vector<4x1024xf32>
    %61 = vector.extract_strided_slice %60 {offsets = [0, 0], sizes = [2, 1024], strides = [1, 1]} : vector<4x1024xf32> to vector<2x1024xf32>
    %62 = vector.extract_strided_slice %60 {offsets = [2, 0], sizes = [2, 1024], strides = [1, 1]} : vector<4x1024xf32> to vector<2x1024xf32>
    %63 = arith.negf %62 : vector<2x1024xf32>
    %64 = math.exp %63 : vector<2x1024xf32>
    %cst_43 = arith.constant 1.000000e+00 : f32
    %65 = vector.broadcast %cst_43 : f32 to vector<2x1024xf32>
    %66 = arith.addf %65, %64 : vector<2x1024xf32>
    %67 = arith.divf %65, %66 : vector<2x1024xf32>
    %68 = arith.mulf %61, %67 : vector<2x1024xf32>
    %c0_44 = arith.constant 0 : index
    %c0_45 = arith.constant 0 : index
    %c0_46 = arith.constant 0 : index
    %69 = vector.load %arg4[%c0_44, %c0_45, %c0_46] : memref<1x2x4096xf32, #tpu.memory_space<vmem>>, vector<1x2x1024xf32>
    %70 = vector.shape_cast %69 : vector<1x2x1024xf32> to vector<2x1024xf32>
    %71 = vector.shape_cast %68 : vector<2x1024xf32> to vector<1x2x1024xf32>
    tpu.vector_store %arg4[%c0_44, %c0_45, %c0_46], %71 {strides = array<i32>} : memref<1x2x4096xf32, #tpu.memory_space<vmem>>, vector<1x2x1024xf32>,
    %c0_47 = arith.constant 0 : index
    %c1024 = arith.constant 1024 : index
    %72 = vector.load %arg5[%c0_47, %c1024] : memref<16x4226xbf16, #tpu.memory_space<vmem>>, vector<16x1024xbf16>
    %c0_48 = arith.constant 0 : index
    %c0_49 = arith.constant 0 : index
    %73 = vector.load %arg7[%c0_48, %c0_49] : memref<144x1024xbf16, #tpu.memory_space<vmem>>, vector<16x1024xbf16>
    tpu.vector_store %arg7[%c0_48, %c0_49], %72 {strides = array<i32>} : memref<144x1024xbf16, #tpu.memory_space<vmem>>, vector<16x1024xbf16>,
    %c0_50 = arith.constant 0 : index
    %c0_51 = arith.constant 0 : index
    %c1025 = arith.constant 1025 : index
    %74 = vector.load %arg1[%c0_50, %c0_51, %c1025] : memref<1x16x4226xbf16, #tpu.memory_space<vmem>>, vector<1x16x1024xbf16>
    %75 = vector.shape_cast %74 : vector<1x16x1024xbf16> to vector<16x1024xbf16>
    %c16_52 = arith.constant 16 : index
    %c0_53 = arith.constant 0 : index
    %76 = vector.load %arg7[%c16_52, %c0_53] : memref<144x1024xbf16, #tpu.memory_space<vmem>>, vector<16x1024xbf16>
    tpu.vector_store %arg7[%c16_52, %c0_53], %75 {strides = array<i32>} : memref<144x1024xbf16, #tpu.memory_space<vmem>>, vector<16x1024xbf16>,
    %c0_54 = arith.constant 0 : index
    %c1026 = arith.constant 1026 : index
    %77 = vector.load %arg6[%c0_54, %c1026] : memref<16x4226xbf16, #tpu.memory_space<vmem>>, vector<16x1024xbf16>
    %c32_55 = arith.constant 32 : index
    %c0_56 = arith.constant 0 : index
    %78 = vector.load %arg7[%c32_55, %c0_56] : memref<144x1024xbf16, #tpu.memory_space<vmem>>, vector<16x1024xbf16>
    tpu.vector_store %arg7[%c32_55, %c0_56], %77 {strides = array<i32>} : memref<144x1024xbf16, #tpu.memory_space<vmem>>, vector<16x1024xbf16>,
    %c0_57 = arith.constant 0 : index
    %c1088 = arith.constant 1088 : index
    %79 = vector.load %arg5[%c0_57, %c1088] : memref<16x4226xbf16, #tpu.memory_space<vmem>>, vector<16x1024xbf16>
    %c48_58 = arith.constant 48 : index
    %c0_59 = arith.constant 0 : index
    %80 = vector.load %arg7[%c48_58, %c0_59] : memref<144x1024xbf16, #tpu.memory_space<vmem>>, vector<16x1024xbf16>
    tpu.vector_store %arg7[%c48_58, %c0_59], %79 {strides = array<i32>} : memref<144x1024xbf16, #tpu.memory_space<vmem>>, vector<16x1024xbf16>,
    %c0_60 = arith.constant 0 : index
    %c0_61 = arith.constant 0 : index
    %c1089 = arith.constant 1089 : index
    %81 = vector.load %arg1[%c0_60, %c0_61, %c1089] : memref<1x16x4226xbf16, #tpu.memory_space<vmem>>, vector<1x16x1024xbf16>
    %82 = vector.shape_cast %81 : vector<1x16x1024xbf16> to vector<16x1024xbf16>
    %c64_62 = arith.constant 64 : index
    %c0_63 = arith.constant 0 : index
    %83 = vector.load %arg7[%c64_62, %c0_63] : memref<144x1024xbf16, #tpu.memory_space<vmem>>, vector<16x1024xbf16>
    tpu.vector_store %arg7[%c64_62, %c0_63], %82 {strides = array<i32>} : memref<144x1024xbf16, #tpu.memory_space<vmem>>, vector<16x1024xbf16>,
    %c0_64 = arith.constant 0 : index
    %c1090 = arith.constant 1090 : index
    %84 = vector.load %arg6[%c0_64, %c1090] : memref<16x4226xbf16, #tpu.memory_space<vmem>>, vector<16x1024xbf16>
    %c80_65 = arith.constant 80 : index
    %c0_66 = arith.constant 0 : index
    %85 = vector.load %arg7[%c80_65, %c0_66] : memref<144x1024xbf16, #tpu.memory_space<vmem>>, vector<16x1024xbf16>
    tpu.vector_store %arg7[%c80_65, %c0_66], %84 {strides = array<i32>} : memref<144x1024xbf16, #tpu.memory_space<vmem>>, vector<16x1024xbf16>,
    %c0_67 = arith.constant 0 : index
    %c1152 = arith.constant 1152 : index
    %86 = vector.load %arg5[%c0_67, %c1152] : memref<16x4226xbf16, #tpu.memory_space<vmem>>, vector<16x1024xbf16>
    %c96_68 = arith.constant 96 : index
    %c0_69 = arith.constant 0 : index
    %87 = vector.load %arg7[%c96_68, %c0_69] : memref<144x1024xbf16, #tpu.memory_space<vmem>>, vector<16x1024xbf16>
    tpu.vector_store %arg7[%c96_68, %c0_69], %86 {strides = array<i32>} : memref<144x1024xbf16, #tpu.memory_space<vmem>>, vector<16x1024xbf16>,
    %c0_70 = arith.constant 0 : index
    %c0_71 = arith.constant 0 : index
    %c1153 = arith.constant 1153 : index
    %88 = vector.load %arg1[%c0_70, %c0_71, %c1153] : memref<1x16x4226xbf16, #tpu.memory_space<vmem>>, vector<1x16x1024xbf16>
    %89 = vector.shape_cast %88 : vector<1x16x1024xbf16> to vector<16x1024xbf16>
    %c112_72 = arith.constant 112 : index
    %c0_73 = arith.constant 0 : index
    %90 = vector.load %arg7[%c112_72, %c0_73] : memref<144x1024xbf16, #tpu.memory_space<vmem>>, vector<16x1024xbf16>
    tpu.vector_store %arg7[%c112_72, %c0_73], %89 {strides = array<i32>} : memref<144x1024xbf16, #tpu.memory_space<vmem>>, vector<16x1024xbf16>,
    %c0_74 = arith.constant 0 : index
    %c1154 = arith.constant 1154 : index
    %91 = vector.load %arg6[%c0_74, %c1154] : memref<16x4226xbf16, #tpu.memory_space<vmem>>, vector<16x1024xbf16>
    %c128_75 = arith.constant 128 : index
    %c0_76 = arith.constant 0 : index
    %92 = vector.load %arg7[%c128_75, %c0_76] : memref<144x1024xbf16, #tpu.memory_space<vmem>>, vector<16x1024xbf16>
    tpu.vector_store %arg7[%c128_75, %c0_76], %91 {strides = array<i32>} : memref<144x1024xbf16, #tpu.memory_space<vmem>>, vector<16x1024xbf16>,
    %c0_77 = arith.constant 0 : index
    %c0_78 = arith.constant 0 : index
    %93 = vector.load %arg2[%c0_77, %c0_78] : memref<4x144xbf16, #tpu.memory_space<vmem>>, vector<4x144xbf16>
    %c0_79 = arith.constant 0 : index
    %c0_80 = arith.constant 0 : index
    %94 = vector.load %arg7[%c0_79, %c0_80] : memref<144x1024xbf16, #tpu.memory_space<vmem>>, vector<144x1024xbf16>
    %cst_81 = arith.constant dense<0.000000e+00> : vector<4x1024xf32>
    %95 = tpu.matmul %93, %94, %cst_81 {dimension_numbers = #tpu.dot_dimension_numbers<[1], [0], [0], [1], [0, 0, 1, 1], [], []>} : vector<4x144xbf16>, vector<144x1024xbf16>, vector<4x1024xf32> -> vector<4x1024xf32>
    %c0_82 = arith.constant 0 : index
    %c0_83 = arith.constant 0 : index
    %96 = vector.load %arg3[%c0_82, %c0_83] : memref<4x1xf32, #tpu.memory_space<vmem>>, vector<4x1xf32>
    %97 = vector.broadcast %96 : vector<4x1xf32> to vector<4x1024xf32>
    %98 = arith.addf %95, %97 : vector<4x1024xf32>
    %99 = vector.extract_strided_slice %98 {offsets = [0, 0], sizes = [2, 1024], strides = [1, 1]} : vector<4x1024xf32> to vector<2x1024xf32>
    %100 = vector.extract_strided_slice %98 {offsets = [2, 0], sizes = [2, 1024], strides = [1, 1]} : vector<4x1024xf32> to vector<2x1024xf32>
    %101 = arith.negf %100 : vector<2x1024xf32>
    %102 = math.exp %101 : vector<2x1024xf32>
    %cst_84 = arith.constant 1.000000e+00 : f32
    %103 = vector.broadcast %cst_84 : f32 to vector<2x1024xf32>
    %104 = arith.addf %103, %102 : vector<2x1024xf32>
    %105 = arith.divf %103, %104 : vector<2x1024xf32>
    %106 = arith.mulf %99, %105 : vector<2x1024xf32>
    %c0_85 = arith.constant 0 : index
    %c0_86 = arith.constant 0 : index
    %c1024_87 = arith.constant 1024 : index
    %107 = vector.load %arg4[%c0_85, %c0_86, %c1024_87] : memref<1x2x4096xf32, #tpu.memory_space<vmem>>, vector<1x2x1024xf32>
    %108 = vector.shape_cast %107 : vector<1x2x1024xf32> to vector<2x1024xf32>
    %109 = vector.shape_cast %106 : vector<2x1024xf32> to vector<1x2x1024xf32>
    tpu.vector_store %arg4[%c0_85, %c0_86, %c1024_87], %109 {strides = array<i32>} : memref<1x2x4096xf32, #tpu.memory_space<vmem>>, vector<1x2x1024xf32>,
    %c0_88 = arith.constant 0 : index
    %c2048 = arith.constant 2048 : index
    %110 = vector.load %arg5[%c0_88, %c2048] : memref<16x4226xbf16, #tpu.memory_space<vmem>>, vector<16x1024xbf16>
    %c0_89 = arith.constant 0 : index
    %c0_90 = arith.constant 0 : index
    %111 = vector.load %arg7[%c0_89, %c0_90] : memref<144x1024xbf16, #tpu.memory_space<vmem>>, vector<16x1024xbf16>
    tpu.vector_store %arg7[%c0_89, %c0_90], %110 {strides = array<i32>} : memref<144x1024xbf16, #tpu.memory_space<vmem>>, vector<16x1024xbf16>,
    %c0_91 = arith.constant 0 : index
    %c0_92 = arith.constant 0 : index
    %c2049 = arith.constant 2049 : index
    %112 = vector.load %arg1[%c0_91, %c0_92, %c2049] : memref<1x16x4226xbf16, #tpu.memory_space<vmem>>, vector<1x16x1024xbf16>
    %113 = vector.shape_cast %112 : vector<1x16x1024xbf16> to vector<16x1024xbf16>
    %c16_93 = arith.constant 16 : index
    %c0_94 = arith.constant 0 : index
    %114 = vector.load %arg7[%c16_93, %c0_94] : memref<144x1024xbf16, #tpu.memory_space<vmem>>, vector<16x1024xbf16>
    tpu.vector_store %arg7[%c16_93, %c0_94], %113 {strides = array<i32>} : memref<144x1024xbf16, #tpu.memory_space<vmem>>, vector<16x1024xbf16>,
    %c0_95 = arith.constant 0 : index
    %c2050 = arith.constant 2050 : index
    %115 = vector.load %arg6[%c0_95, %c2050] : memref<16x4226xbf16, #tpu.memory_space<vmem>>, vector<16x1024xbf16>
    %c32_96 = arith.constant 32 : index
    %c0_97 = arith.constant 0 : index
    %116 = vector.load %arg7[%c32_96, %c0_97] : memref<144x1024xbf16, #tpu.memory_space<vmem>>, vector<16x1024xbf16>
    tpu.vector_store %arg7[%c32_96, %c0_97], %115 {strides = array<i32>} : memref<144x1024xbf16, #tpu.memory_space<vmem>>, vector<16x1024xbf16>,
    %c0_98 = arith.constant 0 : index
    %c2112 = arith.constant 2112 : index
    %117 = vector.load %arg5[%c0_98, %c2112] : memref<16x4226xbf16, #tpu.memory_space<vmem>>, vector<16x1024xbf16>
    %c48_99 = arith.constant 48 : index
    %c0_100 = arith.constant 0 : index
    %118 = vector.load %arg7[%c48_99, %c0_100] : memref<144x1024xbf16, #tpu.memory_space<vmem>>, vector<16x1024xbf16>
    tpu.vector_store %arg7[%c48_99, %c0_100], %117 {strides = array<i32>} : memref<144x1024xbf16, #tpu.memory_space<vmem>>, vector<16x1024xbf16>,
    %c0_101 = arith.constant 0 : index
    %c0_102 = arith.constant 0 : index
    %c2113 = arith.constant 2113 : index
    %119 = vector.load %arg1[%c0_101, %c0_102, %c2113] : memref<1x16x4226xbf16, #tpu.memory_space<vmem>>, vector<1x16x1024xbf16>
    %120 = vector.shape_cast %119 : vector<1x16x1024xbf16> to vector<16x1024xbf16>
    %c64_103 = arith.constant 64 : index
    %c0_104 = arith.constant 0 : index
    %121 = vector.load %arg7[%c64_103, %c0_104] : memref<144x1024xbf16, #tpu.memory_space<vmem>>, vector<16x1024xbf16>
    tpu.vector_store %arg7[%c64_103, %c0_104], %120 {strides = array<i32>} : memref<144x1024xbf16, #tpu.memory_space<vmem>>, vector<16x1024xbf16>,
    %c0_105 = arith.constant 0 : index
    %c2114 = arith.constant 2114 : index
    %122 = vector.load %arg6[%c0_105, %c2114] : memref<16x4226xbf16, #tpu.memory_space<vmem>>, vector<16x1024xbf16>
    %c80_106 = arith.constant 80 : index
    %c0_107 = arith.constant 0 : index
    %123 = vector.load %arg7[%c80_106, %c0_107] : memref<144x1024xbf16, #tpu.memory_space<vmem>>, vector<16x1024xbf16>
    tpu.vector_store %arg7[%c80_106, %c0_107], %122 {strides = array<i32>} : memref<144x1024xbf16, #tpu.memory_space<vmem>>, vector<16x1024xbf16>,
    %c0_108 = arith.constant 0 : index
    %c2176 = arith.constant 2176 : index
    %124 = vector.load %arg5[%c0_108, %c2176] : memref<16x4226xbf16, #tpu.memory_space<vmem>>, vector<16x1024xbf16>
    %c96_109 = arith.constant 96 : index
    %c0_110 = arith.constant 0 : index
    %125 = vector.load %arg7[%c96_109, %c0_110] : memref<144x1024xbf16, #tpu.memory_space<vmem>>, vector<16x1024xbf16>
    tpu.vector_store %arg7[%c96_109, %c0_110], %124 {strides = array<i32>} : memref<144x1024xbf16, #tpu.memory_space<vmem>>, vector<16x1024xbf16>,
    %c0_111 = arith.constant 0 : index
    %c0_112 = arith.constant 0 : index
    %c2177 = arith.constant 2177 : index
    %126 = vector.load %arg1[%c0_111, %c0_112, %c2177] : memref<1x16x4226xbf16, #tpu.memory_space<vmem>>, vector<1x16x1024xbf16>
    %127 = vector.shape_cast %126 : vector<1x16x1024xbf16> to vector<16x1024xbf16>
    %c112_113 = arith.constant 112 : index
    %c0_114 = arith.constant 0 : index
    %128 = vector.load %arg7[%c112_113, %c0_114] : memref<144x1024xbf16, #tpu.memory_space<vmem>>, vector<16x1024xbf16>
    tpu.vector_store %arg7[%c112_113, %c0_114], %127 {strides = array<i32>} : memref<144x1024xbf16, #tpu.memory_space<vmem>>, vector<16x1024xbf16>,
    %c0_115 = arith.constant 0 : index
    %c2178 = arith.constant 2178 : index
    %129 = vector.load %arg6[%c0_115, %c2178] : memref<16x4226xbf16, #tpu.memory_space<vmem>>, vector<16x1024xbf16>
    %c128_116 = arith.constant 128 : index
    %c0_117 = arith.constant 0 : index
    %130 = vector.load %arg7[%c128_116, %c0_117] : memref<144x1024xbf16, #tpu.memory_space<vmem>>, vector<16x1024xbf16>
    tpu.vector_store %arg7[%c128_116, %c0_117], %129 {strides = array<i32>} : memref<144x1024xbf16, #tpu.memory_space<vmem>>, vector<16x1024xbf16>,
    %c0_118 = arith.constant 0 : index
    %c0_119 = arith.constant 0 : index
    %131 = vector.load %arg2[%c0_118, %c0_119] : memref<4x144xbf16, #tpu.memory_space<vmem>>, vector<4x144xbf16>
    %c0_120 = arith.constant 0 : index
    %c0_121 = arith.constant 0 : index
    %132 = vector.load %arg7[%c0_120, %c0_121] : memref<144x1024xbf16, #tpu.memory_space<vmem>>, vector<144x1024xbf16>
    %cst_122 = arith.constant dense<0.000000e+00> : vector<4x1024xf32>
    %133 = tpu.matmul %131, %132, %cst_122 {dimension_numbers = #tpu.dot_dimension_numbers<[1], [0], [0], [1], [0, 0, 1, 1], [], []>} : vector<4x144xbf16>, vector<144x1024xbf16>, vector<4x1024xf32> -> vector<4x1024xf32>
    %c0_123 = arith.constant 0 : index
    %c0_124 = arith.constant 0 : index
    %134 = vector.load %arg3[%c0_123, %c0_124] : memref<4x1xf32, #tpu.memory_space<vmem>>, vector<4x1xf32>
    %135 = vector.broadcast %134 : vector<4x1xf32> to vector<4x1024xf32>
    %136 = arith.addf %133, %135 : vector<4x1024xf32>
    %137 = vector.extract_strided_slice %136 {offsets = [0, 0], sizes = [2, 1024], strides = [1, 1]} : vector<4x1024xf32> to vector<2x1024xf32>
    %138 = vector.extract_strided_slice %136 {offsets = [2, 0], sizes = [2, 1024], strides = [1, 1]} : vector<4x1024xf32> to vector<2x1024xf32>
    %139 = arith.negf %138 : vector<2x1024xf32>
    %140 = math.exp %139 : vector<2x1024xf32>
    %cst_125 = arith.constant 1.000000e+00 : f32
    %141 = vector.broadcast %cst_125 : f32 to vector<2x1024xf32>
    %142 = arith.addf %141, %140 : vector<2x1024xf32>
    %143 = arith.divf %141, %142 : vector<2x1024xf32>
    %144 = arith.mulf %137, %143 : vector<2x1024xf32>
    %c0_126 = arith.constant 0 : index
    %c0_127 = arith.constant 0 : index
    %c2048_128 = arith.constant 2048 : index
    %145 = vector.load %arg4[%c0_126, %c0_127, %c2048_128] : memref<1x2x4096xf32, #tpu.memory_space<vmem>>, vector<1x2x1024xf32>
    %146 = vector.shape_cast %145 : vector<1x2x1024xf32> to vector<2x1024xf32>
    %147 = vector.shape_cast %144 : vector<2x1024xf32> to vector<1x2x1024xf32>
    tpu.vector_store %arg4[%c0_126, %c0_127, %c2048_128], %147 {strides = array<i32>} : memref<1x2x4096xf32, #tpu.memory_space<vmem>>, vector<1x2x1024xf32>,
    %c0_129 = arith.constant 0 : index
    %c3072 = arith.constant 3072 : index
    %148 = vector.load %arg5[%c0_129, %c3072] : memref<16x4226xbf16, #tpu.memory_space<vmem>>, vector<16x1024xbf16>
    %c0_130 = arith.constant 0 : index
    %c0_131 = arith.constant 0 : index
    %149 = vector.load %arg7[%c0_130, %c0_131] : memref<144x1024xbf16, #tpu.memory_space<vmem>>, vector<16x1024xbf16>
    tpu.vector_store %arg7[%c0_130, %c0_131], %148 {strides = array<i32>} : memref<144x1024xbf16, #tpu.memory_space<vmem>>, vector<16x1024xbf16>,
    %c0_132 = arith.constant 0 : index
    %c0_133 = arith.constant 0 : index
    %c3073 = arith.constant 3073 : index
    %150 = vector.load %arg1[%c0_132, %c0_133, %c3073] : memref<1x16x4226xbf16, #tpu.memory_space<vmem>>, vector<1x16x1024xbf16>
    %151 = vector.shape_cast %150 : vector<1x16x1024xbf16> to vector<16x1024xbf16>
    %c16_134 = arith.constant 16 : index
    %c0_135 = arith.constant 0 : index
    %152 = vector.load %arg7[%c16_134, %c0_135] : memref<144x1024xbf16, #tpu.memory_space<vmem>>, vector<16x1024xbf16>
    tpu.vector_store %arg7[%c16_134, %c0_135], %151 {strides = array<i32>} : memref<144x1024xbf16, #tpu.memory_space<vmem>>, vector<16x1024xbf16>,
    %c0_136 = arith.constant 0 : index
    %c3074 = arith.constant 3074 : index
    %153 = vector.load %arg6[%c0_136, %c3074] : memref<16x4226xbf16, #tpu.memory_space<vmem>>, vector<16x1024xbf16>
    %c32_137 = arith.constant 32 : index
    %c0_138 = arith.constant 0 : index
    %154 = vector.load %arg7[%c32_137, %c0_138] : memref<144x1024xbf16, #tpu.memory_space<vmem>>, vector<16x1024xbf16>
    tpu.vector_store %arg7[%c32_137, %c0_138], %153 {strides = array<i32>} : memref<144x1024xbf16, #tpu.memory_space<vmem>>, vector<16x1024xbf16>,
    %c0_139 = arith.constant 0 : index
    %c3136 = arith.constant 3136 : index
    %155 = vector.load %arg5[%c0_139, %c3136] : memref<16x4226xbf16, #tpu.memory_space<vmem>>, vector<16x1024xbf16>
    %c48_140 = arith.constant 48 : index
    %c0_141 = arith.constant 0 : index
    %156 = vector.load %arg7[%c48_140, %c0_141] : memref<144x1024xbf16, #tpu.memory_space<vmem>>, vector<16x1024xbf16>
    tpu.vector_store %arg7[%c48_140, %c0_141], %155 {strides = array<i32>} : memref<144x1024xbf16, #tpu.memory_space<vmem>>, vector<16x1024xbf16>,
    %c0_142 = arith.constant 0 : index
    %c0_143 = arith.constant 0 : index
    %c3137 = arith.constant 3137 : index
    %157 = vector.load %arg1[%c0_142, %c0_143, %c3137] : memref<1x16x4226xbf16, #tpu.memory_space<vmem>>, vector<1x16x1024xbf16>
    %158 = vector.shape_cast %157 : vector<1x16x1024xbf16> to vector<16x1024xbf16>
    %c64_144 = arith.constant 64 : index
    %c0_145 = arith.constant 0 : index
    %159 = vector.load %arg7[%c64_144, %c0_145] : memref<144x1024xbf16, #tpu.memory_space<vmem>>, vector<16x1024xbf16>
    tpu.vector_store %arg7[%c64_144, %c0_145], %158 {strides = array<i32>} : memref<144x1024xbf16, #tpu.memory_space<vmem>>, vector<16x1024xbf16>,
    %c0_146 = arith.constant 0 : index
    %c3138 = arith.constant 3138 : index
    %160 = vector.load %arg6[%c0_146, %c3138] : memref<16x4226xbf16, #tpu.memory_space<vmem>>, vector<16x1024xbf16>
    %c80_147 = arith.constant 80 : index
    %c0_148 = arith.constant 0 : index
    %161 = vector.load %arg7[%c80_147, %c0_148] : memref<144x1024xbf16, #tpu.memory_space<vmem>>, vector<16x1024xbf16>
    tpu.vector_store %arg7[%c80_147, %c0_148], %160 {strides = array<i32>} : memref<144x1024xbf16, #tpu.memory_space<vmem>>, vector<16x1024xbf16>,
    %c0_149 = arith.constant 0 : index
    %c3200 = arith.constant 3200 : index
    %162 = vector.load %arg5[%c0_149, %c3200] : memref<16x4226xbf16, #tpu.memory_space<vmem>>, vector<16x1024xbf16>
    %c96_150 = arith.constant 96 : index
    %c0_151 = arith.constant 0 : index
    %163 = vector.load %arg7[%c96_150, %c0_151] : memref<144x1024xbf16, #tpu.memory_space<vmem>>, vector<16x1024xbf16>
    tpu.vector_store %arg7[%c96_150, %c0_151], %162 {strides = array<i32>} : memref<144x1024xbf16, #tpu.memory_space<vmem>>, vector<16x1024xbf16>,
    %c0_152 = arith.constant 0 : index
    %c0_153 = arith.constant 0 : index
    %c3201 = arith.constant 3201 : index
    %164 = vector.load %arg1[%c0_152, %c0_153, %c3201] : memref<1x16x4226xbf16, #tpu.memory_space<vmem>>, vector<1x16x1024xbf16>
    %165 = vector.shape_cast %164 : vector<1x16x1024xbf16> to vector<16x1024xbf16>
    %c112_154 = arith.constant 112 : index
    %c0_155 = arith.constant 0 : index
    %166 = vector.load %arg7[%c112_154, %c0_155] : memref<144x1024xbf16, #tpu.memory_space<vmem>>, vector<16x1024xbf16>
    tpu.vector_store %arg7[%c112_154, %c0_155], %165 {strides = array<i32>} : memref<144x1024xbf16, #tpu.memory_space<vmem>>, vector<16x1024xbf16>,
    %c0_156 = arith.constant 0 : index
    %c3202 = arith.constant 3202 : index
    %167 = vector.load %arg6[%c0_156, %c3202] : memref<16x4226xbf16, #tpu.memory_space<vmem>>, vector<16x1024xbf16>
    %c128_157 = arith.constant 128 : index
    %c0_158 = arith.constant 0 : index
    %168 = vector.load %arg7[%c128_157, %c0_158] : memref<144x1024xbf16, #tpu.memory_space<vmem>>, vector<16x1024xbf16>
    tpu.vector_store %arg7[%c128_157, %c0_158], %167 {strides = array<i32>} : memref<144x1024xbf16, #tpu.memory_space<vmem>>, vector<16x1024xbf16>,
    %c0_159 = arith.constant 0 : index
    %c0_160 = arith.constant 0 : index
    %169 = vector.load %arg2[%c0_159, %c0_160] : memref<4x144xbf16, #tpu.memory_space<vmem>>, vector<4x144xbf16>
    %c0_161 = arith.constant 0 : index
    %c0_162 = arith.constant 0 : index
    %170 = vector.load %arg7[%c0_161, %c0_162] : memref<144x1024xbf16, #tpu.memory_space<vmem>>, vector<144x1024xbf16>
    %cst_163 = arith.constant dense<0.000000e+00> : vector<4x1024xf32>
    %171 = tpu.matmul %169, %170, %cst_163 {dimension_numbers = #tpu.dot_dimension_numbers<[1], [0], [0], [1], [0, 0, 1, 1], [], []>} : vector<4x144xbf16>, vector<144x1024xbf16>, vector<4x1024xf32> -> vector<4x1024xf32>
    %c0_164 = arith.constant 0 : index
    %c0_165 = arith.constant 0 : index
    %172 = vector.load %arg3[%c0_164, %c0_165] : memref<4x1xf32, #tpu.memory_space<vmem>>, vector<4x1xf32>
    %173 = vector.broadcast %172 : vector<4x1xf32> to vector<4x1024xf32>
    %174 = arith.addf %171, %173 : vector<4x1024xf32>
    %175 = vector.extract_strided_slice %174 {offsets = [0, 0], sizes = [2, 1024], strides = [1, 1]} : vector<4x1024xf32> to vector<2x1024xf32>
    %176 = vector.extract_strided_slice %174 {offsets = [2, 0], sizes = [2, 1024], strides = [1, 1]} : vector<4x1024xf32> to vector<2x1024xf32>
    %177 = arith.negf %176 : vector<2x1024xf32>
    %178 = math.exp %177 : vector<2x1024xf32>
    %cst_166 = arith.constant 1.000000e+00 : f32
    %179 = vector.broadcast %cst_166 : f32 to vector<2x1024xf32>
    %180 = arith.addf %179, %178 : vector<2x1024xf32>
    %181 = arith.divf %179, %180 : vector<2x1024xf32>
    %182 = arith.mulf %175, %181 : vector<2x1024xf32>
    %c0_167 = arith.constant 0 : index
    %c0_168 = arith.constant 0 : index
    %c3072_169 = arith.constant 3072 : index
    %183 = vector.load %arg4[%c0_167, %c0_168, %c3072_169] : memref<1x2x4096xf32, #tpu.memory_space<vmem>>, vector<1x2x1024xf32>
    %184 = vector.shape_cast %183 : vector<1x2x1024xf32> to vector<2x1024xf32>
    %185 = vector.shape_cast %182 : vector<2x1024xf32> to vector<1x2x1024xf32>
    tpu.vector_store %arg4[%c0_167, %c0_168, %c3072_169], %185 {strides = array<i32>} : memref<1x2x4096xf32, #tpu.memory_space<vmem>>, vector<1x2x1024xf32>,
    return
  }
  func.func @transform_0(%arg0: i32) -> (i32, i32, i32) {
    %c0_i32 = arith.constant 0 : i32
    %c0_i32_0 = arith.constant 0 : i32
    %c0_i32_1 = arith.constant 0 : i32
    return %arg0, %c0_i32, %c0_i32_0 : i32, i32, i32
  }
  func.func @transform_1(%arg0: i32) -> (i32, i32) {
    %c0_i32 = arith.constant 0 : i32
    %c0_i32_0 = arith.constant 0 : i32
    %c0_i32_1 = arith.constant 0 : i32
    return %c0_i32, %c0_i32_0 : i32, i32
  }
  func.func @transform_2(%arg0: i32) -> (i32, i32) {
    %c0_i32 = arith.constant 0 : i32
    %c0_i32_0 = arith.constant 0 : i32
    %c0_i32_1 = arith.constant 0 : i32
    return %c0_i32, %c0_i32_0 : i32, i32
  }
  func.func @transform_3(%arg0: i32) -> (i32, i32, i32) {
    %c0_i32 = arith.constant 0 : i32
    %c0_i32_0 = arith.constant 0 : i32
    %c0_i32_1 = arith.constant 0 : i32
    return %arg0, %c0_i32, %c0_i32_0 : i32, i32, i32
  }
}

</mosaic_0001>

<bundles_post_ra>
// kernel: init_stage_g.5
= control target key start
LH: loop header
LB: loop body
LE: loop exit
PB: predicated region body
PF: predicated region fallthrough
CT: control target
= control target key end

     0   :  { %v490_v3 = vmov 0.0   ;;  %vm89_vm0 = vcmask 261120   ;;  %v49_v50 = vlaneseq  ;;  %s636_s1 = inlined_call_operand.vmem [shape: f32[32,1024], index: 1, kind: input, shape index: {}]   ;;  %s637_s0 = inlined_call_operand.vmem [shape: f32[2,32], index: 0, kind: input, shape index: {}]   ;;  %s638_s2 = inlined_call_operand.vmem [shape: f32[1,1024], index: 2, kind: input, shape index: {}]   ;;  %s639_s3 = inlined_call_operand.vmem [shape: f32[2,512], index: 3, kind: output, shape index: {}]  }
   0x1   :  { %v16_v0 = vld [vmem:[%s636_s1 + $0x8] sm:$0xff]  ;;  %v18_v2 = vld [vmem:[%s636_s1 + $0x18] sm:$0xff]  ;;  %157 = vmatprep.mubr.f32.mxu0 %v490_v3  ;;  %228 = vmatprep.mubr.f32.mxu1 %v490_v3  ;;  %v15_v6 = vld [vmem:[%s636_s1] sm:$0xff] }
   0x2   :  { %v24_v1 = vld [vmem:[%s636_s1 + $0x48] sm:$0xff]  ;;  %v26_v5 = vld [vmem:[%s636_s1 + $0x58] sm:$0xff]  ;;  %v23_v7 = vld [vmem:[%s636_s1 + $0x40] sm:$0xff]  ;;  %v619_v51 = vshrl.u32 %v49_v50, 7 }
   0x3   :  { %v440_v4 = vpack.c.bf16 %v24_v1, %v16_v0  ;;  %v448_v8 = vpack.c.bf16 %v26_v5, %v18_v2  ;;  %v442_v9 = vpack.c.bf16 %v23_v7, %v15_v6  ;;  %v17_v10 = vld [vmem:[%s636_s1 + $0x10] sm:$0xff]  ;;  %v32_v12 = vld [vmem:[%s636_s1 + $0x88] sm:$0xff]  ;;  %v34_v15 = vld [vmem:[%s636_s1 + $0x98] sm:$0xff] }
   0x4   :  { %v25_v11 = vld [vmem:[%s636_s1 + $0x50] sm:$0xff]  ;;  %v40_v14 = vld [vmem:[%s636_s1 + $0xc8] sm:$0xff]  ;;  %v42_v16 = vld [vmem:[%s636_s1 + $0xd8] sm:$0xff]  ;;  %v67_v55 = vsub.s32 4, %v619_v51  ;;  %v75_v57 = vsub.s32 6, %v619_v51  ;;  %v71_v58 = vsub.s32 5, %v619_v51 }
   0x5   :  { %441 = vmatprep.subr.bf16.mxu0 %v440_v4  ;;  %v450_v13 = vpack.c.bf16 %v25_v11, %v17_v10  ;;  %449 = vmatprep.subr.bf16.mxu1 %v448_v8  ;;  %v444_v17 = vpack.c.bf16 %v40_v14, %v32_v12  ;;  %v452_v18 = vpack.c.bf16 %v42_v16, %v34_v15  ;;  %v31_v19 = vld [vmem:[%s636_s1 + $0x80] sm:$0xff]  ;;  %v33_v21 = vld [vmem:[%s636_s1 + $0x90] sm:$0xff]  ;;  %v20_v24 = vld [vmem:[%s636_s1 + $0x28] sm:$0xff]  ;;  %v79_v59 = vsub.s32 7, %v619_v51 }
   0x6   :  { %443 = vmatpush1.bf16.msra.mxu0 %v442_v9  ;;  %v39_v20 = vld [vmem:[%s636_s1 + $0xc0] sm:$0xff]  ;;  %v41_v23 = vld [vmem:[%s636_s1 + $0xd0] sm:$0xff]  ;;  %v28_v27 = vld [vmem:[%s636_s1 + $0x68] sm:$0xff] }
   0x7   :  { %451 = vmatpush1.bf16.msra.mxu1 %v450_v13  ;;  %v446_v22 = vpack.c.bf16 %v39_v20, %v31_v19  ;;  %445 = vmatprep.subr.bf16.mxu0 %v444_v17  ;;  %v454_v25 = vpack.c.bf16 %v41_v23, %v33_v21  ;;  %v14_v26 = vld [vmem:[%s637_s0] sm:$0x3]  ;;  %v22_v28 = vld [vmem:[%s636_s1 + $0x38] sm:$0xff]  ;;  %v456_v30 = vpack.c.bf16 %v28_v27, %v20_v24  ;;  %v21_v34 = vld [vmem:[%s636_s1 + $0x30] sm:$0xff]  ;;  %v51_v20 = vsub.s32 0, %v619_v51 }
   0x8   :  { %453 = vmatprep.subr.bf16.mxu1 %v452_v18  ;;  %v30_v29 = vld [vmem:[%s636_s1 + $0x78] sm:$0xff]  ;;  %v19_v32 = vld [vmem:[%s636_s1 + $0x20] sm:$0xff]  ;;  %v29_v36 = vld [vmem:[%s636_s1 + $0x70] sm:$0xff]  ;;  %v55_v23 = vsub.s32 1, %v619_v51  ;;  %v63_v24 = vsub.s32 3, %v619_v51 }
   0x9   :  { %v464_v31 = vpack.c.bf16 %v30_v29, %v22_v28  ;;  %v27_v33 = vld [vmem:[%s636_s1 + $0x60] sm:$0xff]  ;;  %v36_v37 = vld [vmem:[%s636_s1 + $0xa8] sm:$0xff]  ;;  %v466_v39 = vpack.c.bf16 %v29_v36, %v21_v34  ;;  %v38_v41 = vld [vmem:[%s636_s1 + $0xb8] sm:$0xff] }
   0xa   :  { %447 = vmatpush1.bf16.msra.mxu0 %v446_v22  ;;  %v458_v35 = vpack.c.bf16 %v27_v33, %v19_v32  ;;  %v44_v38 = vld [vmem:[%s636_s1 + $0xe8] sm:$0xff]  ;;  %v46_v42 = vld [vmem:[%s636_s1 + $0xf8] sm:$0xff]  ;;  %v35_v43 = vld [vmem:[%s636_s1 + $0xa0] sm:$0xff]  ;;  %v59_v22 = vsub.s32 2, %v619_v51 }
   0xb   :  { %455 = vmatpush1.bf16.msra.mxu1 %v454_v25  ;;  %457 = vmatprep.subr.bf16.mxu0 %v456_v30  ;;  %v460_v40 = vpack.c.bf16 %v44_v38, %v36_v37  ;;  %v468_v44 = vpack.c.bf16 %v46_v42, %v38_v41  ;;  %v43_v45 = vld [vmem:[%s636_s1 + $0xe0] sm:$0xff]  ;;  %v37_v46 = vld [vmem:[%s636_s1 + $0xb0] sm:$0xff] }
   0xc   :  { %465 = vmatprep.subr.bf16.mxu1 %v464_v31  ;;  %v45_v47 = vld [vmem:[%s636_s1 + $0xf0] sm:$0xff]  ;;  %v462_v48 = vpack.c.bf16 %v43_v45, %v35_v43  ;;  %v47_v60 = vld [vmem:[%s638_s2] sm:$0xff] }
   0xd   :  { %432 = vmatmul.mubr.msk.f32.vlgmr.msra.gmra.mrb[0].mxu0 %vm89_vm0, %v14_v26  ;;  %v470_v49 = vpack.c.bf16 %v45_v47, %v37_v46  ;;  %v68_v61 = vrot.slane %v47_v60, %v67_v55  ;;  %v76_v62 = vrot.slane %v47_v60, %v75_v57  ;;  %v72_v63 = vrot.slane %v47_v60, %v71_v58 }
   0xe   :  { %433 = vmatmul.mubr.msk.f32.vlgmr.msra.gmra.mrb[0].mxu1 %vm89_vm0, %v14_v26  ;;  %459 = vmatpush1.bf16.msra.mxu0 %v458_v35  ;;  %v80_v0 = vrot.slane %v47_v60, %v79_v59  ;;  %v52_v25 = vrot.slane %v47_v60, %v51_v20  ;;  %v60_v28 = vrot.slane %v47_v60, %v59_v22 }
   0xf   :  { %467 = vmatpush1.bf16.msra.mxu1 %v466_v39  ;;  %461 = vmatprep.subr.bf16.mxu0 %v460_v40  ;;  %v56_v29 = vrot.slane %v47_v60, %v55_v23  ;;  %v64_v30 = vrot.slane %v47_v60, %v63_v24 }
  0x10   :  { %469 = vmatprep.subr.bf16.mxu1 %v468_v44  ;;  %299 = vmatprep.mubr.f32.mxu0 %v490_v3 }
  0x11   :  { %370 = vmatprep.mubr.f32.mxu1 %v490_v3 }
  0x12   :  { %463 = vmatpush1.bf16.msra.mxu0 %v462_v48 }
  0x13   :  { %471 = vmatpush1.bf16.msra.mxu1 %v470_v49 }
  0x15   :  { %434 = vmatmul.mubr.msk.f32.vlgmr.msra.gmra.mrb[2].mxu0 %vm89_vm0, %v14_v26 }
  0x16   :  { %435 = vmatmul.mubr.msk.f32.vlgmr.msra.gmra.mrb[2].mxu1 %vm89_vm0, %v14_v26  ;;  %v491_v26 = vmov 1983009808  }
  0x17   :  { %v412_v27 = vunpack.c.l.s4 %v491_v26 }
  0x19   :  { %v413_v32 = vunpack.c.0.s8 %v412_v27 }
  0x1b   :  { %v416_v43 = vsub.s32 %v413_v32, %v619_v51 }
  0xe0   :  { %v159_v52 = vpop.f32.mrb[0].mxu0 }
  0xe1   :  { %v230_v53 = vpop.f32.mrb[0].mxu1  ;;  %v161_v54 = vpop.f32.mrb[1].mxu0  ;;  %v160_v31 = vadd.f32 %v159_v52, %v52_v25 }
  0xe2   :  { %v232_v56 = vpop.f32.mrb[1].mxu1  ;;  %v231_v34 = vadd.f32 %v230_v53, %v60_v28  ;;  %v162_v36 = vadd.f32 %v161_v54, %v56_v29 }
  0xe3   :  { %v233_v39 = vadd.f32 %v232_v56, %v64_v30 }
  0xe8   :  { %v301_v1 = vpop.f32.mrb[2].mxu0 }
  0xe9   :  { %v302_v2 = vadd.f32 %v301_v1, %v68_v61  ;;  %v372_v3 = vpop.f32.mrb[2].mxu1  ;;  %v303_v4 = vpop.f32.mrb[3].mxu0 }
  0xea   :  { %v373_v5 = vadd.f32 %v372_v3, %v76_v62  ;;  %v304_v6 = vadd.f32 %v303_v4, %v72_v63  ;;  %v374_v7 = vpop.f32.mrb[3].mxu1 }
  0xeb   :  { %v436_v8 = vmul.f32 -1.442695, %v302_v2  ;;  %v375_v9 = vadd.f32 %v374_v7, %v80_v0 }
  0xec   :  { %v438_v10 = vmul.f32 -1.442695, %v373_v5  ;;  %v437_v11 = vmul.f32 -1.442695, %v304_v6 }
  0xed   :  { %474 = vpow2.f32 %v436_v8  ;;  %v439_v12 = vmul.f32 -1.442695, %v375_v9 }
  0xee   :  { %476 = vpow2.f32 %v438_v10 }
  0xef   :  { %478 = vpow2.f32 %v437_v11 }
  0xf0   :  { %480 = vpow2.f32 %v439_v12 }
  0xf7   :  { %v475_v13 = vpop.eup %474 }
  0xf8   :  { %v477_v14 = vpop.eup %476  ;;  %v389_v15 = vadd.f32 1.0, %v475_v13 }
  0xf9   :  { %v479_v16 = vpop.eup %478  ;;  %v391_v17 = vadd.f32 1.0, %v477_v14 }
  0xfa   :  { %v481_v18 = vpop.eup %480  ;;  %482 = vrcp.f32 %v389_v15  ;;  %v390_v19 = vadd.f32 1.0, %v479_v16 }
  0xfb   :  { %484 = vrcp.f32 %v391_v17  ;;  %v392_v21 = vadd.f32 1.0, %v481_v18 }
  0xfc   :  { %486 = vrcp.f32 %v390_v19 }
  0xfd   :  { %488 = vrcp.f32 %v392_v21 }
 0x104   :  { %v483_v33 = vpop.eup %482 }
 0x105   :  { %v485_v35 = vpop.eup %484  ;;  %v401_v37 = vmul.f32 %v483_v33, %v160_v31 }
 0x106   :  { %v487_v38 = vpop.eup %486  ;;  %v403_v40 = vmul.f32 %v485_v35, %v231_v34 }
 0x107   :  { %v489_v41 = vpop.eup %488  ;;  %v402_v42 = vmul.f32 %v487_v38, %v162_v36 }
 0x108   :  { %v404_v44 = vmul.f32 %v489_v41, %v233_v39 }
 0x109   :  { %v409_v45 = vcombine.low %v401_v37, %v402_v42 }
 0x10a   :  { %v410_v46 = vcombine.low %v403_v40, %v404_v44 }
 0x10b   :  { %v417_v47 = vrot.slane %v409_v45, %v416_v43 }
 0x10c   :  { %v424_v48 = vrot.slane %v410_v46, %v416_v43 }
 0x10e   :  { %v425_v49 = vcombine.low %v417_v47, %v424_v48 }
 0x110   :  { %427 = vst [vmem:[%s639_s3] sm:$0xff] %v425_v49 }

// kernel: init_stage_g.6
= control target key start
LH: loop header
LB: loop body
LE: loop exit
PB: predicated region body
PF: predicated region fallthrough
CT: control target
= control target key end

     0   :  { %s774_s12 = smov 0   ;;  %s866_s0 = inlined_call_operand.vmem [shape: bf16[2,32,82], index: 0, kind: input, shape index: {}]   ;;  %s867_s1 = inlined_call_operand.vmem [shape: bf16[32,288], index: 1, kind: input, shape index: {}]   ;;  %s868_s2 = inlined_call_operand.vmem [shape: f32[32,1], index: 2, kind: input, shape index: {}]   ;;  %s869_s3 = inlined_call_operand.vmem [shape: f32[2,16,64], index: 3, kind: output, shape index: {}]  }
   0x1 LB: > { %s623_s13 = sadd.s32 4294967295, %s743_s12   ;;  %p627_p0 = scmp.ge.s32.totalorder %s743_s12, 1  ;;  %s743_s12 = sphi %s774_s12, %s13_s12  }
   0x2   : > { %p137_p1 = scmp.lt.s32.totalorder %s743_s12, 3 }
   0x4   : > { %p138_p2 = pnand %p627_p0, %p137_p1 }
   0x5   : > { %p161_p3 = scmp.lt.s32.totalorder (!%p138_p2), %s623_s13, 1  ;;  %v176_v0 = vlaneseq (!%p138_p2)  ;;  %s745_s18 = smov (!%p138_p2), 119   ;;  %vm211_vm1 = vcmask (!%p138_p2), 670720   ;;  %vm238_vm5 = vcmask (!%p138_p2), 523264   ;;  %v723_v30 = vld [vmem:[%s867_s1 + $0x4] ss:$12 sps:$4 sm:$0xff] (!%p138_p2)  }
   0x6   : > { %141 = sbr.rel (%p138_p2) target bundleno = 437 (0x1b5), region = 32  ;;  %s746_s19 = smov (!%p138_p2), 118   ;;  %486 = vmatprep.mubr.bf16.mxu0 (!%p138_p2), %v723_v30  ;;  %v724_v31 = vld [vmem:[%s867_s1 + $0x8] ss:$12 sps:$4 sm:$0xff] (!%p138_p2)   ;;  %vm447_vm6 = vcmask (!%p138_p2), 261120   ;;  %v396_v32 = vld [vmem:[%s868_s2 + $0x18] sm:$0xff] (!%p138_p2) }
   0x7   : > { %v177_v1 = vand.u32 (!%p138_p2), 127, %v176_v0  ;;  %s747_s20 = smov (!%p138_p2), 127   ;;  %s748_s21 = smov (!%p138_p2), 112   ;;  %692 = vmatprep.mubr.msk.bf16.mxu1 (!%p138_p2), %vm447_vm6, %v724_v31  ;;  %v395_v33 = vld [vmem:[%s868_s2 + $0x10] sm:$0xff] (!%p138_p2)  ;;  %v753_v34 = vmov (!%p138_p2), 0   ;;  %v393_v35 = vld [vmem:[%s868_s2] sm:$0xff] (!%p138_p2) }
   0x8   : > { %s749_s22 = smov (!%p138_p2), 126   ;;  %s750_s23 = smov (!%p138_p2), 111   ;;  %714 = vset.pattern.permute.xlu1 (!%p138_p2), %v753_v34  ;;  %713 = vset.pattern.permute.xlu0 (!%p138_p2), %v753_v34  ;;  %v394_v36 = vld [vmem:[%s868_s2 + $0x8] sm:$0xff] (!%p138_p2) }
   0x9   : > { %v178_v2 = vadd.s32 (!%p138_p2), 7, %v177_v1  ;;  %s751_s26 = smov (!%p138_p2), 120   ;;  %s752_s27 = smov (!%p138_p2), 110  }
   0xb   : > { %v183_v4 = vand.u32 (!%p138_p2), 7, %v178_v2 }
   0xd   : > { %s871_s13 = smov (!%p161_p3, %s623_s13), 1  ;;  %vm214_vm0 = vcmp.ne.s32.totalorder %v183_v4, 0  ;;  %vm191_vm3 = vcmp.ne.s32.totalorder %v183_v4, 7 }
   0xe   : > { %s654_s14 = sshll.u32 %s871_s13, 4  ;;  %vm217_vm2 = vmpackc.low %vm214_vm0, %vm214_vm0 }
   0xf   : > { %s790_s17 = scalar_lea.vmem %s866_s0, %s654_s14  ;;  %vm194_vm4 = vmpackc.low %vm191_vm3, %vm191_vm3  ;;  %s170_s24 = scalar_lea.vmem %s869_s3, %s654_s14 }
  0x10   : > { %v715_v3 = vld [vmem:[%s790_s17] sm:$0xff]   ;;  %v716_v5 = vld [vmem:[%s790_s17 + $0x8] sm:$0xff]  }
  0x11   : > { %301 = vrot.lane.b32.xlu0 %v715_v3, %s745_s18  ;;  %v172_v6 = vld [vmem:[%s790_s17] sm:$0xf]  ;;  %v173_v7 = vld [vmem:[%s790_s17 + $0x4] sm:$0xf]  ;;  %v174_v8 = vld [vmem:[%s790_s17 + $0x8] sm:$0xf] }
  0x12   : > { %v175_v9 = vld [vmem:[%s790_s17 + $0xc] sm:$0xf]  ;;  %v218_v10 = vsel %vm217_vm2, %v172_v6, 0  ;;  %v219_v11 = vsel %vm217_vm2, %v173_v7, 0  ;;  %v220_v12 = vsel %vm217_vm2, %v174_v8, 0  ;;  %v195_v16 = vsel %vm194_vm4, %v172_v6, 0 }
  0x13   : > { %v221_v13 = vsel %vm217_vm2, %v175_v9, 0  ;;  %v634_v14 = vcombine.low %v218_v10, %v219_v11  ;;  %v196_v17 = vsel %vm194_vm4, %v173_v7, 0  ;;  %v197_v18 = vsel %vm194_vm4, %v174_v8, 0  ;;  %v717_v24 = vld [vmem:[%s790_s17] sm:$0xff]   ;;  %v718_v27 = vld [vmem:[%s790_s17 + $0x8] sm:$0xff]  }
  0x14   : > { %v635_v15 = vcombine.low %v220_v12, %v221_v13  ;;  %v198_v19 = vsel %vm194_vm4, %v175_v9, 0  ;;  %v632_v20 = vcombine.low %v195_v16, %v196_v17  ;;  %v719_v28 = vld [vmem:[%s790_s17] sm:$0xff]   ;;  %v720_v29 = vld [vmem:[%s790_s17 + $0x8] sm:$0xff]  }
  0x15   : > { %303 = vrot.lane.b32.xlu0 %v716_v5, %s745_s18  ;;  %234 = vst.msk [vmem:[#allocation3] sm:$0xff] %vm211_vm1, %v634_v14  ;;  %v633_v21 = vcombine.low %v197_v18, %v198_v19  ;;  %v721_v6 = vld [vmem:[%s867_s1] ss:$12 sps:$4 sm:$0xff]   ;;  %v726_v7 = vld [vmem:[%s867_s1 + $0x1c] ss:$12 sps:$4 sm:$0xff]  }
  0x16   : > { %235 = vst.msk [vmem:[#allocation3 + $0x8] sm:$0xff] %vm211_vm1, %v635_v15  ;;  %212 = vst.msk [vmem:[#allocation2] sm:$0xff] %vm211_vm1, %v632_v20  ;;  %v725_v9 = vld [vmem:[%s867_s1 + $0x20] ss:$12 sps:$4 sm:$0xff]   ;;  %v728_v10 = vld [vmem:[%s867_s1 + $0x18] ss:$12 sps:$4 sm:$0xff]  }
  0x17   : > { %213 = vst.msk [vmem:[#allocation2 + $0x8] sm:$0xff] %vm211_vm1, %v633_v21 }
  0x1c   : > { %v309_v22 = vld [vmem:[#allocation3] sm:$0xff] }
  0x1d   : > { %v310_v23 = vld [vmem:[#allocation3 + $0x8] sm:$0xff]  ;;  %313 = vrot.lane.b32.xlu1 %v309_v22, %s746_s19  ;;  %v321_v25 = vld [vmem:[#allocation2] sm:$0xff] }
  0x1e   : > { %315 = vrot.lane.b32.xlu0 %v310_v23, %s746_s19  ;;  %v322_v26 = vld [vmem:[#allocation2 + $0x8] sm:$0xff]  ;;  %239 = vst.msk [vmem:[#allocation4] sm:$0xff] %vm238_vm5, %v321_v25 }
  0x1f   : > { %240 = vst.msk [vmem:[#allocation4 + $0x8] sm:$0xff] %vm238_vm5, %v322_v26 }
  0x21   : > { %255 = vrot.lane.b32.xlu1 %v717_v24, %s747_s20 }
  0x22   : > { %325 = vrot.lane.b32.xlu0 %v321_v25, %s748_s21 }
  0x25   : > { %257 = vrot.lane.b32.xlu1 %v718_v27, %s747_s20  ;;  %v375_v39 = vld [vmem:[#allocation4] sm:$0xff] }
  0x26   : > { %327 = vrot.lane.b32.xlu0 %v322_v26, %s748_s21  ;;  %v376_v41 = vld [vmem:[#allocation4 + $0x8] sm:$0xff] }
  0x29   : > { %267 = vrot.lane.b32.xlu1 %v309_v22, %s749_s22 }
  0x2a   : > { %347 = vrot.lane.b32.xlu0 %v719_v28, %s750_s23 }
  0x2d   : > { %269 = vrot.lane.b32.xlu1 %v310_v23, %s749_s22 }
  0x2e   : > { %349 = vrot.lane.b32.xlu0 %v720_v29, %s750_s23 }
  0x31   : > { %279 = vrot.lane.b32.xlu1 %v321_v25, %s751_s26 }
  0x32   : > { %359 = vrot.lane.b32.xlu0 %v309_v22, %s752_s27 }
  0x35   : > { %281 = vrot.lane.b32.xlu1 %v322_v26, %s751_s26 }
  0x36   : > { %409 = vperm.xlu0 %713, %v395_v33  }
  0x39   : > { %361 = vrot.lane.b32.xlu1 %v310_v23, %s752_s27 }
  0x3a   : > { %404 = vperm.xlu0 %713, %v394_v36  }
  0x3d   : > { %414 = vperm.xlu1 %714, %v396_v32  }
  0x41   : > { %399 = vperm.xlu1 %714, %v393_v35  }
  0x83   : > { %v302_v37 = vpop.permute.xlu0 %301 }
  0x84   : > { %307 = vst.msk [vmem:[#allocation4 + $0x40] sm:$0xff] %vm238_vm5, %v302_v37 }
  0x87   : > { %v304_v38 = vpop.permute.xlu0 %303 }
  0x88   : > { %308 = vst.msk [vmem:[#allocation4 + $0x48] sm:$0xff] %vm238_vm5, %v304_v38 }
  0x8b   : > { %v383_v40 = vld [vmem:[#allocation4 + $0x40] sm:$0xff] }
  0x8c   : > { %656 = vmatprep.subr.bf16.mxu0 %v383_v40 }
  0x8d   : > { %657 = vmatpush3.bf16.msra.mxu0 %v375_v39 }
  0x8f   : > { %v384_v42 = vld [vmem:[#allocation4 + $0x48] sm:$0xff]  ;;  %v314_v43 = vpop.permute.xlu1 %313 }
  0x90   : > { %v316_v44 = vpop.permute.xlu0 %315  ;;  %658 = vmatprep.subr.bf16.mxu0 %v384_v42  ;;  %319 = vst.msk [vmem:[#allocation4 + $0x50] sm:$0xff] %vm238_vm5, %v314_v43 }
  0x91   : > { %320 = vst.msk [vmem:[#allocation4 + $0x58] sm:$0xff] %vm238_vm5, %v316_v44  ;;  %659 = vmatpush3.bf16.msra.mxu0 %v376_v41 }
  0x93   : > { %v256_v45 = vpop.permute.xlu1 %255 }
  0x94   : > { %v326_v46 = vpop.permute.xlu0 %325  ;;  %261 = vst.msk [vmem:[#allocation4 + $0x10] sm:$0xff] %vm238_vm5, %v256_v45 }
  0x95   : > { %331 = vst.msk [vmem:[#allocation4 + $0x60] sm:$0xff] %vm238_vm5, %v326_v46 }
  0x97   : > { %v258_v47 = vpop.permute.xlu1 %257  ;;  %v385_v48 = vld [vmem:[#allocation4 + $0x50] sm:$0xff] }
  0x98   : > { %v328_v49 = vpop.permute.xlu0 %327  ;;  %262 = vst.msk [vmem:[#allocation4 + $0x18] sm:$0xff] %vm238_vm5, %v258_v47  ;;  %660 = vmatprep.subr.bf16.mxu0 %v385_v48  ;;  %v386_v50 = vld [vmem:[#allocation4 + $0x58] sm:$0xff] }
  0x99   : > { %332 = vst.msk [vmem:[#allocation4 + $0x68] sm:$0xff] %vm238_vm5, %v328_v49 }
  0x9b   : > { %v268_v51 = vpop.permute.xlu1 %267  ;;  %v377_v52 = vld [vmem:[#allocation4 + $0x10] sm:$0xff] }
  0x9c   : > { %v348_v53 = vpop.permute.xlu0 %347  ;;  %273 = vst.msk [vmem:[#allocation4 + $0x20] sm:$0xff] %vm238_vm5, %v268_v51  ;;  %661 = vmatpush3.bf16.msra.mxu0 %v377_v52  ;;  %v387_v54 = vld [vmem:[#allocation4 + $0x60] sm:$0xff] }
  0x9d   : > { %353 = vst.msk [vmem:[#allocation4 + $0x70] sm:$0xff] %vm238_vm5, %v348_v53  ;;  %662 = vmatprep.subr.bf16.mxu0 %v386_v50 }
  0x9f   : > { %v270_v55 = vpop.permute.xlu1 %269  ;;  %v378_v56 = vld [vmem:[#allocation4 + $0x18] sm:$0xff] }
  0xa0   : > { %v350_v57 = vpop.permute.xlu0 %349  ;;  %274 = vst.msk [vmem:[#allocation4 + $0x28] sm:$0xff] %vm238_vm5, %v270_v55  ;;  %663 = vmatpush3.bf16.msra.mxu0 %v378_v56  ;;  %v388_v58 = vld [vmem:[#allocation4 + $0x68] sm:$0xff] }
  0xa1   : > { %354 = vst.msk [vmem:[#allocation4 + $0x78] sm:$0xff] %vm238_vm5, %v350_v57  ;;  %664 = vmatprep.subr.bf16.mxu0 %v387_v54 }
  0xa3   : > { %v280_v59 = vpop.permute.xlu1 %279  ;;  %v379_v60 = vld [vmem:[#allocation4 + $0x20] sm:$0xff] }
  0xa4   : > { %v360_v61 = vpop.permute.xlu0 %359  ;;  %285 = vst.msk [vmem:[#allocation4 + $0x30] sm:$0xff] %vm238_vm5, %v280_v59  ;;  %665 = vmatpush3.bf16.msra.mxu0 %v379_v60  ;;  %v389_v62 = vld [vmem:[#allocation4 + $0x70] sm:$0xff] }
  0xa5   : > { %365 = vst.msk [vmem:[#allocation4 + $0x80] sm:$0xff] %vm238_vm5, %v360_v61  ;;  %666 = vmatprep.subr.bf16.mxu0 %v388_v58 }
  0xa7   : > { %v282_v63 = vpop.permute.xlu1 %281  ;;  %v380_v0 = vld [vmem:[#allocation4 + $0x28] sm:$0xff] }
  0xa8   : > { %286 = vst.msk [vmem:[#allocation4 + $0x38] sm:$0xff] %vm238_vm5, %v282_v63  ;;  %667 = vmatpush3.bf16.msra.mxu0 %v380_v0  ;;  %v390_v1 = vld [vmem:[#allocation4 + $0x78] sm:$0xff] }
  0xa9   : > { %668 = vmatprep.subr.bf16.mxu0 %v389_v62 }
  0xab   : > { %v362_v2 = vpop.permute.xlu1 %361  ;;  %v381_v3 = vld [vmem:[#allocation4 + $0x30] sm:$0xff] }
  0xac   : > { %v391_v4 = vld [vmem:[#allocation4 + $0x80] sm:$0xff]  ;;  %366 = vst.msk [vmem:[#allocation4 + $0x88] sm:$0xff] %vm238_vm5, %v362_v2  ;;  %669 = vmatpush3.bf16.msra.mxu0 %v381_v3 }
  0xad   : > { %688 = vmatprep.subr.bf16.mxu1 %v391_v4  ;;  %670 = vmatprep.subr.bf16.mxu0 %v390_v1 }
  0xae   : > { %689 = vmatpush3.bf16.msra.mxu1 %v391_v4 }
  0xaf   : > { %v382_v5 = vld [vmem:[#allocation4 + $0x38] sm:$0xff] }
  0xb0   : > { %671 = vmatpush3.bf16.msra.mxu0 %v382_v5 }
  0xb3   : > { %487 = vmatmul.mubr.bf16.vlgmr.msra.gmra.mrb[0].mxu0 %v721_v6  ;;  %v392_v8 = vld [vmem:[#allocation4 + $0x88] sm:$0xff] }
  0xb4   : > { %690 = vmatprep.subr.bf16.mxu1 %v392_v8  ;;  %494 = vmatprep.mubr.bf16.mxu0 %v726_v7 }
  0xb5   : > { %691 = vmatpush3.bf16.msra.mxu1 %v392_v8  ;;  %v410_v12 = vpop.permute.xlu0 %409 }
  0xb8   : > { %693 = vmatmul.mubr.msk.bf16.vlgmr.msra.gmra.mrb[0].mxu1 %vm447_vm6, %v725_v9 }
  0xb9   : > { %v405_v19 = vpop.permute.xlu0 %404 }
  0xbb   : > { %495 = vmatmul.mubr.bf16.gmra.mrb[4].mxu0 %v728_v10 }
  0xbc   : > { %v415_v11 = vpop.permute.xlu1 %414 }
  0xc0   : > { %v400_v15 = vpop.permute.xlu1 %399 }
 0x186   : > { %v672_v13 = vpop.f32.mrb[0].mxu0 }
 0x187   : > { %v673_v14 = vpop.f32.mrb[1].mxu0 }
 0x188   : > { %v674_v16 = vadd.f32 %v673_v14, %v672_v13  ;;  %v675_v17 = vpop.f32.mrb[2].mxu0 }
 0x189   : > { %v676_v18 = vpop.f32.mrb[3].mxu0 }
 0x18a   : > { %v489_v20 = vadd.f32 %v674_v16, %v400_v15  ;;  %v677_v21 = vadd.f32 %v676_v18, %v675_v17 }
 0x18b   : > { %v694_v22 = vpop.f32.mrb[0].mxu1 }
 0x18c   : > { %v492_v23 = vadd.f32 %v677_v21, %v405_v19  ;;  %v537_v24 = vpop.f32.mrb[1].mxu1 }
 0x18d   : > { %v538_v25 = vadd.f32 %v537_v24, %v489_v20  ;;  %v695_v26 = vpop.f32.mrb[2].mxu1 }
 0x18e   : > { %v678_v27 = vpop.f32.mrb[4].mxu0  ;;  %v540_v28 = vpop.f32.mrb[3].mxu1 }
 0x18f   : > { %v541_v29 = vadd.f32 %v540_v28, %v492_v23  ;;  %v679_v30 = vpop.f32.mrb[5].mxu0 }
 0x190   : > { %v680_v31 = vadd.f32 %v679_v30, %v678_v27  ;;  %v681_v32 = vpop.f32.mrb[6].mxu0 }
 0x191   : > { %v682_v33 = vpop.f32.mrb[7].mxu0 }
 0x192   : > { %v497_v34 = vadd.f32 %v680_v31, %v410_v12  ;;  %v683_v35 = vadd.f32 %v682_v33, %v681_v32 }
 0x194   : > { %v546_v36 = vadd.f32 %v694_v22, %v497_v34  ;;  %v500_v37 = vadd.f32 %v683_v35, %v415_v11 }
 0x196   : > { %v650_v38 = vmul.f32 -1.442695, %v546_v36  ;;  %v549_v39 = vadd.f32 %v695_v26, %v500_v37 }
 0x198   : > { %729 = vpow2.f32 %v650_v38  ;;  %v651_v40 = vmul.f32 -1.442695, %v549_v39 }
 0x19a   : > { %731 = vpow2.f32 %v651_v40 }
 0x1a2   : > { %v730_v41 = vpop.eup %729 }
 0x1a3   : > { %v558_v42 = vadd.f32 1.0, %v730_v41 }
 0x1a4   : > { %v732_v43 = vpop.eup %731 }
 0x1a5   : > { %733 = vrcp.f32 %v558_v42  ;;  %v559_v44 = vadd.f32 1.0, %v732_v43 }
 0x1a7   : > { %735 = vrcp.f32 %v559_v44 }
 0x1af   : > { %v734_v45 = vpop.eup %733 }
 0x1b0   : > { %v564_v46 = vmul.f32 %v734_v45, %v538_v25 }
 0x1b1   : > { %v736_v47 = vpop.eup %735 }
 0x1b2   : > { %566 = vst.msk [vmem:[%s170_s24] sm:$0xff] %vm238_vm5, %v564_v46  ;;  %v565_v48 = vmul.f32 %v736_v47, %v541_v29 }
 0x1b4   : > { %567 = vst.msk [vmem:[%s170_s24 + $0x8] sm:$0xff] %vm238_vm5, %v565_v48 }
 0x1b5 PF: > { %s13_s12 = sadd.s32 1, %s743_s12  }
 0x1b6   : > { %p10_p4 = scmp.ge.s32.totalorder %s13_s12, 4  }
 0x1b8   :  { %12 = sbr.rel (!%p10_p4) target bundleno = 1 (0x1), region = 62 }

// kernel: init_stage_g.7
= control target key start
LH: loop header
LB: loop body
LE: loop exit
PB: predicated region body
PF: predicated region fallthrough
CT: control target
= control target key end

     0   :  { %s740_s12 = smov 0   ;;  %s825_s0 = inlined_call_operand.vmem [shape: bf16[2,16,290], index: 0, kind: input, shape index: {}]   ;;  %s826_s1 = inlined_call_operand.vmem [shape: bf16[16,144], index: 1, kind: input, shape index: {}]   ;;  %s827_s2 = inlined_call_operand.vmem [shape: f32[16,1], index: 2, kind: input, shape index: {}]   ;;  %s828_s3 = inlined_call_operand.vmem [shape: f32[2,8,256], index: 3, kind: output, shape index: {}]  }
   0x1 LB: > { %s636_s13 = sadd.s32 4294967295, %s709_s12   ;;  %p640_p0 = scmp.ge.s32.totalorder %s709_s12, 1  ;;  %s709_s12 = sphi %s740_s12, %s13_s12  }
   0x2   : > { %p137_p1 = scmp.lt.s32.totalorder %s709_s12, 3 }
   0x4   : > { %p138_p2 = pnand %p640_p0, %p137_p1 }
   0x5   : > { %p161_p3 = scmp.lt.s32.totalorder (!%p138_p2), %s636_s13, 1  ;;  %v176_v0 = vlaneseq (!%p138_p2)  ;;  %s711_s18 = smov (!%p138_p2), 127   ;;  %vm252_vm7 = vcmask (!%p138_p2), 277504   ;;  %v694_v40 = vld [vmem:[%s826_s1 + $0x4] ss:$8 sps:$4 sm:$0xff] (!%p138_p2)   ;;  %vm518_vm11 = vcmask (!%p138_p2), 130048  }
   0x6   : > { %141 = sbr.rel (%p138_p2) target bundleno = 430 (0x1ae), region = 32  ;;  %s712_s19 = smov (!%p138_p2), 111   ;;  %661 = vmatprep.mubr.msk.bf16.mxu0 (!%p138_p2), %vm518_vm11, %v694_v40  ;;  %v719_v41 = vmov (!%p138_p2), 0   ;;  %v497_v42 = vld [vmem:[%s827_s2] sm:$0xff] (!%p138_p2)  ;;  %v498_v43 = vld [vmem:[%s827_s2 + $0x8] sm:$0xff] (!%p138_p2)  ;;  %vm315_vm12 = vcmask (!%p138_p2), 1039360  }
   0x7   : > { %v177_v1 = vand.u32 (!%p138_p2), 127, %v176_v0  ;;  %s713_s20 = smov (!%p138_p2), 126   ;;  %s714_s21 = smov (!%p138_p2), 112   ;;  %685 = vset.pattern.permute.xlu0 (!%p138_p2), %v719_v41  ;;  %686 = vset.pattern.permute.xlu1 (!%p138_p2), %v719_v41  ;;  %vm334_vm13 = vcmask (!%p138_p2), 1031168   ;;  %vm353_vm14 = vcmask (!%p138_p2), 916480   ;;  %vm383_vm15 = vcmask (!%p138_p2), 908288  }
   0x8   : > { %s715_s22 = smov (!%p138_p2), 110   ;;  %s716_s23 = smov (!%p138_p2), 96   ;;  %v692_v20 = vld [vmem:[%s826_s1] ss:$8 sps:$4 sm:$0xff] (!%p138_p2)  }
   0x9   : > { %v179_v2 = vadd.s32 (!%p138_p2), 256, %v177_v1  ;;  %v178_v3 = vadd.s32 (!%p138_p2), 128, %v177_v1  ;;  %v180_v4 = vadd.s32 (!%p138_p2), 15, %v177_v1  ;;  %s717_s24 = smov (!%p138_p2), 95   ;;  %s718_s27 = smov (!%p138_p2), 94  }
   0xb   : > { %v182_v5 = vadd.s32 (!%p138_p2), 15, %v179_v2  ;;  %v181_v6 = vadd.s32 (!%p138_p2), 15, %v178_v3  ;;  %v187_v9 = vand.u32 (!%p138_p2), 15, %v180_v4 }
   0xd   : > { %s840_s13 = smov (!%p161_p3, %s636_s13), 1  ;;  %v201_v15 = vand.u32 15, %v182_v5  ;;  %v194_v16 = vand.u32 15, %v181_v6  ;;  %vm767_vm0 = vcmp.ne.s32.totalorder %v187_v9, 0  ;;  %vm775_vm3 = vcmp.ne.s32.totalorder %v187_v9, 15 }
   0xe   : > { %s667_s14 = smul.u32 24, %s840_s13  ;;  %s666_s7 = sshll.u32 %s840_s13, 4 }
   0xf   : > { %vm256_vm1 = vcmp.ne.s32.totalorder %v201_v15, 0  ;;  %vm771_vm2 = vcmp.ne.s32.totalorder %v194_v16, 0  ;;  %vm779_vm4 = vcmp.ne.s32.totalorder %v194_v16, 15  ;;  %vm783_vm6 = vcmp.ne.s32.totalorder %v201_v15, 15  ;;  %s170_s10 = scalar_lea.vmem %s828_s3, %s666_s7 }
  0x10   : > { %s754_s17 = scalar_lea.vmem %s825_s0, %s667_s14  ;;  %vm264_vm5 = vmpackc.low %vm256_vm1, %vm256_vm1  ;;  %vm421_vm1 = vcmask 785408  }
  0x11   : > { %v292_v7 = vld [vmem:[%s754_s17] sm:$0xff]  ;;  %v294_v8 = vld [vmem:[%s754_s17 + $0xc] sm:$0xff]  ;;  %v689_v12 = vld [vmem:[%s754_s17 + $0x8] ss:$12 sps:$4 sm:$0xff]  }
  0x12   : > { %v758_v10 = vcombine.high %v292_v7, %v294_v8  ;;  %v760_v11 = vcombine.low %v292_v7, %v294_v8  ;;  %v173_v13 = vld [vmem:[%s754_s17 + $0x8] sm:$0xf]  ;;  %v175_v14 = vld [vmem:[%s754_s17 + $0x14] sm:$0xf]  ;;  %vm263_vm8 = vmpackc.low %vm771_vm2, %vm767_vm0  ;;  %vm402_vm0 = vcmask 900096   ;;  %vm451_vm2 = vcmask 777216  }
  0x13   : > { %v690_v22 = vld [vmem:[%s754_s17 + $0x8] ss:$12 sps:$4 sm:$0xff]   ;;  %v266_v23 = vsel %vm264_vm5, %v173_v13, 0  ;;  %v268_v24 = vsel %vm264_vm5, %v175_v14, 0  ;;  %v265_v26 = vsel %vm263_vm8, %v292_v7, 0  ;;  %v267_v27 = vsel %vm263_vm8, %v294_v8, 0  ;;  %vm228_vm9 = vmpackc.low %vm779_vm4, %vm775_vm3 }
  0x14   : > { %311 = vrot.lane.b32.xlu0 %v758_v10, %s711_s18  ;;  %309 = vrot.lane.b32.xlu1 %v760_v11, %s711_s18  ;;  %v649_v25 = vcombine.low %v266_v23, %v268_v24  ;;  %v648_v28 = vcombine.high %v265_v26, %v267_v27  ;;  %v647_v29 = vcombine.low %v265_v26, %v267_v27  ;;  %v230_v30 = vsel %vm228_vm9, %v292_v7, 0  ;;  %vm229_vm10 = vmpackc.low %vm783_vm6, %vm783_vm6  ;;  %v691_v39 = vld [vmem:[%s754_s17 + $0x8] ss:$12 sps:$4 sm:$0xff]  }
  0x15   : > { %v232_v31 = vsel %vm228_vm9, %v294_v8, 0  ;;  %v231_v33 = vsel %vm229_vm10, %v173_v13, 0  ;;  %v233_v34 = vsel %vm229_vm10, %v175_v14, 0  ;;  %vm470_vm3 = vcmask 769024  }
  0x16   : > { %287 = vst.msk [vmem:[#allocation3 + $0x10] sm:$0xff] %vm252_vm7, %v649_v25  ;;  %v645_v32 = vcombine.high %v230_v30, %v232_v31  ;;  %v644_v35 = vcombine.low %v230_v30, %v232_v31  ;;  %v646_v36 = vcombine.low %v231_v33, %v233_v34 }
  0x18   : > { %313 = vrot.lane.b32.xlu0 %v689_v12, %s711_s18  ;;  %379 = vrot.lane.b32.xlu1 %v758_v10, %s712_s19  ;;  %253 = vst.msk [vmem:[#allocation2 + $0x10] sm:$0xff] %vm252_vm7, %v646_v36 }
  0x19   : > { %522 = vmatprep.subr.bf16.mxu0 %v645_v32 }
  0x1a   : > { %523 = vmatpush1.bf16.msra.mxu0 %v644_v35 }
  0x1c   : > { %381 = vrot.lane.b32.xlu0 %v690_v22, %s712_s19  ;;  %377 = vrot.lane.b32.xlu1 %v760_v11, %s712_s19 }
  0x1d   : > { %v324_v37 = vld [vmem:[#allocation3 + $0x10] sm:$0xff] }
  0x1f   : > { %v343_v38 = vld [vmem:[#allocation2 + $0x10] sm:$0xff] }
  0x20   : > { %330 = vrot.lane.b32.xlu1 %v648_v28, %s713_s20  ;;  %332 = vrot.lane.b32.xlu0 %v324_v37, %s713_s20 }
  0x24   : > { %328 = vrot.lane.b32.xlu1 %v647_v29, %s713_s20  ;;  %349 = vrot.lane.b32.xlu0 %v645_v32, %s714_s21 }
  0x28   : > { %351 = vrot.lane.b32.xlu1 %v343_v38, %s714_s21  ;;  %347 = vrot.lane.b32.xlu0 %v644_v35, %s714_s21 }
  0x2c   : > { %400 = vrot.lane.b32.xlu1 %v324_v37, %s715_s22  ;;  %398 = vrot.lane.b32.xlu0 %v648_v28, %s715_s22 }
  0x30   : > { %417 = vrot.lane.b32.xlu1 %v645_v32, %s716_s23  ;;  %396 = vrot.lane.b32.xlu0 %v647_v29, %s715_s22 }
  0x34   : > { %415 = vrot.lane.b32.xlu1 %v644_v35, %s716_s23  ;;  %419 = vrot.lane.b32.xlu0 %v343_v38, %s716_s23 }
  0x38   : > { %449 = vrot.lane.b32.xlu1 %v691_v39, %s717_s24  ;;  %447 = vrot.lane.b32.xlu0 %v758_v10, %s717_s24 }
  0x3c   : > { %466 = vrot.lane.b32.xlu1 %v648_v28, %s718_s27  ;;  %445 = vrot.lane.b32.xlu0 %v760_v11, %s717_s24 }
  0x40   : > { %464 = vrot.lane.b32.xlu1 %v647_v29, %s718_s27  ;;  %468 = vrot.lane.b32.xlu0 %v324_v37, %s718_s27 }
  0x44   : > { %501 = vperm.xlu1 %686, %v497_v42   ;;  %506 = vperm.xlu0 %685, %v498_v43  }
  0x86   : > { %v312_v44 = vpop.permute.xlu0 %311  ;;  %v310_v45 = vpop.permute.xlu1 %309 }
  0x87   : > { %v316_v49 = vsel %vm315_vm12, %v310_v45, %v312_v44 }
  0x8a   : > { %v314_v46 = vpop.permute.xlu0 %313  ;;  %v380_v47 = vpop.permute.xlu1 %379 }
  0x8b   : > { %v317_v48 = vsel %vm315_vm12, %v312_v44, %v314_v46 }
  0x8c   : > { %524 = vmatprep.subr.bf16.mxu0 %v317_v48 }
  0x8d   : > { %525 = vmatpush1.bf16.msra.mxu0 %v316_v49 }
  0x8e   : > { %v378_v50 = vpop.permute.xlu1 %377  ;;  %v382_v51 = vpop.permute.xlu0 %381 }
  0x8f   : > { %v385_v63 = vsel %vm383_vm15, %v380_v47, %v382_v51  ;;  %v384_v1 = vsel %vm383_vm15, %v378_v50, %v380_v47 }
  0x92   : > { %v331_v52 = vpop.permute.xlu1 %330  ;;  %v333_v53 = vpop.permute.xlu0 %332 }
  0x93   : > { %v336_v54 = vsel %vm334_vm13, %v331_v52, %v333_v53 }
  0x94   : > { %526 = vmatprep.subr.bf16.mxu0 %v336_v54 }
  0x96   : > { %v329_v55 = vpop.permute.xlu1 %328  ;;  %v350_v57 = vpop.permute.xlu0 %349 }
  0x97   : > { %v335_v56 = vsel %vm334_vm13, %v329_v55, %v331_v52 }
  0x98   : > { %527 = vmatpush1.bf16.msra.mxu0 %v335_v56 }
  0x9a   : > { %v352_v58 = vpop.permute.xlu1 %351  ;;  %v348_v60 = vpop.permute.xlu0 %347 }
  0x9b   : > { %v355_v59 = vsel %vm353_vm14, %v350_v57, %v352_v58  ;;  %v354_v61 = vsel %vm353_vm14, %v348_v60, %v350_v57 }
  0x9c   : > { %528 = vmatprep.subr.bf16.mxu0 %v355_v59 }
  0x9d   : > { %529 = vmatpush1.bf16.msra.mxu0 %v354_v61 }
  0x9e   : > { %v401_v62 = vpop.permute.xlu1 %400  ;;  %530 = vmatprep.subr.bf16.mxu0 %v385_v63  ;;  %v399_v0 = vpop.permute.xlu0 %398 }
  0x9f   : > { %v404_v3 = vsel %vm402_vm0, %v399_v0, %v401_v62 }
  0xa1   : > { %531 = vmatpush1.bf16.msra.mxu0 %v384_v1 }
  0xa2   : > { %v418_v2 = vpop.permute.xlu1 %417  ;;  %532 = vmatprep.subr.bf16.mxu0 %v404_v3  ;;  %v397_v4 = vpop.permute.xlu0 %396 }
  0xa3   : > { %v403_v5 = vsel %vm402_vm0, %v397_v4, %v399_v0 }
  0xa5   : > { %533 = vmatpush1.bf16.msra.mxu0 %v403_v5 }
  0xa6   : > { %v416_v6 = vpop.permute.xlu1 %415  ;;  %v420_v7 = vpop.permute.xlu0 %419 }
  0xa7   : > { %v423_v8 = vsel %vm421_vm1, %v418_v2, %v420_v7  ;;  %v422_v10 = vsel %vm421_vm1, %v416_v6, %v418_v2 }
  0xa8   : > { %534 = vmatprep.subr.bf16.mxu0 %v423_v8 }
  0xa9   : > { %535 = vmatpush1.bf16.msra.mxu0 %v422_v10 }
  0xaa   : > { %v450_v9 = vpop.permute.xlu1 %449  ;;  %v448_v11 = vpop.permute.xlu0 %447 }
  0xab   : > { %v453_v12 = vsel %vm451_vm2, %v448_v11, %v450_v9 }
  0xac   : > { %536 = vmatprep.subr.bf16.mxu0 %v453_v12 }
  0xae   : > { %v467_v13 = vpop.permute.xlu1 %466  ;;  %v446_v14 = vpop.permute.xlu0 %445 }
  0xaf   : > { %v452_v15 = vsel %vm451_vm2, %v446_v14, %v448_v11 }
  0xb0   : > { %537 = vmatpush1.bf16.msra.mxu0 %v452_v15 }
  0xb2   : > { %v465_v16 = vpop.permute.xlu1 %464  ;;  %v469_v17 = vpop.permute.xlu0 %468 }
  0xb3   : > { %v472_v18 = vsel %vm470_vm3, %v467_v13, %v469_v17  ;;  %v471_v19 = vsel %vm470_vm3, %v465_v16, %v467_v13 }
  0xb4   : > { %538 = vmatprep.subr.bf16.mxu0 %v472_v18 }
  0xb5   : > { %539 = vmatpush1.bf16.msra.mxu0 %v471_v19 }
  0xb8   : > { %555 = vmatmul.mubr.bf16.vlgmr.msra.gmra.mrb[0].mxu0 %v692_v20 }
  0xc3   : > { %v507_v22 = vpop.permute.xlu0 %506  ;;  %v502_v34 = vpop.permute.xlu1 %501 }
 0x18b   : > { %v556_v21 = vpop.f32.mrb[0].mxu0 }
 0x18c   : > { %v558_v23 = vpop.f32.mrb[1].mxu0  ;;  %v557_v35 = vadd.f32 %v556_v21, %v502_v34 }
 0x18d   : > { %v560_v24 = vpop.f32.mrb[2].mxu0  ;;  %v559_v37 = vadd.f32 %v558_v23, %v502_v34 }
 0x18e   : > { %v561_v25 = vadd.f32 %v560_v24, %v507_v22  ;;  %v562_v26 = vpop.f32.mrb[3].mxu0 }
 0x18f   : > { %v563_v27 = vadd.f32 %v562_v26, %v507_v22 }
 0x190   : > { %v662_v28 = vmul.f32 -1.442695, %v561_v25 }
 0x191   : > { %v663_v29 = vmul.f32 -1.442695, %v563_v27 }
 0x192   : > { %695 = vpow2.f32 %v662_v28 }
 0x193   : > { %697 = vpow2.f32 %v663_v29 }
 0x19c   : > { %v696_v30 = vpop.eup %695 }
 0x19d   : > { %v698_v31 = vpop.eup %697  ;;  %v571_v32 = vadd.f32 1.0, %v696_v30 }
 0x19e   : > { %v572_v33 = vadd.f32 1.0, %v698_v31 }
 0x19f   : > { %699 = vrcp.f32 %v571_v32 }
 0x1a0   : > { %701 = vrcp.f32 %v572_v33 }
 0x1a9   : > { %v700_v36 = vpop.eup %699 }
 0x1aa   : > { %v702_v38 = vpop.eup %701  ;;  %v577_v39 = vmul.f32 %v700_v36, %v557_v35 }
 0x1ab   : > { %v578_v40 = vmul.f32 %v702_v38, %v559_v37 }
 0x1ac   : > { %579 = vst [vmem:[%s170_s10] sm:$0xff] %v577_v39 }
 0x1ad   : > { %580 = vst [vmem:[%s170_s10 + $0x8] sm:$0xff] %v578_v40 }
 0x1ae PF: > { %s13_s12 = sadd.s32 1, %s709_s12  }
 0x1af   : > { %p10_p4 = scmp.ge.s32.totalorder %s13_s12, 4  }
 0x1b1   :  { %12 = sbr.rel (!%p10_p4) target bundleno = 1 (0x1), region = 62 }

// kernel: init_stage_g.8
= control target key start
LH: loop header
LB: loop body
LE: loop exit
PB: predicated region body
PF: predicated region fallthrough
CT: control target
= control target key end

     0   :  { %s1674_s12 = smov 0   ;;  %s2115_s0 = inlined_call_operand.vmem [shape: bf16[2,16,1090], index: 0, kind: input, shape index: {}]   ;;  %s2116_s1 = inlined_call_operand.vmem [shape: bf16[8,144], index: 1, kind: input, shape index: {}]   ;;  %s2117_s2 = inlined_call_operand.vmem [shape: f32[8,1], index: 2, kind: input, shape index: {}]   ;;  %s2118_s3 = inlined_call_operand.vmem [shape: f32[2,4,1024], index: 3, kind: output, shape index: {}]  }
   0x1 LB: > { %s1503_s13 = sadd.s32 4294967295, %s1643_s12   ;;  %p1507_p0 = scmp.ge.s32.totalorder %s1643_s12, 1  ;;  %s1643_s12 = sphi %s1674_s12, %s13_s12  }
   0x2   : > { %p137_p1 = scmp.lt.s32.totalorder %s1643_s12, 3 }
   0x4   : > { %p138_p2 = pnand %p1507_p0, %p137_p1 }
   0x5   : > { %p161_p3 = scmp.lt.s32.totalorder (!%p138_p2), %s1503_s13, 1  ;;  %v182_v0 = vlaneseq (!%p138_p2)  ;;  %s1645_s18 = smov (!%p138_p2), 127   ;;  %v1892_v31 = vld [vmem:[%s2116_s1] sm:$0xff] (!%p138_p2) }
   0x6   : > { %141 = sbr.rel (%p138_p2) target bundleno = 530 (0x212), region = 32  ;;  %s1646_s19 = smov (!%p138_p2), 126  }
   0x7   : > { %v1684_v1 = vand.u32 (!%p138_p2), 127, %v182_v0  ;;  %s1647_s20 = smov (!%p138_p2), 96   ;;  %s1648_s21 = smov (!%p138_p2), 95  }
   0x8   : > { %s1649_s22 = smov (!%p138_p2), 94   ;;  %s1650_s23 = smov (!%p138_p2), 64  }
   0x9   : > { %v185_v2 = vadd.s32 (!%p138_p2), 256, %v1684_v1  ;;  %v186_v3 = vadd.s32 (!%p138_p2), 384, %v1684_v1  ;;  %v184_v4 = vadd.s32 (!%p138_p2), 128, %v1684_v1  ;;  %v192_v5 = vadd.s32 (!%p138_p2), 31, %v1684_v1  ;;  %s1651_s24 = smov (!%p138_p2), 63   ;;  %s1652_s27 = smov (!%p138_p2), 62  }
   0xa   : > { %v187_v6 = vadd.s32 (!%p138_p2), 512, %v1684_v1  ;;  %v188_v7 = vadd.s32 (!%p138_p2), 640, %v1684_v1  ;;  %v189_v8 = vadd.s32 (!%p138_p2), 768, %v1684_v1  ;;  %v1695_v9 = vadd.s32 (!%p138_p2), 896, %v1684_v1 }
   0xb   : > { %v194_v10 = vadd.s32 (!%p138_p2), 31, %v185_v2  ;;  %v195_v11 = vadd.s32 (!%p138_p2), 31, %v186_v3  ;;  %v193_v12 = vadd.s32 (!%p138_p2), 31, %v184_v4  ;;  %v205_v13 = vand.u32 (!%p138_p2), 31, %v192_v5 }
   0xc   : > { %v196_v17 = vadd.s32 (!%p138_p2), 31, %v187_v6  ;;  %v197_v18 = vadd.s32 (!%p138_p2), 31, %v188_v7  ;;  %v1705_v19 = vadd.s32 (!%p138_p2), 31, %v189_v8  ;;  %v199_v2 = vadd.s32 (!%p138_p2), 31, %v1695_v9 }
   0xd   : > { %s2134_s13 = smov (!%p161_p3, %s1503_s13), 1  ;;  %v219_v25 = vand.u32 31, %v194_v10  ;;  %v226_v26 = vand.u32 31, %v195_v11  ;;  %v212_v30 = vand.u32 31, %v193_v12  ;;  %vm1722_vm2 = vcmp.ne.s32.totalorder %v205_v13, 0 }
   0xe   : > { %s1573_s14 = smul.u32 72, %s2134_s13  ;;  %v233_v32 = vand.u32 31, %v196_v17  ;;  %v240_v33 = vand.u32 31, %v197_v18  ;;  %vm1728_vm5 = vcmp.ne.s32.totalorder %v205_v13, 31  ;;  %v247_v3 = vand.u32 31, %v1705_v19  ;;  %s1572_s30 = sshll.u32 %s2134_s13, 5 }
   0xf   : > { %vm409_vm0 = vcmp.ne.s32.totalorder %v219_v25, 0  ;;  %vm410_vm1 = vcmp.ne.s32.totalorder %v226_v26, 0  ;;  %vm408_vm4 = vcmp.ne.s32.totalorder %v212_v30, 0  ;;  %vm1732_vm6 = vcmp.ne.s32.totalorder %v212_v30, 31  ;;  %s2102_s6 = scalar_lea.vmem %s2118_s3, %s1572_s30 }
  0x10   : > { %s1700_s17 = scalar_lea.vmem %s2115_s0, %s1573_s14  ;;  %vm435_vm3 = vmpackc.low %vm410_vm1, %vm409_vm0  ;;  %vm1738_vm8 = vcmp.ne.s32.totalorder %v233_v32, 0  ;;  %vm1742_vm9 = vcmp.ne.s32.totalorder %v219_v25, 31  ;;  %vm412_vm10 = vcmp.ne.s32.totalorder %v240_v33, 0  ;;  %vm312_vm13 = vcmp.ne.s32.totalorder %v226_v26, 31 }
  0x11   : > { %v521_v14 = vld [vmem:[%s1700_s17 + $0x8] sm:$0xff]  ;;  %v520_v16 = vld [vmem:[%s1700_s17] sm:$0xff]  ;;  %v522_v23 = vld [vmem:[%s1700_s17 + $0x10] sm:$0xff]  ;;  %vm313_vm15 = vcmp.ne.s32.totalorder %v233_v32, 31  ;;  %vm314_vm0 = vcmp.ne.s32.totalorder %v240_v33, 31  ;;  %v191_v4 = vadd.s32 1024, %v1684_v1  ;;  %v1896_v32 = vcombine.high %v1892_v31, %v1892_v31 }
  0x12   : > { %v526_v15 = vld [vmem:[%s1700_s17 + $0x2c] sm:$0xff]  ;;  %v525_v22 = vld [vmem:[%s1700_s17 + $0x24] sm:$0xff]  ;;  %v527_v24 = vld [vmem:[%s1700_s17 + $0x34] sm:$0xff]  ;;  %v440_v36 = vsel %vm435_vm3, %v521_v14, 0  ;;  %v254_v6 = vand.u32 31, %v199_v2 }
  0x13   : > { %v1707_v20 = vcombine.high %v521_v14, %v526_v15  ;;  %v1709_v21 = vcombine.low %v521_v14, %v526_v15  ;;  %v1714_v27 = vcombine.high %v520_v16, %v525_v22  ;;  %v1716_v28 = vcombine.low %v520_v16, %v525_v22  ;;  %vm434_vm7 = vmpackc.low %vm408_vm4, %vm1722_vm2  ;;  %v1781_v60 = vld [vmem:[%s1700_s17 + $0x18] sm:$0xff]  ;;  %v176_v10 = vld [vmem:[%s1700_s17 + $0x20] sm:$0xf] }
  0x14   : > { %v1718_v29 = vcombine.low %v522_v23, %v527_v24  ;;  %v445_v37 = vsel %vm435_vm3, %v526_v15, 0  ;;  %v439_v41 = vsel %vm434_vm7, %v520_v16, 0  ;;  %v444_v42 = vsel %vm434_vm7, %v525_v22, 0  ;;  %vm336_vm11 = vmpackc.low %vm1732_vm6, %vm1728_vm5  ;;  %v1784_v61 = vld [vmem:[%s1700_s17 + $0x3c] sm:$0xff]  ;;  %v181_v11 = vld [vmem:[%s1700_s17 + $0x44] sm:$0xf] }
  0x15   : > { %573 = vrot.lane.b32.xlu1 %v1707_v20, %s1645_s18  ;;  %569 = vrot.lane.b32.xlu0 %v1714_v27, %s1645_s18  ;;  %v1746_v40 = vcombine.low %v440_v36, %v445_v37  ;;  %v1754_v43 = vcombine.high %v439_v41, %v444_v42  ;;  %vm436_vm12 = vmpackc.low %vm412_vm10, %vm1738_vm8  ;;  %v1758_v44 = vcombine.high %v440_v36, %v445_v37  ;;  %v341_v46 = vsel %vm336_vm11, %v520_v16, 0 }
  0x16   : > { %v1760_v45 = vcombine.low %v439_v41, %v444_v42  ;;  %v441_v47 = vsel %vm436_vm12, %v522_v23, 0  ;;  %v446_v48 = vsel %vm436_vm12, %v527_v24, 0  ;;  %v346_v49 = vsel %vm336_vm11, %v525_v22, 0  ;;  %vm337_vm14 = vmpackc.low %vm312_vm13, %vm1742_vm9 }
  0x17   : > { %v1764_v50 = vcombine.low %v441_v47, %v446_v48  ;;  %v1766_v51 = vcombine.high %v341_v46, %v346_v49  ;;  %v342_v52 = vsel %vm337_vm14, %v521_v14, 0  ;;  %v347_v53 = vsel %vm337_vm14, %v526_v15, 0  ;;  %vm338_vm1 = vmpackc.low %vm314_vm0, %vm313_vm15 }
  0x18   : > { %v1770_v54 = vcombine.low %v341_v46, %v346_v49  ;;  %v1772_v55 = vcombine.high %v522_v23, %v527_v24  ;;  %v1776_v56 = vcombine.low %v342_v52, %v347_v53  ;;  %v1778_v57 = vcombine.high %v342_v52, %v347_v53  ;;  %v1602_v46 = vld [vmem:[%s1700_s17 + $0x20] ss:$36 sps:$4 sm:$0xff]  }
  0x19   : > { %575 = vrot.lane.b32.xlu1 %v1718_v29, %s1645_s18  ;;  %571 = vrot.lane.b32.xlu0 %v1709_v21, %s1645_s18  ;;  %v343_v58 = vsel %vm338_vm1, %v522_v23, 0  ;;  %v348_v59 = vsel %vm338_vm1, %v527_v24, 0  ;;  %v1793_v63 = vcombine.high %v1781_v60, %v1784_v61  ;;  %v1795_v0 = vcombine.high %v441_v47, %v446_v48 }
  0x1a   : > { %1184 = vmatprep.subr.bf16.mxu0 %v1766_v51  ;;  %v1789_v62 = vcombine.low %v343_v58, %v348_v59  ;;  %v1800_v5 = vcombine.high %v343_v58, %v348_v59  ;;  %1225 = vmatprep.subr.bf16.mxu1 %v1778_v57  ;;  %vm413_vm2 = vcmp.ne.s32.totalorder %v247_v3, 0  ;;  %v200_v7 = vadd.s32 31, %v191_v4 }
  0x1b   : > { %1185 = vmatpush1.bf16.msra.mxu0 %v1770_v54  ;;  %1226 = vmatpush1.bf16.msra.mxu1 %v1776_v56  ;;  %vm1809_vm3 = vcmp.ne.s32.totalorder %v247_v3, 31  ;;  %vm414_vm4 = vcmp.ne.s32.totalorder %v254_v6, 0  ;;  %vm1813_vm5 = vcmp.ne.s32.totalorder %v254_v6, 31  ;;  %vm405_vm7 = vcmask 539648  }
  0x1c   : > { %v261_v8 = vand.u32 31, %v200_v7  ;;  %vm437_vm6 = vmpackc.low %vm414_vm4, %vm413_vm2  ;;  %vm1180_vm13 = vcmask 130048   ;;  %vm585_vm14 = vcmask 1039360   ;;  %vm646_vm15 = vcmask 1031168  }
  0x1d   : > { %630 = vrot.lane.b32.xlu1 %v1754_v43, %s1646_s19  ;;  %567 = vrot.lane.b32.xlu0 %v1716_v28, %s1645_s18  ;;  %v442_v12 = vsel %vm437_vm6, %v1781_v60, 0  ;;  %v447_v13 = vsel %vm437_vm6, %v1784_v61, 0  ;;  %vm339_vm9 = vmpackc.low %vm1813_vm5, %vm1809_vm3  ;;  %vm707_vm0 = vcmask 785408   ;;  %v1653_v53 = vmov 0  }
  0x1e   : > { %vm415_vm8 = vcmp.ne.s32.totalorder %v261_v8, 0  ;;  %vm317_vm10 = vcmp.ne.s32.totalorder %v261_v8, 31  ;;  %v1829_v14 = vcombine.low %v442_v12, %v447_v13  ;;  %v1831_v15 = vcombine.high %v442_v12, %v447_v13  ;;  %1558 = vmatprep.mubr.msk.bf16.mxu0 %vm1180_vm13, %v1896_v32  ;;  %1559 = vmatprep.mubr.msk.bf16.mxu1 %vm1180_vm13, %v1896_v32 }
  0x1f   : > { %vm438_vm11 = vmpackc.low %vm415_vm8, %vm415_vm8  ;;  %v344_v16 = vsel %vm339_vm9, %v1781_v60, 0  ;;  %v349_v17 = vsel %vm339_vm9, %v1784_v61, 0  ;;  %1591 = vset.pattern.permute.xlu0 %v1653_v53  ;;  %vm797_vm1 = vcmask 777216   ;;  %vm858_vm2 = vcmask 769024  }
  0x20   : > { %v443_v18 = vsel %vm438_vm11, %v176_v10, 0  ;;  %v448_v19 = vsel %vm438_vm11, %v181_v11, 0  ;;  %v1835_v22 = vcombine.low %v344_v16, %v349_v17  ;;  %v1837_v23 = vcombine.high %v344_v16, %v349_v17  ;;  %vm340_vm12 = vmpackc.low %vm317_vm10, %vm317_vm10 }
  0x21   : > { %634 = vrot.lane.b32.xlu1 %v1758_v44, %s1646_s19  ;;  %632 = vrot.lane.b32.xlu0 %v1746_v40, %s1646_s19  ;;  %v1528_v24 = vcombine.low %v443_v18, %v448_v19  ;;  %v345_v25 = vsel %vm340_vm12, %v176_v10, 0  ;;  %v350_v26 = vsel %vm340_vm12, %v181_v11, 0  ;;  %vm919_vm3 = vcmask 523264  }
  0x22   : > { %v1519_v30 = vcombine.low %v345_v25, %v350_v26  ;;  %vm1009_vm4 = vcmask 515072   ;;  %vm1070_vm5 = vcmask 506880  }
  0x23   : > { %503 = vst.msk [vmem:[#allocation3 + $0x40] sm:$0xff] %vm405_vm7, %v1528_v24 }
  0x24   : > { %406 = vst.msk [vmem:[#allocation2 + $0x40] sm:$0xff] %vm405_vm7, %v1519_v30 }
  0x25   : > { %628 = vrot.lane.b32.xlu1 %v1760_v45, %s1646_s19  ;;  %636 = vrot.lane.b32.xlu0 %v1764_v50, %s1646_s19 }
  0x29   : > { %693 = vrot.lane.b32.xlu1 %v1776_v56, %s1647_s20  ;;  %691 = vrot.lane.b32.xlu0 %v1766_v51, %s1647_s20 }
  0x2d   : > { %697 = vrot.lane.b32.xlu1 %v1789_v62, %s1647_s20  ;;  %695 = vrot.lane.b32.xlu0 %v1778_v57, %s1647_s20 }
  0x31   : > { %781 = vrot.lane.b32.xlu1 %v1714_v27, %s1648_s21  ;;  %689 = vrot.lane.b32.xlu0 %v1770_v54, %s1647_s20 }
  0x35   : > { %785 = vrot.lane.b32.xlu1 %v1707_v20, %s1648_s21  ;;  %783 = vrot.lane.b32.xlu0 %v1709_v21, %s1648_s21 }
  0x39   : > { %779 = vrot.lane.b32.xlu1 %v1716_v28, %s1648_s21  ;;  %787 = vrot.lane.b32.xlu0 %v1718_v29, %s1648_s21 }
  0x3d   : > { %844 = vrot.lane.b32.xlu1 %v1746_v40, %s1649_s22  ;;  %842 = vrot.lane.b32.xlu0 %v1754_v43, %s1649_s22 }
  0x41   : > { %848 = vrot.lane.b32.xlu1 %v1764_v50, %s1649_s22  ;;  %846 = vrot.lane.b32.xlu0 %v1758_v44, %s1649_s22 }
  0x45   : > { %903 = vrot.lane.b32.xlu1 %v1766_v51, %s1650_s23  ;;  %840 = vrot.lane.b32.xlu0 %v1760_v45, %s1649_s22 }
  0x49   : > { %907 = vrot.lane.b32.xlu1 %v1778_v57, %s1650_s23  ;;  %905 = vrot.lane.b32.xlu0 %v1776_v56, %s1650_s23 }
  0x4d   : > { %901 = vrot.lane.b32.xlu1 %v1770_v54, %s1650_s23  ;;  %909 = vrot.lane.b32.xlu0 %v1789_v62, %s1650_s23 }
  0x51   : > { %995 = vrot.lane.b32.xlu1 %v1709_v21, %s1651_s24  ;;  %993 = vrot.lane.b32.xlu0 %v1714_v27, %s1651_s24  ;;  %v1600_v21 = vld [vmem:[%s1700_s17 + $0x20] ss:$36 sps:$4 sm:$0xff]   ;;  %v1927_v27 = vld [vmem:[#allocation3 + $0x40] sm:$0xff] }
  0x55   : > { %999 = vrot.lane.b32.xlu1 %v1718_v29, %s1651_s24  ;;  %997 = vrot.lane.b32.xlu0 %v1707_v20, %s1651_s24  ;;  %v1535_v20 = vcombine.low %v1781_v60, %v1784_v61  ;;  %v1601_v29 = vld [vmem:[%s1700_s17 + $0x20] ss:$36 sps:$4 sm:$0xff]  }
  0x56   : > { %v1168_v61 = vld [vmem:[%s2117_s2] sm:$0xff] }
  0x59   : > { %1054 = vrot.lane.b32.xlu1 %v1754_v43, %s1652_s27  ;;  %991 = vrot.lane.b32.xlu0 %v1716_v28, %s1651_s24  ;;  %v679_v28 = vld [vmem:[#allocation2 + $0x40] sm:$0xff] }
  0x5d   : > { %1058 = vrot.lane.b32.xlu1 %v1758_v44, %s1652_s27  ;;  %1056 = vrot.lane.b32.xlu0 %v1746_v40, %s1652_s27 }
  0x61   : > { %1052 = vrot.lane.b32.xlu1 %v1760_v45, %s1652_s27  ;;  %1060 = vrot.lane.b32.xlu0 %v1764_v50, %s1652_s27 }
  0x65   : > { %579 = vrot.lane.b32.xlu1 %v1535_v20, %s1645_s18  ;;  %577 = vrot.lane.b32.xlu0 %v1772_v55, %s1645_s18 }
  0x69   : > { %583 = vrot.lane.b32.xlu1 %v1600_v21, %s1645_s18  ;;  %581 = vrot.lane.b32.xlu0 %v1793_v63, %s1645_s18 }
  0x6d   : > { %640 = vrot.lane.b32.xlu1 %v1829_v14, %s1646_s19  ;;  %638 = vrot.lane.b32.xlu0 %v1795_v0, %s1646_s19 }
  0x71   : > { %644 = vrot.lane.b32.xlu1 %v1927_v27, %s1646_s19  ;;  %642 = vrot.lane.b32.xlu0 %v1831_v15, %s1646_s19 }
  0x75   : > { %701 = vrot.lane.b32.xlu1 %v1835_v22, %s1647_s20  ;;  %699 = vrot.lane.b32.xlu0 %v1800_v5, %s1647_s20 }
  0x79   : > { %705 = vrot.lane.b32.xlu1 %v679_v28, %s1647_s20  ;;  %703 = vrot.lane.b32.xlu0 %v1837_v23, %s1647_s20 }
  0x7d   : > { %791 = vrot.lane.b32.xlu1 %v1535_v20, %s1648_s21  ;;  %789 = vrot.lane.b32.xlu0 %v1772_v55, %s1648_s21 }
  0x81   : > { %795 = vrot.lane.b32.xlu1 %v1601_v29, %s1648_s21  ;;  %793 = vrot.lane.b32.xlu0 %v1793_v63, %s1648_s21 }
  0x85   : > { %852 = vrot.lane.b32.xlu1 %v1829_v14, %s1649_s22  ;;  %850 = vrot.lane.b32.xlu0 %v1795_v0, %s1649_s22 }
  0x87   : > { %v574_v33 = vpop.permute.xlu1 %573  ;;  %v570_v34 = vpop.permute.xlu0 %569 }
  0x89   : > { %856 = vrot.lane.b32.xlu1 %v1927_v27, %s1649_s22  ;;  %854 = vrot.lane.b32.xlu0 %v1831_v15, %s1649_s22 }
  0x8b   : > { %v1955_v35 = vpop.permute.xlu1 %575  ;;  %v572_v36 = vpop.permute.xlu0 %571 }
  0x8c   : > { %v589_v37 = vsel %vm585_vm14, %v574_v33, %v1955_v35  ;;  %v588_v38 = vsel %vm585_vm14, %v572_v36, %v574_v33  ;;  %v587_v39 = vsel %vm585_vm14, %v570_v34, %v572_v36 }
  0x8d   : > { %1227 = vmatprep.subr.bf16.mxu1 %v589_v37  ;;  %913 = vrot.lane.b32.xlu1 %v1835_v22, %s1650_s23 }
  0x8e   : > { %1228 = vmatpush1.bf16.msra.mxu1 %v588_v38  ;;  %911 = vrot.lane.b32.xlu0 %v1800_v5, %s1650_s23 }
  0x8f   : > { %1186 = vmatprep.subr.bf16.mxu0 %v587_v39  ;;  %v631_v40 = vpop.permute.xlu1 %630  ;;  %v568_v41 = vpop.permute.xlu0 %567 }
  0x90   : > { %v586_v42 = vsel %vm585_vm14, %v568_v41, %v570_v34 }
  0x91   : > { %917 = vrot.lane.b32.xlu1 %v679_v28, %s1650_s23  ;;  %1187 = vmatpush1.bf16.msra.mxu0 %v586_v42 }
  0x92   : > { %915 = vrot.lane.b32.xlu0 %v1837_v23, %s1650_s23 }
  0x93   : > { %v635_v43 = vpop.permute.xlu1 %634  ;;  %v633_v44 = vpop.permute.xlu0 %632 }
  0x94   : > { %v648_v45 = vsel %vm646_vm15, %v631_v40, %v633_v44  ;;  %v649_v51 = vsel %vm646_vm15, %v633_v44, %v635_v43 }
  0x95   : > { %1003 = vrot.lane.b32.xlu1 %v1535_v20, %s1651_s24  ;;  %1188 = vmatprep.subr.bf16.mxu0 %v648_v45 }
  0x96   : > { %1001 = vrot.lane.b32.xlu0 %v1772_v55, %s1651_s24 }
  0x97   : > { %v629_v47 = vpop.permute.xlu1 %628  ;;  %v1974_v48 = vpop.permute.xlu0 %636 }
  0x98   : > { %v647_v49 = vsel %vm646_vm15, %v629_v47, %v631_v40  ;;  %v650_v50 = vsel %vm646_vm15, %v635_v43, %v1974_v48 }
  0x99   : > { %1007 = vrot.lane.b32.xlu1 %v1602_v46, %s1651_s24  ;;  %1189 = vmatpush1.bf16.msra.mxu0 %v647_v49 }
  0x9a   : > { %1229 = vmatprep.subr.bf16.mxu1 %v650_v50  ;;  %1005 = vrot.lane.b32.xlu0 %v1793_v63, %s1651_s24  ;;  %v2035_v50 = vcombine.low %v1892_v31, %v1892_v31 }
  0x9b   : > { %1230 = vmatpush1.bf16.msra.mxu1 %v649_v51  ;;  %v694_v52 = vpop.permute.xlu1 %693  ;;  %v692_v54 = vpop.permute.xlu0 %691 }
  0x9c   : > { %v709_v55 = vsel %vm707_vm0, %v692_v54, %v694_v52 }
  0x9d   : > { %1064 = vrot.lane.b32.xlu1 %v1829_v14, %s1652_s27  ;;  %1190 = vmatprep.subr.bf16.mxu0 %v709_v55 }
  0x9e   : > { %1062 = vrot.lane.b32.xlu0 %v1795_v0, %s1652_s27 }
  0x9f   : > { %v1988_v56 = vpop.permute.xlu1 %697  ;;  %v696_v57 = vpop.permute.xlu0 %695 }
  0xa0   : > { %v711_v58 = vsel %vm707_vm0, %v696_v57, %v1988_v56  ;;  %v710_v59 = vsel %vm707_vm0, %v694_v52, %v696_v57 }
  0xa1   : > { %1068 = vrot.lane.b32.xlu1 %v1927_v27, %s1652_s27  ;;  %1231 = vmatprep.subr.bf16.mxu1 %v711_v58 }
  0xa2   : > { %1066 = vrot.lane.b32.xlu0 %v1831_v15, %s1652_s27  ;;  %1232 = vmatpush1.bf16.msra.mxu1 %v710_v59 }
  0xa3   : > { %v782_v60 = vpop.permute.xlu1 %781  ;;  %v690_v63 = vpop.permute.xlu0 %689 }
  0xa4   : > { %v708_v0 = vsel %vm707_vm0, %v690_v63, %v692_v54 }
  0xa5   : > { %1191 = vmatpush1.bf16.msra.mxu0 %v708_v0 }
  0xa6   : > { %1171 = vperm.xlu0 %1591, %v1168_v61  }
  0xa7   : > { %v786_v2 = vpop.permute.xlu1 %785  ;;  %v784_v3 = vpop.permute.xlu0 %783 }
  0xa8   : > { %v799_v4 = vsel %vm797_vm1, %v782_v60, %v784_v3  ;;  %v800_v9 = vsel %vm797_vm1, %v784_v3, %v786_v2 }
  0xa9   : > { %1192 = vmatprep.subr.bf16.mxu0 %v799_v4 }
  0xab   : > { %v780_v6 = vpop.permute.xlu1 %779  ;;  %v2002_v7 = vpop.permute.xlu0 %787 }
  0xac   : > { %v798_v1 = vsel %vm797_vm1, %v780_v6, %v782_v60  ;;  %v801_v8 = vsel %vm797_vm1, %v786_v2, %v2002_v7 }
  0xad   : > { %1193 = vmatpush1.bf16.msra.mxu0 %v798_v1  ;;  %1233 = vmatprep.subr.bf16.mxu1 %v801_v8 }
  0xae   : > { %1234 = vmatpush1.bf16.msra.mxu1 %v800_v9 }
  0xaf   : > { %v845_v10 = vpop.permute.xlu1 %844  ;;  %v843_v11 = vpop.permute.xlu0 %842 }
  0xb0   : > { %v860_v12 = vsel %vm858_vm2, %v843_v11, %v845_v10 }
  0xb1   : > { %1194 = vmatprep.subr.bf16.mxu0 %v860_v12 }
  0xb3   : > { %v2009_v13 = vpop.permute.xlu1 %848  ;;  %v847_v14 = vpop.permute.xlu0 %846 }
  0xb4   : > { %v862_v15 = vsel %vm858_vm2, %v847_v14, %v2009_v13  ;;  %v861_v16 = vsel %vm858_vm2, %v845_v10, %v847_v14 }
  0xb5   : > { %1235 = vmatprep.subr.bf16.mxu1 %v862_v15 }
  0xb6   : > { %1236 = vmatpush1.bf16.msra.mxu1 %v861_v16 }
  0xb7   : > { %v904_v17 = vpop.permute.xlu1 %903  ;;  %v841_v18 = vpop.permute.xlu0 %840 }
  0xb8   : > { %v859_v19 = vsel %vm858_vm2, %v841_v18, %v843_v11 }
  0xb9   : > { %1195 = vmatpush1.bf16.msra.mxu0 %v859_v19 }
  0xbb   : > { %v908_v24 = vpop.permute.xlu1 %907  ;;  %v906_v25 = vpop.permute.xlu0 %905 }
  0xbc   : > { %v921_v26 = vsel %vm919_vm3, %v904_v17, %v906_v25  ;;  %v922_v28 = vsel %vm919_vm3, %v906_v25, %v908_v24 }
  0xbd   : > { %1196 = vmatprep.subr.bf16.mxu0 %v921_v26 }
  0xbf   : > { %v902_v30 = vpop.permute.xlu1 %901  ;;  %v2016_v20 = vpop.permute.xlu0 %909 }
  0xc0   : > { %v920_v21 = vsel %vm919_vm3, %v902_v30, %v904_v17  ;;  %v923_v27 = vsel %vm919_vm3, %v908_v24, %v2016_v20 }
  0xc1   : > { %1197 = vmatpush1.bf16.msra.mxu0 %v920_v21  ;;  %1237 = vmatprep.subr.bf16.mxu1 %v923_v27 }
  0xc2   : > { %1238 = vmatpush1.bf16.msra.mxu1 %v922_v28 }
  0xc3   : > { %v996_v29 = vpop.permute.xlu1 %995  ;;  %v994_v33 = vpop.permute.xlu0 %993 }
  0xc4   : > { %v1011_v34 = vsel %vm1009_vm4, %v994_v33, %v996_v29 }
  0xc5   : > { %1198 = vmatprep.subr.bf16.mxu0 %v1011_v34 }
  0xc7   : > { %v2023_v36 = vpop.permute.xlu1 %999  ;;  %v998_v37 = vpop.permute.xlu0 %997 }
  0xc8   : > { %v1013_v38 = vsel %vm1009_vm4, %v998_v37, %v2023_v36  ;;  %v1012_v39 = vsel %vm1009_vm4, %v996_v29, %v998_v37 }
  0xc9   : > { %1239 = vmatprep.subr.bf16.mxu1 %v1013_v38 }
  0xca   : > { %1240 = vmatpush1.bf16.msra.mxu1 %v1012_v39 }
  0xcb   : > { %v1055_v40 = vpop.permute.xlu1 %1054  ;;  %v992_v41 = vpop.permute.xlu0 %991 }
  0xcc   : > { %v1010_v42 = vsel %vm1009_vm4, %v992_v41, %v994_v33 }
  0xcd   : > { %1199 = vmatpush1.bf16.msra.mxu0 %v1010_v42 }
  0xcf   : > { %v1059_v43 = vpop.permute.xlu1 %1058  ;;  %v1057_v44 = vpop.permute.xlu0 %1056 }
  0xd0   : > { %v1072_v45 = vsel %vm1070_vm5, %v1055_v40, %v1057_v44  ;;  %v1073_v52 = vsel %vm1070_vm5, %v1057_v44, %v1059_v43 }
  0xd1   : > { %1200 = vmatprep.subr.bf16.mxu0 %v1072_v45 }
  0xd3   : > { %v1053_v46 = vpop.permute.xlu1 %1052  ;;  %v2030_v47 = vpop.permute.xlu0 %1060 }
  0xd4   : > { %v1071_v49 = vsel %vm1070_vm5, %v1053_v46, %v1055_v40  ;;  %v1074_v51 = vsel %vm1070_vm5, %v1059_v43, %v2030_v47 }
  0xd5   : > { %1201 = vmatpush1.bf16.msra.mxu0 %v1071_v49  ;;  %1241 = vmatprep.subr.bf16.mxu1 %v1074_v51 }
  0xd6   : > { %1266 = vmatprep.subr.bf16.mxu0 %v1800_v5  ;;  %1242 = vmatpush1.bf16.msra.mxu1 %v1073_v52 }
  0xd7   : > { %v580_v53 = vpop.permute.xlu1 %579  ;;  %v578_v54 = vpop.permute.xlu0 %577  ;;  %1307 = vmatprep.subr.bf16.mxu1 %v1837_v23 }
  0xd8   : > { %1217 = vmatmul.mubr.bf16.vlgmr.msra.gmra.mrb[0].mxu0 %v2035_v50  ;;  %v591_v31 = vsel %vm585_vm14, %v578_v54, %v580_v53  ;;  %v590_v55 = vsel %vm585_vm14, %v1955_v35, %v578_v54 }
  0xd9   : > { %1267 = vmatpush1.bf16.msra.mxu0 %v1789_v62  ;;  %1560 = vmatprep.mubr.msk.bf16.mxu0 %vm1180_vm13, %v1896_v32 }
  0xda   : > { %1258 = vmatmul.mubr.bf16.vlgmr.msra.gmra.mrb[0].mxu1 %v2035_v50  ;;  %1268 = vmatprep.subr.bf16.mxu0 %v591_v31 }
  0xdb   : > { %1308 = vmatpush1.bf16.msra.mxu1 %v1835_v22  ;;  %v584_v5 = vpop.permute.xlu1 %583  ;;  %1561 = vmatprep.mubr.msk.bf16.mxu1 %vm1180_vm13, %v1896_v32  ;;  %v582_v23 = vpop.permute.xlu0 %581 }
  0xdc   : > { %v592_v62 = vsel %vm585_vm14, %v580_v53, %v582_v23  ;;  %v593_v57 = vsel %vm585_vm14, %v582_v23, %v584_v5 }
  0xdd   : > { %1269 = vmatpush1.bf16.msra.mxu0 %v590_v55  ;;  %1309 = vmatprep.subr.bf16.mxu1 %v593_v57 }
  0xdf   : > { %1310 = vmatpush1.bf16.msra.mxu1 %v592_v62  ;;  %v641_v58 = vpop.permute.xlu1 %640  ;;  %v639_v59 = vpop.permute.xlu0 %638 }
  0xe0   : > { %v651_v22 = vsel %vm646_vm15, %v1974_v48, %v639_v59  ;;  %v652_v60 = vsel %vm646_vm15, %v639_v59, %v641_v58 }
  0xe1   : > { %1270 = vmatprep.subr.bf16.mxu0 %v652_v60 }
  0xe2   : > { %1271 = vmatpush1.bf16.msra.mxu0 %v651_v22 }
  0xe3   : > { %v645_v32 = vpop.permute.xlu1 %644  ;;  %v643_v61 = vpop.permute.xlu0 %642 }
  0xe4   : > { %v653_v35 = vsel %vm646_vm15, %v641_v58, %v643_v61  ;;  %v654_v63 = vsel %vm646_vm15, %v643_v61, %v645_v32 }
  0xe5   : > { %1311 = vmatprep.subr.bf16.mxu1 %v654_v63 }
  0xe6   : > { %1312 = vmatpush1.bf16.msra.mxu1 %v653_v35 }
  0xe7   : > { %v702_v0 = vpop.permute.xlu1 %701  ;;  %v700_v2 = vpop.permute.xlu0 %699 }
  0xe8   : > { %v712_v3 = vsel %vm707_vm0, %v1988_v56, %v700_v2  ;;  %v713_v4 = vsel %vm707_vm0, %v700_v2, %v702_v0 }
  0xe9   : > { %1272 = vmatprep.subr.bf16.mxu0 %v713_v4 }
  0xea   : > { %1273 = vmatpush1.bf16.msra.mxu0 %v712_v3 }
  0xeb   : > { %v706_v48 = vpop.permute.xlu1 %705  ;;  %v704_v6 = vpop.permute.xlu0 %703 }
  0xec   : > { %v714_v1 = vsel %vm707_vm0, %v702_v0, %v704_v6  ;;  %v715_v8 = vsel %vm707_vm0, %v704_v6, %v706_v48 }
  0xed   : > { %1313 = vmatprep.subr.bf16.mxu1 %v715_v8 }
  0xee   : > { %1314 = vmatpush1.bf16.msra.mxu1 %v714_v1 }
  0xef   : > { %v792_v9 = vpop.permute.xlu1 %791  ;;  %v790_v10 = vpop.permute.xlu0 %789 }
  0xf0   : > { %v802_v11 = vsel %vm797_vm1, %v2002_v7, %v790_v10  ;;  %v803_v12 = vsel %vm797_vm1, %v790_v10, %v792_v9 }
  0xf1   : > { %1274 = vmatprep.subr.bf16.mxu0 %v803_v12 }
  0xf2   : > { %1275 = vmatpush1.bf16.msra.mxu0 %v802_v11 }
  0xf3   : > { %v796_v56 = vpop.permute.xlu1 %795  ;;  %v794_v14 = vpop.permute.xlu0 %793 }
  0xf4   : > { %v804_v15 = vsel %vm797_vm1, %v792_v9, %v794_v14  ;;  %v805_v16 = vsel %vm797_vm1, %v794_v14, %v796_v56 }
  0xf5   : > { %1315 = vmatprep.subr.bf16.mxu1 %v805_v16 }
  0xf6   : > { %1316 = vmatpush1.bf16.msra.mxu1 %v804_v15 }
  0xf7   : > { %v853_v17 = vpop.permute.xlu1 %852  ;;  %v851_v18 = vpop.permute.xlu0 %850 }
  0xf8   : > { %v863_v19 = vsel %vm858_vm2, %v2009_v13, %v851_v18  ;;  %v864_v24 = vsel %vm858_vm2, %v851_v18, %v853_v17 }
  0xf9   : > { %1276 = vmatprep.subr.bf16.mxu0 %v864_v24 }
  0xfa   : > { %1277 = vmatpush1.bf16.msra.mxu0 %v863_v19 }
  0xfb   : > { %v857_v7 = vpop.permute.xlu1 %856  ;;  %v855_v25 = vpop.permute.xlu0 %854 }
  0xfc   : > { %v865_v26 = vsel %vm858_vm2, %v853_v17, %v855_v25  ;;  %v866_v30 = vsel %vm858_vm2, %v855_v25, %v857_v7 }
  0xfd   : > { %1317 = vmatprep.subr.bf16.mxu1 %v866_v30 }
  0xfe   : > { %1318 = vmatpush1.bf16.msra.mxu1 %v865_v26 }
  0xff   : > { %v914_v21 = vpop.permute.xlu1 %913 }
 0x100   : > { %v912_v27 = vpop.permute.xlu0 %911 }
 0x101   : > { %v924_v28 = vsel %vm919_vm3, %v2016_v20, %v912_v27  ;;  %v925_v29 = vsel %vm919_vm3, %v912_v27, %v914_v21 }
 0x102   : > { %1278 = vmatprep.subr.bf16.mxu0 %v925_v29 }
 0x103   : > { %1279 = vmatpush1.bf16.msra.mxu0 %v924_v28  ;;  %v918_v13 = vpop.permute.xlu1 %917 }
 0x104   : > { %v916_v33 = vpop.permute.xlu0 %915 }
 0x105   : > { %v926_v34 = vsel %vm919_vm3, %v914_v21, %v916_v33  ;;  %v927_v37 = vsel %vm919_vm3, %v916_v33, %v918_v13 }
 0x106   : > { %1319 = vmatprep.subr.bf16.mxu1 %v927_v37 }
 0x107   : > { %1320 = vmatpush1.bf16.msra.mxu1 %v926_v34  ;;  %v1004_v38 = vpop.permute.xlu1 %1003 }
 0x108   : > { %v1002_v39 = vpop.permute.xlu0 %1001 }
 0x109   : > { %v1014_v40 = vsel %vm1009_vm4, %v2023_v36, %v1002_v39  ;;  %v1015_v41 = vsel %vm1009_vm4, %v1002_v39, %v1004_v38 }
 0x10a   : > { %1280 = vmatprep.subr.bf16.mxu0 %v1015_v41 }
 0x10b   : > { %1281 = vmatpush1.bf16.msra.mxu0 %v1014_v40  ;;  %v1008_v20 = vpop.permute.xlu1 %1007 }
 0x10c   : > { %v1006_v42 = vpop.permute.xlu0 %1005 }
 0x10d   : > { %v1016_v43 = vsel %vm1009_vm4, %v1004_v38, %v1006_v42  ;;  %v1017_v44 = vsel %vm1009_vm4, %v1006_v42, %v1008_v20 }
 0x10e   : > { %1321 = vmatprep.subr.bf16.mxu1 %v1017_v44 }
 0x10f   : > { %1322 = vmatpush1.bf16.msra.mxu1 %v1016_v43  ;;  %v1065_v45 = vpop.permute.xlu1 %1064 }
 0x110   : > { %v1063_v46 = vpop.permute.xlu0 %1062 }
 0x111   : > { %v1075_v49 = vsel %vm1070_vm5, %v2030_v47, %v1063_v46  ;;  %v1076_v51 = vsel %vm1070_vm5, %v1063_v46, %v1065_v45 }
 0x112   : > { %1282 = vmatprep.subr.bf16.mxu0 %v1076_v51 }
 0x113   : > { %1283 = vmatpush1.bf16.msra.mxu0 %v1075_v49  ;;  %v1069_v36 = vpop.permute.xlu1 %1068 }
 0x114   : > { %v1067_v52 = vpop.permute.xlu0 %1066 }
 0x115   : > { %v1077_v53 = vsel %vm1070_vm5, %v1065_v45, %v1067_v52  ;;  %v1078_v54 = vsel %vm1070_vm5, %v1067_v52, %v1069_v36 }
 0x116   : > { %1299 = vmatmul.mubr.bf16.vlgmr.msra.gmra.mrb[4].mxu0 %v2035_v50  ;;  %1323 = vmatprep.subr.bf16.mxu1 %v1078_v54 }
 0x117   : > { %1324 = vmatpush1.bf16.msra.mxu1 %v1077_v53 }
 0x11a   : > { %1340 = vmatmul.mubr.bf16.vlgmr.msra.gmra.mrb[4].mxu1 %v2035_v50 }
 0x125   : > { %v2092_v31 = vpop.permute.xlu0 %1171 }
 0x1ab   : > { %v1218_v5 = vpop.f32.mrb[0].mxu0 }
 0x1ac   : > { %v1219_v47 = vadd.f32 %v1218_v5, %v2092_v31  ;;  %v1220_v55 = vpop.f32.mrb[1].mxu0 }
 0x1ad   : > { %v1259_v23 = vpop.f32.mrb[0].mxu1  ;;  %v1221_v62 = vadd.f32 %v1220_v55, %v2092_v31  ;;  %v1222_v57 = vpop.f32.mrb[2].mxu0 }
 0x1ae   : > { %v1261_v58 = vpop.f32.mrb[1].mxu1  ;;  %v1260_v59 = vadd.f32 %v1259_v23, %v2092_v31  ;;  %v1562_v22 = vmul.f32 -1.442695, %v1219_v47  ;;  %v1223_v60 = vpop.f32.mrb[3].mxu0 }
 0x1af   : > { %v1262_v32 = vadd.f32 %v1261_v58, %v2092_v31  ;;  %v1563_v61 = vmul.f32 -1.442695, %v1221_v62  ;;  %v1263_v35 = vpop.f32.mrb[2].mxu1 }
 0x1b0   : > { %v1564_v50 = vmul.f32 -1.442695, %v1260_v59  ;;  %1605 = vpow2.f32 %v1562_v22  ;;  %v1264_v63 = vpop.f32.mrb[3].mxu1 }
 0x1b1   : > { %v1565_v0 = vmul.f32 -1.442695, %v1262_v32  ;;  %1607 = vpow2.f32 %v1563_v61 }
 0x1b2   : > { %1609 = vpow2.f32 %v1564_v50 }
 0x1b3   : > { %1611 = vpow2.f32 %v1565_v0 }
 0x1ba   : > { %v1606_v2 = vpop.eup %1605 }
 0x1bb   : > { %v1608_v3 = vpop.eup %1607  ;;  %v1372_v4 = vadd.f32 1.0, %v1606_v2 }
 0x1bc   : > { %v1610_v48 = vpop.eup %1609  ;;  %v1373_v6 = vadd.f32 1.0, %v1608_v3 }
 0x1bd   : > { %v1612_v1 = vpop.eup %1611  ;;  %v1374_v8 = vadd.f32 1.0, %v1610_v48  ;;  %1613 = vrcp.f32 %v1372_v4 }
 0x1be   : > { %v1375_v9 = vadd.f32 1.0, %v1612_v1  ;;  %1615 = vrcp.f32 %v1373_v6 }
 0x1bf   : > { %1617 = vrcp.f32 %v1374_v8 }
 0x1c0   : > { %1619 = vrcp.f32 %v1375_v9 }
 0x1c7   : > { %v1614_v10 = vpop.eup %1613 }
 0x1c8   : > { %v1616_v11 = vpop.eup %1615  ;;  %v1404_v12 = vrot.slane %v1614_v10, 4 }
 0x1c9   : > { %v1618_v56 = vpop.eup %1617  ;;  %v1405_v14 = vrot.slane %v1616_v11, 4 }
 0x1ca   : > { %v1620_v15 = vpop.eup %1619  ;;  %v1406_v16 = vrot.slane %v1618_v56, 4  ;;  %v1420_v17 = vmul.f32 %v1404_v12, %v1219_v47 }
 0x1cb   : > { %v1407_v18 = vrot.slane %v1620_v15, 4  ;;  %v1421_v19 = vmul.f32 %v1405_v14, %v1221_v62 }
 0x1cc   : > { %v1422_v24 = vmul.f32 %v1406_v16, %v1260_v59 }
 0x1cd   : > { %v1423_v7 = vmul.f32 %v1407_v18, %v1262_v32  ;;  %v1436_v25 = vcombine.low %v1420_v17, %v1421_v19 }
 0x1cf   : > { %v1437_v26 = vcombine.low %v1422_v24, %v1423_v7  ;;  %1444 = vst [vmem:[%s2102_s6] sm:$0xff] %v1436_v25 }
 0x1d1   : > { %1445 = vst [vmem:[%s2102_s6 + $0x8] sm:$0xff] %v1437_v26 }
 0x1e9   : > { %v1300_v30 = vpop.f32.mrb[4].mxu0 }
 0x1ea   : > { %v1301_v21 = vadd.f32 %v1300_v30, %v2092_v31  ;;  %v1302_v27 = vpop.f32.mrb[5].mxu0 }
 0x1eb   : > { %v1303_v28 = vadd.f32 %v1302_v27, %v2092_v31  ;;  %v1304_v29 = vpop.f32.mrb[6].mxu0 }
 0x1ec   : > { %v1566_v13 = vmul.f32 -1.442695, %v1301_v21  ;;  %v1305_v33 = vpop.f32.mrb[7].mxu0 }
 0x1ed   : > { %v1567_v34 = vmul.f32 -1.442695, %v1303_v28  ;;  %v1341_v37 = vpop.f32.mrb[4].mxu1 }
 0x1ee   : > { %1621 = vpow2.f32 %v1566_v13  ;;  %v1342_v38 = vadd.f32 %v1341_v37, %v2092_v31  ;;  %v1343_v39 = vpop.f32.mrb[5].mxu1 }
 0x1ef   : > { %1623 = vpow2.f32 %v1567_v34  ;;  %v1344_v40 = vadd.f32 %v1343_v39, %v2092_v31  ;;  %v1345_v41 = vpop.f32.mrb[6].mxu1 }
 0x1f0   : > { %v1568_v20 = vmul.f32 -1.442695, %v1342_v38  ;;  %v1346_v42 = vpop.f32.mrb[7].mxu1 }
 0x1f1   : > { %v1569_v43 = vmul.f32 -1.442695, %v1344_v40 }
 0x1f2   : > { %1625 = vpow2.f32 %v1568_v20 }
 0x1f3   : > { %1627 = vpow2.f32 %v1569_v43 }
 0x1f8   : > { %v1622_v44 = vpop.eup %1621 }
 0x1f9   : > { %v1624_v45 = vpop.eup %1623  ;;  %v1376_v46 = vadd.f32 1.0, %v1622_v44 }
 0x1fa   : > { %v1377_v49 = vadd.f32 1.0, %v1624_v45 }
 0x1fb   : > { %1629 = vrcp.f32 %v1376_v46 }
 0x1fc   : > { %v1626_v51 = vpop.eup %1625  ;;  %1631 = vrcp.f32 %v1377_v49 }
 0x1fd   : > { %v1628_v36 = vpop.eup %1627  ;;  %v1378_v52 = vadd.f32 1.0, %v1626_v51 }
 0x1fe   : > { %v1379_v53 = vadd.f32 1.0, %v1628_v36 }
 0x1ff   : > { %1633 = vrcp.f32 %v1378_v52 }
 0x200   : > { %1635 = vrcp.f32 %v1379_v53 }
 0x205   : > { %v1630_v54 = vpop.eup %1629 }
 0x206   : > { %v1632_v31 = vpop.eup %1631  ;;  %v1408_v5 = vrot.slane %v1630_v54, 4 }
 0x207   : > { %v1409_v47 = vrot.slane %v1632_v31, 4 }
 0x208   : > { %v1424_v55 = vmul.f32 %v1408_v5, %v1301_v21 }
 0x209   : > { %v1634_v23 = vpop.eup %1633  ;;  %v1425_v62 = vmul.f32 %v1409_v47, %v1303_v28 }
 0x20a   : > { %v1636_v57 = vpop.eup %1635  ;;  %v1410_v58 = vrot.slane %v1634_v23, 4 }
 0x20b   : > { %v1438_v59 = vcombine.low %v1424_v55, %v1425_v62  ;;  %v1411_v22 = vrot.slane %v1636_v57, 4 }
 0x20c   : > { %v1426_v60 = vmul.f32 %v1410_v58, %v1342_v38 }
 0x20d   : > { %1446 = vst [vmem:[%s2102_s6 + $0x10] sm:$0xff] %v1438_v59  ;;  %v1427_v32 = vmul.f32 %v1411_v22, %v1344_v40 }
 0x20f   : > { %v1439_v61 = vcombine.low %v1426_v60, %v1427_v32 }
 0x211   : > { %1447 = vst [vmem:[%s2102_s6 + $0x18] sm:$0xff] %v1439_v61 }
 0x212 PF: > { %s13_s12 = sadd.s32 1, %s1643_s12  }
 0x213   : > { %p10_p4 = scmp.ge.s32.totalorder %s13_s12, 4  }
 0x215   :  { %12 = sbr.rel (!%p10_p4) target bundleno = 1 (0x1), region = 62 }

// kernel: init_stage_g.9
= control target key start
LH: loop header
LB: loop body
LE: loop exit
PB: predicated region body
PF: predicated region fallthrough
CT: control target
= control target key end

     0   :  { %s5692_s12 = smov 0   ;;  %s7449_s0 = inlined_call_operand.vmem [shape: bf16[2,16,4226], index: 0, kind: input, shape index: {}]   ;;  %s7450_s1 = inlined_call_operand.vmem [shape: bf16[4,144], index: 1, kind: input, shape index: {}]   ;;  %s7451_s2 = inlined_call_operand.vmem [shape: f32[4,1], index: 2, kind: input, shape index: {}]   ;;  %s7452_s3 = inlined_call_operand.vmem [shape: f32[2,2,4096], index: 3, kind: output, shape index: {}]  }
   0x1 LB: > { %s5143_s13 = sadd.s32 4294967295, %s5663_s12   ;;  %p5147_p0 = scmp.ge.s32.totalorder %s5663_s12, 1  ;;  %s5663_s12 = sphi %s5692_s12, %s13_s12  }
   0x2   : > { %p137_p1 = scmp.lt.s32.totalorder %s5663_s12, 3 }
   0x4   : > { %p138_p2 = pnand %p5147_p0, %p137_p1 }
   0x6   : > { %141 = sbr.rel (%p138_p2) target bundleno = 895 (0x37f), region = 32 }
   0xd   : > { %p161_p3 = scmp.lt.s32.totalorder %s5143_s13, 1  ;;  %v7453_v0 = vlaneseq  ;;  %s5665_s18 = smov 127  }
   0xe   : > { %s5666_s19 = smov 126   ;;  %s5667_s20 = smov 64  }
   0xf   : > { %s7498_s13 = smov (!%p161_p3, %s5143_s13), 1  ;;  %v5703_v1 = vand.u32 127, %v7453_v0  ;;  %s5668_s21 = smov 63  }
  0x10   : > { %s5382_s14 = smul.u32 272, %s7498_s13  ;;  %s5669_s22 = smov 62  }
  0x11   : > { %v209_v2 = vadd.s32 256, %v5703_v1  ;;  %v210_v3 = vadd.s32 384, %v5703_v1  ;;  %v208_v4 = vadd.s32 128, %v5703_v1  ;;  %v241_v5 = vadd.s32 63, %v5703_v1 }
  0x12   : > { %v211_v6 = vadd.s32 512, %v5703_v1  ;;  %v212_v7 = vadd.s32 640, %v5703_v1  ;;  %v213_v8 = vadd.s32 768, %v5703_v1  ;;  %v5714_v9 = vadd.s32 896, %v5703_v1  ;;  %s5719_s17 = scalar_lea.vmem %s7449_s0, %s5382_s14  ;;  %s5381_s14 = sshll.u32 %s7498_s13, 6 }
  0x13   : > { %v243_v10 = vadd.s32 63, %v209_v2  ;;  %v244_v11 = vadd.s32 63, %v210_v3  ;;  %v242_v12 = vadd.s32 63, %v208_v4  ;;  %v279_v13 = vand.u32 63, %v241_v5  ;;  %v1415_v14 = vld [vmem:[%s5719_s17 + $0x8] sm:$0xff]  ;;  %v1420_v15 = vld [vmem:[%s5719_s17 + $0x90] sm:$0xff] }
  0x14   : > { %v1414_v16 = vld [vmem:[%s5719_s17] sm:$0xff]  ;;  %v245_v17 = vadd.s32 63, %v211_v6  ;;  %v246_v18 = vadd.s32 63, %v212_v7  ;;  %v5724_v19 = vadd.s32 63, %v213_v8  ;;  %v5726_v20 = vcombine.high %v1415_v14, %v1420_v15  ;;  %v1419_v22 = vld [vmem:[%s5719_s17 + $0x88] sm:$0xff]  ;;  %v1416_v23 = vld [vmem:[%s5719_s17 + $0x10] sm:$0xff] }
  0x15   : > { %v5728_v21 = vcombine.low %v1415_v14, %v1420_v15  ;;  %v1421_v24 = vld [vmem:[%s5719_s17 + $0x98] sm:$0xff]  ;;  %v293_v25 = vand.u32 63, %v243_v10  ;;  %v300_v26 = vand.u32 63, %v244_v11  ;;  %v5733_v27 = vcombine.high %v1414_v16, %v1419_v22  ;;  %v5807_v62 = vld [vmem:[%s5719_s17 + $0x20] sm:$0xff]  ;;  %v193_v3 = vld [vmem:[%s5719_s17 + $0xa8] sm:$0xff] }
  0x16   : > { %v5735_v28 = vcombine.low %v1414_v16, %v1419_v22  ;;  %v5737_v29 = vcombine.low %v1416_v23, %v1421_v24  ;;  %v286_v30 = vand.u32 63, %v242_v12  ;;  %1467 = vrot.lane.b32.xlu1 %v5726_v20, %s5665_s18  ;;  %vm5741_vm2 = vcmp.ne.s32.totalorder %v279_v13, 0  ;;  %v5823_v8 = vld [vmem:[%s5719_s17 + $0x28] sm:$0xff] }
  0x17   : > { %vm1043_vm0 = vcmp.ne.s32.totalorder %v293_v25, 0  ;;  %vm1044_vm1 = vcmp.ne.s32.totalorder %v300_v26, 0  ;;  %v307_v32 = vand.u32 63, %v245_v17  ;;  %1463 = vrot.lane.b32.xlu0 %v5733_v27, %s5665_s18  ;;  %v314_v33 = vand.u32 63, %v246_v18  ;;  %v5848_v17 = vld [vmem:[%s5719_s17 + $0xb0] sm:$0xff] }
  0x18   : > { %vm1144_vm3 = vmpackc.low %vm1044_vm1, %vm1043_vm0  ;;  %vm1042_vm4 = vcmp.ne.s32.totalorder %v286_v30, 0  ;;  %vm5747_vm5 = vcmp.ne.s32.totalorder %v279_v13, 63  ;;  %vm5751_vm6 = vcmp.ne.s32.totalorder %v286_v30, 63  ;;  %vm5761_vm9 = vcmp.ne.s32.totalorder %v293_v25, 63  ;;  %v5851_v18 = vld [vmem:[%s5719_s17 + $0x30] sm:$0xff] }
  0x19   : > { %v1161_v36 = vsel %vm1144_vm3, %v1415_v14, 0  ;;  %v1178_v37 = vsel %vm1144_vm3, %v1420_v15, 0  ;;  %vm1143_vm7 = vmpackc.low %vm1042_vm4, %vm5741_vm2  ;;  %vm5757_vm8 = vcmp.ne.s32.totalorder %v307_v32, 0  ;;  %vm1046_vm10 = vcmp.ne.s32.totalorder %v314_v33, 0 }
  0x1a   : > { %v5765_v40 = vcombine.low %v1161_v36, %v1178_v37  ;;  %v1160_v41 = vsel %vm1143_vm7, %v1414_v16, 0  ;;  %v1177_v42 = vsel %vm1143_vm7, %v1419_v22, 0  ;;  %vm785_vm11 = vmpackc.low %vm5751_vm6, %vm5747_vm5  ;;  %1469 = vrot.lane.b32.xlu1 %v5737_v29, %s5665_s18  ;;  %v5777_v44 = vcombine.high %v1161_v36, %v1178_v37 }
  0x1b   : > { %v5773_v43 = vcombine.high %v1160_v41, %v1177_v42  ;;  %vm1145_vm12 = vmpackc.low %vm1046_vm10, %vm5757_vm8  ;;  %v5779_v45 = vcombine.low %v1160_v41, %v1177_v42  ;;  %v802_v46 = vsel %vm785_vm11, %v1414_v16, 0  ;;  %1465 = vrot.lane.b32.xlu0 %v5728_v21, %s5665_s18  ;;  %v819_v49 = vsel %vm785_vm11, %v1419_v22, 0 }
  0x1c   : > { %v1162_v47 = vsel %vm1145_vm12, %v1416_v23, 0  ;;  %v1179_v48 = vsel %vm1145_vm12, %v1421_v24, 0  ;;  %vm686_vm13 = vcmp.ne.s32.totalorder %v300_v26, 63  ;;  %v5785_v51 = vcombine.high %v802_v46, %v819_v49 }
  0x1d   : > { %v5783_v50 = vcombine.low %v1162_v47, %v1179_v48  ;;  %vm786_vm14 = vmpackc.low %vm686_vm13, %vm5761_vm9  ;;  %vm687_vm15 = vcmp.ne.s32.totalorder %v307_v32, 63  ;;  %vm688_vm0 = vcmp.ne.s32.totalorder %v314_v33, 63  ;;  %v5789_v54 = vcombine.low %v802_v46, %v819_v49 }
  0x1e   : > { %v803_v52 = vsel %vm786_vm14, %v1415_v14, 0  ;;  %v820_v53 = vsel %vm786_vm14, %v1420_v15, 0  ;;  %vm787_vm1 = vmpackc.low %vm688_vm0, %vm687_vm15  ;;  %v5791_v55 = vcombine.high %v1162_v47, %v1179_v48  ;;  %1524 = vrot.lane.b32.xlu1 %v5773_v43, %s5666_s19  ;;  %2035 = vmatprep.subr.bf16.mxu0 %v5785_v51  ;;  %v5804_v61 = vcombine.high %v1416_v23, %v1421_v24  ;;  %v5837_v14 = vld [vmem:[%s5719_s17 + $0x18] sm:$0xff]  ;;  %v5840_v15 = vld [vmem:[%s5719_s17 + $0xa0] sm:$0xff] }
  0x1f   : > { %v5795_v56 = vcombine.low %v803_v52, %v820_v53  ;;  %v5797_v57 = vcombine.high %v803_v52, %v820_v53  ;;  %v804_v58 = vsel %vm787_vm1, %v1416_v23, 0  ;;  %v821_v59 = vsel %vm787_vm1, %v1421_v24, 0  ;;  %1461 = vrot.lane.b32.xlu0 %v5735_v28, %s5665_s18  ;;  %2036 = vmatpush1.bf16.msra.mxu0 %v5789_v54  ;;  %v5858_v24 = vld [vmem:[%s5719_s17 + $0xb8] sm:$0xff] }
  0x20   : > { %v5802_v60 = vcombine.low %v804_v58, %v821_v59  ;;  %v248_v63 = vadd.s32 63, %v5714_v9  ;;  %v321_v2 = vand.u32 63, %v5724_v19  ;;  %v215_v4 = vadd.s32 1024, %v5703_v1 }
  0x21   : > { %v216_v5 = vadd.s32 1152, %v5703_v1  ;;  %2076 = vmatprep.subr.bf16.mxu1 %v5797_v57  ;;  %v5816_v6 = vcombine.high %v804_v58, %v821_v59  ;;  %v5820_v7 = vcombine.high %v5807_v62, %v193_v3  ;;  %v5826_v9 = vcombine.low %v5807_v62, %v193_v3 }
  0x22   : > { %2077 = vmatpush1.bf16.msra.mxu1 %v5795_v56  ;;  %1528 = vrot.lane.b32.xlu1 %v5777_v44, %s5666_s19  ;;  %v328_v10 = vand.u32 63, %v248_v63  ;;  %vm5830_vm2 = vcmp.ne.s32.totalorder %v321_v2, 0  ;;  %v249_v12 = vadd.s32 63, %v215_v4  ;;  %vm5843_vm3 = vcmp.ne.s32.totalorder %v321_v2, 63 }
  0x23   : > { %v250_v13 = vadd.s32 63, %v216_v5  ;;  %1526 = vrot.lane.b32.xlu0 %v5765_v40, %s5666_s19  ;;  %1011 = vst [vmem:[#allocation2 + $0x28] sm:$0xff] %v5816_v6  ;;  %v5864_v25 = vcombine.low %v5823_v8, %v5848_v17  ;;  %v5868_v26 = vcombine.high %v5823_v8, %v5848_v17  ;;  %v5872_v30 = vcombine.low %v5851_v18, %v5858_v24 }
  0x24   : > { %vm1048_vm4 = vcmp.ne.s32.totalorder %v328_v10, 0  ;;  %v335_v19 = vand.u32 63, %v249_v12  ;;  %vm5853_vm5 = vcmp.ne.s32.totalorder %v328_v10, 63  ;;  %v5876_v31 = vcombine.high %v5851_v18, %v5858_v24 }
  0x25   : > { %v342_v22 = vand.u32 63, %v250_v13  ;;  %vm1146_vm6 = vmpackc.low %vm1048_vm4, %vm5830_vm2  ;;  %v217_v48 = vadd.s32 1280, %v5703_v1  ;;  %v218_v49 = vadd.s32 1408, %v5703_v1  ;;  %v219_v52 = vadd.s32 1536, %v5703_v1 }
  0x26   : > { %1522 = vrot.lane.b32.xlu1 %v5779_v45, %s5666_s19  ;;  %v1163_v32 = vsel %vm1146_vm6, %v5837_v14, 0  ;;  %v1180_v33 = vsel %vm1146_vm6, %v5840_v15, 0  ;;  %vm1049_vm7 = vcmp.ne.s32.totalorder %v335_v19, 0  ;;  %vm788_vm9 = vmpackc.low %vm5853_vm5, %vm5843_vm3  ;;  %vm691_vm11 = vcmp.ne.s32.totalorder %v335_v19, 63 }
  0x27   : > { %vm1050_vm8 = vcmp.ne.s32.totalorder %v342_v22, 0  ;;  %1530 = vrot.lane.b32.xlu0 %v5783_v50, %s5666_s19  ;;  %v5888_v34 = vcombine.low %v1163_v32, %v1180_v33  ;;  %v5890_v35 = vcombine.high %v1163_v32, %v1180_v33  ;;  %v805_v36 = vsel %vm788_vm9, %v5837_v14, 0 }
  0x28   : > { %vm1147_vm10 = vmpackc.low %vm1050_vm8, %vm1049_vm7  ;;  %v822_v37 = vsel %vm788_vm9, %v5840_v15, 0  ;;  %vm692_vm12 = vcmp.ne.s32.totalorder %v342_v22, 63  ;;  %v220_v59 = vadd.s32 1664, %v5703_v1  ;;  %v251_v2 = vadd.s32 63, %v217_v48 }
  0x29   : > { %v1164_v38 = vsel %vm1147_vm10, %v5807_v62, 0  ;;  %v1181_v39 = vsel %vm1147_vm10, %v193_v3, 0  ;;  %v5895_v41 = vcombine.low %v805_v36, %v822_v37  ;;  %v5897_v42 = vcombine.high %v805_v36, %v822_v37  ;;  %vm789_vm13 = vmpackc.low %vm692_vm12, %vm691_vm11 }
  0x2a   : > { %v5899_v46 = vcombine.low %v1164_v38, %v1181_v39  ;;  %v5901_v47 = vcombine.high %v1164_v38, %v1181_v39  ;;  %1587 = vrot.lane.b32.xlu1 %v5795_v56, %s5667_s20  ;;  %v806_v53 = vsel %vm789_vm13, %v5807_v62, 0  ;;  %v823_v58 = vsel %vm789_vm13, %v193_v3, 0 }
  0x2b   : > { %1012 = vst [vmem:[#allocation2 + $0x30] sm:$0xff] %v5895_v41  ;;  %1013 = vst [vmem:[#allocation2 + $0x38] sm:$0xff] %v5897_v42  ;;  %1585 = vrot.lane.b32.xlu0 %v5785_v51, %s5667_s20  ;;  %v5914_v63 = vcombine.low %v806_v53, %v823_v58  ;;  %v252_v4 = vadd.s32 63, %v218_v49  ;;  %v253_v5 = vadd.s32 63, %v219_v52  ;;  %v254_v10 = vadd.s32 63, %v220_v59 }
  0x2c   : > { %v5916_v11 = vcombine.high %v806_v53, %v823_v58  ;;  %v349_v12 = vand.u32 63, %v251_v2  ;;  %vm2031_vm10 = vcmask 130048   ;;  %v2344_v2 = vld [vmem:[%s5719_s17 + $0x38] sm:$0xff]  ;;  %v223_v19 = vadd.s32 2048, %v5703_v1 }
  0x2d   : > { %1014 = vst [vmem:[#allocation2 + $0x40] sm:$0xff] %v5914_v63  ;;  %v356_v13 = vand.u32 63, %v252_v4  ;;  %v363_v16 = vand.u32 63, %v253_v5  ;;  %v370_v62 = vand.u32 63, %v254_v10  ;;  %v2349_v4 = vld [vmem:[%s5719_s17 + $0xc0] sm:$0xff]  ;;  %v5226_v5 = vcombine.high %v5837_v14, %v5840_v15 }
  0x2e   : > { %1591 = vrot.lane.b32.xlu1 %v5802_v60, %s5667_s20  ;;  %1015 = vst [vmem:[#allocation2 + $0x48] sm:$0xff] %v5916_v11  ;;  %vm1051_vm14 = vcmp.ne.s32.totalorder %v349_v12, 0  ;;  %vm5928_vm1 = vcmp.ne.s32.totalorder %v349_v12, 63  ;;  %v6046_v10 = vcombine.low %v2344_v2, %v2349_v4  ;;  %v224_v22 = vadd.s32 2176, %v5703_v1 }
  0x2f   : > { %1589 = vrot.lane.b32.xlu0 %v5797_v57, %s5667_s20  ;;  %vm1052_vm15 = vcmp.ne.s32.totalorder %v356_v13, 0  ;;  %vm5924_vm0 = vcmp.ne.s32.totalorder %v363_v16, 0  ;;  %vm1054_vm3 = vcmp.ne.s32.totalorder %v370_v62, 0  ;;  %vm5932_vm4 = vcmp.ne.s32.totalorder %v356_v13, 63 }
  0x30   : > { %vm1148_vm2 = vmpackc.low %vm1052_vm15, %vm1051_vm14  ;;  %vm5936_vm5 = vcmp.ne.s32.totalorder %v363_v16, 63  ;;  %vm5940_vm6 = vcmp.ne.s32.totalorder %v370_v62, 63  ;;  %v6052_v16 = vcombine.high %v2344_v2, %v2349_v4  ;;  %v227_v0 = vadd.s32 2560, %v5703_v1 }
  0x31   : > { %v1165_v33 = vsel %vm1148_vm2, %v5823_v8, 0  ;;  %v1182_v36 = vsel %vm1148_vm2, %v5848_v17, 0  ;;  %vm1149_vm7 = vmpackc.low %vm1054_vm3, %vm5924_vm0 }
  0x32   : > { %1675 = vrot.lane.b32.xlu1 %v5733_v27, %s5668_s21  ;;  %v5952_v37 = vcombine.low %v1165_v33, %v1182_v36  ;;  %v5954_v38 = vcombine.high %v1165_v33, %v1182_v36  ;;  %v1166_v39 = vsel %vm1149_vm7, %v5851_v18, 0  ;;  %v1183_v48 = vsel %vm1149_vm7, %v5858_v24, 0  ;;  %vm790_vm8 = vmpackc.low %vm5932_vm4, %vm5928_vm1 }
  0x33   : > { %1583 = vrot.lane.b32.xlu0 %v5789_v54, %s5667_s20  ;;  %v5962_v27 = vcombine.low %v1166_v39, %v1183_v48  ;;  %v807_v49 = vsel %vm790_vm8, %v5823_v8, 0  ;;  %v824_v52 = vsel %vm790_vm8, %v5848_v17, 0  ;;  %vm791_vm9 = vmpackc.low %vm5940_vm6, %vm5936_vm5  ;;  %v5410_v17 = vld [vmem:[%s5719_s17 + $0x14] ss:$136 sps:$4 sm:$0xff]   ;;  %vm1479_vm7 = vcmask 1039360  }
  0x34   : > { %v5970_v54 = vcombine.low %v807_v49, %v824_v52  ;;  %v5972_v53 = vcombine.high %v807_v49, %v824_v52  ;;  %v5975_v58 = vsel %vm791_vm9, %v5851_v18, 0  ;;  %v5978_v59 = vsel %vm791_vm9, %v5858_v24, 0  ;;  %v6018_v18 = vld.sshfl [vmem:[%s7450_s1] sm:$0x33 pattern:$0x76325410] }
  0x35   : > { %v5984_v8 = vcombine.low %v5975_v58, %v5978_v59  ;;  %v6032_v24 = vcombine.high %v1166_v39, %v1183_v48  ;;  %v6065_v48 = vld [vmem:[%s5719_s17 + $0x40] sm:$0xff]  ;;  %v6068_v49 = vld [vmem:[%s5719_s17 + $0xc8] sm:$0xff]  ;;  %vm1540_vm8 = vcmask 1031168   ;;  %vm1601_vm9 = vcmask 523264  }
  0x36   : > { %1679 = vrot.lane.b32.xlu1 %v5726_v20, %s5668_s21  ;;  %1016 = vst [vmem:[#allocation2 + $0x50] sm:$0xff] %v5970_v54  ;;  %1017 = vst [vmem:[#allocation2 + $0x58] sm:$0xff] %v5972_v53  ;;  %v5405_v20 = vld [vmem:[%s5719_s17 + $0x8] ss:$136 sps:$4 sm:$0xff]  }
  0x37   : > { %1677 = vrot.lane.b32.xlu0 %v5728_v21, %s5668_s21  ;;  %1018 = vst [vmem:[#allocation2 + $0x60] sm:$0xff] %v5984_v8  ;;  %v5409_v21 = vld [vmem:[%s5719_s17 + $0x10] ss:$136 sps:$4 sm:$0xff]  }
  0x3a   : > { %1673 = vrot.lane.b32.xlu1 %v5735_v28, %s5668_s21  ;;  %v5407_v28 = vld [vmem:[%s5719_s17 + $0xc] ss:$136 sps:$4 sm:$0xff]  }
  0x3b   : > { %1681 = vrot.lane.b32.xlu0 %v5737_v29, %s5668_s21  ;;  %v5412_v29 = vld [vmem:[%s5719_s17 + $0x4] ss:$136 sps:$4 sm:$0xff]  }
  0x3e   : > { %1738 = vrot.lane.b32.xlu1 %v5765_v40, %s5669_s22 }
  0x3f   : > { %1736 = vrot.lane.b32.xlu0 %v5773_v43, %s5669_s22 }
  0x42   : > { %1742 = vrot.lane.b32.xlu1 %v5783_v50, %s5669_s22 }
  0x43   : > { %1740 = vrot.lane.b32.xlu0 %v5777_v44, %s5669_s22 }
  0x46   : > { %1842 = vrot.lane.b32.xlu1 %v5405_v20, %s5665_s18 }
  0x47   : > { %1734 = vrot.lane.b32.xlu0 %v5779_v45, %s5669_s22  ;;  %v6022_v45 = vcombine.high %v6018_v18, %v6018_v18 }
  0x49   : > { %5247 = vmatprep.mubr.msk.bf16.mxu0 %vm2031_vm10, %v6022_v45  ;;  %5248 = vmatprep.mubr.msk.bf16.mxu1 %vm2031_vm10, %v6022_v45 }
  0x4a   : > { %1846 = vrot.lane.b32.xlu1 %v5409_v21, %s5665_s18 }
  0x4b   : > { %1844 = vrot.lane.b32.xlu0 %v5407_v28, %s5665_s18 }
  0x4e   : > { %1840 = vrot.lane.b32.xlu1 %v5412_v29, %s5665_s18  ;;  %v6083_v29 = vcombine.high %v5975_v58, %v5978_v59 }
  0x4f   : > { %1848 = vrot.lane.b32.xlu0 %v5410_v17, %s5665_s18 }
  0x50   : > { %1019 = vst [vmem:[#allocation2 + $0x68] sm:$0xff] %v6083_v29 }
  0x52   : > { %1904 = vrot.lane.b32.xlu1 %v5777_v44, %s5666_s19  ;;  %v221_v44 = vadd.s32 1792, %v5703_v1 }
  0x53   : > { %1902 = vrot.lane.b32.xlu0 %v5765_v40, %s5666_s19  ;;  %v222_v40 = vadd.s32 1920, %v5703_v1 }
  0x54   : > { %v255_v12 = vadd.s32 63, %v221_v44 }
  0x55   : > { %v256_v13 = vadd.s32 63, %v222_v40 }
  0x56   : > { %1908 = vrot.lane.b32.xlu1 %v5791_v55, %s5666_s19  ;;  %v377_v62 = vand.u32 63, %v255_v12  ;;  %v5417_v12 = vld [vmem:[%s5719_s17 + $0x20] ss:$136 sps:$4 sm:$0xff]  }
  0x57   : > { %1906 = vrot.lane.b32.xlu0 %v5783_v50, %s5666_s19  ;;  %v5225_v50 = vcombine.low %v5837_v14, %v5840_v15  ;;  %v384_v3 = vand.u32 63, %v256_v13  ;;  %v257_v14 = vadd.s32 63, %v223_v19  ;;  %v258_v15 = vadd.s32 63, %v224_v22  ;;  %v5418_v13 = vld [vmem:[%s5719_s17 + $0x18] ss:$136 sps:$4 sm:$0xff]  }
  0x58   : > { %vm1055_vm11 = vcmp.ne.s32.totalorder %v377_v62, 0  ;;  %vm697_vm1 = vcmp.ne.s32.totalorder %v377_v62, 63 }
  0x59   : > { %vm1056_vm12 = vcmp.ne.s32.totalorder %v384_v3, 0  ;;  %v391_v33 = vand.u32 63, %v257_v14  ;;  %v398_v39 = vand.u32 63, %v258_v15  ;;  %vm698_vm2 = vcmp.ne.s32.totalorder %v384_v3, 63 }
  0x5a   : > { %1471 = vrot.lane.b32.xlu1 %v5804_v61, %s5665_s18  ;;  %vm1150_vm13 = vmpackc.low %vm1056_vm12, %vm1055_vm11 }
  0x5b   : > { %1900 = vrot.lane.b32.xlu0 %v5773_v43, %s5666_s19  ;;  %v5416_v43 = vld [vmem:[%s5719_s17 + $0x20] ss:$136 sps:$4 sm:$0xff]   ;;  %v1167_v23 = vsel %vm1150_vm13, %v2344_v2, 0  ;;  %v1184_v32 = vsel %vm1150_vm13, %v2349_v4, 0  ;;  %vm1057_vm14 = vcmp.ne.s32.totalorder %v391_v33, 0  ;;  %vm1058_vm15 = vcmp.ne.s32.totalorder %v398_v39, 0  ;;  %vm792_vm3 = vmpackc.low %vm698_vm2, %vm697_vm1 }
  0x5c   : > { %v6061_v36 = vcombine.low %v1167_v23, %v1184_v32  ;;  %v6070_v52 = vcombine.high %v1167_v23, %v1184_v32  ;;  %vm1151_vm0 = vmpackc.low %vm1058_vm15, %vm1057_vm14  ;;  %v809_v17 = vsel %vm792_vm3, %v2344_v2, 0  ;;  %v826_v44 = vsel %vm792_vm3, %v2349_v4, 0 }
  0x5d   : > { %v1168_v20 = vsel %vm1151_vm0, %v6065_v48, 0  ;;  %v1185_v21 = vsel %vm1151_vm0, %v6068_v49, 0  ;;  %v6087_v40 = vcombine.low %v809_v17, %v826_v44  ;;  %vm699_vm4 = vcmp.ne.s32.totalorder %v391_v33, 63  ;;  %v6155_v33 = vld [vmem:[%s5719_s17 + $0x48] sm:$0xff] }
  0x5e   : > { %1475 = vrot.lane.b32.xlu1 %v5226_v5, %s5665_s18  ;;  %v6078_v28 = vcombine.low %v1168_v20, %v1185_v21  ;;  %vm700_vm5 = vcmp.ne.s32.totalorder %v398_v39, 63  ;;  %v6093_v58 = vcombine.high %v809_v17, %v826_v44  ;;  %v6145_v15 = vcombine.high %v1168_v20, %v1185_v21  ;;  %v6158_v39 = vld [vmem:[%s5719_s17 + $0xd0] sm:$0xff] }
  0x5f   : > { %1473 = vrot.lane.b32.xlu0 %v5225_v50, %s5665_s18  ;;  %1020 = vst [vmem:[#allocation2 + $0x70] sm:$0xff] %v6087_v40  ;;  %vm793_vm6 = vmpackc.low %vm700_vm5, %vm699_vm4  ;;  %v6152_v32 = vcombine.high %v6065_v48, %v6068_v49  ;;  %v6171_v44 = vcombine.high %v6155_v33, %v6158_v39  ;;  %vm1691_vm4 = vcmask 515072  }
  0x60   : > { %1380 = vst [vmem:[#allocation3 + $0x80] sm:$0xff] %v6078_v28  ;;  %v6096_v59 = vsel %vm793_vm6, %v6065_v48, 0  ;;  %v6099_v2 = vsel %vm793_vm6, %v6068_v49, 0  ;;  %1021 = vst [vmem:[#allocation2 + $0x78] sm:$0xff] %v6093_v58 }
  0x61   : > { %v6105_v4 = vcombine.low %v6096_v59, %v6099_v2  ;;  %1381 = vst [vmem:[#allocation3 + $0x88] sm:$0xff] %v6145_v15  ;;  %7486 = vst [vmem:[#allocation5_spill] sm:$0xff] %v6171_v44 }
  0x62   : > { %1532 = vrot.lane.b32.xlu1 %v5791_v55, %s5666_s19 }
  0x63   : > { %1477 = vrot.lane.b32.xlu0 %v5416_v43, %s5665_s18  ;;  %1022 = vst [vmem:[#allocation2 + $0x80] sm:$0xff] %v6105_v4 }
  0x66   : > { %1536 = vrot.lane.b32.xlu1 %v5890_v35, %s5666_s19 }
  0x67   : > { %1534 = vrot.lane.b32.xlu0 %v5888_v34, %s5666_s19 }
  0x6a   : > { %1593 = vrot.lane.b32.xlu1 %v5816_v6, %s5667_s20 }
  0x6b   : > { %1538 = vrot.lane.b32.xlu0 %v5899_v46, %s5666_s19 }
  0x6e   : > { %1597 = vrot.lane.b32.xlu1 %v5897_v42, %s5667_s20 }
  0x6f   : > { %1595 = vrot.lane.b32.xlu0 %v5895_v41, %s5667_s20 }
  0x72   : > { %1683 = vrot.lane.b32.xlu1 %v5804_v61, %s5668_s21  ;;  %v5421_v61 = vld [vmem:[%s5719_s17 + $0x20] ss:$136 sps:$4 sm:$0xff]  }
  0x73   : > { %1599 = vrot.lane.b32.xlu0 %v5914_v63, %s5667_s20 }
  0x76   : > { %1687 = vrot.lane.b32.xlu1 %v5226_v5, %s5668_s21  ;;  %v5419_v5 = vld [vmem:[%s5719_s17 + $0x1c] ss:$136 sps:$4 sm:$0xff]  }
  0x77   : > { %1685 = vrot.lane.b32.xlu0 %v5225_v50, %s5668_s21 }
  0x7a   : > { %1744 = vrot.lane.b32.xlu1 %v5791_v55, %s5669_s22  ;;  %v5422_v55 = vld [vmem:[%s5719_s17 + $0x24] ss:$136 sps:$4 sm:$0xff]  }
  0x7b   : > { %1689 = vrot.lane.b32.xlu0 %v5417_v12, %s5668_s21  ;;  %v6174_v12 = vld [vmem:[%s5719_s17 + $0x50] sm:$0xff] }
  0x7e   : > { %1748 = vrot.lane.b32.xlu1 %v5890_v35, %s5669_s22 }
  0x7f   : > { %1746 = vrot.lane.b32.xlu0 %v5888_v34, %s5669_s22 }
  0x82   : > { %1850 = vrot.lane.b32.xlu1 %v5418_v13, %s5665_s18  ;;  %v6177_v13 = vld [vmem:[%s5719_s17 + $0xd8] sm:$0xff] }
  0x83   : > { %1750 = vrot.lane.b32.xlu0 %v5899_v46, %s5669_s22 }
  0x86   : > { %1854 = vrot.lane.b32.xlu1 %v5421_v61, %s5665_s18  ;;  %v225_v61 = vadd.s32 2304, %v5703_v1 }
  0x87   : > { %1852 = vrot.lane.b32.xlu0 %v5419_v5, %s5665_s18  ;;  %v226_v5 = vadd.s32 2432, %v5703_v1 }
  0x88   : > { %v1468_v50 = vpop.permute.xlu1 %1467 }
  0x89   : > { %v1464_v62 = vpop.permute.xlu0 %1463 }
  0x8a   : > { %1910 = vrot.lane.b32.xlu1 %v5888_v34, %s5666_s19 }
  0x8b   : > { %1856 = vrot.lane.b32.xlu0 %v5422_v55, %s5665_s18 }
  0x8c   : > { %v6137_v3 = vpop.permute.xlu1 %1469 }
  0x8d   : > { %v1466_v19 = vpop.permute.xlu0 %1465  ;;  %v1483_v22 = vsel %vm1479_vm7, %v1468_v50, %v6137_v3 }
  0x8e   : > { %2078 = vmatprep.subr.bf16.mxu1 %v1483_v22  ;;  %v1482_v43 = vsel %vm1479_vm7, %v1466_v19, %v1468_v50  ;;  %v1481_v14 = vsel %vm1479_vm7, %v1464_v62, %v1466_v19  ;;  %1914 = vrot.lane.b32.xlu1 %v5899_v46, %s5666_s19  ;;  %v6186_v50 = vcombine.low %v6174_v12, %v6177_v13  ;;  %v260_v19 = vadd.s32 63, %v226_v5 }
  0x8f   : > { %2079 = vmatpush1.bf16.msra.mxu1 %v1482_v43  ;;  %1912 = vrot.lane.b32.xlu0 %v5890_v35, %s5666_s19  ;;  %v6165_v35 = vcombine.low %v6155_v33, %v6158_v39  ;;  %v228_v5 = vadd.s32 2688, %v5703_v1 }
  0x90   : > { %2037 = vmatprep.subr.bf16.mxu0 %v1481_v14  ;;  %v1525_v34 = vpop.permute.xlu1 %1524 }
  0x91   : > { %v1462_v23 = vpop.permute.xlu0 %1461 }
  0x92   : > { %v1480_v20 = vsel %vm1479_vm7, %v1462_v23, %v1464_v62  ;;  %2390 = vrot.lane.b32.xlu1 %v5820_v7, %s5665_s18  ;;  %v259_v62 = vadd.s32 63, %v225_v61  ;;  %v6200_v61 = vcombine.low %v6065_v48, %v6068_v49 }
  0x93   : > { %2038 = vmatpush1.bf16.msra.mxu0 %v1480_v20  ;;  %1916 = vrot.lane.b32.xlu0 %v5901_v47, %s5666_s19  ;;  %v412_v20 = vand.u32 63, %v260_v19  ;;  %v262_v19 = vadd.s32 63, %v228_v5 }
  0x94   : > { %v1529_v21 = vpop.permute.xlu1 %1528  ;;  %v405_v23 = vand.u32 63, %v259_v62  ;;  %7487 = vst [vmem:[#allocation6_spill] sm:$0xff] %v6200_v61 }
  0x95   : > { %v1527_v17 = vpop.permute.xlu0 %1526  ;;  %vm1060_vm12 = vcmp.ne.s32.totalorder %v412_v20, 0  ;;  %vm702_vm2 = vcmp.ne.s32.totalorder %v412_v20, 63 }
  0x96   : > { %v1542_v55 = vsel %vm1540_vm8, %v1525_v34, %v1527_v17  ;;  %2394 = vrot.lane.b32.xlu1 %v5868_v26, %s5665_s18  ;;  %vm1059_vm11 = vcmp.ne.s32.totalorder %v405_v23, 0  ;;  %vm701_vm1 = vcmp.ne.s32.totalorder %v405_v23, 63 }
  0x97   : > { %2392 = vrot.lane.b32.xlu0 %v5864_v25, %s5665_s18  ;;  %2039 = vmatprep.subr.bf16.mxu0 %v1542_v55  ;;  %v261_v55 = vadd.s32 63, %v227_v0  ;;  %vm1152_vm13 = vmpackc.low %vm1060_vm12, %vm1059_vm11  ;;  %v426_v0 = vand.u32 63, %v262_v19  ;;  %vm1752_vm12 = vcmask 506880  }
  0x98   : > { %v1523_v22 = vpop.permute.xlu1 %1522  ;;  %v1186_v48 = vsel %vm1152_vm13, %v6158_v39, 0  ;;  %vm794_vm3 = vmpackc.low %vm702_vm2, %vm701_vm1 }
  0x99   : > { %v6190_v43 = vpop.permute.xlu0 %1530  ;;  %v1541_v14 = vsel %vm1540_vm8, %v1523_v22, %v1525_v34  ;;  %v1543_v34 = vsel %vm1540_vm8, %v1527_v17, %v1529_v21  ;;  %v419_v49 = vand.u32 63, %v261_v55  ;;  %vm1062_vm15 = vcmp.ne.s32.totalorder %v426_v0, 0 }
  0x9a   : > { %v1544_v44 = vsel %vm1540_vm8, %v1529_v21, %v6190_v43  ;;  %2388 = vrot.lane.b32.xlu1 %v5826_v9, %s5665_s18  ;;  %2040 = vmatpush1.bf16.msra.mxu0 %v1541_v14  ;;  %v1169_v14 = vsel %vm1152_vm13, %v6155_v33, 0  ;;  %vm704_vm6 = vcmp.ne.s32.totalorder %v426_v0, 63 }
  0x9b   : > { %2080 = vmatprep.subr.bf16.mxu1 %v1544_v44  ;;  %2396 = vrot.lane.b32.xlu0 %v5872_v30, %s5665_s18  ;;  %v6211_v61 = vcombine.low %v1169_v14, %v1186_v48  ;;  %v6213_v21 = vcombine.high %v1169_v14, %v1186_v48  ;;  %vm1061_vm14 = vcmp.ne.s32.totalorder %v419_v49, 0  ;;  %vm703_vm5 = vcmp.ne.s32.totalorder %v419_v49, 63 }
  0x9c   : > { %2081 = vmatpush1.bf16.msra.mxu1 %v1543_v34  ;;  %v1588_v62 = vpop.permute.xlu1 %1587  ;;  %vm1153_vm0 = vmpackc.low %vm1062_vm15, %vm1061_vm14 }
  0x9d   : > { %v1586_v22 = vpop.permute.xlu0 %1585  ;;  %7488 = vst [vmem:[#allocation7_spill] sm:$0xff] %v6211_v61  ;;  %7489 = vst [vmem:[#allocation8_spill] sm:$0xff] %v6213_v21  ;;  %v6227_v19 = vsel %vm1153_vm0, %v6174_v12, 0  ;;  %v6230_v14 = vsel %vm1153_vm0, %v6177_v13, 0 }
  0x9e   : > { %2452 = vrot.lane.b32.xlu1 %v5952_v37, %s5666_s19  ;;  %v1603_v44 = vsel %vm1601_vm9, %v1586_v22, %v1588_v62  ;;  %1382 = vst [vmem:[#allocation3 + $0x90] sm:$0xff] %v6211_v61  ;;  %1383 = vst [vmem:[#allocation3 + $0x98] sm:$0xff] %v6213_v21  ;;  %v6236_v48 = vcombine.low %v6227_v19, %v6230_v14  ;;  %v811_v61 = vsel %vm794_vm3, %v6155_v33, 0 }
  0x9f   : > { %2450 = vrot.lane.b32.xlu0 %v5901_v47, %s5666_s19  ;;  %2041 = vmatprep.subr.bf16.mxu0 %v1603_v44  ;;  %vm795_vm11 = vmpackc.low %vm704_vm6, %vm703_vm5 }
  0xa0   : > { %v6217_v17 = vpop.permute.xlu1 %1591  ;;  %1384 = vst [vmem:[#allocation3 + $0xa0] sm:$0xff] %v6236_v48 }
  0xa1   : > { %v1590_v5 = vpop.permute.xlu0 %1589 }
  0xa2   : > { %2456 = vrot.lane.b32.xlu1 %v5962_v27, %s5666_s19  ;;  %v1605_v34 = vsel %vm1601_vm9, %v1590_v5, %v6217_v17  ;;  %v1604_v55 = vsel %vm1601_vm9, %v1588_v62, %v1590_v5  ;;  %v6241_v5 = vcombine.high %v6096_v59, %v6099_v2 }
  0xa3   : > { %2454 = vrot.lane.b32.xlu0 %v5954_v38, %s5666_s19  ;;  %2082 = vmatprep.subr.bf16.mxu1 %v1605_v34  ;;  %v828_v34 = vsel %vm794_vm3, %v6158_v39, 0  ;;  %v6260_v39 = vsel %vm795_vm11, %v6177_v13, 0 }
  0xa4   : > { %2083 = vmatpush1.bf16.msra.mxu1 %v1604_v55  ;;  %v1676_v44 = vpop.permute.xlu1 %1675  ;;  %v6248_v23 = vcombine.low %v811_v61, %v828_v34  ;;  %1023 = vst [vmem:[#allocation2 + $0x88] sm:$0xff] %v6241_v5  ;;  %v6254_v33 = vcombine.high %v811_v61, %v828_v34 }
  0xa5   : > { %v1584_v62 = vpop.permute.xlu0 %1583 }
  0xa6   : > { %v1602_v21 = vsel %vm1601_vm9, %v1584_v62, %v1586_v22  ;;  %2510 = vrot.lane.b32.xlu1 %v5916_v11, %s5667_s20  ;;  %1024 = vst [vmem:[#allocation2 + $0x90] sm:$0xff] %v6248_v23  ;;  %v6257_v11 = vsel %vm795_vm11, %v6174_v12, 0  ;;  %1025 = vst [vmem:[#allocation2 + $0x98] sm:$0xff] %v6254_v33 }
  0xa7   : > { %2448 = vrot.lane.b32.xlu0 %v5899_v46, %s5666_s19  ;;  %2042 = vmatpush1.bf16.msra.mxu0 %v1602_v21  ;;  %v6267_v22 = vcombine.low %v6257_v11, %v6260_v39 }
  0xa8   : > { %v1680_v59 = vpop.permute.xlu1 %1679 }
  0xa9   : > { %v1678_v2 = vpop.permute.xlu0 %1677  ;;  %1026 = vst [vmem:[#allocation2 + $0xa0] sm:$0xff] %v6267_v22 }
  0xaa   : > { %v1693_v20 = vsel %vm1691_vm4, %v1676_v44, %v1678_v2  ;;  %2514 = vrot.lane.b32.xlu1 %v5972_v53, %s5667_s20 }
  0xab   : > { %2512 = vrot.lane.b32.xlu0 %v5970_v54, %s5667_s20  ;;  %2043 = vmatprep.subr.bf16.mxu0 %v1693_v20  ;;  %v1694_v54 = vsel %vm1691_vm4, %v1678_v2, %v1680_v59 }
  0xac   : > { %v1674_v61 = vpop.permute.xlu1 %1673 }
  0xad   : > { %v6273_v49 = vpop.permute.xlu0 %1681  ;;  %v1692_v21 = vsel %vm1691_vm4, %v1674_v61, %v1676_v44 }
  0xae   : > { %v1695_v0 = vsel %vm1691_vm4, %v1680_v59, %v6273_v49  ;;  %2508 = vrot.lane.b32.xlu1 %v5914_v63, %s5667_s20  ;;  %2044 = vmatpush1.bf16.msra.mxu0 %v1692_v21  ;;  %v5431_v21 = vld [vmem:[%s5719_s17 + $0x2c] ss:$136 sps:$4 sm:$0xff]  }
  0xaf   : > { %2516 = vrot.lane.b32.xlu0 %v5984_v8, %s5667_s20  ;;  %2084 = vmatprep.subr.bf16.mxu1 %v1695_v0  ;;  %v5429_v0 = vld [vmem:[%s5719_s17 + $0x28] ss:$136 sps:$4 sm:$0xff]  }
  0xb0   : > { %2085 = vmatpush1.bf16.msra.mxu1 %v1694_v54  ;;  %v1739_v55 = vpop.permute.xlu1 %1738 }
  0xb1   : > { %v1737_v62 = vpop.permute.xlu0 %1736 }
  0xb2   : > { %2601 = vrot.lane.b32.xlu1 %v5864_v25, %s5668_s21  ;;  %v1754_v44 = vsel %vm1752_vm12, %v1737_v62, %v1739_v55 }
  0xb3   : > { %2599 = vrot.lane.b32.xlu0 %v5820_v7, %s5668_s21  ;;  %2045 = vmatprep.subr.bf16.mxu0 %v1754_v44  ;;  %v5434_v44 = vld [vmem:[%s5719_s17 + $0x34] ss:$136 sps:$4 sm:$0xff]  }
  0xb4   : > { %v6288_v63 = vpop.permute.xlu1 %1742 }
  0xb5   : > { %v1741_v34 = vpop.permute.xlu0 %1740 }
  0xb6   : > { %2605 = vrot.lane.b32.xlu1 %v5872_v30, %s5668_s21  ;;  %v1756_v8 = vsel %vm1752_vm12, %v1741_v34, %v6288_v63  ;;  %v1755_v59 = vsel %vm1752_vm12, %v1739_v55, %v1741_v34 }
  0xb7   : > { %2603 = vrot.lane.b32.xlu0 %v5868_v26, %s5668_s21  ;;  %2086 = vmatprep.subr.bf16.mxu1 %v1756_v8 }
  0xb8   : > { %2087 = vmatpush1.bf16.msra.mxu1 %v1755_v59  ;;  %v1843_v25 = vpop.permute.xlu1 %1842 }
  0xb9   : > { %v1735_v2 = vpop.permute.xlu0 %1734  ;;  %2088 = vmatprep.subr.bf16.mxu1 %v5802_v60 }
  0xba   : > { %v1753_v7 = vsel %vm1752_vm12, %v1735_v2, %v1737_v62  ;;  %2659 = vrot.lane.b32.xlu1 %v5901_v47, %s5669_s22  ;;  %v5437_v2 = vld [vmem:[%s5719_s17 + $0x24] ss:$136 sps:$4 sm:$0xff]  }
  0xbb   : > { %2597 = vrot.lane.b32.xlu0 %v5826_v9, %s5668_s21  ;;  %2046 = vmatpush1.bf16.msra.mxu0 %v1753_v7 }
  0xbc   : > { %2047 = vmatprep.subr.bf16.mxu0 %v5795_v56  ;;  %2089 = vmatpush1.bf16.msra.mxu1 %v5797_v57  ;;  %v1847_v26 = vpop.permute.xlu1 %1846 }
  0xbd   : > { %v1845_v30 = vpop.permute.xlu0 %1844 }
  0xbe   : > { %v1859_v20 = vsel %vm1479_vm7, %v1843_v25, %v1845_v30  ;;  %2663 = vrot.lane.b32.xlu1 %v5954_v38, %s5669_s22 }
  0xbf   : > { %2661 = vrot.lane.b32.xlu0 %v5952_v37, %s5669_s22  ;;  %2048 = vmatpush1.bf16.msra.mxu0 %v5785_v51  ;;  %v1860_v51 = vsel %vm1479_vm7, %v1845_v30, %v1847_v26 }
  0xc0   : > { %2049 = vmatprep.subr.bf16.mxu0 %v1859_v20  ;;  %v1841_v9 = vpop.permute.xlu1 %1840 }
  0xc1   : > { %v6311_v61 = vpop.permute.xlu0 %1848  ;;  %v1858_v56 = vsel %vm1479_vm7, %v1841_v9, %v1843_v25 }
  0xc2   : > { %v1861_v57 = vsel %vm1479_vm7, %v1847_v26, %v6311_v61  ;;  %2657 = vrot.lane.b32.xlu1 %v5899_v46, %s5669_s22  ;;  %v5433_v46 = vld [vmem:[%s5719_s17 + $0x30] ss:$136 sps:$4 sm:$0xff]  }
  0xc3   : > { %2665 = vrot.lane.b32.xlu0 %v5962_v27, %s5669_s22  ;;  %2090 = vmatprep.subr.bf16.mxu1 %v1861_v57  ;;  %v6376_v57 = vld [vmem:[%s5719_s17 + $0xe0] sm:$0xff] }
  0xc4   : > { %2091 = vmatpush1.bf16.msra.mxu1 %v1860_v51  ;;  %2050 = vmatpush1.bf16.msra.mxu0 %v1858_v56  ;;  %v1905_v54 = vpop.permute.xlu1 %1904  ;;  %v6373_v56 = vld [vmem:[%s5719_s17 + $0x58] sm:$0xff] }
  0xc5   : > { %v1903_v55 = vpop.permute.xlu0 %1902  ;;  %v6386_v51 = vcombine.low %v6373_v56, %v6376_v57 }
  0xc6   : > { %2766 = vrot.lane.b32.xlu1 %v5431_v21, %s5665_s18  ;;  %v1919_v62 = vsel %vm1540_vm8, %v1903_v55, %v1905_v54  ;;  %v230_v21 = vadd.s32 2944, %v5703_v1 }
  0xc7   : > { %2764 = vrot.lane.b32.xlu0 %v5429_v0, %s5665_s18  ;;  %2051 = vmatprep.subr.bf16.mxu0 %v1919_v62  ;;  %v6390_v0 = vcombine.high %v6373_v56, %v6376_v57 }
  0xc8   : > { %v6328_v34 = vpop.permute.xlu1 %1908  ;;  %v264_v62 = vadd.s32 63, %v230_v21 }
  0xc9   : > { %v1907_v8 = vpop.permute.xlu0 %1906 }
  0xca   : > { %2770 = vrot.lane.b32.xlu1 %v5434_v44, %s5665_s18  ;;  %v1921_v59 = vsel %vm1540_vm8, %v1907_v8, %v6328_v34  ;;  %v1920_v25 = vsel %vm1540_vm8, %v1905_v54, %v1907_v8 }
  0xcb   : > { %2768 = vrot.lane.b32.xlu0 %v5433_v46, %s5665_s18  ;;  %2092 = vmatprep.subr.bf16.mxu1 %v1921_v59  ;;  %v440_v59 = vand.u32 63, %v264_v62  ;;  %v6436_v62 = vcombine.high %v6257_v11, %v6260_v39 }
  0xcc   : > { %2093 = vmatpush1.bf16.msra.mxu1 %v1920_v25  ;;  %v1472_v7 = vpop.permute.xlu1 %1471  ;;  %v231_v25 = vadd.s32 3072, %v5703_v1 }
  0xcd   : > { %v1901_v26 = vpop.permute.xlu0 %1900  ;;  %2158 = vmatprep.subr.bf16.mxu1 %v5897_v42  ;;  %vm1064_vm14 = vcmp.ne.s32.totalorder %v440_v59, 0  ;;  %vm706_vm5 = vcmp.ne.s32.totalorder %v440_v59, 63  ;;  %1027 = vst [vmem:[#allocation2 + $0xa8] sm:$0xff] %v6436_v62 }
  0xce   : > { %v1918_v30 = vsel %vm1540_vm8, %v1901_v26, %v1903_v55  ;;  %2824 = vrot.lane.b32.xlu1 %v5952_v37, %s5666_s19  ;;  %v6352_v37 = vcombine.high %v6227_v19, %v6230_v14  ;;  %v265_v26 = vadd.s32 63, %v231_v25 }
  0xcf   : > { %2762 = vrot.lane.b32.xlu0 %v5437_v2, %s5665_s18  ;;  %2052 = vmatpush1.bf16.msra.mxu0 %v1918_v30 }
  0xd0   : > { %2117 = vmatprep.subr.bf16.mxu0 %v5816_v6  ;;  %2109 = vmatmul.mubr.bf16.vlgmr.msra.gmra.mrb[0].mxu1 %v6018_v18  ;;  %v1476_v20 = vpop.permute.xlu1 %1475  ;;  %1385 = vst [vmem:[#allocation3 + $0xa8] sm:$0xff] %v6352_v37 }
  0xd1   : > { %v1474_v9 = vpop.permute.xlu0 %1473  ;;  %2159 = vmatpush1.bf16.msra.mxu1 %v5895_v41  ;;  %5250 = vmatprep.mubr.msk.bf16.mxu1 %vm2031_vm10, %v6022_v45 }
  0xd2   : > { %2068 = vmatmul.mubr.bf16.vlgmr.msra.gmra.mrb[0].mxu0 %v6018_v18  ;;  %v1485_v42 = vsel %vm1479_vm7, %v1472_v7, %v1474_v9  ;;  %2828 = vrot.lane.b32.xlu1 %v5962_v27, %s5666_s19  ;;  %v1484_v27 = vsel %vm1479_vm7, %v6137_v3, %v1472_v7  ;;  %v232_v7 = vadd.s32 3200, %v5703_v1 }
  0xd3   : > { %2826 = vrot.lane.b32.xlu0 %v5954_v38, %s5666_s19  ;;  %2118 = vmatpush1.bf16.msra.mxu0 %v5802_v60  ;;  %v6367_v60 = vcombine.high %v6174_v12, %v6177_v13  ;;  %v1486_v38 = vsel %vm1479_vm7, %v1474_v9, %v1476_v20  ;;  %v5440_v13 = vld [vmem:[%s5719_s17 + $0x40] ss:$136 sps:$4 sm:$0xff]  }
  0xd4   : > { %2119 = vmatprep.subr.bf16.mxu0 %v1485_v42  ;;  %v1533_v6 = vpop.permute.xlu1 %1532  ;;  %5249 = vmatprep.mubr.msk.bf16.mxu0 %vm2031_vm10, %v6022_v45 }
  0xd5   : > { %v1478_v41 = vpop.permute.xlu0 %1477  ;;  %v1545_v54 = vsel %vm1540_vm8, %v6190_v43, %v1533_v6 }
  0xd6   : > { %v1487_v19 = vsel %vm1479_vm7, %v1476_v20, %v1478_v41  ;;  %2822 = vrot.lane.b32.xlu1 %v5901_v47, %s5666_s19  ;;  %v229_v47 = vadd.s32 2816, %v5703_v1  ;;  %v266_v20 = vadd.s32 63, %v232_v7  ;;  %v447_v41 = vand.u32 63, %v265_v26 }
  0xd7   : > { %2830 = vrot.lane.b32.xlu0 %v6032_v24, %s5666_s19  ;;  %2120 = vmatpush1.bf16.msra.mxu0 %v1484_v27 }
  0xd8   : > { %2160 = vmatprep.subr.bf16.mxu1 %v1487_v19  ;;  %v1537_v14 = vpop.permute.xlu1 %1536  ;;  %v263_v55 = vadd.s32 63, %v229_v47  ;;  %vm6416_vm0 = vcmp.ne.s32.totalorder %v447_v41, 0  ;;  %vm707_vm11 = vcmp.ne.s32.totalorder %v447_v41, 63 }
  0xd9   : > { %2161 = vmatpush1.bf16.msra.mxu1 %v1486_v38  ;;  %v1535_v3 = vpop.permute.xlu0 %1534 }
  0xda   : > { %v1546_v12 = vsel %vm1540_vm8, %v1533_v6, %v1535_v3  ;;  %2400 = vrot.lane.b32.xlu1 %v6046_v10, %s5665_s18  ;;  %v433_v8 = vand.u32 63, %v263_v55  ;;  %v1547_v43 = vsel %vm1540_vm8, %v1535_v3, %v1537_v14  ;;  %v454_v3 = vand.u32 63, %v266_v20 }
  0xdb   : > { %2398 = vrot.lane.b32.xlu0 %v5876_v31, %s5665_s18  ;;  %2121 = vmatprep.subr.bf16.mxu0 %v1546_v12  ;;  %v6423_v12 = vld [vmem:[%s5719_s17 + $0x60] sm:$0xff] }
  0xdc   : > { %2122 = vmatpush1.bf16.msra.mxu0 %v1545_v54  ;;  %v1594_v44 = vpop.permute.xlu1 %1593  ;;  %vm1063_vm13 = vcmp.ne.s32.totalorder %v433_v8, 0  ;;  %vm1066_vm1 = vcmp.ne.s32.totalorder %v454_v3, 0  ;;  %vm705_vm3 = vcmp.ne.s32.totalorder %v433_v8, 63 }
  0xdd   : > { %v1539_v46 = vpop.permute.xlu0 %1538  ;;  %vm1154_vm15 = vmpackc.low %vm1064_vm14, %vm1063_vm13  ;;  %vm708_vm13 = vcmp.ne.s32.totalorder %v454_v3, 63 }
  0xde   : > { %v1548_v2 = vsel %vm1540_vm8, %v1537_v14, %v1539_v46  ;;  %2404 = vrot.lane.b32.xlu1 %v5440_v13, %s5665_s18  ;;  %v1171_v42 = vsel %vm1154_vm15, %v6373_v56, 0  ;;  %v1188_v6 = vsel %vm1154_vm15, %v6376_v57, 0  ;;  %v1606_v14 = vsel %vm1601_vm9, %v6217_v17, %v1594_v44  ;;  %v6426_v13 = vld [vmem:[%s5719_s17 + $0xe8] sm:$0xff]  ;;  %vm1155_vm2 = vmpackc.low %vm1066_vm1, %vm6416_vm0 }
  0xdf   : > { %2402 = vrot.lane.b32.xlu0 %v6052_v16, %s5665_s18  ;;  %2162 = vmatprep.subr.bf16.mxu1 %v1548_v2  ;;  %v6408_v19 = vcombine.low %v1171_v42, %v1188_v6  ;;  %v6410_v38 = vcombine.high %v1171_v42, %v1188_v6  ;;  %v6444_v46 = vsel %vm1155_vm2, %v6426_v13, 0  ;;  %vm796_vm6 = vmpackc.low %vm706_vm5, %vm705_vm3 }
  0xe0   : > { %2163 = vmatpush1.bf16.msra.mxu1 %v1547_v43  ;;  %v1598_v30 = vpop.permute.xlu1 %1597  ;;  %v813_v39 = vsel %vm796_vm6, %v6373_v56, 0  ;;  %v830_v7 = vsel %vm796_vm6, %v6376_v57, 0  ;;  %vm797_vm14 = vmpackc.low %vm708_vm13, %vm707_vm11 }
  0xe1   : > { %v1596_v9 = vpop.permute.xlu0 %1595  ;;  %1386 = vst [vmem:[#allocation3 + $0xb0] sm:$0xff] %v6408_v19  ;;  %1387 = vst [vmem:[#allocation3 + $0xb8] sm:$0xff] %v6410_v38  ;;  %v6457_v8 = vcombine.low %v813_v39, %v830_v7  ;;  %v6459_v59 = vcombine.high %v813_v39, %v830_v7  ;;  %v6468_v26 = vsel %vm797_vm14, %v6423_v12, 0  ;;  %v5442_v39 = vld [vmem:[%s5719_s17 + $0x3c] ss:$136 sps:$4 sm:$0xff]  }
  0xe2   : > { %v1607_v27 = vsel %vm1601_vm9, %v1594_v44, %v1596_v9  ;;  %2460 = vrot.lane.b32.xlu1 %v6061_v36, %s5666_s19  ;;  %v1608_v17 = vsel %vm1601_vm9, %v1596_v9, %v1598_v30  ;;  %v6441_v44 = vsel %vm1155_vm2, %v6423_v12, 0  ;;  %v5436_v7 = vld [vmem:[%s5719_s17 + $0x38] ss:$136 sps:$4 sm:$0xff]  }
  0xe3   : > { %2458 = vrot.lane.b32.xlu0 %v6032_v24, %s5666_s19  ;;  %2123 = vmatprep.subr.bf16.mxu0 %v1607_v27  ;;  %v6448_v2 = vcombine.low %v6441_v44, %v6444_v46  ;;  %1028 = vst [vmem:[#allocation2 + $0xb0] sm:$0xff] %v6457_v8  ;;  %1029 = vst [vmem:[#allocation2 + $0xb8] sm:$0xff] %v6459_v59 }
  0xe4   : > { %2124 = vmatpush1.bf16.msra.mxu0 %v1606_v14  ;;  %v1684_v21 = vpop.permute.xlu1 %1683  ;;  %v5620_v14 = vld [vmem:[#allocation2 + $0x30] sm:$0xff] }
  0xe5   : > { %v1600_v54 = vpop.permute.xlu0 %1599  ;;  %1388 = vst [vmem:[#allocation3 + $0xc0] sm:$0xff] %v6448_v2  ;;  %v1696_v56 = vsel %vm1691_vm4, %v6273_v49, %v1684_v21 }
  0xe6   : > { %v1609_v55 = vsel %vm1601_vm9, %v1598_v30, %v1600_v54  ;;  %2464 = vrot.lane.b32.xlu1 %v6078_v28, %s5666_s19 }
  0xe7   : > { %2462 = vrot.lane.b32.xlu0 %v6070_v52, %s5666_s19  ;;  %2164 = vmatprep.subr.bf16.mxu1 %v1609_v55  ;;  %v5623_v55 = vld [vmem:[#allocation2 + $0x38] sm:$0xff] }
  0xe8   : > { %2165 = vmatpush1.bf16.msra.mxu1 %v1608_v17  ;;  %v1688_v25 = vpop.permute.xlu1 %1687 }
  0xe9   : > { %v1686_v11 = vpop.permute.xlu0 %1685 }
  0xea   : > { %v1697_v43 = vsel %vm1691_vm4, %v1684_v21, %v1686_v11  ;;  %2520 = vrot.lane.b32.xlu1 %v6087_v40, %s5667_s20  ;;  %v1698_v20 = vsel %vm1691_vm4, %v1686_v11, %v1688_v25  ;;  %v5622_v21 = vld [vmem:[#allocation2 + $0x40] sm:$0xff] }
  0xeb   : > { %2518 = vrot.lane.b32.xlu0 %v6083_v29, %s5667_s20  ;;  %2125 = vmatprep.subr.bf16.mxu0 %v1697_v43  ;;  %v6471_v29 = vsel %vm797_vm14, %v6426_v13, 0 }
  0xec   : > { %2126 = vmatpush1.bf16.msra.mxu0 %v1696_v56  ;;  %v1745_v57 = vpop.permute.xlu1 %1744  ;;  %v6478_v49 = vcombine.low %v6468_v26, %v6471_v29 }
  0xed   : > { %v1690_v40 = vpop.permute.xlu0 %1689 }
  0xee   : > { %v1699_v30 = vsel %vm1691_vm4, %v1688_v25, %v1690_v40  ;;  %2524 = vrot.lane.b32.xlu1 %v6105_v4, %s5667_s20  ;;  %1030 = vst [vmem:[#allocation2 + $0xc0] sm:$0xff] %v6478_v49  ;;  %v5441_v4 = vld [vmem:[%s5719_s17 + $0x40] ss:$136 sps:$4 sm:$0xff]  }
  0xef   : > { %2522 = vrot.lane.b32.xlu0 %v6093_v58, %s5667_s20  ;;  %2166 = vmatprep.subr.bf16.mxu1 %v1699_v30  ;;  %v1757_v58 = vsel %vm1752_vm12, %v6288_v63, %v1745_v57  ;;  %v5444_v30 = vld [vmem:[%s5719_s17 + $0x40] ss:$136 sps:$4 sm:$0xff]  }
  0xf0   : > { %2167 = vmatpush1.bf16.msra.mxu1 %v1698_v20  ;;  %v1749_v9 = vpop.permute.xlu1 %1748 }
  0xf1   : > { %v1747_v42 = vpop.permute.xlu0 %1746 }
  0xf2   : > { %v1758_v6 = vsel %vm1752_vm12, %v1745_v57, %v1747_v42  ;;  %2609 = vrot.lane.b32.xlu1 %v6046_v10, %s5668_s21  ;;  %v1759_v10 = vsel %vm1752_vm12, %v1747_v42, %v1749_v9  ;;  %v5445_v57 = vld [vmem:[%s5719_s17 + $0x44] ss:$136 sps:$4 sm:$0xff]  }
  0xf3   : > { %2607 = vrot.lane.b32.xlu0 %v5876_v31, %s5668_s21  ;;  %2127 = vmatprep.subr.bf16.mxu0 %v1758_v6  ;;  %v5621_v31 = vld [vmem:[#allocation2 + $0x28] sm:$0xff] }
  0xf4   : > { %2128 = vmatpush1.bf16.msra.mxu0 %v1757_v58  ;;  %v1851_v41 = vpop.permute.xlu1 %1850  ;;  %v5624_v42 = vld [vmem:[#allocation2 + $0x48] sm:$0xff] }
  0xf5   : > { %v1751_v27 = vpop.permute.xlu0 %1750  ;;  %2129 = vmatprep.subr.bf16.mxu0 %v5620_v14 }
  0xf6   : > { %v1760_v3 = vsel %vm1752_vm12, %v1749_v9, %v1751_v27  ;;  %2613 = vrot.lane.b32.xlu1 %v5441_v4, %s5668_s21  ;;  %v2325_v4 = vld [vmem:[#allocation2 + $0x40] sm:$0xff] }
  0xf7   : > { %2611 = vrot.lane.b32.xlu0 %v6052_v16, %s5668_s21  ;;  %2168 = vmatprep.subr.bf16.mxu1 %v1760_v3  ;;  %v1862_v16 = vsel %vm1479_vm7, %v6311_v61, %v1851_v41  ;;  %v5625_v3 = vld [vmem:[#allocation2 + $0x50] sm:$0xff] }
  0xf8   : > { %2130 = vmatpush1.bf16.msra.mxu0 %v5621_v31  ;;  %2169 = vmatpush1.bf16.msra.mxu1 %v1759_v10  ;;  %v1855_v47 = vpop.permute.xlu1 %1854 }
  0xf9   : > { %v1853_v63 = vpop.permute.xlu0 %1852  ;;  %2170 = vmatprep.subr.bf16.mxu1 %v5622_v21  ;;  %v6555_v21 = vld [vmem:[%s5719_s17 + $0x68] sm:$0xff] }
  0xfa   : > { %v1863_v54 = vsel %vm1479_vm7, %v1851_v41, %v1853_v63  ;;  %2669 = vrot.lane.b32.xlu1 %v6061_v36, %s5669_s22 }
  0xfb   : > { %2667 = vrot.lane.b32.xlu0 %v6032_v24, %s5669_s22  ;;  %2131 = vmatprep.subr.bf16.mxu0 %v1863_v54  ;;  %v1864_v24 = vsel %vm1479_vm7, %v1853_v63, %v1855_v47  ;;  %v234_v54 = vadd.s32 3456, %v5703_v1 }
  0xfc   : > { %2132 = vmatpush1.bf16.msra.mxu0 %v1862_v16  ;;  %2171 = vmatpush1.bf16.msra.mxu1 %v5623_v55  ;;  %v1911_v17 = vpop.permute.xlu1 %1910 }
  0xfd   : > { %v1857_v25 = vpop.permute.xlu0 %1856  ;;  %v1922_v40 = vsel %vm1540_vm8, %v6328_v34, %v1911_v17 }
  0xfe   : > { %v1865_v11 = vsel %vm1479_vm7, %v1855_v47, %v1857_v25  ;;  %2673 = vrot.lane.b32.xlu1 %v6078_v28, %s5669_s22  ;;  %v268_v25 = vadd.s32 63, %v234_v54  ;;  %v7494_v54 = vld [vmem:[#allocation8_spill] sm:$0xff] }
  0xff   : > { %2671 = vrot.lane.b32.xlu0 %v6070_v52, %s5669_s22  ;;  %2172 = vmatprep.subr.bf16.mxu1 %v1865_v11 }
 0x100   : > { %2173 = vmatpush1.bf16.msra.mxu1 %v1864_v24  ;;  %v1915_v61 = vpop.permute.xlu1 %1914  ;;  %v6581_v24 = vld [vmem:[%s5719_s17 + $0xf8] sm:$0xff] }
 0x101   : > { %v1913_v43 = vpop.permute.xlu0 %1912 }
 0x102   : > { %v1923_v56 = vsel %vm1540_vm8, %v1911_v17, %v1913_v43  ;;  %2774 = vrot.lane.b32.xlu1 %v5442_v39, %s5665_s18  ;;  %v1924_v58 = vsel %vm1540_vm8, %v1913_v43, %v1915_v61  ;;  %v468_v43 = vand.u32 63, %v268_v25 }
 0x103   : > { %2772 = vrot.lane.b32.xlu0 %v5436_v7, %s5665_s18  ;;  %2133 = vmatprep.subr.bf16.mxu0 %v1923_v56  ;;  %v6578_v7 = vld [vmem:[%s5719_s17 + $0x70] sm:$0xff]  ;;  %v235_v56 = vadd.s32 3584, %v5703_v1 }
 0x104   : > { %2134 = vmatpush1.bf16.msra.mxu0 %v1922_v40  ;;  %v2391_v20 = vpop.permute.xlu1 %2390  ;;  %vm1068_vm0 = vcmp.ne.s32.totalorder %v468_v43, 0  ;;  %vm710_vm11 = vcmp.ne.s32.totalorder %v468_v43, 63 }
 0x105   : > { %v1917_v9 = vpop.permute.xlu0 %1916  ;;  %2956 = vmatprep.subr.bf16.mxu0 %v5624_v42  ;;  %v7492_v42 = vld [vmem:[#allocation5_spill] sm:$0xff] }
 0x106   : > { %v1925_v6 = vsel %vm1540_vm8, %v1915_v61, %v1917_v9  ;;  %2778 = vrot.lane.b32.xlu1 %v5445_v57, %s5665_s18  ;;  %v236_v57 = vadd.s32 3712, %v5703_v1  ;;  %v6596_v9 = vcombine.low %v6423_v12, %v6426_v13 }
 0x107   : > { %2776 = vrot.lane.b32.xlu0 %v5444_v30, %s5665_s18  ;;  %2174 = vmatprep.subr.bf16.mxu1 %v1925_v6  ;;  %v269_v6 = vadd.s32 63, %v235_v56 }
 0x108   : > { %2175 = vmatpush1.bf16.msra.mxu1 %v1924_v58  ;;  %2150 = vmatmul.mubr.bf16.vlgmr.msra.gmra.mrb[4].mxu0 %v6018_v18  ;;  %v2395_v34 = vpop.permute.xlu1 %2394 }
 0x109   : > { %v2393_v41 = vpop.permute.xlu0 %2392  ;;  %2957 = vmatpush1.bf16.msra.mxu0 %v2325_v4  ;;  %2997 = vmatprep.subr.bf16.mxu1 %v5972_v53  ;;  %v270_v4 = vadd.s32 63, %v236_v57 }
 0x10a   : > { %v2407_v27 = vsel %vm1479_vm7, %v2391_v20, %v2393_v41  ;;  %2834 = vrot.lane.b32.xlu1 %v6070_v52, %s5666_s19  ;;  %5287 = vmatprep.mubr.msk.bf16.mxu0 %vm2031_vm10, %v6022_v45  ;;  %v2408_v31 = vsel %vm1479_vm7, %v2393_v41, %v2395_v34 }
 0x10b   : > { %2832 = vrot.lane.b32.xlu0 %v6061_v36, %s5666_s19  ;;  %2958 = vmatprep.subr.bf16.mxu0 %v2407_v27  ;;  %v6548_v36 = vcombine.high %v6423_v12, %v6426_v13 }
 0x10c   : > { %2191 = vmatmul.mubr.bf16.vlgmr.msra.gmra.mrb[4].mxu1 %v6018_v18  ;;  %v2389_v14 = vpop.permute.xlu1 %2388  ;;  %v6544_v18 = vcombine.high %v6441_v44, %v6444_v46  ;;  %v6558_v44 = vld [vmem:[%s5719_s17 + $0xf0] sm:$0xff]  ;;  %v233_v46 = vadd.s32 3328, %v5703_v1 }
 0x10d   : > { %2998 = vmatpush1.bf16.msra.mxu1 %v5625_v3  ;;  %v6533_v10 = vpop.permute.xlu0 %2396  ;;  %v2406_v53 = vsel %vm1479_vm7, %v2389_v14, %v2391_v20  ;;  %5288 = vmatprep.mubr.msk.bf16.mxu1 %vm2031_vm10, %v6022_v45  ;;  %v6567_v16 = vcombine.low %v6555_v21, %v6558_v44  ;;  %v6571_v55 = vcombine.high %v6555_v21, %v6558_v44  ;;  %v475_v14 = vand.u32 63, %v269_v6 }
 0x10e   : > { %v2409_v52 = vsel %vm1479_vm7, %v2395_v34, %v6533_v10  ;;  %2838 = vrot.lane.b32.xlu1 %v6145_v15, %s5666_s19  ;;  %2959 = vmatpush1.bf16.msra.mxu0 %v2406_v53  ;;  %1389 = vst [vmem:[#allocation3 + $0xc8] sm:$0xff] %v6544_v18  ;;  %v267_v17 = vadd.s32 63, %v233_v46  ;;  %v6592_v20 = vcombine.low %v6578_v7, %v6581_v24  ;;  %v482_v3 = vand.u32 63, %v270_v4  ;;  %v7493_v53 = vld [vmem:[#allocation6_spill] sm:$0xff] }
 0x10f   : > { %2836 = vrot.lane.b32.xlu0 %v6078_v28, %s5666_s19  ;;  %2999 = vmatprep.subr.bf16.mxu1 %v2409_v52  ;;  %vm1069_vm2 = vcmp.ne.s32.totalorder %v475_v14, 0  ;;  %vm711_vm14 = vcmp.ne.s32.totalorder %v475_v14, 63 }
 0x110   : > { %v2453_v47 = vpop.permute.xlu1 %2452  ;;  %v461_v61 = vand.u32 63, %v267_v17  ;;  %vm1070_vm3 = vcmp.ne.s32.totalorder %v482_v3, 0  ;;  %v7495_v17 = vld [vmem:[#allocation7_spill] sm:$0xff] }
 0x111   : > { %3000 = vmatpush1.bf16.msra.mxu1 %v2408_v31  ;;  %v2451_v63 = vpop.permute.xlu0 %2450  ;;  %vm1157_vm5 = vmpackc.low %vm1070_vm3, %vm1069_vm2 }
 0x112   : > { %3313 = vrot.lane.b32.xlu1 %v6165_v35, %s5665_s18  ;;  %v2467_v28 = vsel %vm1540_vm8, %v2451_v63, %v2453_v47  ;;  %vm1067_vm15 = vcmp.ne.s32.totalorder %v461_v61, 0  ;;  %v6612_v46 = vsel %vm1157_vm5, %v6578_v7, 0  ;;  %vm709_vm6 = vcmp.ne.s32.totalorder %v461_v61, 63 }
 0x113   : > { %3311 = vrot.lane.b32.xlu0 %v6152_v32, %s5665_s18  ;;  %2960 = vmatprep.subr.bf16.mxu0 %v2467_v28  ;;  %vm1156_vm1 = vmpackc.low %vm1068_vm0, %vm1067_vm15  ;;  %vm712_vm15 = vcmp.ne.s32.totalorder %v482_v3, 63 }
 0x114   : > { %v6575_v11 = vpop.permute.xlu1 %2456  ;;  %v1173_v41 = vsel %vm1156_vm1, %v6555_v21, 0  ;;  %v1190_v27 = vsel %vm1156_vm1, %v6558_v44, 0  ;;  %vm798_vm13 = vmpackc.low %vm710_vm11, %vm709_vm6 }
 0x115   : > { %v2455_v39 = vpop.permute.xlu0 %2454  ;;  %v6605_v13 = vcombine.low %v1173_v41, %v1190_v27  ;;  %vm799_vm0 = vmpackc.low %vm712_vm15, %vm711_vm14 }
 0x116   : > { %3317 = vrot.lane.b32.xlu1 %v6186_v50, %s5665_s18  ;;  %v2469_v40 = vsel %vm1540_vm8, %v2455_v39, %v6575_v11  ;;  %v2468_v30 = vsel %vm1540_vm8, %v2453_v47, %v2455_v39  ;;  %v6609_v47 = vcombine.high %v1173_v41, %v1190_v27  ;;  %v832_v41 = vsel %vm798_vm13, %v6558_v44, 0 }
 0x117   : > { %3315 = vrot.lane.b32.xlu0 %v7492_v42, %s5665_s18  ;;  %3001 = vmatprep.subr.bf16.mxu1 %v2469_v40  ;;  %v6631_v40 = vld [vmem:[#allocation3 + $0x80] sm:$0xff]  ;;  %v6662_v44 = vsel %vm799_vm0, %v6581_v24, 0 }
 0x118   : > { %3002 = vmatpush1.bf16.msra.mxu1 %v2468_v30  ;;  %v2511_v58 = vpop.permute.xlu1 %2510  ;;  %v6637_v30 = vcombine.high %v6468_v26, %v6471_v29 }
 0x119   : > { %v2449_v34 = vpop.permute.xlu0 %2448 }
 0x11a   : > { %v2466_v12 = vsel %vm1540_vm8, %v2449_v34, %v2451_v63  ;;  %3371 = vrot.lane.b32.xlu1 %v6145_v15, %s5666_s19  ;;  %v6615_v63 = vsel %vm1157_vm5, %v6581_v24, 0  ;;  %1031 = vst [vmem:[#allocation2 + $0xc8] sm:$0xff] %v6637_v30  ;;  %v815_v34 = vsel %vm798_vm13, %v6555_v21, 0  ;;  %v6659_v21 = vsel %vm799_vm0, %v6578_v7, 0 }
 0x11b   : > { %3309 = vrot.lane.b32.xlu0 %v7493_v53, %s5665_s18  ;;  %2961 = vmatpush1.bf16.msra.mxu0 %v2466_v12  ;;  %v6622_v28 = vcombine.low %v6612_v46, %v6615_v63  ;;  %v6648_v29 = vcombine.low %v815_v34, %v832_v41  ;;  %v6650_v27 = vcombine.high %v815_v34, %v832_v41  ;;  %v2701_v41 = vld [vmem:[#allocation2 + $0x58] sm:$0xff] }
 0x11c   : > { %v2515_v52 = vpop.permute.xlu1 %2514  ;;  %v6671_v14 = vcombine.low %v6659_v21, %v6662_v44 }
 0x11d   : > { %v2513_v31 = vpop.permute.xlu0 %2512  ;;  %1032 = vst [vmem:[#allocation2 + $0xd0] sm:$0xff] %v6648_v29  ;;  %1033 = vst [vmem:[#allocation2 + $0xd8] sm:$0xff] %v6650_v27 }
 0x11e   : > { %v2527_v15 = vsel %vm1601_vm9, %v2511_v58, %v2513_v31  ;;  %3375 = vrot.lane.b32.xlu1 %v7494_v54, %s5666_s19  ;;  %v2528_v6 = vsel %vm1601_vm9, %v2513_v31, %v2515_v52  ;;  %1034 = vst [vmem:[#allocation2 + $0xe0] sm:$0xff] %v6671_v14 }
 0x11f   : > { %3373 = vrot.lane.b32.xlu0 %v7495_v17, %s5666_s19  ;;  %2962 = vmatprep.subr.bf16.mxu0 %v2527_v15 }
 0x120   : > { %v2509_v25 = vpop.permute.xlu1 %2508 }
 0x121   : > { %v6626_v39 = vpop.permute.xlu0 %2516  ;;  %v2526_v56 = vsel %vm1601_vm9, %v2509_v25, %v2511_v58 }
 0x122   : > { %v2529_v57 = vsel %vm1601_vm9, %v2515_v52, %v6626_v39  ;;  %3369 = vrot.lane.b32.xlu1 %v6631_v40, %s5666_s19  ;;  %2963 = vmatpush1.bf16.msra.mxu0 %v2526_v56  ;;  %v5627_v52 = vld [vmem:[#allocation2 + $0x80] sm:$0xff] }
 0x123   : > { %3377 = vrot.lane.b32.xlu0 %v6236_v48, %s5666_s19  ;;  %3003 = vmatprep.subr.bf16.mxu1 %v2529_v57  ;;  %v2700_v57 = vld [vmem:[#allocation2 + $0x50] sm:$0xff] }
 0x124   : > { %3004 = vmatpush1.bf16.msra.mxu1 %v2528_v6  ;;  %v2602_v4 = vpop.permute.xlu1 %2601 }
 0x125   : > { %v2600_v58 = vpop.permute.xlu0 %2599 }
 0x126   : > { %3433 = vrot.lane.b32.xlu1 %v6248_v23, %s5667_s20  ;;  %v2616_v26 = vsel %vm1691_vm4, %v2600_v58, %v2602_v4 }
 0x127   : > { %3431 = vrot.lane.b32.xlu0 %v6241_v5, %s5667_s20  ;;  %2964 = vmatprep.subr.bf16.mxu0 %v2616_v26  ;;  %v6698_v26 = vld [vmem:[#allocation3 + $0x88] sm:$0xff] }
 0x128   : > { %v6654_v61 = vpop.permute.xlu1 %2605 }
 0x129   : > { %v2604_v23 = vpop.permute.xlu0 %2603 }
 0x12a   : > { %3437 = vrot.lane.b32.xlu1 %v6267_v22, %s5667_s20  ;;  %v2618_v5 = vsel %vm1691_vm4, %v2604_v23, %v6654_v61  ;;  %v2617_v43 = vsel %vm1691_vm4, %v2602_v4, %v2604_v23  ;;  %v2702_v4 = vld [vmem:[#allocation2 + $0x60] sm:$0xff] }
 0x12b   : > { %3435 = vrot.lane.b32.xlu0 %v6254_v33, %s5667_s20  ;;  %3005 = vmatprep.subr.bf16.mxu1 %v2618_v5 }
 0x12c   : > { %3006 = vmatpush1.bf16.msra.mxu1 %v2617_v43  ;;  %v2660_v3 = vpop.permute.xlu1 %2659  ;;  %v5451_v43 = vld [vmem:[%s5719_s17 + $0x48] ss:$136 sps:$4 sm:$0xff]  }
 0x12d   : > { %v2598_v12 = vpop.permute.xlu0 %2597 }
 0x12e   : > { %v2615_v22 = vsel %vm1691_vm4, %v2598_v12, %v2600_v58  ;;  %3520 = vrot.lane.b32.xlu1 %v6152_v32, %s5668_s21 }
 0x12f   : > { %3429 = vrot.lane.b32.xlu0 %v5627_v52, %s5667_s20  ;;  %2965 = vmatpush1.bf16.msra.mxu0 %v2615_v22  ;;  %v5453_v52 = vld [vmem:[%s5719_s17 + $0x4c] ss:$136 sps:$4 sm:$0xff]  }
 0x130   : > { %v2664_v31 = vpop.permute.xlu1 %2663 }
 0x131   : > { %v2662_v15 = vpop.permute.xlu0 %2661 }
 0x132   : > { %v2676_v25 = vsel %vm1752_vm12, %v2660_v3, %v2662_v15  ;;  %3524 = vrot.lane.b32.xlu1 %v7492_v42, %s5668_s21  ;;  %v2699_v42 = vld [vmem:[#allocation2 + $0x48] sm:$0xff] }
 0x133   : > { %3522 = vrot.lane.b32.xlu0 %v6165_v35, %s5668_s21  ;;  %2966 = vmatprep.subr.bf16.mxu0 %v2676_v25  ;;  %v2677_v35 = vsel %vm1752_vm12, %v2662_v15, %v2664_v31 }
 0x134   : > { %v2658_v33 = vpop.permute.xlu1 %2657 }
 0x135   : > { %v6685_v56 = vpop.permute.xlu0 %2665  ;;  %v2675_v32 = vsel %vm1752_vm12, %v2658_v33, %v2660_v3  ;;  %v5456_v33 = vld [vmem:[%s5719_s17 + $0x54] ss:$136 sps:$4 sm:$0xff]  }
 0x136   : > { %v2678_v6 = vsel %vm1752_vm12, %v2664_v31, %v6685_v56  ;;  %3518 = vrot.lane.b32.xlu1 %v7493_v53, %s5668_s21  ;;  %2967 = vmatpush1.bf16.msra.mxu0 %v2675_v32 }
 0x137   : > { %3526 = vrot.lane.b32.xlu0 %v6186_v50, %s5668_s21  ;;  %3007 = vmatprep.subr.bf16.mxu1 %v2678_v6 }
 0x138   : > { %3008 = vmatpush1.bf16.msra.mxu1 %v2677_v35  ;;  %v2767_v58 = vpop.permute.xlu1 %2766  ;;  %2968 = vmatprep.subr.bf16.mxu0 %v2700_v57 }
 0x139   : > { %v2765_v34 = vpop.permute.xlu0 %2764  ;;  %3009 = vmatprep.subr.bf16.mxu1 %v2702_v4 }
 0x13a   : > { %3582 = vrot.lane.b32.xlu1 %v7495_v17, %s5669_s22  ;;  %2969 = vmatpush1.bf16.msra.mxu0 %v2699_v42  ;;  %v2781_v53 = vsel %vm1479_vm7, %v2765_v34, %v2767_v58 }
 0x13b   : > { %3580 = vrot.lane.b32.xlu0 %v6698_v26, %s5669_s22  ;;  %2970 = vmatprep.subr.bf16.mxu0 %v2781_v53  ;;  %v5631_v53 = vld [vmem:[#allocation2 + $0x78] sm:$0xff] }
 0x13c   : > { %3010 = vmatpush1.bf16.msra.mxu1 %v2701_v41  ;;  %v6702_v50 = vpop.permute.xlu1 %2770  ;;  %v6734_v41 = vld.sshfl [vmem:[%s7450_s1] sm:$0x33 pattern:$0x76325410] }
 0x13d   : > { %v2769_v23 = vpop.permute.xlu0 %2768 }
 0x13e   : > { %3586 = vrot.lane.b32.xlu1 %v6236_v48, %s5669_s22  ;;  %v2783_v17 = vsel %vm1479_vm7, %v2769_v23, %v6702_v50  ;;  %v2782_v5 = vsel %vm1479_vm7, %v2767_v58, %v2769_v23  ;;  %v5455_v48 = vld [vmem:[%s5719_s17 + $0x50] ss:$136 sps:$4 sm:$0xff]   ;;  %v5629_v58 = vld [vmem:[#allocation2 + $0x68] sm:$0xff] }
 0x13f   : > { %3584 = vrot.lane.b32.xlu0 %v7494_v54, %s5669_s22  ;;  %3011 = vmatprep.subr.bf16.mxu1 %v2783_v17  ;;  %v5458_v54 = vld [vmem:[%s5719_s17 + $0x44] ss:$136 sps:$4 sm:$0xff]  }
 0x140   : > { %3012 = vmatpush1.bf16.msra.mxu1 %v2782_v5  ;;  %v2825_v3 = vpop.permute.xlu1 %2824  ;;  %v5632_v23 = vld [vmem:[#allocation3 + $0x98] sm:$0xff]  ;;  %v5633_v5 = vld [vmem:[#allocation3 + $0x90] sm:$0xff] }
 0x141   : > { %v2763_v12 = vpop.permute.xlu0 %2762 }
 0x142   : > { %v2780_v22 = vsel %vm1479_vm7, %v2763_v12, %v2765_v34  ;;  %3685 = vrot.lane.b32.xlu1 %v5451_v43, %s5665_s18  ;;  %v5634_v43 = vld [vmem:[#allocation2 + $0x70] sm:$0xff] }
 0x143   : > { %3578 = vrot.lane.b32.xlu0 %v6631_v40, %s5669_s22  ;;  %2971 = vmatpush1.bf16.msra.mxu0 %v2780_v22 }
 0x144   : > { %v2829_v31 = vpop.permute.xlu1 %2828 }
 0x145   : > { %v2827_v15 = vpop.permute.xlu0 %2826 }
 0x146   : > { %v2841_v25 = vsel %vm1540_vm8, %v2825_v3, %v2827_v15  ;;  %3689 = vrot.lane.b32.xlu1 %v5455_v48, %s5665_s18  ;;  %v2842_v35 = vsel %vm1540_vm8, %v2827_v15, %v2829_v31 }
 0x147   : > { %3687 = vrot.lane.b32.xlu0 %v5453_v52, %s5665_s18  ;;  %2972 = vmatprep.subr.bf16.mxu0 %v2841_v25  ;;  %v237_v25 = vadd.s32 3840, %v5703_v1 }
 0x148   : > { %v2823_v32 = vpop.permute.xlu1 %2822 }
 0x149   : > { %v6723_v57 = vpop.permute.xlu0 %2830  ;;  %v2840_v6 = vsel %vm1540_vm8, %v2823_v32, %v2825_v3 }
 0x14a   : > { %v2843_v40 = vsel %vm1540_vm8, %v2829_v31, %v6723_v57  ;;  %3683 = vrot.lane.b32.xlu1 %v5458_v54, %s5665_s18  ;;  %2973 = vmatpush1.bf16.msra.mxu0 %v2840_v6  ;;  %v238_v54 = vadd.s32 3968, %v5703_v1 }
 0x14b   : > { %3691 = vrot.lane.b32.xlu0 %v5456_v33, %s5665_s18  ;;  %3013 = vmatprep.subr.bf16.mxu1 %v2843_v40 }
 0x14c   : > { %3014 = vmatpush1.bf16.msra.mxu1 %v2842_v35  ;;  %v2401_v42 = vpop.permute.xlu1 %2400  ;;  %3038 = vmatprep.subr.bf16.mxu0 %v5629_v58  ;;  %v272_v6 = vadd.s32 63, %v238_v54  ;;  %v188_v54 = vld [vmem:[%s5719_s17 + $0x80] sm:$0xff] }
 0x14d   : > { %v2399_v34 = vpop.permute.xlu0 %2398  ;;  %2989 = vmatmul.mubr.bf16.vlgmr.msra.gmra.mrb[8].mxu0 %v6734_v41  ;;  %3079 = vmatprep.subr.bf16.mxu1 %v5631_v53 }
 0x14e   : > { %3747 = vrot.lane.b32.xlu1 %v5632_v23, %s5666_s19  ;;  %3039 = vmatpush1.bf16.msra.mxu0 %v2702_v4  ;;  %v2411_v17 = vsel %vm1479_vm7, %v2399_v34, %v2401_v42  ;;  %v2410_v22 = vsel %vm1479_vm7, %v6533_v10, %v2399_v34  ;;  %v6749_v4 = vcombine.high %v6612_v46, %v6615_v63  ;;  %v5635_v10 = vld [vmem:[#allocation3 + $0xa0] sm:$0xff]  ;;  %v6761_v46 = vld [vmem:[%s5719_s17 + $0x78] sm:$0xff]  ;;  %v6764_v63 = vld [vmem:[%s5719_s17 + $0x100] sm:$0xff]  ;;  %v239_v34 = vadd.s32 4096, %v5703_v1 }
 0x14f   : > { %3745 = vrot.lane.b32.xlu0 %v5633_v5, %s5666_s19  ;;  %3030 = vmatmul.mubr.bf16.vlgmr.msra.gmra.mrb[8].mxu1 %v6734_v41  ;;  %v240_v23 = vadd.s32 4224, %v5703_v1 }
 0x150   : > { %3040 = vmatprep.subr.bf16.mxu0 %v2411_v17  ;;  %3080 = vmatpush1.bf16.msra.mxu1 %v5634_v43  ;;  %v2405_v3 = vpop.permute.xlu1 %2404  ;;  %v5462_v17 = vld [vmem:[%s5719_s17 + $0x60] ss:$136 sps:$4 sm:$0xff]   ;;  %v273_v5 = vadd.s32 63, %v239_v34 }
 0x151   : > { %v2403_v12 = vpop.permute.xlu0 %2402  ;;  %5289 = vmatprep.mubr.msk.bf16.mxu0 %vm2031_vm10, %v6022_v45  ;;  %5290 = vmatprep.mubr.msk.bf16.mxu1 %vm2031_vm10, %v6022_v45  ;;  %v6758_v45 = vcombine.high %v6578_v7, %v6581_v24  ;;  %v6775_v7 = vcombine.low %v6761_v46, %v6764_v63  ;;  %v271_v24 = vadd.s32 63, %v237_v25 }
 0x152   : > { %3751 = vrot.lane.b32.xlu1 %v6352_v37, %s5666_s19  ;;  %3041 = vmatpush1.bf16.msra.mxu0 %v2410_v22  ;;  %v2413_v48 = vsel %vm1479_vm7, %v2403_v12, %v2405_v3  ;;  %v2412_v52 = vsel %vm1479_vm7, %v2401_v42, %v2403_v12  ;;  %v6781_v42 = vcombine.high %v6761_v46, %v6764_v63  ;;  %v274_v3 = vadd.s32 63, %v240_v23 }
 0x153   : > { %3749 = vrot.lane.b32.xlu0 %v5635_v10, %s5666_s19  ;;  %3081 = vmatprep.subr.bf16.mxu1 %v2413_v48  ;;  %v489_v58 = vand.u32 63, %v271_v24  ;;  %v503_v1 = vand.u32 63, %v273_v5 }
 0x154   : > { %3082 = vmatpush1.bf16.msra.mxu1 %v2412_v52  ;;  %v2461_v31 = vpop.permute.xlu1 %2460 }
 0x155   : > { %v2459_v15 = vpop.permute.xlu0 %2458  ;;  %vm1071_vm1 = vcmp.ne.s32.totalorder %v489_v58, 0  ;;  %vm1073_vm5 = vcmp.ne.s32.totalorder %v503_v1, 0  ;;  %vm713_vm13 = vcmp.ne.s32.totalorder %v489_v58, 63  ;;  %vm715_vm0 = vcmp.ne.s32.totalorder %v503_v1, 63  ;;  %v2704_v1 = vld [vmem:[#allocation2 + $0x70] sm:$0xff] }
 0x156   : > { %3319 = vrot.lane.b32.xlu1 %v6367_v60, %s5665_s18  ;;  %v2471_v33 = vsel %vm1540_vm8, %v2459_v15, %v2461_v31  ;;  %v2470_v32 = vsel %vm1540_vm8, %v6575_v11, %v2459_v15  ;;  %v496_v11 = vand.u32 63, %v272_v6  ;;  %v510_v15 = vand.u32 63, %v274_v3 }
 0x157   : > { %3743 = vrot.lane.b32.xlu0 %v6698_v26, %s5666_s19  ;;  %3042 = vmatprep.subr.bf16.mxu0 %v2471_v33  ;;  %v205_v33 = vld [vmem:[%s5719_s17 + $0x108] sm:$0xff] }
 0x158   : > { %3043 = vmatpush1.bf16.msra.mxu0 %v2470_v32  ;;  %v2465_v40 = vpop.permute.xlu1 %2464  ;;  %vm1072_vm2 = vcmp.ne.s32.totalorder %v496_v11, 0  ;;  %vm1074_vm6 = vcmp.ne.s32.totalorder %v510_v15, 0  ;;  %vm714_vm14 = vcmp.ne.s32.totalorder %v496_v11, 63 }
 0x159   : > { %v2463_v35 = vpop.permute.xlu0 %2462  ;;  %vm1158_vm3 = vmpackc.low %vm1072_vm2, %vm1071_vm1  ;;  %vm716_vm1 = vcmp.ne.s32.totalorder %v510_v15, 63 }
 0x15a   : > { %3323 = vrot.lane.b32.xlu1 %v6390_v0, %s5665_s18  ;;  %v2473_v26 = vsel %vm1540_vm8, %v2463_v35, %v2465_v40  ;;  %v2472_v53 = vsel %vm1540_vm8, %v2461_v31, %v2463_v35  ;;  %v1175_v22 = vsel %vm1158_vm3, %v6761_v46, 0  ;;  %v1192_v48 = vsel %vm1158_vm3, %v6764_v63, 0  ;;  %vm1159_vm11 = vmpackc.low %vm1074_vm6, %vm1073_vm5 }
 0x15b   : > { %3321 = vrot.lane.b32.xlu0 %v6386_v51, %s5665_s18  ;;  %3083 = vmatprep.subr.bf16.mxu1 %v2473_v26  ;;  %v6799_v31 = vcombine.low %v1175_v22, %v1192_v48  ;;  %v6804_v24 = vcombine.high %v1175_v22, %v1192_v48  ;;  %v6810_v6 = vsel %vm1159_vm11, %v188_v54, 0  ;;  %v6812_v40 = vsel %vm1159_vm11, %v205_v33, 0  ;;  %vm800_vm15 = vmpackc.low %vm714_vm14, %vm713_vm13 }
 0x15c   : > { %3084 = vmatpush1.bf16.msra.mxu1 %v2472_v53  ;;  %v2521_v43 = vpop.permute.xlu1 %2520  ;;  %v6818_v35 = vcombine.low %v6810_v6, %v6812_v40  ;;  %v6822_v53 = vcombine.high %v6659_v21, %v6662_v44  ;;  %v817_v23 = vsel %vm800_vm15, %v6761_v46, 0  ;;  %vm801_vm2 = vmpackc.low %vm716_vm1, %vm715_vm0  ;;  %vm1039_vm3 = vcmask 15360  }
 0x15d   : > { %v2519_v12 = vpop.permute.xlu0 %2518  ;;  %v818_v46 = vsel %vm801_vm2, %v188_v54, 0 }
 0x15e   : > { %3379 = vrot.lane.b32.xlu1 %v6352_v37, %s5666_s19  ;;  %v2531_v52 = vsel %vm1601_vm9, %v2519_v12, %v2521_v43  ;;  %v2530_v10 = vsel %vm1601_vm9, %v6626_v39, %v2519_v12  ;;  %1035 = vst [vmem:[#allocation2 + $0xe8] sm:$0xff] %v6822_v53 }
 0x15f   : > { %3325 = vrot.lane.b32.xlu0 %v5462_v17, %s5665_s18  ;;  %3044 = vmatprep.subr.bf16.mxu0 %v2531_v52  ;;  %v834_v17 = vsel %vm800_vm15, %v6764_v63, 0 }
 0x160   : > { %3045 = vmatpush1.bf16.msra.mxu0 %v2530_v10  ;;  %v2525_v25 = vpop.permute.xlu1 %2524  ;;  %v6831_v11 = vcombine.low %v817_v23, %v834_v17  ;;  %v6837_v44 = vcombine.high %v817_v23, %v834_v17  ;;  %v2703_v10 = vld [vmem:[#allocation2 + $0x68] sm:$0xff]  ;;  %v5464_v23 = vld [vmem:[%s5719_s17 + $0x58] ss:$136 sps:$4 sm:$0xff]  }
 0x161   : > { %v2523_v32 = vpop.permute.xlu0 %2522 }
 0x162   : > { %3383 = vrot.lane.b32.xlu1 %v6410_v38, %s5666_s19  ;;  %v2533_v37 = vsel %vm1601_vm9, %v2523_v32, %v2525_v25  ;;  %v2532_v39 = vsel %vm1601_vm9, %v2521_v43, %v2523_v32  ;;  %1036 = vst [vmem:[#allocation2 + $0xf0] sm:$0xff] %v6831_v11  ;;  %1037 = vst [vmem:[#allocation2 + $0xf8] sm:$0xff] %v6837_v44  ;;  %v2706_v25 = vld [vmem:[#allocation2 + $0x80] sm:$0xff]  ;;  %v5636_v32 = vld [vmem:[#allocation3 + $0xa8] sm:$0xff] }
 0x163   : > { %3381 = vrot.lane.b32.xlu0 %v6408_v19, %s5666_s19  ;;  %3085 = vmatprep.subr.bf16.mxu1 %v2533_v37 }
 0x164   : > { %3086 = vmatpush1.bf16.msra.mxu1 %v2532_v39  ;;  %v2610_v34 = vpop.permute.xlu1 %2609 }
 0x165   : > { %v2608_v26 = vpop.permute.xlu0 %2607 }
 0x166   : > { %3439 = vrot.lane.b32.xlu1 %v6436_v62, %s5667_s20  ;;  %v2620_v5 = vsel %vm1691_vm4, %v2608_v26, %v2610_v34  ;;  %v2619_v58 = vsel %vm1691_vm4, %v6654_v61, %v2608_v26  ;;  %v835_v61 = vsel %vm801_vm2, %v205_v33, 0  ;;  %v2705_v33 = vld [vmem:[#allocation2 + $0x78] sm:$0xff] }
 0x167   : > { %3385 = vrot.lane.b32.xlu0 %v6448_v2, %s5666_s19  ;;  %3046 = vmatprep.subr.bf16.mxu0 %v2620_v5  ;;  %v6843_v3 = vcombine.low %v818_v46, %v835_v61  ;;  %v5637_v61 = vld [vmem:[#allocation2 + $0x88] sm:$0xff] }
 0x168   : > { %3047 = vmatpush1.bf16.msra.mxu0 %v2619_v58  ;;  %v2614_v21 = vpop.permute.xlu1 %2613 }
 0x169   : > { %v2612_v62 = vpop.permute.xlu0 %2611  ;;  %1038 = vst [vmem:[#allocation2 + $0x100] sm:$0xff] %v6843_v3 }
 0x16a   : > { %3443 = vrot.lane.b32.xlu1 %v6459_v59, %s5667_s20  ;;  %v2622_v63 = vsel %vm1691_vm4, %v2612_v62, %v2614_v21  ;;  %v2621_v43 = vsel %vm1691_vm4, %v2610_v34, %v2612_v62  ;;  %v5465_v21 = vld [vmem:[%s5719_s17 + $0x5c] ss:$136 sps:$4 sm:$0xff]  }
 0x16b   : > { %3441 = vrot.lane.b32.xlu0 %v6457_v8, %s5667_s20  ;;  %3087 = vmatprep.subr.bf16.mxu1 %v2622_v63 }
 0x16c   : > { %3088 = vmatpush1.bf16.msra.mxu1 %v2621_v43  ;;  %v2670_v12 = vpop.permute.xlu1 %2669 }
 0x16d   : > { %v2668_v22 = vpop.permute.xlu0 %2667 }
 0x16e   : > { %3528 = vrot.lane.b32.xlu1 %v6367_v60, %s5668_s21  ;;  %v2680_v59 = vsel %vm1752_vm12, %v2668_v22, %v2670_v12  ;;  %v2679_v48 = vsel %vm1752_vm12, %v6685_v56, %v2668_v22  ;;  %v5463_v56 = vld [vmem:[%s5719_s17 + $0x60] ss:$136 sps:$4 sm:$0xff]   ;;  %v5468_v22 = vld [vmem:[%s5719_s17 + $0x64] ss:$136 sps:$4 sm:$0xff]  }
 0x16f   : > { %3445 = vrot.lane.b32.xlu0 %v6478_v49, %s5667_s20  ;;  %3048 = vmatprep.subr.bf16.mxu0 %v2680_v59 }
 0x170   : > { %3049 = vmatpush1.bf16.msra.mxu0 %v2679_v48  ;;  %v2674_v8 = vpop.permute.xlu1 %2673 }
 0x171   : > { %v2672_v52 = vpop.permute.xlu0 %2671  ;;  %3050 = vmatprep.subr.bf16.mxu0 %v2704_v1  ;;  %v5638_v1 = vld [vmem:[#allocation2 + $0x98] sm:$0xff] }
 0x172   : > { %3532 = vrot.lane.b32.xlu1 %v6390_v0, %s5668_s21  ;;  %v2682_v60 = vsel %vm1752_vm12, %v2672_v52, %v2674_v8  ;;  %v2681_v15 = vsel %vm1752_vm12, %v2670_v12, %v2672_v52  ;;  %v5218_v12 = vcombine.high %v6810_v6, %v6812_v40  ;;  %v5639_v8 = vld [vmem:[#allocation3 + $0xb0] sm:$0xff] }
 0x173   : > { %3530 = vrot.lane.b32.xlu0 %v6386_v51, %s5668_s21  ;;  %3089 = vmatprep.subr.bf16.mxu1 %v2682_v60 }
 0x174   : > { %3051 = vmatpush1.bf16.msra.mxu0 %v2703_v10  ;;  %3090 = vmatpush1.bf16.msra.mxu1 %v2681_v15  ;;  %v2775_v49 = vpop.permute.xlu1 %2774  ;;  %1397 = vst.msk [vmem:[#allocation3 + $0x108] sm:$0xff] %vm1039_vm3, %v5218_v12  ;;  %v5640_v10 = vld [vmem:[#allocation2 + $0x90] sm:$0xff] }
 0x175   : > { %v2773_v54 = vpop.permute.xlu0 %2772  ;;  %3091 = vmatprep.subr.bf16.mxu1 %v2706_v25 }
 0x176   : > { %3588 = vrot.lane.b32.xlu1 %v5636_v32, %s5669_s22  ;;  %v2785_v0 = vsel %vm1479_vm7, %v2773_v54, %v2775_v49  ;;  %v2784_v37 = vsel %vm1479_vm7, %v6702_v50, %v2773_v54  ;;  %v5670_v54 = vmov 0  }
 0x177   : > { %3534 = vrot.lane.b32.xlu0 %v5463_v56, %s5668_s21  ;;  %3052 = vmatprep.subr.bf16.mxu0 %v2785_v0 }
 0x178   : > { %3053 = vmatpush1.bf16.msra.mxu0 %v2784_v37  ;;  %3092 = vmatpush1.bf16.msra.mxu1 %v2705_v33  ;;  %v2779_v51 = vpop.permute.xlu1 %2778 }
 0x179   : > { %v2777_v39 = vpop.permute.xlu0 %2776  ;;  %5398 = vset.pattern.permute.xlu0 %v5670_v54  ;;  %5399 = vset.pattern.permute.xlu1 %v5670_v54 }
 0x17a   : > { %3592 = vrot.lane.b32.xlu1 %v6410_v38, %s5669_s22  ;;  %v2787_v34 = vsel %vm1479_vm7, %v2777_v39, %v2779_v51  ;;  %v2786_v26 = vsel %vm1479_vm7, %v2775_v49, %v2777_v39  ;;  %v5467_v38 = vld [vmem:[%s5719_s17 + $0x60] ss:$136 sps:$4 sm:$0xff]  }
 0x17b   : > { %3590 = vrot.lane.b32.xlu0 %v6408_v19, %s5669_s22  ;;  %3093 = vmatprep.subr.bf16.mxu1 %v2787_v34  ;;  %v6886_v19 = vld.sshfl [vmem:[%s7450_s1] sm:$0x33 pattern:$0x76325410] }
 0x17c   : > { %3094 = vmatpush1.bf16.msra.mxu1 %v2786_v26  ;;  %v2835_v50 = vpop.permute.xlu1 %2834  ;;  %v6893_v43 = vcombine.high %v6886_v19, %v6886_v19 }
 0x17d   : > { %v2833_v17 = vpop.permute.xlu0 %2832 }
 0x17e   : > { %3693 = vrot.lane.b32.xlu1 %v5464_v23, %s5665_s18  ;;  %v2845_v5 = vsel %vm1540_vm8, %v2833_v17, %v2835_v50  ;;  %v2844_v58 = vsel %vm1540_vm8, %v6723_v57, %v2833_v17 }
 0x17f   : > { %3594 = vrot.lane.b32.xlu0 %v6448_v2, %s5669_s22  ;;  %3054 = vmatprep.subr.bf16.mxu0 %v2845_v5 }
 0x180   : > { %3055 = vmatpush1.bf16.msra.mxu0 %v2844_v58  ;;  %v2839_v62 = vpop.permute.xlu1 %2838 }
 0x181   : > { %v2837_v46 = vpop.permute.xlu0 %2836  ;;  %3877 = vmatprep.subr.bf16.mxu0 %v5637_v61  ;;  %v5642_v61 = vld [vmem:[#allocation3 + $0xc0] sm:$0xff] }
 0x182   : > { %3697 = vrot.lane.b32.xlu1 %v5467_v38, %s5665_s18  ;;  %v2847_v57 = vsel %vm1540_vm8, %v2837_v46, %v2839_v62  ;;  %v2846_v63 = vsel %vm1540_vm8, %v2835_v50, %v2837_v46 }
 0x183   : > { %3695 = vrot.lane.b32.xlu0 %v5465_v21, %s5665_s18  ;;  %3095 = vmatprep.subr.bf16.mxu1 %v2847_v57 }
 0x184   : > { %3096 = vmatpush1.bf16.msra.mxu1 %v2846_v63  ;;  %v3314_v59 = vpop.permute.xlu1 %3313  ;;  %3071 = vmatmul.mubr.bf16.vlgmr.msra.gmra.mrb[12].mxu0 %v6734_v41 }
 0x185   : > { %v3312_v48 = vpop.permute.xlu0 %3311  ;;  %3878 = vmatpush1.bf16.msra.mxu0 %v2706_v25  ;;  %3918 = vmatprep.subr.bf16.mxu1 %v5638_v1  ;;  %v5641_v25 = vld [vmem:[#allocation3 + $0xb8] sm:$0xff]  ;;  %v5643_v1 = vld [vmem:[#allocation2 + $0xc0] sm:$0xff] }
 0x186   : > { %3753 = vrot.lane.b32.xlu1 %v5639_v8, %s5666_s19  ;;  %v3328_v52 = vsel %vm1479_vm7, %v3312_v48, %v3314_v59  ;;  %5327 = vmatprep.mubr.msk.bf16.mxu0 %vm2031_vm10, %v6893_v43 }
 0x187   : > { %3699 = vrot.lane.b32.xlu0 %v5468_v22, %s5665_s18  ;;  %3879 = vmatprep.subr.bf16.mxu0 %v3328_v52 }
 0x188   : > { %3112 = vmatmul.mubr.bf16.vlgmr.msra.gmra.mrb[12].mxu1 %v6734_v41  ;;  %v6906_v6 = vpop.permute.xlu1 %3317 }
 0x189   : > { %v3316_v40 = vpop.permute.xlu0 %3315  ;;  %3919 = vmatpush1.bf16.msra.mxu1 %v5640_v10  ;;  %5328 = vmatprep.mubr.msk.bf16.mxu1 %vm2031_vm10, %v6893_v43 }
 0x18a   : > { %3757 = vrot.lane.b32.xlu1 %v6448_v2, %s5666_s19  ;;  %v3330_v60 = vsel %vm1479_vm7, %v3316_v40, %v6906_v6  ;;  %v3329_v15 = vsel %vm1479_vm7, %v3314_v59, %v3316_v40 }
 0x18b   : > { %3755 = vrot.lane.b32.xlu0 %v5641_v25, %s5666_s19  ;;  %3920 = vmatprep.subr.bf16.mxu1 %v3330_v60  ;;  %v3621_v25 = vld [vmem:[#allocation2 + $0x90] sm:$0xff] }
 0x18c   : > { %v3372_v41 = vpop.permute.xlu1 %3371 }
 0x18d   : > { %v3310_v56 = vpop.permute.xlu0 %3309  ;;  %3921 = vmatpush1.bf16.msra.mxu1 %v3329_v15  ;;  %v6980_v15 = vld [vmem:[#allocation2 + $0xa0] sm:$0xff] }
 0x18e   : > { %v3327_v49 = vsel %vm1479_vm7, %v3310_v56, %v3312_v48  ;;  %4232 = vrot.lane.b32.xlu1 %v6548_v36, %s5665_s18 }
 0x18f   : > { %3759 = vrot.lane.b32.xlu0 %v6544_v18, %s5666_s19  ;;  %3880 = vmatpush1.bf16.msra.mxu0 %v3327_v49 }
 0x190   : > { %v3376_v2 = vpop.permute.xlu1 %3375 }
 0x191   : > { %v3374_v33 = vpop.permute.xlu0 %3373 }
 0x192   : > { %v3388_v32 = vsel %vm1540_vm8, %v3372_v41, %v3374_v33  ;;  %4236 = vrot.lane.b32.xlu1 %v6571_v55, %s5665_s18  ;;  %v3389_v34 = vsel %vm1540_vm8, %v3374_v33, %v3376_v2 }
 0x193   : > { %4234 = vrot.lane.b32.xlu0 %v6567_v16, %s5665_s18  ;;  %3881 = vmatprep.subr.bf16.mxu0 %v3388_v32  ;;  %v5476_v32 = vld [vmem:[%s5719_s17 + $0x6c] ss:$136 sps:$4 sm:$0xff]  }
 0x194   : > { %v3370_v0 = vpop.permute.xlu1 %3369 }
 0x195   : > { %v6926_v37 = vpop.permute.xlu0 %3377  ;;  %v3387_v51 = vsel %vm1540_vm8, %v3370_v0, %v3372_v41  ;;  %v3622_v41 = vld [vmem:[#allocation2 + $0x98] sm:$0xff] }
 0x196   : > { %v3390_v39 = vsel %vm1540_vm8, %v3376_v2, %v6926_v37  ;;  %4230 = vrot.lane.b32.xlu1 %v6596_v9, %s5665_s18  ;;  %3882 = vmatpush1.bf16.msra.mxu0 %v3387_v51  ;;  %v5474_v51 = vld [vmem:[%s5719_s17 + $0x68] ss:$136 sps:$4 sm:$0xff]  }
 0x197   : > { %4238 = vrot.lane.b32.xlu0 %v6592_v20, %s5665_s18  ;;  %3922 = vmatprep.subr.bf16.mxu1 %v3390_v39 }
 0x198   : > { %3923 = vmatpush1.bf16.msra.mxu1 %v3389_v34  ;;  %v3434_v26 = vpop.permute.xlu1 %3433 }
 0x199   : > { %v3432_v23 = vpop.permute.xlu0 %3431 }
 0x19a   : > { %4294 = vrot.lane.b32.xlu1 %v6605_v13, %s5666_s19  ;;  %v3448_v50 = vsel %vm1601_vm9, %v3432_v23, %v3434_v26 }
 0x19b   : > { %4292 = vrot.lane.b32.xlu0 %v6544_v18, %s5666_s19  ;;  %3883 = vmatprep.subr.bf16.mxu0 %v3448_v50  ;;  %v5478_v50 = vld [vmem:[%s5719_s17 + $0x70] ss:$136 sps:$4 sm:$0xff]  }
 0x19c   : > { %v6941_v17 = vpop.permute.xlu1 %3437 }
 0x19d   : > { %v3436_v5 = vpop.permute.xlu0 %3435 }
 0x19e   : > { %4298 = vrot.lane.b32.xlu1 %v6622_v28, %s5666_s19  ;;  %v3450_v58 = vsel %vm1601_vm9, %v3436_v5, %v6941_v17  ;;  %v3449_v38 = vsel %vm1601_vm9, %v3434_v26, %v3436_v5 }
 0x19f   : > { %4296 = vrot.lane.b32.xlu0 %v6609_v47, %s5666_s19  ;;  %3924 = vmatprep.subr.bf16.mxu1 %v3450_v58 }
 0x1a0   : > { %3925 = vmatpush1.bf16.msra.mxu1 %v3449_v38  ;;  %v3521_v21 = vpop.permute.xlu1 %3520 }
 0x1a1   : > { %v3430_v62 = vpop.permute.xlu0 %3429 }
 0x1a2   : > { %v3447_v46 = vsel %vm1601_vm9, %v3430_v62, %v3432_v23  ;;  %4352 = vrot.lane.b32.xlu1 %v6637_v30, %s5667_s20  ;;  %v5479_v23 = vld [vmem:[%s5719_s17 + $0x74] ss:$136 sps:$4 sm:$0xff]   ;;  %v5481_v62 = vld [vmem:[%s5719_s17 + $0x64] ss:$136 sps:$4 sm:$0xff]  }
 0x1a3   : > { %4290 = vrot.lane.b32.xlu0 %v5642_v61, %s5666_s19  ;;  %3884 = vmatpush1.bf16.msra.mxu0 %v3447_v46 }
 0x1a4   : > { %v3525_v57 = vpop.permute.xlu1 %3524 }
 0x1a5   : > { %v3523_v63 = vpop.permute.xlu0 %3522 }
 0x1a6   : > { %v3537_v12 = vsel %vm1691_vm4, %v3521_v21, %v3523_v63  ;;  %4356 = vrot.lane.b32.xlu1 %v6650_v27, %s5667_s20  ;;  %v3538_v27 = vsel %vm1691_vm4, %v3523_v63, %v3525_v57 }
 0x1a7   : > { %4354 = vrot.lane.b32.xlu0 %v6648_v29, %s5667_s20  ;;  %3885 = vmatprep.subr.bf16.mxu0 %v3537_v12  ;;  %v5645_v12 = vld [vmem:[#allocation2 + $0xa8] sm:$0xff] }
 0x1a8   : > { %v3519_v22 = vpop.permute.xlu1 %3518 }
 0x1a9   : > { %v6959_v59 = vpop.permute.xlu0 %3526  ;;  %v3536_v30 = vsel %vm1691_vm4, %v3519_v22, %v3521_v21 }
 0x1aa   : > { %v3539_v48 = vsel %vm1691_vm4, %v3525_v57, %v6959_v59  ;;  %4350 = vrot.lane.b32.xlu1 %v5643_v1, %s5667_s20  ;;  %3886 = vmatpush1.bf16.msra.mxu0 %v3536_v30  ;;  %v5644_v57 = vld [vmem:[#allocation2 + $0xb8] sm:$0xff] }
 0x1ab   : > { %4358 = vrot.lane.b32.xlu0 %v6671_v14, %s5667_s20  ;;  %3926 = vmatprep.subr.bf16.mxu1 %v3539_v48  ;;  %v5646_v48 = vld [vmem:[#allocation2 + $0xb0] sm:$0xff] }
 0x1ac   : > { %3927 = vmatpush1.bf16.msra.mxu1 %v3538_v27  ;;  %v3583_v29 = vpop.permute.xlu1 %3582 }
 0x1ad   : > { %v3581_v8 = vpop.permute.xlu0 %3580 }
 0x1ae   : > { %4443 = vrot.lane.b32.xlu1 %v6567_v16, %s5668_s21  ;;  %v3597_v52 = vsel %vm1752_vm12, %v3581_v8, %v3583_v29 }
 0x1af   : > { %4441 = vrot.lane.b32.xlu0 %v6548_v36, %s5668_s21  ;;  %3887 = vmatprep.subr.bf16.mxu0 %v3597_v52  ;;  %v5647_v52 = vld [vmem:[#allocation3 + $0xc8] sm:$0xff] }
 0x1b0   : > { %v6973_v40 = vpop.permute.xlu1 %3586 }
 0x1b1   : > { %v3585_v10 = vpop.permute.xlu0 %3584 }
 0x1b2   : > { %4447 = vrot.lane.b32.xlu1 %v6592_v20, %s5668_s21  ;;  %v3599_v14 = vsel %vm1752_vm12, %v3585_v10, %v6973_v40  ;;  %v3598_v60 = vsel %vm1752_vm12, %v3583_v29, %v3585_v10 }
 0x1b3   : > { %4445 = vrot.lane.b32.xlu0 %v6571_v55, %s5668_s21  ;;  %3928 = vmatprep.subr.bf16.mxu1 %v3599_v14  ;;  %v3620_v55 = vld [vmem:[#allocation2 + $0x88] sm:$0xff] }
 0x1b4   : > { %3929 = vmatpush1.bf16.msra.mxu1 %v3598_v60  ;;  %v3686_v36 = vpop.permute.xlu1 %3685 }
 0x1b5   : > { %v3579_v16 = vpop.permute.xlu0 %3578  ;;  %3930 = vmatprep.subr.bf16.mxu1 %v6980_v15 }
 0x1b6   : > { %v3596_v20 = vsel %vm1752_vm12, %v3579_v16, %v3581_v8  ;;  %4501 = vrot.lane.b32.xlu1 %v6544_v18, %s5669_s22  ;;  %v7050_v16 = vpop.f32.mrb[0].mxu0 }
 0x1b7   : > { %4439 = vrot.lane.b32.xlu0 %v6596_v9, %s5668_s21  ;;  %3888 = vmatpush1.bf16.msra.mxu0 %v3596_v20  ;;  %v7056_v20 = vpop.f32.mrb[1].mxu0 }
 0x1b8   : > { %3889 = vmatprep.subr.bf16.mxu0 %v3621_v25  ;;  %3931 = vmatpush1.bf16.msra.mxu1 %v3622_v41  ;;  %v3690_v56 = vpop.permute.xlu1 %3689  ;;  %v7054_v41 = vpop.f32.mrb[0].mxu1 }
 0x1b9   : > { %v3688_v49 = vpop.permute.xlu0 %3687 }
 0x1ba   : > { %v3702_v54 = vsel %vm1479_vm7, %v3686_v36, %v3688_v49  ;;  %4505 = vrot.lane.b32.xlu1 %v6609_v47, %s5669_s22  ;;  %v3703_v0 = vsel %vm1479_vm7, %v3688_v49, %v3690_v56 }
 0x1bb   : > { %4503 = vrot.lane.b32.xlu0 %v6605_v13, %s5669_s22  ;;  %3890 = vmatpush1.bf16.msra.mxu0 %v3620_v55 }
 0x1bc   : > { %3891 = vmatprep.subr.bf16.mxu0 %v3702_v54  ;;  %v3684_v18 = vpop.permute.xlu1 %3683 }
 0x1bd   : > { %v6995_v9 = vpop.permute.xlu0 %3691  ;;  %v3701_v2 = vsel %vm1479_vm7, %v3684_v18, %v3686_v36 }
 0x1be   : > { %v3704_v33 = vsel %vm1479_vm7, %v3690_v56, %v6995_v9  ;;  %4499 = vrot.lane.b32.xlu1 %v5642_v61, %s5669_s22  ;;  %v2073_v56 = vpop.f32.mrb[2].mxu0 }
 0x1bf   : > { %4507 = vrot.lane.b32.xlu0 %v6622_v28, %s5669_s22  ;;  %3932 = vmatprep.subr.bf16.mxu1 %v3704_v33 }
 0x1c0   : > { %3933 = vmatpush1.bf16.msra.mxu1 %v3703_v0  ;;  %3892 = vmatpush1.bf16.msra.mxu0 %v3701_v2  ;;  %v3748_v39 = vpop.permute.xlu1 %3747  ;;  %v2074_v2 = vpop.f32.mrb[3].mxu0 }
 0x1c1   : > { %v3746_v34 = vpop.permute.xlu0 %3745  ;;  %v7132_v2 = vld [vmem:[#allocation2 + $0xc8] sm:$0xff] }
 0x1c2   : > { %4608 = vrot.lane.b32.xlu1 %v5476_v32, %s5665_s18  ;;  %v3762_v26 = vsel %vm1540_vm8, %v3746_v34, %v3748_v39 }
 0x1c3   : > { %4606 = vrot.lane.b32.xlu0 %v5474_v51, %s5665_s18  ;;  %3893 = vmatprep.subr.bf16.mxu0 %v3762_v26 }
 0x1c4   : > { %v7011_v5 = vpop.permute.xlu1 %3751 }
 0x1c5   : > { %v3750_v58 = vpop.permute.xlu0 %3749 }
 0x1c6   : > { %v3763_v38 = vsel %vm1540_vm8, %v3748_v39, %v3750_v58  ;;  %4612 = vrot.lane.b32.xlu1 %v5479_v23, %s5665_s18  ;;  %v3764_v21 = vsel %vm1540_vm8, %v3750_v58, %v7011_v5 }
 0x1c7   : > { %4610 = vrot.lane.b32.xlu0 %v5478_v50, %s5665_s18  ;;  %3934 = vmatprep.subr.bf16.mxu1 %v3764_v21 }
 0x1c8   : > { %3935 = vmatpush1.bf16.msra.mxu1 %v3763_v38  ;;  %v3320_v46 = vpop.permute.xlu1 %3319 }
 0x1c9   : > { %v3744_v61 = vpop.permute.xlu0 %3743  ;;  %4000 = vmatprep.subr.bf16.mxu1 %v5644_v57  ;;  %v3331_v29 = vsel %vm1479_vm7, %v6906_v6, %v3320_v46  ;;  %v5485_v6 = vld [vmem:[%s5719_s17 + $0x80] ss:$136 sps:$4 sm:$0xff]  }
 0x1ca   : > { %v3761_v63 = vsel %vm1540_vm8, %v3744_v61, %v3746_v34  ;;  %4666 = vrot.lane.b32.xlu1 %v6605_v13, %s5666_s19  ;;  %v3625_v61 = vld [vmem:[#allocation2 + $0xb0] sm:$0xff]  ;;  %v5486_v57 = vld [vmem:[%s5719_s17 + $0x80] ss:$136 sps:$4 sm:$0xff]  }
 0x1cb   : > { %4604 = vrot.lane.b32.xlu0 %v5481_v62, %s5665_s18  ;;  %3894 = vmatpush1.bf16.msra.mxu0 %v3761_v63 }
 0x1cc   : > { %3959 = vmatprep.subr.bf16.mxu0 %v5645_v12  ;;  %3951 = vmatmul.mubr.bf16.vlgmr.msra.gmra.mrb[16].mxu1 %v6886_v19  ;;  %v3324_v22 = vpop.permute.xlu1 %3323 }
 0x1cd   : > { %v3322_v30 = vpop.permute.xlu0 %3321  ;;  %4001 = vmatpush1.bf16.msra.mxu1 %v5646_v48  ;;  %5330 = vmatprep.mubr.msk.bf16.mxu1 %vm2031_vm10, %v6893_v43  ;;  %v3627_v48 = vld [vmem:[#allocation2 + $0xc0] sm:$0xff] }
 0x1ce   : > { %3910 = vmatmul.mubr.bf16.vlgmr.msra.gmra.mrb[16].mxu0 %v6886_v19  ;;  %v3332_v1 = vsel %vm1479_vm7, %v3320_v46, %v3322_v30  ;;  %4670 = vrot.lane.b32.xlu1 %v6622_v28, %s5666_s19 }
 0x1cf   : > { %4668 = vrot.lane.b32.xlu0 %v6609_v47, %s5666_s19  ;;  %3960 = vmatpush1.bf16.msra.mxu0 %v6980_v15  ;;  %v3333_v47 = vsel %vm1479_vm7, %v3322_v30, %v3324_v22 }
 0x1d0   : > { %3961 = vmatprep.subr.bf16.mxu0 %v3332_v1  ;;  %v3380_v13 = vpop.permute.xlu1 %3379  ;;  %5329 = vmatprep.mubr.msk.bf16.mxu0 %vm2031_vm10, %v6893_v43  ;;  %v3626_v1 = vld [vmem:[#allocation2 + $0xb8] sm:$0xff] }
 0x1d1   : > { %v3326_v27 = vpop.permute.xlu0 %3325  ;;  %v3391_v60 = vsel %vm1540_vm8, %v6926_v37, %v3380_v13  ;;  %v7061_v37 = vpop.f32.mrb[1].mxu1 }
 0x1d2   : > { %v3334_v8 = vsel %vm1479_vm7, %v3324_v22, %v3326_v27  ;;  %4664 = vrot.lane.b32.xlu1 %v5647_v52, %s5666_s19  ;;  %v2114_v54 = vpop.f32.mrb[2].mxu1  ;;  %v3624_v22 = vld [vmem:[#allocation2 + $0xa8] sm:$0xff]  ;;  %v5488_v52 = vld [vmem:[%s5719_s17 + $0x7c] ss:$136 sps:$4 sm:$0xff]  }
 0x1d3   : > { %4672 = vrot.lane.b32.xlu0 %v6749_v4, %s5666_s19  ;;  %3962 = vmatpush1.bf16.msra.mxu0 %v3331_v29  ;;  %v2115_v32 = vpop.f32.mrb[3].mxu1 }
 0x1d4   : > { %4002 = vmatprep.subr.bf16.mxu1 %v3334_v8  ;;  %v3384_v28 = vpop.permute.xlu1 %3383 }
 0x1d5   : > { %4003 = vmatpush1.bf16.msra.mxu1 %v3333_v47  ;;  %v3382_v10 = vpop.permute.xlu0 %3381 }
 0x1d6   : > { %v3392_v14 = vsel %vm1540_vm8, %v3380_v13, %v3382_v10  ;;  %4242 = vrot.lane.b32.xlu1 %v6775_v7, %s5665_s18  ;;  %v3393_v55 = vsel %vm1540_vm8, %v3382_v10, %v3384_v28 }
 0x1d7   : > { %4240 = vrot.lane.b32.xlu0 %v6758_v45, %s5665_s18  ;;  %3963 = vmatprep.subr.bf16.mxu0 %v3392_v14 }
 0x1d8   : > { %3964 = vmatpush1.bf16.msra.mxu0 %v3391_v60  ;;  %v3440_v15 = vpop.permute.xlu1 %3439 }
 0x1d9   : > { %v3386_v36 = vpop.permute.xlu0 %3385  ;;  %v3451_v0 = vsel %vm1601_vm9, %v6941_v17, %v3440_v15 }
 0x1da   : > { %v3394_v25 = vsel %vm1540_vm8, %v3384_v28, %v3386_v36  ;;  %4246 = vrot.lane.b32.xlu1 %v5485_v6, %s5665_s18  ;;  %v5491_v6 = vld [vmem:[%s5719_s17 + $0x84] ss:$136 sps:$4 sm:$0xff]  }
 0x1db   : > { %4244 = vrot.lane.b32.xlu0 %v6781_v42, %s5665_s18  ;;  %4004 = vmatprep.subr.bf16.mxu1 %v3394_v25  ;;  %v7117_v10 = vpop.f32.mrb[4].mxu0  ;;  %v5490_v25 = vld [vmem:[%s5719_s17 + $0x80] ss:$136 sps:$4 sm:$0xff]  }
 0x1dc   : > { %4005 = vmatpush1.bf16.msra.mxu1 %v3393_v55  ;;  %v3444_v49 = vpop.permute.xlu1 %3443 }
 0x1dd   : > { %v3442_v18 = vpop.permute.xlu0 %3441 }
 0x1de   : > { %v3452_v33 = vsel %vm1601_vm9, %v3440_v15, %v3442_v18  ;;  %4302 = vrot.lane.b32.xlu1 %v6799_v31, %s5666_s19  ;;  %v3453_v26 = vsel %vm1601_vm9, %v3442_v18, %v3444_v49  ;;  %v7124_v15 = vpop.f32.mrb[5].mxu0 }
 0x1df   : > { %4300 = vrot.lane.b32.xlu0 %v6749_v4, %s5666_s19  ;;  %3965 = vmatprep.subr.bf16.mxu0 %v3452_v33  ;;  %v7122_v60 = vpop.f32.mrb[4].mxu1  ;;  %v2155_v56 = vpop.f32.mrb[6].mxu0 }
 0x1e0   : > { %3966 = vmatpush1.bf16.msra.mxu0 %v3451_v0  ;;  %v3529_v51 = vpop.permute.xlu1 %3528  ;;  %v7130_v55 = vpop.f32.mrb[5].mxu1 }
 0x1e1   : > { %v3446_v39 = vpop.permute.xlu0 %3445  ;;  %v3540_v58 = vsel %vm1691_vm4, %v6959_v59, %v3529_v51  ;;  %v2196_v54 = vpop.f32.mrb[6].mxu1 }
 0x1e2   : > { %v3454_v34 = vsel %vm1601_vm9, %v3444_v49, %v3446_v39  ;;  %4306 = vrot.lane.b32.xlu1 %v6818_v35, %s5666_s19  ;;  %v2156_v33 = vpop.f32.mrb[7].mxu0 }
 0x1e3   : > { %4304 = vrot.lane.b32.xlu0 %v6804_v24, %s5666_s19  ;;  %4006 = vmatprep.subr.bf16.mxu1 %v3454_v34  ;;  %v7140_v34 = vld [vmem:[#allocation2 + $0xd8] sm:$0xff] }
 0x1e4   : > { %4007 = vmatpush1.bf16.msra.mxu1 %v3453_v26  ;;  %v3533_v17 = vpop.permute.xlu1 %3532 }
 0x1e5   : > { %v3531_v23 = vpop.permute.xlu0 %3530 }
 0x1e6   : > { %v3541_v50 = vsel %vm1691_vm4, %v3529_v51, %v3531_v23  ;;  %4362 = vrot.lane.b32.xlu1 %v6831_v11, %s5667_s20  ;;  %v3542_v46 = vsel %vm1691_vm4, %v3531_v23, %v3533_v17 }
 0x1e7   : > { %4360 = vrot.lane.b32.xlu0 %v6822_v53, %s5667_s20  ;;  %3967 = vmatprep.subr.bf16.mxu0 %v3541_v50  ;;  %v7151_v50 = vld [vmem:[#allocation2 + $0xd0] sm:$0xff] }
 0x1e8   : > { %3968 = vmatpush1.bf16.msra.mxu0 %v3540_v58  ;;  %v3589_v38 = vpop.permute.xlu1 %3588 }
 0x1e9   : > { %v3535_v21 = vpop.permute.xlu0 %3534  ;;  %v3600_v63 = vsel %vm1752_vm12, %v6973_v40, %v3589_v38 }
 0x1ea   : > { %v3543_v62 = vsel %vm1691_vm4, %v3533_v17, %v3535_v21  ;;  %4366 = vrot.lane.b32.xlu1 %v6843_v3, %s5667_s20  ;;  %v4654_v17 = vld [vmem:[#allocation3 + $0x108] sm:$0xff] }
 0x1eb   : > { %4364 = vrot.lane.b32.xlu0 %v6837_v44, %s5667_s20  ;;  %4008 = vmatprep.subr.bf16.mxu1 %v3543_v62  ;;  %v2015_v62 = vld [vmem:[%s7451_s2] sm:$0xf] }
 0x1ec   : > { %4009 = vmatpush1.bf16.msra.mxu1 %v3542_v46  ;;  %v3593_v11 = vpop.permute.xlu1 %3592 }
 0x1ed   : > { %v3591_v59 = vpop.permute.xlu0 %3590 }
 0x1ee   : > { %v3601_v53 = vsel %vm1752_vm12, %v3589_v38, %v3591_v59  ;;  %4451 = vrot.lane.b32.xlu1 %v6775_v7, %s5668_s21  ;;  %v3602_v7 = vsel %vm1752_vm12, %v3591_v59, %v3593_v11 }
 0x1ef   : > { %4449 = vrot.lane.b32.xlu0 %v6758_v45, %s5668_s21  ;;  %3969 = vmatprep.subr.bf16.mxu0 %v3601_v53 }
 0x1f0   : > { %3970 = vmatpush1.bf16.msra.mxu0 %v3600_v63  ;;  %v3694_v3 = vpop.permute.xlu1 %3693 }
 0x1f1   : > { %v3595_v12 = vpop.permute.xlu0 %3594  ;;  %3971 = vmatprep.subr.bf16.mxu0 %v3625_v61  ;;  %v3705_v27 = vsel %vm1479_vm7, %v6995_v9, %v3694_v3 }
 0x1f2   : > { %v3603_v30 = vsel %vm1752_vm12, %v3593_v11, %v3595_v12  ;;  %4455 = vrot.lane.b32.xlu1 %v5486_v57, %s5668_s21 }
 0x1f3   : > { %4453 = vrot.lane.b32.xlu0 %v6781_v42, %s5668_s21  ;;  %4010 = vmatprep.subr.bf16.mxu1 %v3603_v30 }
 0x1f4   : > { %3972 = vmatpush1.bf16.msra.mxu0 %v3624_v22  ;;  %4011 = vmatpush1.bf16.msra.mxu1 %v3602_v7  ;;  %v3698_v45 = vpop.permute.xlu1 %3697 }
 0x1f5   : > { %v3696_v40 = vpop.permute.xlu0 %3695  ;;  %4012 = vmatprep.subr.bf16.mxu1 %v3627_v48 }
 0x1f6   : > { %v3706_v13 = vsel %vm1479_vm7, %v3694_v3, %v3696_v40  ;;  %4511 = vrot.lane.b32.xlu1 %v6799_v31, %s5669_s22  ;;  %v3707_v47 = vsel %vm1479_vm7, %v3696_v40, %v3698_v45 }
 0x1f7   : > { %4509 = vrot.lane.b32.xlu0 %v6749_v4, %s5669_s22  ;;  %3973 = vmatprep.subr.bf16.mxu0 %v3706_v13  ;;  %v5487_v4 = vld [vmem:[%s5719_s17 + $0x78] ss:$136 sps:$4 sm:$0xff]   ;;  %s7397_s17 = scalar_lea.vmem %s7452_s3, %s5381_s14 }
 0x1f8   : > { %3974 = vmatpush1.bf16.msra.mxu0 %v3705_v27  ;;  %4013 = vmatpush1.bf16.msra.mxu1 %v3626_v1  ;;  %v3754_v42 = vpop.permute.xlu1 %3753 }
 0x1f9   : > { %v3700_v29 = vpop.permute.xlu0 %3699  ;;  %v3765_v36 = vsel %vm1540_vm8, %v7011_v5, %v3754_v42  ;;  %v2197_v5 = vpop.f32.mrb[7].mxu1 }
 0x1fa   : > { %v3708_v8 = vsel %vm1479_vm7, %v3698_v45, %v3700_v29  ;;  %4515 = vrot.lane.b32.xlu1 %v6818_v35, %s5669_s22 }
 0x1fb   : > { %4513 = vrot.lane.b32.xlu0 %v6804_v24, %s5669_s22  ;;  %4014 = vmatprep.subr.bf16.mxu1 %v3708_v8 }
 0x1fc   : > { %4015 = vmatpush1.bf16.msra.mxu1 %v3707_v47  ;;  %v3758_v9 = vpop.permute.xlu1 %3757 }
 0x1fd   : > { %v3756_v28 = vpop.permute.xlu0 %3755 }
 0x1fe   : > { %v3766_v14 = vsel %vm1540_vm8, %v3754_v42, %v3756_v28  ;;  %4616 = vrot.lane.b32.xlu1 %v5488_v52, %s5665_s18  ;;  %v3767_v0 = vsel %vm1540_vm8, %v3756_v28, %v3758_v9 }
 0x1ff   : > { %4614 = vrot.lane.b32.xlu0 %v5487_v4, %s5665_s18  ;;  %3975 = vmatprep.subr.bf16.mxu0 %v3766_v14 }
 0x200   : > { %3976 = vmatpush1.bf16.msra.mxu0 %v3765_v36  ;;  %v4233_v49 = vpop.permute.xlu1 %4232 }
 0x201   : > { %v3760_v18 = vpop.permute.xlu0 %3759  ;;  %4798 = vmatprep.subr.bf16.mxu0 %v7132_v2 }
 0x202   : > { %v3768_v32 = vsel %vm1540_vm8, %v3758_v9, %v3760_v18  ;;  %4620 = vrot.lane.b32.xlu1 %v5491_v6, %s5665_s18 }
 0x203   : > { %4618 = vrot.lane.b32.xlu0 %v5490_v25, %s5665_s18  ;;  %4016 = vmatprep.subr.bf16.mxu1 %v3768_v32  ;;  %v4779_v32 = vld [vmem:[%s7451_s2] sm:$0xf] }
 0x204   : > { %4017 = vmatpush1.bf16.msra.mxu1 %v3767_v0  ;;  %3992 = vmatmul.mubr.bf16.vlgmr.msra.gmra.mrb[20].mxu0 %v6886_v19  ;;  %v4237_v51 = vpop.permute.xlu1 %4236 }
 0x205   : > { %v4235_v39 = vpop.permute.xlu0 %4234  ;;  %4799 = vmatpush1.bf16.msra.mxu0 %v3627_v48  ;;  %4839 = vmatprep.subr.bf16.mxu1 %v7140_v34 }
 0x206   : > { %v4249_v26 = vsel %vm1479_vm7, %v4233_v49, %v4235_v39  ;;  %4676 = vrot.lane.b32.xlu1 %v6804_v24, %s5666_s19  ;;  %5367 = vmatprep.mubr.msk.bf16.mxu0 %vm2031_vm10, %v6893_v43  ;;  %v4250_v21 = vsel %vm1479_vm7, %v4235_v39, %v4237_v51 }
 0x207   : > { %4674 = vrot.lane.b32.xlu0 %v6799_v31, %s5666_s19  ;;  %4800 = vmatprep.subr.bf16.mxu0 %v4249_v26  ;;  %v2937_v31 = vld [vmem:[%s7451_s2] sm:$0xf] }
 0x208   : > { %4033 = vmatmul.mubr.bf16.vlgmr.msra.gmra.mrb[20].mxu1 %v6886_v19  ;;  %v4231_v23 = vpop.permute.xlu1 %4230 }
 0x209   : > { %4840 = vmatpush1.bf16.msra.mxu1 %v7151_v50  ;;  %v7154_v58 = vpop.permute.xlu0 %4238  ;;  %v4248_v38 = vsel %vm1479_vm7, %v4231_v23, %v4233_v49  ;;  %5368 = vmatprep.mubr.msk.bf16.mxu1 %vm2031_vm10, %v6893_v43 }
 0x20a   : > { %v4251_v24 = vsel %vm1479_vm7, %v4237_v51, %v7154_v58  ;;  %4680 = vrot.lane.b32.xlu1 %v4654_v17, %s5666_s19  ;;  %4801 = vmatpush1.bf16.msra.mxu0 %v4248_v38 }
 0x20b   : > { %4678 = vrot.lane.b32.xlu0 %v6818_v35, %s5666_s19  ;;  %4841 = vmatprep.subr.bf16.mxu1 %v4251_v24  ;;  %v3858_v35 = vld [vmem:[%s7451_s2] sm:$0xf] }
 0x20c   : > { %v4295_v46 = vpop.permute.xlu1 %4294 }
 0x20d   : > { %4842 = vmatpush1.bf16.msra.mxu1 %v4250_v21  ;;  %v4293_v11 = vpop.permute.xlu0 %4292 }
 0x20e   : > { %2940 = vperm.xlu1 %5399, %v2937_v31   ;;  %v4309_v59 = vsel %vm1540_vm8, %v4293_v11, %v4295_v46 }
 0x20f   : > { %2018 = vperm.xlu0 %5398, %v2015_v62   ;;  %4802 = vmatprep.subr.bf16.mxu0 %v4309_v59  ;;  %v5651_v62 = vld [vmem:[#allocation2 + $0xe0] sm:$0xff] }
 0x210   : > { %v7175_v53 = vpop.permute.xlu1 %4298 }
 0x211   : > { %v4297_v61 = vpop.permute.xlu0 %4296 }
 0x212   : > { %v4310_v57 = vsel %vm1540_vm8, %v4295_v46, %v4297_v61  ;;  %v4311_v63 = vsel %vm1540_vm8, %v4297_v61, %v7175_v53  ;;  %3861 = vperm.xlu1 %5399, %v3858_v35  }
 0x213   : > { %4843 = vmatprep.subr.bf16.mxu1 %v4311_v63  ;;  %4782 = vperm.xlu0 %5398, %v4779_v32  }
 0x214   : > { %4844 = vmatpush1.bf16.msra.mxu1 %v4310_v57  ;;  %v4353_v3 = vpop.permute.xlu1 %4352 }
 0x215   : > { %v4291_v12 = vpop.permute.xlu0 %4290 }
 0x216   : > { %v4308_v22 = vsel %vm1540_vm8, %v4291_v12, %v4293_v11 }
 0x217   : > { %4803 = vmatpush1.bf16.msra.mxu0 %v4308_v22 }
 0x218   : > { %v4357_v30 = vpop.permute.xlu1 %4356 }
 0x219   : > { %v4355_v48 = vpop.permute.xlu0 %4354 }
 0x21a   : > { %v4369_v7 = vsel %vm1601_vm9, %v4353_v3, %v4355_v48  ;;  %v4370_v27 = vsel %vm1601_vm9, %v4355_v48, %v4357_v30 }
 0x21b   : > { %4804 = vmatprep.subr.bf16.mxu0 %v4369_v7 }
 0x21c   : > { %v4351_v45 = vpop.permute.xlu1 %4350 }
 0x21d   : > { %v7182_v40 = vpop.permute.xlu0 %4358  ;;  %v4368_v1 = vsel %vm1601_vm9, %v4351_v45, %v4353_v3  ;;  %v7230_v45 = vld [vmem:[#allocation2 + $0xe8] sm:$0xff] }
 0x21e   : > { %v4371_v13 = vsel %vm1601_vm9, %v4357_v30, %v7182_v40  ;;  %4805 = vmatpush1.bf16.msra.mxu0 %v4368_v1 }
 0x21f   : > { %4845 = vmatprep.subr.bf16.mxu1 %v4371_v13 }
 0x220   : > { %4846 = vmatpush1.bf16.msra.mxu1 %v4370_v27  ;;  %v4444_v42 = vpop.permute.xlu1 %4443  ;;  %v7188_v29 = vpop.f32.mrb[8].mxu0 }
 0x221   : > { %v4442_v8 = vpop.permute.xlu0 %4441  ;;  %v7190_v52 = vpop.f32.mrb[9].mxu0 }
 0x222   : > { %v4458_v47 = vsel %vm1691_vm4, %v4442_v8, %v4444_v42  ;;  %v7193_v4 = vpop.f32.mrb[8].mxu1  ;;  %v2994_v9 = vpop.f32.mrb[10].mxu0 }
 0x223   : > { %4806 = vmatprep.subr.bf16.mxu0 %v4458_v47  ;;  %v7195_v28 = vpop.f32.mrb[9].mxu1  ;;  %v2995_v14 = vpop.f32.mrb[11].mxu0 }
 0x224   : > { %v7197_v6 = vpop.permute.xlu1 %4447  ;;  %v3035_v36 = vpop.f32.mrb[10].mxu1 }
 0x225   : > { %v4446_v25 = vpop.permute.xlu0 %4445  ;;  %v3036_v56 = vpop.f32.mrb[11].mxu1 }
 0x226   : > { %v4459_v49 = vsel %vm1691_vm4, %v4444_v42, %v4446_v25  ;;  %v4460_v54 = vsel %vm1691_vm4, %v4446_v25, %v7197_v6  ;;  %v5653_v42 = vld [vmem:[#allocation2 + $0xf0] sm:$0xff] }
 0x227   : > { %4847 = vmatprep.subr.bf16.mxu1 %v4460_v54 }
 0x228   : > { %4848 = vmatpush1.bf16.msra.mxu1 %v4459_v49  ;;  %v4502_v18 = vpop.permute.xlu1 %4501 }
 0x229   : > { %v4440_v33 = vpop.permute.xlu0 %4439 }
 0x22a   : > { %v4457_v5 = vsel %vm1691_vm4, %v4440_v33, %v4442_v8 }
 0x22b   : > { %4807 = vmatpush1.bf16.msra.mxu0 %v4457_v5 }
 0x22c   : > { %v4506_v0 = vpop.permute.xlu1 %4505 }
 0x22d   : > { %v4504_v51 = vpop.permute.xlu0 %4503 }
 0x22e   : > { %v4518_v39 = vsel %vm1752_vm12, %v4502_v18, %v4504_v51  ;;  %v4519_v24 = vsel %vm1752_vm12, %v4504_v51, %v4506_v0 }
 0x22f   : > { %4808 = vmatprep.subr.bf16.mxu0 %v4518_v39 }
 0x230   : > { %v4500_v26 = vpop.permute.xlu1 %4499 }
 0x231   : > { %v7207_v17 = vpop.permute.xlu0 %4507  ;;  %v4517_v23 = vsel %vm1752_vm12, %v4500_v26, %v4502_v18 }
 0x232   : > { %v4520_v38 = vsel %vm1752_vm12, %v4506_v0, %v7207_v17  ;;  %4809 = vmatpush1.bf16.msra.mxu0 %v4517_v23 }
 0x233   : > { %4849 = vmatprep.subr.bf16.mxu1 %v4520_v38  ;;  %4810 = vmatprep.subr.bf16.mxu0 %v7151_v50 }
 0x234   : > { %4850 = vmatpush1.bf16.msra.mxu1 %v4519_v24  ;;  %v4609_v31 = vpop.permute.xlu1 %4608 }
 0x235   : > { %v4607_v21 = vpop.permute.xlu0 %4606  ;;  %4851 = vmatprep.subr.bf16.mxu1 %v5651_v62 }
 0x236   : > { %4811 = vmatpush1.bf16.msra.mxu0 %v7132_v2  ;;  %v4623_v46 = vsel %vm1479_vm7, %v4607_v21, %v4609_v31 }
 0x237   : > { %4812 = vmatprep.subr.bf16.mxu0 %v4623_v46 }
 0x238   : > { %4852 = vmatpush1.bf16.msra.mxu1 %v7140_v34  ;;  %v7217_v11 = vpop.permute.xlu1 %4612 }
 0x239   : > { %v4611_v59 = vpop.permute.xlu0 %4610 }
 0x23a   : > { %v4624_v35 = vsel %vm1479_vm7, %v4609_v31, %v4611_v59  ;;  %v4625_v50 = vsel %vm1479_vm7, %v4611_v59, %v7217_v11 }
 0x23b   : > { %4853 = vmatprep.subr.bf16.mxu1 %v4625_v50 }
 0x23c   : > { %4854 = vmatpush1.bf16.msra.mxu1 %v4624_v35  ;;  %v4667_v61 = vpop.permute.xlu1 %4666 }
 0x23d   : > { %v4605_v57 = vpop.permute.xlu0 %4604 }
 0x23e   : > { %v4622_v63 = vsel %vm1479_vm7, %v4605_v57, %v4607_v21 }
 0x23f   : > { %4813 = vmatpush1.bf16.msra.mxu0 %v4622_v63 }
 0x240   : > { %v4671_v2 = vpop.permute.xlu1 %4670 }
 0x241   : > { %v4669_v3 = vpop.permute.xlu0 %4668 }
 0x242   : > { %v4683_v12 = vsel %vm1540_vm8, %v4667_v61, %v4669_v3  ;;  %v4684_v7 = vsel %vm1540_vm8, %v4669_v3, %v4671_v2 }
 0x243   : > { %4814 = vmatprep.subr.bf16.mxu0 %v4683_v12 }
 0x244   : > { %v4665_v34 = vpop.permute.xlu1 %4664 }
 0x245   : > { %v7224_v22 = vpop.permute.xlu0 %4672  ;;  %v4682_v30 = vsel %vm1540_vm8, %v4665_v34, %v4667_v61 }
 0x246   : > { %v4685_v48 = vsel %vm1540_vm8, %v4671_v2, %v7224_v22  ;;  %4815 = vmatpush1.bf16.msra.mxu0 %v4682_v30 }
 0x247   : > { %4855 = vmatprep.subr.bf16.mxu1 %v4685_v48  ;;  %4880 = vmatprep.subr.bf16.mxu0 %v7230_v45 }
 0x248   : > { %4856 = vmatpush1.bf16.msra.mxu1 %v4684_v7  ;;  %v4243_v1 = vpop.permute.xlu1 %4242 }
 0x249   : > { %v4241_v13 = vpop.permute.xlu0 %4240  ;;  %4831 = vmatmul.mubr.bf16.vlgmr.msra.gmra.mrb[24].mxu0 %v6886_v19  ;;  %4921 = vmatprep.subr.bf16.mxu1 %v6837_v44 }
 0x24a   : > { %4881 = vmatpush1.bf16.msra.mxu0 %v5651_v62  ;;  %v4253_v27 = vsel %vm1479_vm7, %v4241_v13, %v4243_v1  ;;  %5369 = vmatprep.mubr.msk.bf16.mxu0 %vm2031_vm10, %v6893_v43  ;;  %v4252_v47 = vsel %vm1479_vm7, %v7154_v58, %v4241_v13 }
 0x24b   : > { %4872 = vmatmul.mubr.bf16.vlgmr.msra.gmra.mrb[24].mxu1 %v6886_v19  ;;  %4882 = vmatprep.subr.bf16.mxu0 %v4253_v27 }
 0x24c   : > { %4922 = vmatpush1.bf16.msra.mxu1 %v5653_v42  ;;  %v4247_v8 = vpop.permute.xlu1 %4246  ;;  %5370 = vmatprep.mubr.msk.bf16.mxu1 %vm2031_vm10, %v6893_v43 }
 0x24d   : > { %v4245_v9 = vpop.permute.xlu0 %4244 }
 0x24e   : > { %v4254_v44 = vsel %vm1479_vm7, %v4243_v1, %v4245_v9  ;;  %4883 = vmatpush1.bf16.msra.mxu0 %v4252_v47  ;;  %v4255_v14 = vsel %vm1479_vm7, %v4245_v9, %v4247_v8  ;;  %v5654_v8 = vld [vmem:[#allocation2 + $0x100] sm:$0xff] }
 0x24f   : > { %4923 = vmatprep.subr.bf16.mxu1 %v4255_v14 }
 0x250   : > { %4924 = vmatpush1.bf16.msra.mxu1 %v4254_v44  ;;  %v4303_v36 = vpop.permute.xlu1 %4302 }
 0x251   : > { %v4301_v19 = vpop.permute.xlu0 %4300 }
 0x252   : > { %v4312_v25 = vsel %vm1540_vm8, %v7175_v53, %v4301_v19  ;;  %v4313_v56 = vsel %vm1540_vm8, %v4301_v19, %v4303_v36 }
 0x253   : > { %4884 = vmatprep.subr.bf16.mxu0 %v4313_v56 }
 0x254   : > { %4885 = vmatpush1.bf16.msra.mxu0 %v4312_v25  ;;  %v4307_v43 = vpop.permute.xlu1 %4306 }
 0x255   : > { %v4305_v49 = vpop.permute.xlu0 %4304 }
 0x256   : > { %v4314_v58 = vsel %vm1540_vm8, %v4303_v36, %v4305_v49  ;;  %v4315_v54 = vsel %vm1540_vm8, %v4305_v49, %v4307_v43 }
 0x257   : > { %4925 = vmatprep.subr.bf16.mxu1 %v4315_v54  ;;  %v7250_v18 = vpop.f32.mrb[12].mxu0  ;;  %v5656_v54 = vld.sshfl [vmem:[%s7450_s1] sm:$0x33 pattern:$0x76325410] }
 0x258   : > { %4926 = vmatpush1.bf16.msra.mxu1 %v4314_v58  ;;  %v4363_v33 = vpop.permute.xlu1 %4362  ;;  %v7252_v32 = vpop.f32.mrb[13].mxu0 }
 0x259   : > { %v4361_v5 = vpop.permute.xlu0 %4360  ;;  %v3076_v0 = vpop.f32.mrb[14].mxu0 }
 0x25a   : > { %v4372_v53 = vsel %vm1601_vm9, %v7182_v40, %v4361_v5  ;;  %v4373_v51 = vsel %vm1601_vm9, %v4361_v5, %v4363_v33  ;;  %v3077_v39 = vpop.f32.mrb[15].mxu0 }
 0x25b   : > { %4886 = vmatprep.subr.bf16.mxu0 %v4373_v51  ;;  %v7257_v26 = vpop.f32.mrb[12].mxu1 }
 0x25c   : > { %4887 = vmatpush1.bf16.msra.mxu0 %v4372_v53  ;;  %v4367_v23 = vpop.permute.xlu1 %4366  ;;  %v7259_v38 = vpop.f32.mrb[13].mxu1 }
 0x25d   : > { %v4365_v24 = vpop.permute.xlu0 %4364  ;;  %v3117_v31 = vpop.f32.mrb[14].mxu1 }
 0x25e   : > { %v4374_v21 = vsel %vm1601_vm9, %v4363_v33, %v4365_v24  ;;  %v4375_v62 = vsel %vm1601_vm9, %v4365_v24, %v4367_v23  ;;  %v3118_v46 = vpop.f32.mrb[15].mxu1 }
 0x25f   : > { %4927 = vmatprep.subr.bf16.mxu1 %v4375_v62 }
 0x260   : > { %4928 = vmatpush1.bf16.msra.mxu1 %v4374_v21  ;;  %v4452_v40 = vpop.permute.xlu1 %4451 }
 0x261   : > { %v4450_v59 = vpop.permute.xlu0 %4449 }
 0x262   : > { %v4461_v35 = vsel %vm1691_vm4, %v7197_v6, %v4450_v59  ;;  %v4462_v50 = vsel %vm1691_vm4, %v4450_v59, %v4452_v40 }
 0x263   : > { %4888 = vmatprep.subr.bf16.mxu0 %v4462_v50 }
 0x264   : > { %4889 = vmatpush1.bf16.msra.mxu0 %v4461_v35  ;;  %v4456_v61 = vpop.permute.xlu1 %4455 }
 0x265   : > { %v4454_v57 = vpop.permute.xlu0 %4453 }
 0x266   : > { %v4463_v63 = vsel %vm1691_vm4, %v4452_v40, %v4454_v57  ;;  %v4464_v2 = vsel %vm1691_vm4, %v4454_v57, %v4456_v61 }
 0x267   : > { %4929 = vmatprep.subr.bf16.mxu1 %v4464_v2 }
 0x268   : > { %4930 = vmatpush1.bf16.msra.mxu1 %v4463_v63  ;;  %v4512_v3 = vpop.permute.xlu1 %4511 }
 0x269   : > { %v4510_v12 = vpop.permute.xlu0 %4509 }
 0x26a   : > { %v4521_v34 = vsel %vm1752_vm12, %v7207_v17, %v4510_v12  ;;  %v4522_v30 = vsel %vm1752_vm12, %v4510_v12, %v4512_v3 }
 0x26b   : > { %4890 = vmatprep.subr.bf16.mxu0 %v4522_v30 }
 0x26c   : > { %4891 = vmatpush1.bf16.msra.mxu0 %v4521_v34  ;;  %v4516_v6 = vpop.permute.xlu1 %4515 }
 0x26d   : > { %v4514_v48 = vpop.permute.xlu0 %4513  ;;  %4892 = vmatprep.subr.bf16.mxu0 %v5653_v42  ;;  %v5655_v42 = vld [vmem:[#allocation2 + $0xf8] sm:$0xff] }
 0x26e   : > { %v4523_v7 = vsel %vm1752_vm12, %v4512_v3, %v4514_v48  ;;  %v4524_v1 = vsel %vm1752_vm12, %v4514_v48, %v4516_v6 }
 0x26f   : > { %4931 = vmatprep.subr.bf16.mxu1 %v4524_v1 }
 0x270   : > { %4893 = vmatpush1.bf16.msra.mxu0 %v7230_v45  ;;  %4932 = vmatpush1.bf16.msra.mxu1 %v4523_v7  ;;  %v4617_v13 = vpop.permute.xlu1 %4616 }
 0x271   : > { %v4615_v27 = vpop.permute.xlu0 %4614  ;;  %4933 = vmatprep.subr.bf16.mxu1 %v5654_v8 }
 0x272   : > { %v4626_v17 = vsel %vm1479_vm7, %v7217_v11, %v4615_v27  ;;  %v4627_v47 = vsel %vm1479_vm7, %v4615_v27, %v4617_v13 }
 0x273   : > { %4894 = vmatprep.subr.bf16.mxu0 %v4627_v47 }
 0x274   : > { %4895 = vmatpush1.bf16.msra.mxu0 %v4626_v17  ;;  %4934 = vmatpush1.bf16.msra.mxu1 %v5655_v42  ;;  %v4621_v9 = vpop.permute.xlu1 %4620 }
 0x275   : > { %v4619_v44 = vpop.permute.xlu0 %4618 }
 0x276   : > { %v4628_v14 = vsel %vm1479_vm7, %v4617_v13, %v4619_v44  ;;  %v4629_v45 = vsel %vm1479_vm7, %v4619_v44, %v4621_v9 }
 0x277   : > { %4935 = vmatprep.subr.bf16.mxu1 %v4629_v45 }
 0x278   : > { %4936 = vmatpush1.bf16.msra.mxu1 %v4628_v14  ;;  %v4677_v36 = vpop.permute.xlu1 %4676 }
 0x279   : > { %v4675_v19 = vpop.permute.xlu0 %4674 }
 0x27a   : > { %v4686_v25 = vsel %vm1540_vm8, %v7224_v22, %v4675_v19  ;;  %v4687_v11 = vsel %vm1540_vm8, %v4675_v19, %v4677_v36 }
 0x27b   : > { %4896 = vmatprep.subr.bf16.mxu0 %v4687_v11 }
 0x27c   : > { %4897 = vmatpush1.bf16.msra.mxu0 %v4686_v25  ;;  %v4681_v56 = vpop.permute.xlu1 %4680 }
 0x27d   : > { %v4679_v43 = vpop.permute.xlu0 %4678 }
 0x27e   : > { %v4688_v49 = vsel %vm1540_vm8, %v4677_v36, %v4679_v43  ;;  %v4689_v58 = vsel %vm1540_vm8, %v4679_v43, %v4681_v56  ;;  %v5671_v56 = vmov 1983009808  }
 0x27f   : > { %4913 = vmatmul.mubr.bf16.vlgmr.msra.gmra.mrb[28].mxu0 %v5656_v54  ;;  %4937 = vmatprep.subr.bf16.mxu1 %v4689_v58  ;;  %v2290_v43 = vunpack.c.l.s4 %v5671_v56 }
 0x280   : > { %4938 = vmatpush1.bf16.msra.mxu1 %v4688_v49 }
 0x283   : > { %4954 = vmatmul.mubr.bf16.vlgmr.msra.gmra.mrb[28].mxu1 %v5656_v54 }
 0x28d   : > { %v7305_v23 = vpop.permute.xlu1 %2940 }
 0x28e   : > { %v2019_v33 = vpop.permute.xlu0 %2018  ;;  %v7320_v31 = vadd.f32 %v7188_v29, %v7305_v23  ;;  %v7325_v21 = vadd.f32 %v7190_v52, %v7305_v23  ;;  %v7330_v62 = vadd.f32 %v7193_v4, %v7305_v23  ;;  %v7335_v29 = vadd.f32 %v7195_v28, %v7305_v23 }
 0x28f   : > { %v7288_v22 = vadd.f32 %v7050_v16, %v2019_v33  ;;  %v7291_v5 = vadd.f32 %v7056_v20, %v2019_v33  ;;  %v7294_v0 = vadd.f32 %v7054_v41, %v2019_v33  ;;  %v7297_v53 = vadd.f32 %v7061_v37, %v2019_v33 }
 0x290   : > { %v7300_v51 = vadd.f32 %v7117_v10, %v2019_v33  ;;  %v7303_v39 = vadd.f32 %v7124_v15, %v2019_v33  ;;  %v7308_v16 = vadd.f32 %v7122_v60, %v2019_v33  ;;  %v7314_v37 = vadd.f32 %v7130_v55, %v2019_v33 }
 0x291   : > { %v5251_v20 = vmul.f32 -1.442695, %v7288_v22  ;;  %v5252_v24 = vmul.f32 -1.442695, %v7291_v5  ;;  %v5253_v41 = vmul.f32 -1.442695, %v7294_v0  ;;  %v7340_v52 = vadd.f32 %v7250_v18, %v7305_v23  ;;  %v7350_v25 = vpop.permute.xlu1 %3861 }
 0x292   : > { %v5254_v10 = vmul.f32 -1.442695, %v7297_v53  ;;  %v5255_v15 = vmul.f32 -1.442695, %v7300_v51  ;;  %v5256_v60 = vmul.f32 -1.442695, %v7303_v39  ;;  %v7348_v19 = vadd.f32 %v7257_v26, %v7305_v23 }
 0x293   : > { %5492 = vpow2.f32 %v5251_v20  ;;  %v5257_v55 = vmul.f32 -1.442695, %v7308_v16  ;;  %v5258_v46 = vmul.f32 -1.442695, %v7314_v37  ;;  %v5291_v40 = vmul.f32 -1.442695, %v7320_v31 }
 0x294   : > { %5494 = vpow2.f32 %v5252_v24  ;;  %v5292_v59 = vmul.f32 -1.442695, %v7325_v21  ;;  %v5293_v4 = vmul.f32 -1.442695, %v7330_v62  ;;  %v5294_v35 = vmul.f32 -1.442695, %v7335_v29 }
 0x295   : > { %5496 = vpow2.f32 %v5253_v41  ;;  %v5295_v28 = vmul.f32 -1.442695, %v7340_v52  ;;  %v7354_v58 = vadd.f32 %v7252_v32, %v7305_v23  ;;  %v7358_v20 = vadd.f32 %v7259_v38, %v7305_v23 }
 0x296   : > { %5498 = vpow2.f32 %v5254_v10  ;;  %v7496_v24 = vlaneseq  ;;  %v5297_v32 = vmul.f32 -1.442695, %v7348_v19 }
 0x297   : > { %5500 = vpow2.f32 %v5255_v15  ;;  %v5296_v23 = vmul.f32 -1.442695, %v7354_v58 }
 0x298   : > { %5502 = vpow2.f32 %v5256_v60  ;;  %v2293_v41 = vshrl.u32 %v7496_v24, 7 }
 0x299   : > { %5504 = vpow2.f32 %v5257_v55 }
 0x29a   : > { %5506 = vpow2.f32 %v5258_v46 }
 0x29b   : > { %5508 = vpow2.f32 %v5291_v40 }
 0x29c   : > { %5510 = vpow2.f32 %v5292_v59  ;;  %v2291_v59 = vunpack.c.0.s8 %v2290_v43 }
 0x29d   : > { %v5493_v50 = vpop.eup %5492  ;;  %5512 = vpow2.f32 %v5293_v4 }
 0x29e   : > { %v5495_v61 = vpop.eup %5494  ;;  %v2223_v57 = vadd.f32 1.0, %v5493_v50  ;;  %5514 = vpow2.f32 %v5294_v35 }
 0x29f   : > { %v5497_v18 = vpop.eup %5496  ;;  %v2224_v63 = vadd.f32 1.0, %v5495_v61  ;;  %5516 = vpow2.f32 %v5295_v28  ;;  %v3952_v2 = vpop.f32.mrb[16].mxu1  ;;  %v5298_v28 = vmul.f32 -1.442695, %v7358_v20 }
 0x2a0   : > { %v5499_v3 = vpop.eup %5498  ;;  %v2225_v12 = vadd.f32 1.0, %v5497_v18  ;;  %5518 = vrcp.f32 %v2223_v57  ;;  %v3954_v34 = vpop.f32.mrb[17].mxu1  ;;  %v7371_v50 = vadd.f32 %v3952_v2, %v7350_v25 }
 0x2a1   : > { %v5501_v30 = vpop.eup %5500  ;;  %v2226_v6 = vadd.f32 1.0, %v5499_v3  ;;  %5520 = vrcp.f32 %v2224_v63  ;;  %v3911_v48 = vpop.f32.mrb[16].mxu0  ;;  %v7375_v63 = vadd.f32 %v3954_v34, %v7350_v25 }
 0x2a2   : > { %v3956_v7 = vpop.f32.mrb[18].mxu1  ;;  %v5503_v1 = vpop.eup %5502  ;;  %v2227_v13 = vadd.f32 1.0, %v5501_v30  ;;  %5522 = vrcp.f32 %v2225_v12  ;;  %v7362_v15 = vadd.f32 %v3911_v48, %v7350_v25  ;;  %v5333_v34 = vmul.f32 -1.442695, %v7371_v50 }
 0x2a3   : > { %v3913_v27 = vpop.f32.mrb[17].mxu0  ;;  %v3957_v8 = vpop.f32.mrb[19].mxu1  ;;  %v2228_v47 = vadd.f32 1.0, %v5503_v1  ;;  %5524 = vrcp.f32 %v2226_v6  ;;  %v7379_v7 = vsub.s32 %v2291_v59, %v2293_v41 }
 0x2a4   : > { %v5505_v17 = vpop.eup %5504  ;;  %v3915_v42 = vpop.f32.mrb[18].mxu0  ;;  %5526 = vrcp.f32 %v2227_v13  ;;  %v7366_v46 = vadd.f32 %v3913_v27, %v7350_v25  ;;  %v5331_v18 = vmul.f32 -1.442695, %v7362_v15 }
 0x2a5   : > { %v5507_v9 = vpop.eup %5506  ;;  %v2229_v44 = vadd.f32 1.0, %v5505_v17  ;;  %v3916_v14 = vpop.f32.mrb[19].mxu0  ;;  %5528 = vrcp.f32 %v2228_v47 }
 0x2a6   : > { %v5509_v45 = vpop.eup %5508  ;;  %v2230_v36 = vadd.f32 1.0, %v5507_v9  ;;  %v5332_v6 = vmul.f32 -1.442695, %v7366_v46 }
 0x2a7   : > { %v5511_v11 = vpop.eup %5510  ;;  %5530 = vrcp.f32 %v2229_v44  ;;  %v3144_v49 = vadd.f32 1.0, %v5509_v45 }
 0x2a8   : > { %v5513_v54 = vpop.eup %5512  ;;  %5532 = vrcp.f32 %v2230_v36  ;;  %v3145_v33 = vadd.f32 1.0, %v5511_v11 }
 0x2a9   : > { %v5515_v26 = vpop.eup %5514  ;;  %5534 = vrcp.f32 %v3144_v49  ;;  %v3146_v10 = vadd.f32 1.0, %v5513_v54 }
 0x2aa   : > { %v5517_v60 = vpop.eup %5516  ;;  %5536 = vrcp.f32 %v3145_v33  ;;  %v3147_v55 = vadd.f32 1.0, %v5515_v26 }
 0x2ab   : > { %v5519_v40 = vpop.eup %5518  ;;  %5538 = vrcp.f32 %v3146_v10  ;;  %v3148_v38 = vadd.f32 1.0, %v5517_v60 }
 0x2ac   : > { %v5521_v4 = vpop.eup %5520  ;;  %v2255_v35 = vrot.slane %v5519_v40, 2  ;;  %5540 = vrcp.f32 %v3147_v55 }
 0x2ad   : > { %v5523_v61 = vpop.eup %5522  ;;  %v2256_v57 = vrot.slane %v5521_v4, 2  ;;  %5542 = vrcp.f32 %v3148_v38 }
 0x2ae   : > { %v5525_v3 = vpop.eup %5524  ;;  %v2257_v12 = vrot.slane %v5523_v61, 2  ;;  %v2271_v30 = vmul.f32 %v2255_v35, %v7288_v22  ;;  %5544 = vpow2.f32 %v5297_v32 }
 0x2af   : > { %v5527_v48 = vpop.eup %5526  ;;  %v2258_v2 = vrot.slane %v5525_v3, 2  ;;  %v2272_v1 = vmul.f32 %v2256_v57, %v7291_v5  ;;  %5546 = vpow2.f32 %v5296_v23  ;;  %v5334_v5 = vmul.f32 -1.442695, %v7375_v63 }
 0x2b0   : > { %v5529_v13 = vpop.eup %5528  ;;  %v2259_v27 = vrot.slane %v5527_v48, 2  ;;  %v2273_v8 = vmul.f32 %v2257_v12, %v7294_v0  ;;  %5548 = vpow2.f32 %v5298_v28 }
 0x2b1   : > { %v5531_v17 = vpop.eup %5530  ;;  %v2260_v22 = vrot.slane %v5529_v13, 2  ;;  %v2274_v47 = vmul.f32 %v2258_v2, %v7297_v53  ;;  %v2287_v42 = vcombine.low %v2271_v30, %v2272_v1  ;;  %5550 = vpow2.f32 %v5331_v18 }
 0x2b2   : > { %v5533_v9 = vpop.eup %5532  ;;  %v2261_v44 = vrot.slane %v5531_v17, 2  ;;  %v2275_v14 = vmul.f32 %v2259_v27, %v7300_v51  ;;  %5552 = vpow2.f32 %v5332_v6 }
 0x2b3   : > { %v5535_v45 = vpop.eup %5534  ;;  %v2262_v36 = vrot.slane %v5533_v9, 2  ;;  %v2276_v0 = vmul.f32 %v2260_v22, %v7303_v39  ;;  %v2288_v11 = vcombine.low %v2273_v8, %v2274_v47  ;;  %v2295_v56 = vrot.slane %v2287_v42, %v7379_v7 }
 0x2b4   : > { %v5537_v43 = vpop.eup %5536  ;;  %v2277_v53 = vmul.f32 %v2261_v44, %v7308_v16  ;;  %v3176_v49 = vrot.slane %v5535_v45, 2  ;;  %5554 = vpow2.f32 %v5333_v34 }
 0x2b5   : > { %v5539_v54 = vpop.eup %5538  ;;  %v2278_v33 = vmul.f32 %v2262_v36, %v7314_v37  ;;  %v2302_v51 = vrot.slane %v2288_v11, %v7379_v7  ;;  %v2304_v26 = vcombine.low %v2275_v14, %v2276_v0  ;;  %v3177_v24 = vrot.slane %v5537_v43, 2 }
 0x2b6   : > { %v5541_v41 = vpop.eup %5540  ;;  %v3192_v10 = vmul.f32 %v3176_v49, %v7320_v31  ;;  %v3178_v39 = vrot.slane %v5539_v54, 2  ;;  %5556 = vpow2.f32 %v5334_v5 }
 0x2b7   : > { %v5543_v16 = vpop.eup %5542  ;;  %v2303_v60 = vcombine.low %v2295_v56, %v2302_v51  ;;  %v2305_v55 = vcombine.low %v2277_v53, %v2278_v33  ;;  %v2312_v37 = vrot.slane %v2304_v26, %v7379_v7  ;;  %v3193_v32 = vmul.f32 %v3177_v24, %v7325_v21 }
 0x2b8   : > { %v5545_v40 = vpop.eup %5544  ;;  %v3179_v59 = vrot.slane %v5541_v41, 2  ;;  %v3194_v38 = vmul.f32 %v3178_v39, %v7330_v62  ;;  %v3180_v34 = vrot.slane %v5543_v16, 2 }
 0x2b9   : > { %v5547_v31 = vpop.eup %5546  ;;  %v2319_v23 = vrot.slane %v2305_v55, %v7379_v7  ;;  %v3208_v4 = vcombine.low %v3192_v10, %v3193_v32  ;;  %2323 = vst [vmem:[%s7397_s17] sm:$0xff] %v2303_v60  ;;  %v3150_v35 = vadd.f32 1.0, %v5545_v40 }
 0x2ba   : > { %v5549_v28 = vpop.eup %5548  ;;  %v3195_v61 = vmul.f32 %v3179_v59, %v7335_v29  ;;  %v3149_v57 = vadd.f32 1.0, %v5547_v31  ;;  %v3196_v9 = vmul.f32 %v3180_v34, %v7340_v52 }
 0x2bb   : > { %v5551_v18 = vpop.eup %5550  ;;  %v2320_v3 = vcombine.low %v2312_v37, %v2319_v23  ;;  %5558 = vrcp.f32 %v3150_v35  ;;  %v3151_v12 = vadd.f32 1.0, %v5549_v28  ;;  %v3216_v30 = vrot.slane %v3208_v4, %v7379_v7 }
 0x2bc   : > { %v5553_v21 = vpop.eup %5552  ;;  %v3209_v62 = vcombine.low %v3194_v38, %v3195_v61  ;;  %5560 = vrcp.f32 %v3149_v57  ;;  %v4065_v6 = vadd.f32 1.0, %v5551_v18 }
 0x2bd   : > { %2324 = vst [vmem:[%s7397_s17 + $0x8] sm:$0xff] %v2320_v3  ;;  %5562 = vrcp.f32 %v3151_v12  ;;  %v4066_v48 = vadd.f32 1.0, %v5553_v21 }
 0x2be   : > { %v5555_v2 = vpop.eup %5554  ;;  %v3223_v1 = vrot.slane %v3209_v62, %v7379_v7  ;;  %5564 = vrcp.f32 %v4065_v6 }
 0x2bf   : > { %5566 = vrcp.f32 %v4066_v48  ;;  %v4067_v29 = vadd.f32 1.0, %v5555_v2 }
 0x2c0   : > { %v5557_v13 = vpop.eup %5556  ;;  %v3224_v27 = vcombine.low %v3216_v30, %v3223_v1 }
 0x2c1   : > { %v4068_v8 = vadd.f32 1.0, %v5557_v13  ;;  %5568 = vrcp.f32 %v4067_v29 }
 0x2c2   : > { %3244 = vst [vmem:[%s7397_s17 + $0x10] sm:$0xff] %v3224_v27 }
 0x2c3   : > { %5570 = vrcp.f32 %v4068_v8 }
 0x2c5   : > { %v5559_v17 = vpop.eup %5558 }
 0x2c6   : > { %v5561_v22 = vpop.eup %5560  ;;  %v3182_v47 = vrot.slane %v5559_v17, 2 }
 0x2c7   : > { %v5563_v42 = vpop.eup %5562  ;;  %v3181_v44 = vrot.slane %v5561_v22, 2 }
 0x2c8   : > { %v5565_v14 = vpop.eup %5564  ;;  %v3198_v5 = vmul.f32 %v3182_v47, %v7348_v19  ;;  %v3183_v45 = vrot.slane %v5563_v42, 2 }
 0x2c9   : > { %v5567_v36 = vpop.eup %5566  ;;  %v3197_v0 = vmul.f32 %v3181_v44, %v7354_v58  ;;  %v4097_v11 = vrot.slane %v5565_v14, 2 }
 0x2ca   : > { %v3199_v56 = vmul.f32 %v3183_v45, %v7358_v20  ;;  %v4098_v43 = vrot.slane %v5567_v36, 2 }
 0x2cb   : > { %v5569_v53 = vpop.eup %5568  ;;  %v3225_v49 = vcombine.low %v3196_v9, %v3197_v0  ;;  %v4113_v54 = vmul.f32 %v4097_v11, %v7362_v15  ;;  %v7430_v0 = vpop.permute.xlu0 %4782 }
 0x2cc   : > { %v3226_v33 = vcombine.low %v3198_v5, %v3199_v56  ;;  %v4114_v52 = vmul.f32 %v4098_v43, %v7366_v46  ;;  %v4099_v51 = vrot.slane %v5569_v53, 2 }
 0x2cd   : > { %v5571_v26 = vpop.eup %5570  ;;  %v3233_v19 = vrot.slane %v3225_v49, %v7379_v7 }
 0x2ce   : > { %v3240_v24 = vrot.slane %v3226_v33, %v7379_v7  ;;  %v4129_v58 = vcombine.low %v4113_v54, %v4114_v52  ;;  %v4100_v41 = vrot.slane %v5571_v26, 2  ;;  %v4115_v20 = vmul.f32 %v4099_v51, %v7371_v50 }
 0x2d0   : > { %v3241_v10 = vcombine.low %v3233_v19, %v3240_v24  ;;  %v4116_v39 = vmul.f32 %v4100_v41, %v7375_v63  ;;  %v4137_v15 = vrot.slane %v4129_v58, %v7379_v7 }
 0x2d2   : > { %3245 = vst [vmem:[%s7397_s17 + $0x18] sm:$0xff] %v3241_v10  ;;  %v4130_v16 = vcombine.low %v4115_v20, %v4116_v39 }
 0x2d4   : > { %v4144_v60 = vrot.slane %v4130_v16, %v7379_v7 }
 0x2d6   : > { %v4145_v46 = vcombine.low %v4137_v15, %v4144_v60 }
 0x2d7   : > { %v3993_v55 = vpop.f32.mrb[20].mxu0 }
 0x2d8   : > { %4165 = vst [vmem:[%s7397_s17 + $0x20] sm:$0xff] %v4145_v46  ;;  %v3994_v37 = vadd.f32 %v3993_v55, %v7350_v25  ;;  %v3995_v32 = vpop.f32.mrb[21].mxu0 }
 0x2d9   : > { %v3996_v40 = vadd.f32 %v3995_v32, %v7350_v25  ;;  %v3997_v59 = vpop.f32.mrb[22].mxu0 }
 0x2da   : > { %v5335_v38 = vmul.f32 -1.442695, %v3994_v37  ;;  %v3998_v50 = vpop.f32.mrb[23].mxu0 }
 0x2db   : > { %v4034_v31 = vpop.f32.mrb[20].mxu1  ;;  %v5336_v23 = vmul.f32 -1.442695, %v3996_v40 }
 0x2dc   : > { %5572 = vpow2.f32 %v5335_v38  ;;  %v4035_v63 = vadd.f32 %v4034_v31, %v7350_v25  ;;  %v4036_v4 = vpop.f32.mrb[21].mxu1 }
 0x2dd   : > { %5574 = vpow2.f32 %v5336_v23  ;;  %v4037_v35 = vadd.f32 %v4036_v4, %v7350_v25  ;;  %v4038_v28 = vpop.f32.mrb[22].mxu1 }
 0x2de   : > { %v5337_v61 = vmul.f32 -1.442695, %v4035_v63  ;;  %v4039_v57 = vpop.f32.mrb[23].mxu1 }
 0x2df   : > { %v5338_v18 = vmul.f32 -1.442695, %v4037_v35 }
 0x2e0   : > { %5576 = vpow2.f32 %v5337_v61 }
 0x2e1   : > { %5578 = vpow2.f32 %v5338_v18 }
 0x2e6   : > { %v5573_v3 = vpop.eup %5572 }
 0x2e7   : > { %v5575_v12 = vpop.eup %5574  ;;  %v4069_v21 = vadd.f32 1.0, %v5573_v3 }
 0x2e8   : > { %v4070_v30 = vadd.f32 1.0, %v5575_v12 }
 0x2e9   : > { %5580 = vrcp.f32 %v4069_v21 }
 0x2ea   : > { %v5577_v62 = vpop.eup %5576  ;;  %5582 = vrcp.f32 %v4070_v30 }
 0x2eb   : > { %v5579_v6 = vpop.eup %5578  ;;  %v4071_v48 = vadd.f32 1.0, %v5577_v62 }
 0x2ec   : > { %v4072_v2 = vadd.f32 1.0, %v5579_v6 }
 0x2ed   : > { %5584 = vrcp.f32 %v4071_v48 }
 0x2ee   : > { %5586 = vrcp.f32 %v4072_v2 }
 0x2f3   : > { %v5581_v1 = vpop.eup %5580 }
 0x2f4   : > { %v5583_v25 = vpop.eup %5582  ;;  %v4101_v29 = vrot.slane %v5581_v1, 2 }
 0x2f5   : > { %v4102_v13 = vrot.slane %v5583_v25, 2 }
 0x2f6   : > { %v4117_v27 = vmul.f32 %v4101_v29, %v3994_v37 }
 0x2f7   : > { %v5585_v8 = vpop.eup %5584  ;;  %v4118_v34 = vmul.f32 %v4102_v13, %v3996_v40 }
 0x2f8   : > { %v5587_v17 = vpop.eup %5586  ;;  %v4103_v22 = vrot.slane %v5585_v8, 2 }
 0x2f9   : > { %v4146_v47 = vcombine.low %v4117_v27, %v4118_v34  ;;  %v4104_v42 = vrot.slane %v5587_v17, 2 }
 0x2fa   : > { %v4119_v9 = vmul.f32 %v4103_v22, %v4035_v63 }
 0x2fb   : > { %v4120_v44 = vmul.f32 %v4104_v42, %v4037_v35  ;;  %v4154_v14 = vrot.slane %v4146_v47, %v7379_v7 }
 0x2fd   : > { %v4147_v5 = vcombine.low %v4119_v9, %v4120_v44 }
 0x2ff   : > { %v4161_v45 = vrot.slane %v4147_v5, %v7379_v7 }
 0x301   : > { %v4162_v36 = vcombine.low %v4154_v14, %v4161_v45 }
 0x303   : > { %4166 = vst [vmem:[%s7397_s17 + $0x28] sm:$0xff] %v4162_v36 }
 0x31c   : > { %v4832_v11 = vpop.f32.mrb[24].mxu0 }
 0x31d   : > { %v4833_v56 = vadd.f32 %v4832_v11, %v7430_v0  ;;  %v4834_v43 = vpop.f32.mrb[25].mxu0 }
 0x31e   : > { %v4873_v53 = vpop.f32.mrb[24].mxu1  ;;  %v4835_v49 = vadd.f32 %v4834_v43, %v7430_v0  ;;  %v4836_v54 = vpop.f32.mrb[26].mxu0 }
 0x31f   : > { %v4874_v33 = vadd.f32 %v4873_v53, %v7430_v0  ;;  %v4875_v52 = vpop.f32.mrb[25].mxu1  ;;  %v5371_v51 = vmul.f32 -1.442695, %v4833_v56  ;;  %v4837_v26 = vpop.f32.mrb[27].mxu0 }
 0x320   : > { %v4876_v19 = vadd.f32 %v4875_v52, %v7430_v0  ;;  %v5372_v24 = vmul.f32 -1.442695, %v4835_v49  ;;  %v4877_v58 = vpop.f32.mrb[26].mxu1 }
 0x321   : > { %v5373_v41 = vmul.f32 -1.442695, %v4874_v33  ;;  %5588 = vpow2.f32 %v5371_v51  ;;  %v4878_v20 = vpop.f32.mrb[27].mxu1 }
 0x322   : > { %v5374_v10 = vmul.f32 -1.442695, %v4876_v19  ;;  %5590 = vpow2.f32 %v5372_v24 }
 0x323   : > { %5592 = vpow2.f32 %v5373_v41 }
 0x324   : > { %5594 = vpow2.f32 %v5374_v10 }
 0x32b   : > { %v5589_v39 = vpop.eup %5588 }
 0x32c   : > { %v5591_v15 = vpop.eup %5590  ;;  %v4986_v16 = vadd.f32 1.0, %v5589_v39 }
 0x32d   : > { %v5593_v60 = vpop.eup %5592  ;;  %v4987_v46 = vadd.f32 1.0, %v5591_v15 }
 0x32e   : > { %v5595_v55 = vpop.eup %5594  ;;  %v4988_v37 = vadd.f32 1.0, %v5593_v60  ;;  %5596 = vrcp.f32 %v4986_v16 }
 0x32f   : > { %v4989_v32 = vadd.f32 1.0, %v5595_v55  ;;  %5598 = vrcp.f32 %v4987_v46 }
 0x330   : > { %5600 = vrcp.f32 %v4988_v37 }
 0x331   : > { %5602 = vrcp.f32 %v4989_v32 }
 0x338   : > { %v5597_v40 = vpop.eup %5596 }
 0x339   : > { %v5599_v59 = vpop.eup %5598  ;;  %v5018_v38 = vrot.slane %v5597_v40, 2 }
 0x33a   : > { %v5601_v50 = vpop.eup %5600  ;;  %v5019_v31 = vrot.slane %v5599_v59, 2 }
 0x33b   : > { %v5603_v23 = vpop.eup %5602  ;;  %v5020_v63 = vrot.slane %v5601_v50, 2  ;;  %v5034_v4 = vmul.f32 %v5018_v38, %v4833_v56 }
 0x33c   : > { %v5021_v35 = vrot.slane %v5603_v23, 2  ;;  %v5035_v28 = vmul.f32 %v5019_v31, %v4835_v49 }
 0x33d   : > { %v5036_v61 = vmul.f32 %v5020_v63, %v4874_v33 }
 0x33e   : > { %v5037_v57 = vmul.f32 %v5021_v35, %v4876_v19  ;;  %v5050_v18 = vcombine.low %v5034_v4, %v5035_v28 }
 0x340   : > { %v5051_v3 = vcombine.low %v5036_v61, %v5037_v57  ;;  %v5058_v12 = vrot.slane %v5050_v18, %v7379_v7 }
 0x342   : > { %v5065_v21 = vrot.slane %v5051_v3, %v7379_v7 }
 0x344   : > { %v5066_v30 = vcombine.low %v5058_v12, %v5065_v21 }
 0x346   : > { %5086 = vst [vmem:[%s7397_s17 + $0x30] sm:$0xff] %v5066_v30 }
 0x352   : > { %v4914_v62 = vpop.f32.mrb[28].mxu0 }
 0x353   : > { %v4915_v6 = vadd.f32 %v4914_v62, %v7430_v0  ;;  %v4916_v48 = vpop.f32.mrb[29].mxu0 }
 0x354   : > { %v4917_v2 = vadd.f32 %v4916_v48, %v7430_v0  ;;  %v4918_v1 = vpop.f32.mrb[30].mxu0 }
 0x355   : > { %v5375_v25 = vmul.f32 -1.442695, %v4915_v6  ;;  %v4919_v29 = vpop.f32.mrb[31].mxu0 }
 0x356   : > { %v5376_v13 = vmul.f32 -1.442695, %v4917_v2  ;;  %v4955_v27 = vpop.f32.mrb[28].mxu1 }
 0x357   : > { %5604 = vpow2.f32 %v5375_v25  ;;  %v4956_v8 = vadd.f32 %v4955_v27, %v7430_v0  ;;  %v4957_v34 = vpop.f32.mrb[29].mxu1 }
 0x358   : > { %5606 = vpow2.f32 %v5376_v13  ;;  %v4958_v17 = vadd.f32 %v4957_v34, %v7430_v0  ;;  %v4959_v22 = vpop.f32.mrb[30].mxu1 }
 0x359   : > { %v5377_v47 = vmul.f32 -1.442695, %v4956_v8  ;;  %v4960_v42 = vpop.f32.mrb[31].mxu1 }
 0x35a   : > { %v5378_v9 = vmul.f32 -1.442695, %v4958_v17 }
 0x35b   : > { %5608 = vpow2.f32 %v5377_v47 }
 0x35c   : > { %5610 = vpow2.f32 %v5378_v9 }
 0x361   : > { %v5605_v44 = vpop.eup %5604 }
 0x362   : > { %v5607_v14 = vpop.eup %5606  ;;  %v4990_v5 = vadd.f32 1.0, %v5605_v44 }
 0x363   : > { %v4991_v45 = vadd.f32 1.0, %v5607_v14 }
 0x364   : > { %5612 = vrcp.f32 %v4990_v5 }
 0x365   : > { %v5609_v36 = vpop.eup %5608  ;;  %5614 = vrcp.f32 %v4991_v45 }
 0x366   : > { %v5611_v11 = vpop.eup %5610  ;;  %v4992_v56 = vadd.f32 1.0, %v5609_v36 }
 0x367   : > { %v4993_v43 = vadd.f32 1.0, %v5611_v11 }
 0x368   : > { %5616 = vrcp.f32 %v4992_v56 }
 0x369   : > { %5618 = vrcp.f32 %v4993_v43 }
 0x36e   : > { %v5613_v53 = vpop.eup %5612 }
 0x36f   : > { %v5615_v0 = vpop.eup %5614  ;;  %v5022_v49 = vrot.slane %v5613_v53, 2 }
 0x370   : > { %v5023_v54 = vrot.slane %v5615_v0, 2 }
 0x371   : > { %v5038_v33 = vmul.f32 %v5022_v49, %v4915_v6 }
 0x372   : > { %v5617_v52 = vpop.eup %5616  ;;  %v5039_v51 = vmul.f32 %v5023_v54, %v4917_v2 }
 0x373   : > { %v5619_v26 = vpop.eup %5618  ;;  %v5024_v19 = vrot.slane %v5617_v52, 2 }
 0x374   : > { %v5067_v24 = vcombine.low %v5038_v33, %v5039_v51  ;;  %v5025_v58 = vrot.slane %v5619_v26, 2 }
 0x375   : > { %v5040_v41 = vmul.f32 %v5024_v19, %v4956_v8 }
 0x376   : > { %v5041_v20 = vmul.f32 %v5025_v58, %v4958_v17  ;;  %v5075_v39 = vrot.slane %v5067_v24, %v7379_v7 }
 0x378   : > { %v5068_v10 = vcombine.low %v5040_v41, %v5041_v20 }
 0x37a   : > { %v5082_v15 = vrot.slane %v5068_v10, %v7379_v7 }
 0x37c   : > { %v5083_v16 = vcombine.low %v5075_v39, %v5082_v15 }
 0x37e   : > { %5087 = vst [vmem:[%s7397_s17 + $0x38] sm:$0xff] %v5083_v16 }
 0x37f PF: > { %s13_s12 = sadd.s32 1, %s5663_s12  }
 0x380   : > { %p10_p4 = scmp.ge.s32.totalorder %s13_s12, 4  }
 0x382   :  { %12 = sbr.rel (!%p10_p4) target bundleno = 1 (0x1), region = 62 }

</bundles_post_ra>
